<compile_context>
chip_gen: v5e
topology: v5e:2x2
jax: 0.10.0
libtpu: 0.0.40
codegen_flags: <defaults>
</compile_context>

<pallas_src>
import functools

import jax
import jax.numpy as jnp
from jax.experimental import pallas as pl
from jax.experimental.pallas import tpu as pltpu


def _conv_bn_add_kernel(x_ref, w_ref, res_ref, gamma_ref, beta_ref, o_ref, *, eps):
    # x_ref:     [M, Cin]    flattened spatial x input channels (same block every step)
    # w_ref:     [Cin, tn]   1x1-conv weight slice (pre-transposed), streamed per step
    # res_ref:   [M, tn]     residual (x331) slice
    # gamma/beta:[1, tn]     BN affine slice
    x = x_ref[...]
    w = w_ref[...]

    # 1x1 convolution == matmul over the channel dimension (MXU).
    y = jnp.dot(x, w, preferred_element_type=jnp.float32)          # [M, tn]

    # BatchNorm2d, training mode: biased batch statistics over N*H*W per channel.
    m = y.shape[0]
    inv_m = 1.0 / m
    mean = jnp.sum(y, axis=0, keepdims=True) * inv_m                # [1, tn]
    centered = y - mean
    var = jnp.sum(centered * centered, axis=0, keepdims=True) * inv_m
    # Fold affine into a single per-channel scale: bn = centered*scale + beta.
    scale = gamma_ref[...] * jax.lax.rsqrt(var + eps)               # [1, tn]

    o_ref[...] = (res_ref[...] + centered * scale + beta_ref[...]).astype(o_ref.dtype)


def conv1x1_bn_add(x343, x331, weight, gamma, beta, *, eps=1e-5, tn=512):
    """x343, x331: [N, C, H, W] float32 (NCHW). weight: [Cout, Cin] (1x1 conv weight
    squeezed). gamma/beta: [Cout]. Returns [N, Cout, H, W] float32."""
    n, c_in, h, w_sp = x343.shape
    c_out = weight.shape[0]
    m = n * h * w_sp

    # NCHW -> NHWC -> [M, C] so channels land on the fast (lane) axis.
    x_flat = jnp.transpose(x343, (0, 2, 3, 1)).reshape(m, c_in)
    r_flat = jnp.transpose(x331, (0, 2, 3, 1)).reshape(m, c_out)
    w_t = jnp.transpose(weight, (1, 0))                  # [Cin, Cout]
    gamma2 = gamma.reshape(1, c_out)
    beta2 = beta.reshape(1, c_out)

    kernel = functools.partial(_conv_bn_add_kernel, eps=eps)
    grid = (pl.cdiv(c_out, tn),)                         # 3 tiles of 512 (last ragged)

    out_flat = pl.pallas_call(
        kernel,
        out_shape=jax.ShapeDtypeStruct((m, c_out), jnp.float32),
        grid=grid,
        in_specs=[
            # x: same block every step -> fetched once by the pipeline.
            pl.BlockSpec((m, c_in), lambda j: (0, 0)),
            # weight slice [Cin, tn]: streamed & double-buffered across the grid.
            pl.BlockSpec((c_in, tn), lambda j: (0, j)),
            pl.BlockSpec((m, tn), lambda j: (0, j)),
            pl.BlockSpec((1, tn), lambda j: (0, j)),
            pl.BlockSpec((1, tn), lambda j: (0, j)),
        ],
        out_specs=pl.BlockSpec((m, tn), lambda j: (0, j)),
        compiler_params=pltpu.CompilerParams(
            dimension_semantics=("parallel",),           # shard Cout tiles over v7x's 2 TCs
            vmem_limit_bytes=24 << 20,
        ),
    )(x_flat, w_t, r_flat, gamma2, beta2)

    # [M, Cout] -> NHWC -> NCHW
    out = out_flat.reshape(n, h, w_sp, c_out)
    return jnp.transpose(out, (0, 3, 1, 2))


if __name__ == "__main__":
    # Shapes consistent with the module's forward: [1, 1512, 7, 7]
    N, C, H, W = 1, 1512, 7, 7

    key = jax.random.PRNGKey(0)
    k_x343, k_x331, k_w = jax.random.split(key, 3)

    x343 = jax.random.normal(k_x343, (N, C, H, W), dtype=jnp.float32)
    x331 = jax.random.normal(k_x331, (N, C, H, W), dtype=jnp.float32)

    # Deterministic parameter init (Conv2d weight kaiming-ish scale; BN affine = identity).
    fan_in = C  # 1x1 kernel
    weight = jax.random.normal(k_w, (C, C), dtype=jnp.float32) * (1.0 / jnp.sqrt(fan_in))
    gamma = jnp.ones((C,), dtype=jnp.float32)
    beta = jnp.zeros((C,), dtype=jnp.float32)

    run = jax.jit(conv1x1_bn_add)   # fuse the layout transposes with the pallas call
    out = run(x343, x331, weight, gamma, beta)
    jax.block_until_ready(out)

    assert out.shape == (N, C, H, W), out.shape
    assert out.dtype == jnp.float32, out.dtype
    assert bool(jnp.isfinite(out).all()), "non-finite values in output"
    print("KERNEL_OK")
</pallas_src>

<mosaic_0001>
module attributes {stable_mosaic.version = 11 : i64} {
  func.func @_conv_bn_add_kernel(%arg0: i32, %arg1: memref<49x1512xf32, #tpu.memory_space<vmem>>, %arg2: memref<1512x512xf32, #tpu.memory_space<vmem>>, %arg3: memref<49x512xf32, #tpu.memory_space<vmem>>, %arg4: memref<1x512xf32, #tpu.memory_space<vmem>>, %arg5: memref<1x512xf32, #tpu.memory_space<vmem>>, %arg6: memref<49x512xf32, #tpu.memory_space<vmem>>) attributes {dimension_semantics = [#tpu.dimension_semantics<parallel>], iteration_bounds = array<i64: 3>, scalar_prefetch = 0 : i64, scratch_operands = 0 : i64, tpu.core_type = #tpu.core_type<tc>, window_params = [{pipeline_mode = #tpu.pipeline_mode<synchronous>, transform_indices = @transform_0, window_bounds = array<i64: 49, 1512>}, {transform_indices = @transform_1, window_bounds = array<i64: 1512, 512>}, {transform_indices = @transform_2, window_bounds = array<i64: 49, 512>}, {transform_indices = @transform_3, window_bounds = array<i64: 1, 512>}, {transform_indices = @transform_4, window_bounds = array<i64: 1, 512>}, {transform_indices = @transform_5, window_bounds = array<i64: 49, 512>}]} {
    %c0 = arith.constant 0 : index
    %c0_0 = arith.constant 0 : index
    %0 = vector.load %arg1[%c0, %c0_0] : memref<49x1512xf32, #tpu.memory_space<vmem>>, vector<49x1512xf32>
    %c0_1 = arith.constant 0 : index
    %c0_2 = arith.constant 0 : index
    %1 = vector.load %arg2[%c0_1, %c0_2] : memref<1512x512xf32, #tpu.memory_space<vmem>>, vector<1512x512xf32>
    %cst = arith.constant dense<0.000000e+00> : vector<49x512xf32>
    %2 = tpu.matmul %0, %1, %cst {dimension_numbers = #tpu.dot_dimension_numbers<[1], [0], [0], [1], [0, 0, 1, 1], [], []>} : vector<49x1512xf32>, vector<1512x512xf32>, vector<49x512xf32> -> vector<49x512xf32>
    %cst_3 = arith.constant dense<0.000000e+00> : vector<512xf32>
    %3 = vector.multi_reduction <add>, %2, %cst_3 [0] : vector<49x512xf32> to vector<512xf32>
    %4 = vector.shape_cast %3 : vector<512xf32> to vector<1x512xf32>
    %cst_4 = arith.constant 0.0204081628 : f32
    %5 = vector.broadcast %cst_4 : f32 to vector<1x512xf32>
    %6 = arith.mulf %4, %5 : vector<1x512xf32>
    %7 = vector.broadcast %6 : vector<1x512xf32> to vector<49x512xf32>
    %8 = arith.subf %2, %7 : vector<49x512xf32>
    %9 = arith.mulf %8, %8 : vector<49x512xf32>
    %cst_5 = arith.constant dense<0.000000e+00> : vector<512xf32>
    %10 = vector.multi_reduction <add>, %9, %cst_5 [0] : vector<49x512xf32> to vector<512xf32>
    %11 = vector.shape_cast %10 : vector<512xf32> to vector<1x512xf32>
    %cst_6 = arith.constant 0.0204081628 : f32
    %12 = vector.broadcast %cst_6 : f32 to vector<1x512xf32>
    %13 = arith.mulf %11, %12 : vector<1x512xf32>
    %c0_7 = arith.constant 0 : index
    %c0_8 = arith.constant 0 : index
    %14 = vector.load %arg4[%c0_7, %c0_8] : memref<1x512xf32, #tpu.memory_space<vmem>>, vector<1x512xf32>
    %cst_9 = arith.constant 9.99999974E-6 : f32
    %15 = vector.broadcast %cst_9 : f32 to vector<1x512xf32>
    %16 = arith.addf %13, %15 : vector<1x512xf32>
    %17 = math.rsqrt %16 : vector<1x512xf32>
    %18 = arith.mulf %14, %17 : vector<1x512xf32>
    %c0_10 = arith.constant 0 : index
    %c0_11 = arith.constant 0 : index
    %19 = vector.load %arg3[%c0_10, %c0_11] : memref<49x512xf32, #tpu.memory_space<vmem>>, vector<49x512xf32>
    %20 = vector.broadcast %18 : vector<1x512xf32> to vector<49x512xf32>
    %21 = arith.mulf %8, %20 : vector<49x512xf32>
    %22 = arith.addf %19, %21 : vector<49x512xf32>
    %c0_12 = arith.constant 0 : index
    %c0_13 = arith.constant 0 : index
    %23 = vector.load %arg5[%c0_12, %c0_13] : memref<1x512xf32, #tpu.memory_space<vmem>>, vector<1x512xf32>
    %24 = vector.broadcast %23 : vector<1x512xf32> to vector<49x512xf32>
    %25 = arith.addf %22, %24 : vector<49x512xf32>
    %c0_14 = arith.constant 0 : index
    %c0_15 = arith.constant 0 : index
    %26 = vector.load %arg6[%c0_14, %c0_15] : memref<49x512xf32, #tpu.memory_space<vmem>>, vector<49x512xf32>
    tpu.vector_store %arg6[%c0_14, %c0_15], %25 {strides = array<i32>} : memref<49x512xf32, #tpu.memory_space<vmem>>, vector<49x512xf32>,
    return
  }
  func.func @transform_0(%arg0: i32) -> (i32, i32) {
    %c0_i32 = arith.constant 0 : i32
    %c0_i32_0 = arith.constant 0 : i32
    %c0_i32_1 = arith.constant 0 : i32
    return %c0_i32, %c0_i32_0 : i32, i32
  }
  func.func @transform_1(%arg0: i32) -> (i32, i32) {
    %c0_i32 = arith.constant 0 : i32
    %c0_i32_0 = arith.constant 0 : i32
    return %c0_i32, %arg0 : i32, i32
  }
  func.func @transform_2(%arg0: i32) -> (i32, i32) {
    %c0_i32 = arith.constant 0 : i32
    %c0_i32_0 = arith.constant 0 : i32
    return %c0_i32, %arg0 : i32, i32
  }
  func.func @transform_3(%arg0: i32) -> (i32, i32) {
    %c0_i32 = arith.constant 0 : i32
    %c0_i32_0 = arith.constant 0 : i32
    return %c0_i32, %arg0 : i32, i32
  }
  func.func @transform_4(%arg0: i32) -> (i32, i32) {
    %c0_i32 = arith.constant 0 : i32
    %c0_i32_0 = arith.constant 0 : i32
    return %c0_i32, %arg0 : i32, i32
  }
  func.func @transform_5(%arg0: i32) -> (i32, i32) {
    %c0_i32 = arith.constant 0 : i32
    %c0_i32_0 = arith.constant 0 : i32
    return %c0_i32, %arg0 : i32, i32
  }
}

</mosaic_0001>

<bundles_post_ra>
// kernel: conv1x1_bn_add.1
= control target key start
LH: loop header
LB: loop body
LE: loop exit
PB: predicated region body
PF: predicated region fallthrough
CT: control target
= control target key end

     0   :  { %s5518_s18 = smov 0   ;;  %s5520_s19 = smov 0   ;;  %s9601_s0 = inlined_call_operand.vmem [shape: f32[49,1512], index: 0, kind: input, shape index: {}]   ;;  %s9602_s1 = inlined_call_operand.vmem [shape: f32[1512,1512], index: 1, kind: input, shape index: {}]   ;;  %s9603_s2 = inlined_call_operand.vmem [shape: f32[49,1512], index: 2, kind: input, shape index: {}]   ;;  %s9604_s3 = inlined_call_operand.vmem [shape: f32[1,1512], index: 3, kind: input, shape index: {}]   ;;  %s9605_s4 = inlined_call_operand.vmem [shape: f32[1,1512], index: 4, kind: input, shape index: {}]   ;;  %s9606_s5 = inlined_call_operand.vmem [shape: f32[49,1512], index: 5, kind: output, shape index: {}]  }
   0x1   :  { %s5522_s20 = smov 0  }
   0x2 LB: > { %s5534_s21 = sadd.s32 4294967295, %s5486_s20   ;;  %s5537_s22 = sadd.s32 1, %s5486_s20   ;;  %s5486_s20 = sphi %s5522_s20, %s9613_s20   ;;  %s5482_s19 = sphi %s5520_s19, %s9612_s19   ;;  %s5478_s18 = sphi %s5518_s18, %s9611_s18  }
   0x3   : > { %s40_s23 = ssub.s32 %s5486_s20, %s5537_s22  ;;  %s43_s24 = sadd.s32 1, %s5482_s19 }
   0x4   : > { %p41_p0 = scmp.eq.s32.totalorder %s40_s23, 0  ;;  %p50_p1 = scmp.ne.s32.totalorder %s5482_s19, %s5478_s18 }
   0x5   : > { %p51_p2 = scmp.eq.s32.totalorder %s5486_s20, 0  ;;  %p158_p3 = scmp.eq.s32.totalorder %s5534_s21, 2 }
   0x6   : > { %s5547_s25 = scalar_select %p41_p0, %s5482_s19, %s43_s24  }
   0x7   : > { %p5549_p4 = por %p51_p2, %p50_p1  ;;  %p5553_p5 = por %p158_p3, %p50_p1 }
   0x8   : > { %p5133_p6 = scmp.ge.s32.totalorder %s5486_s20, 3 }
   0xa   : > { %183 = sbr.rel (%p5133_p6) target bundleno = 807 (0x327), region = 20 }
   0xf   : > { %186 = sbr.rel (!%p5549_p4) target bundleno = 775 (0x307), region = 24  ;;  %s188_s28 = sand.u32 (%p5549_p4), 1, %s5482_s19  }
  0x10   : > { %s5173_s29 = sshll.u32 (%p5549_p4), %s5486_s20, 5  ;;  %s5176_s30 = smul.u32 (%p5549_p4), 6048, %s188_s28 }
  0x11   : > { %s5565_s8 = scalar_lea.vmem (%p5549_p4), %s9602_s1, %s5173_s29 }
  0x12   : > { %v206_v0 = vld [vmem:[%s5565_s8] sm:$0xff] (%p5549_p4)  ;;  %v208_v1 = vld [vmem:[%s5565_s8 + $0x8] sm:$0xff] (%p5549_p4)  ;;  %v210_v2 = vld [vmem:[%s5565_s8 + $0x10] sm:$0xff] (%p5549_p4)  ;;  %s5570_s9 = scalar_lea.vmem (%p5549_p4), [#allocation2], %s5176_s30 }
  0x13   : > { %207 = vst [vmem:[%s5570_s9] sm:$0xff] (%p5549_p4), %v206_v0  ;;  %v212_v3 = vld [vmem:[%s5565_s8 + $0x18] sm:$0xff] (%p5549_p4)  ;;  %v214_v4 = vld [vmem:[%s5565_s8 + $0x60] sm:$0xff] (%p5549_p4)  ;;  %v216_v5 = vld [vmem:[%s5565_s8 + $0x68] sm:$0xff] (%p5549_p4) }
  0x14   : > { %209 = vst [vmem:[%s5570_s9 + $0x8] sm:$0xff] %v208_v1  ;;  %v218_v6 = vld [vmem:[%s5565_s8 + $0x70] sm:$0xff]  ;;  %v220_v7 = vld [vmem:[%s5565_s8 + $0x78] sm:$0xff]  ;;  %v222_v8 = vld [vmem:[%s5565_s8 + $0xc0] sm:$0xff] }
  0x15   : > { %211 = vst [vmem:[%s5570_s9 + $0x10] sm:$0xff] %v210_v2  ;;  %v224_v9 = vld [vmem:[%s5565_s8 + $0xc8] sm:$0xff]  ;;  %v226_v10 = vld [vmem:[%s5565_s8 + $0xd0] sm:$0xff]  ;;  %v228_v11 = vld [vmem:[%s5565_s8 + $0xd8] sm:$0xff] }
  0x16   : > { %213 = vst [vmem:[%s5570_s9 + $0x18] sm:$0xff] %v212_v3  ;;  %v230_v12 = vld [vmem:[%s5565_s8 + $0x120] sm:$0xff]  ;;  %v232_v13 = vld [vmem:[%s5565_s8 + $0x128] sm:$0xff]  ;;  %v234_v14 = vld [vmem:[%s5565_s8 + $0x130] sm:$0xff] }
  0x17   : > { %215 = vst [vmem:[%s5570_s9 + $0x20] sm:$0xff] %v214_v4  ;;  %v236_v15 = vld [vmem:[%s5565_s8 + $0x138] sm:$0xff]  ;;  %v238_v16 = vld [vmem:[%s5565_s8 + $0x180] sm:$0xff]  ;;  %v240_v17 = vld [vmem:[%s5565_s8 + $0x188] sm:$0xff] }
  0x18   : > { %217 = vst [vmem:[%s5570_s9 + $0x28] sm:$0xff] %v216_v5  ;;  %v242_v18 = vld [vmem:[%s5565_s8 + $0x190] sm:$0xff]  ;;  %v244_v19 = vld [vmem:[%s5565_s8 + $0x198] sm:$0xff]  ;;  %v246_v20 = vld [vmem:[%s5565_s8 + $0x1e0] sm:$0xff] }
  0x19   : > { %219 = vst [vmem:[%s5570_s9 + $0x30] sm:$0xff] %v218_v6  ;;  %v248_v21 = vld [vmem:[%s5565_s8 + $0x1e8] sm:$0xff]  ;;  %v250_v22 = vld [vmem:[%s5565_s8 + $0x1f0] sm:$0xff]  ;;  %v252_v23 = vld [vmem:[%s5565_s8 + $0x1f8] sm:$0xff] }
  0x1a   : > { %221 = vst [vmem:[%s5570_s9 + $0x38] sm:$0xff] %v220_v7  ;;  %v254_v24 = vld [vmem:[%s5565_s8 + $0x240] sm:$0xff]  ;;  %v256_v25 = vld [vmem:[%s5565_s8 + $0x248] sm:$0xff]  ;;  %v258_v26 = vld [vmem:[%s5565_s8 + $0x250] sm:$0xff] }
  0x1b   : > { %223 = vst [vmem:[%s5570_s9 + $0x40] sm:$0xff] %v222_v8  ;;  %v260_v27 = vld [vmem:[%s5565_s8 + $0x258] sm:$0xff]  ;;  %v262_v28 = vld [vmem:[%s5565_s8 + $0x2a0] sm:$0xff]  ;;  %v264_v29 = vld [vmem:[%s5565_s8 + $0x2a8] sm:$0xff] }
  0x1c   : > { %225 = vst [vmem:[%s5570_s9 + $0x48] sm:$0xff] %v224_v9  ;;  %v266_v30 = vld [vmem:[%s5565_s8 + $0x2b0] sm:$0xff]  ;;  %v268_v31 = vld [vmem:[%s5565_s8 + $0x2b8] sm:$0xff]  ;;  %v270_v32 = vld [vmem:[%s5565_s8 + $0x300] sm:$0xff] }
  0x1d   : > { %227 = vst [vmem:[%s5570_s9 + $0x50] sm:$0xff] %v226_v10  ;;  %v272_v33 = vld [vmem:[%s5565_s8 + $0x308] sm:$0xff]  ;;  %v274_v34 = vld [vmem:[%s5565_s8 + $0x310] sm:$0xff]  ;;  %v276_v35 = vld [vmem:[%s5565_s8 + $0x318] sm:$0xff] }
  0x1e   : > { %229 = vst [vmem:[%s5570_s9 + $0x58] sm:$0xff] %v228_v11  ;;  %v278_v36 = vld [vmem:[%s5565_s8 + $0x360] sm:$0xff]  ;;  %v280_v37 = vld [vmem:[%s5565_s8 + $0x368] sm:$0xff]  ;;  %v282_v38 = vld [vmem:[%s5565_s8 + $0x370] sm:$0xff] }
  0x1f   : > { %231 = vst [vmem:[%s5570_s9 + $0x60] sm:$0xff] %v230_v12  ;;  %v284_v39 = vld [vmem:[%s5565_s8 + $0x378] sm:$0xff]  ;;  %v286_v40 = vld [vmem:[%s5565_s8 + $0x3c0] sm:$0xff]  ;;  %v288_v41 = vld [vmem:[%s5565_s8 + $0x3c8] sm:$0xff] }
  0x20   : > { %233 = vst [vmem:[%s5570_s9 + $0x68] sm:$0xff] %v232_v13  ;;  %v290_v42 = vld [vmem:[%s5565_s8 + $0x3d0] sm:$0xff]  ;;  %v292_v43 = vld [vmem:[%s5565_s8 + $0x3d8] sm:$0xff]  ;;  %v294_v44 = vld [vmem:[%s5565_s8 + $0x420] sm:$0xff] }
  0x21   : > { %235 = vst [vmem:[%s5570_s9 + $0x70] sm:$0xff] %v234_v14  ;;  %v296_v45 = vld [vmem:[%s5565_s8 + $0x428] sm:$0xff]  ;;  %v298_v46 = vld [vmem:[%s5565_s8 + $0x430] sm:$0xff]  ;;  %v300_v47 = vld [vmem:[%s5565_s8 + $0x438] sm:$0xff] }
  0x22   : > { %237 = vst [vmem:[%s5570_s9 + $0x78] sm:$0xff] %v236_v15  ;;  %v302_v48 = vld [vmem:[%s5565_s8 + $0x480] sm:$0xff]  ;;  %v304_v49 = vld [vmem:[%s5565_s8 + $0x488] sm:$0xff]  ;;  %v306_v50 = vld [vmem:[%s5565_s8 + $0x490] sm:$0xff] }
  0x23   : > { %239 = vst [vmem:[%s5570_s9 + $0x80] sm:$0xff] %v238_v16  ;;  %v308_v51 = vld [vmem:[%s5565_s8 + $0x498] sm:$0xff]  ;;  %v310_v52 = vld [vmem:[%s5565_s8 + $0x4e0] sm:$0xff]  ;;  %v312_v53 = vld [vmem:[%s5565_s8 + $0x4e8] sm:$0xff] }
  0x24   : > { %241 = vst [vmem:[%s5570_s9 + $0x88] sm:$0xff] %v240_v17  ;;  %v314_v54 = vld [vmem:[%s5565_s8 + $0x4f0] sm:$0xff]  ;;  %v316_v55 = vld [vmem:[%s5565_s8 + $0x4f8] sm:$0xff]  ;;  %v318_v56 = vld [vmem:[%s5565_s8 + $0x540] sm:$0xff] }
  0x25   : > { %243 = vst [vmem:[%s5570_s9 + $0x90] sm:$0xff] %v242_v18  ;;  %v320_v57 = vld [vmem:[%s5565_s8 + $0x548] sm:$0xff]  ;;  %v322_v58 = vld [vmem:[%s5565_s8 + $0x550] sm:$0xff]  ;;  %v324_v59 = vld [vmem:[%s5565_s8 + $0x558] sm:$0xff] }
  0x26   : > { %245 = vst [vmem:[%s5570_s9 + $0x98] sm:$0xff] %v244_v19  ;;  %v326_v60 = vld [vmem:[%s5565_s8 + $0x5a0] sm:$0xff]  ;;  %v328_v61 = vld [vmem:[%s5565_s8 + $0x5a8] sm:$0xff]  ;;  %v330_v62 = vld [vmem:[%s5565_s8 + $0x5b0] sm:$0xff] }
  0x27   : > { %247 = vst [vmem:[%s5570_s9 + $0xa0] sm:$0xff] %v246_v20  ;;  %v332_v63 = vld [vmem:[%s5565_s8 + $0x5b8] sm:$0xff]  ;;  %v334_v0 = vld [vmem:[%s5565_s8 + $0x600] sm:$0xff]  ;;  %v336_v1 = vld [vmem:[%s5565_s8 + $0x608] sm:$0xff] }
  0x28   : > { %249 = vst [vmem:[%s5570_s9 + $0xa8] sm:$0xff] %v248_v21  ;;  %v338_v2 = vld [vmem:[%s5565_s8 + $0x610] sm:$0xff]  ;;  %v340_v3 = vld [vmem:[%s5565_s8 + $0x618] sm:$0xff]  ;;  %v342_v4 = vld [vmem:[%s5565_s8 + $0x660] sm:$0xff] }
  0x29   : > { %251 = vst [vmem:[%s5570_s9 + $0xb0] sm:$0xff] %v250_v22  ;;  %v344_v5 = vld [vmem:[%s5565_s8 + $0x668] sm:$0xff]  ;;  %v346_v6 = vld [vmem:[%s5565_s8 + $0x670] sm:$0xff]  ;;  %v348_v7 = vld [vmem:[%s5565_s8 + $0x678] sm:$0xff] }
  0x2a   : > { %253 = vst [vmem:[%s5570_s9 + $0xb8] sm:$0xff] %v252_v23  ;;  %v350_v8 = vld [vmem:[%s5565_s8 + $0x6c0] sm:$0xff]  ;;  %v352_v9 = vld [vmem:[%s5565_s8 + $0x6c8] sm:$0xff]  ;;  %v354_v10 = vld [vmem:[%s5565_s8 + $0x6d0] sm:$0xff] }
  0x2b   : > { %255 = vst [vmem:[%s5570_s9 + $0xc0] sm:$0xff] %v254_v24  ;;  %v356_v11 = vld [vmem:[%s5565_s8 + $0x6d8] sm:$0xff]  ;;  %v358_v12 = vld [vmem:[%s5565_s8 + $0x720] sm:$0xff]  ;;  %v360_v13 = vld [vmem:[%s5565_s8 + $0x728] sm:$0xff] }
  0x2c   : > { %257 = vst [vmem:[%s5570_s9 + $0xc8] sm:$0xff] %v256_v25  ;;  %v362_v14 = vld [vmem:[%s5565_s8 + $0x730] sm:$0xff]  ;;  %v364_v15 = vld [vmem:[%s5565_s8 + $0x738] sm:$0xff]  ;;  %v366_v16 = vld [vmem:[%s5565_s8 + $0x780] sm:$0xff] }
  0x2d   : > { %259 = vst [vmem:[%s5570_s9 + $0xd0] sm:$0xff] %v258_v26  ;;  %v368_v17 = vld [vmem:[%s5565_s8 + $0x788] sm:$0xff]  ;;  %v370_v18 = vld [vmem:[%s5565_s8 + $0x790] sm:$0xff]  ;;  %v372_v19 = vld [vmem:[%s5565_s8 + $0x798] sm:$0xff] }
  0x2e   : > { %261 = vst [vmem:[%s5570_s9 + $0xd8] sm:$0xff] %v260_v27  ;;  %v374_v20 = vld [vmem:[%s5565_s8 + $0x7e0] sm:$0xff]  ;;  %v376_v21 = vld [vmem:[%s5565_s8 + $0x7e8] sm:$0xff]  ;;  %v378_v22 = vld [vmem:[%s5565_s8 + $0x7f0] sm:$0xff] }
  0x2f   : > { %263 = vst [vmem:[%s5570_s9 + $0xe0] sm:$0xff] %v262_v28  ;;  %v380_v23 = vld [vmem:[%s5565_s8 + $0x7f8] sm:$0xff]  ;;  %v382_v24 = vld [vmem:[%s5565_s8 + $0x840] sm:$0xff]  ;;  %v384_v25 = vld [vmem:[%s5565_s8 + $0x848] sm:$0xff] }
  0x30   : > { %265 = vst [vmem:[%s5570_s9 + $0xe8] sm:$0xff] %v264_v29  ;;  %v386_v26 = vld [vmem:[%s5565_s8 + $0x850] sm:$0xff]  ;;  %v388_v27 = vld [vmem:[%s5565_s8 + $0x858] sm:$0xff]  ;;  %v390_v28 = vld [vmem:[%s5565_s8 + $0x8a0] sm:$0xff] }
  0x31   : > { %267 = vst [vmem:[%s5570_s9 + $0xf0] sm:$0xff] %v266_v30  ;;  %v392_v29 = vld [vmem:[%s5565_s8 + $0x8a8] sm:$0xff]  ;;  %v394_v30 = vld [vmem:[%s5565_s8 + $0x8b0] sm:$0xff] }
  0x32   : > { %269 = vst [vmem:[%s5570_s9 + $0xf8] sm:$0xff] %v268_v31  ;;  %v396_v31 = vld [vmem:[%s5565_s8 + $0x8b8] sm:$0xff] }
  0x33   : > { %271 = vst [vmem:[%s5570_s9 + $0x100] sm:$0xff] %v270_v32  ;;  %v398_v32 = vld [vmem:[%s5565_s8 + $0x900] sm:$0xff] }
  0x34   : > { %273 = vst [vmem:[%s5570_s9 + $0x108] sm:$0xff] %v272_v33  ;;  %v400_v33 = vld [vmem:[%s5565_s8 + $0x908] sm:$0xff] }
  0x35   : > { %275 = vst [vmem:[%s5570_s9 + $0x110] sm:$0xff] %v274_v34  ;;  %v402_v34 = vld [vmem:[%s5565_s8 + $0x910] sm:$0xff] }
  0x36   : > { %277 = vst [vmem:[%s5570_s9 + $0x118] sm:$0xff] %v276_v35  ;;  %v404_v35 = vld [vmem:[%s5565_s8 + $0x918] sm:$0xff] }
  0x37   : > { %279 = vst [vmem:[%s5570_s9 + $0x120] sm:$0xff] %v278_v36  ;;  %v406_v36 = vld [vmem:[%s5565_s8 + $0x960] sm:$0xff] }
  0x38   : > { %281 = vst [vmem:[%s5570_s9 + $0x128] sm:$0xff] %v280_v37  ;;  %v408_v37 = vld [vmem:[%s5565_s8 + $0x968] sm:$0xff] }
  0x39   : > { %283 = vst [vmem:[%s5570_s9 + $0x130] sm:$0xff] %v282_v38  ;;  %v410_v38 = vld [vmem:[%s5565_s8 + $0x970] sm:$0xff] }
  0x3a   : > { %285 = vst [vmem:[%s5570_s9 + $0x138] sm:$0xff] %v284_v39  ;;  %v412_v39 = vld [vmem:[%s5565_s8 + $0x978] sm:$0xff] }
  0x3b   : > { %287 = vst [vmem:[%s5570_s9 + $0x140] sm:$0xff] %v286_v40  ;;  %v414_v40 = vld [vmem:[%s5565_s8 + $0x9c0] sm:$0xff] }
  0x3c   : > { %289 = vst [vmem:[%s5570_s9 + $0x148] sm:$0xff] %v288_v41  ;;  %v416_v41 = vld [vmem:[%s5565_s8 + $0x9c8] sm:$0xff] }
  0x3d   : > { %291 = vst [vmem:[%s5570_s9 + $0x150] sm:$0xff] %v290_v42  ;;  %v418_v42 = vld [vmem:[%s5565_s8 + $0x9d0] sm:$0xff] }
  0x3e   : > { %293 = vst [vmem:[%s5570_s9 + $0x158] sm:$0xff] %v292_v43  ;;  %v420_v43 = vld [vmem:[%s5565_s8 + $0x9d8] sm:$0xff] }
  0x3f   : > { %295 = vst [vmem:[%s5570_s9 + $0x160] sm:$0xff] %v294_v44  ;;  %v422_v44 = vld [vmem:[%s5565_s8 + $0xa20] sm:$0xff] }
  0x40   : > { %297 = vst [vmem:[%s5570_s9 + $0x168] sm:$0xff] %v296_v45  ;;  %v424_v45 = vld [vmem:[%s5565_s8 + $0xa28] sm:$0xff] }
  0x41   : > { %299 = vst [vmem:[%s5570_s9 + $0x170] sm:$0xff] %v298_v46  ;;  %v426_v46 = vld [vmem:[%s5565_s8 + $0xa30] sm:$0xff] }
  0x42   : > { %301 = vst [vmem:[%s5570_s9 + $0x178] sm:$0xff] %v300_v47  ;;  %v428_v47 = vld [vmem:[%s5565_s8 + $0xa38] sm:$0xff] }
  0x43   : > { %303 = vst [vmem:[%s5570_s9 + $0x180] sm:$0xff] %v302_v48  ;;  %v430_v48 = vld [vmem:[%s5565_s8 + $0xa80] sm:$0xff] }
  0x44   : > { %305 = vst [vmem:[%s5570_s9 + $0x188] sm:$0xff] %v304_v49  ;;  %v432_v49 = vld [vmem:[%s5565_s8 + $0xa88] sm:$0xff] }
  0x45   : > { %307 = vst [vmem:[%s5570_s9 + $0x190] sm:$0xff] %v306_v50  ;;  %v434_v50 = vld [vmem:[%s5565_s8 + $0xa90] sm:$0xff] }
  0x46   : > { %309 = vst [vmem:[%s5570_s9 + $0x198] sm:$0xff] %v308_v51  ;;  %v436_v51 = vld [vmem:[%s5565_s8 + $0xa98] sm:$0xff] }
  0x47   : > { %311 = vst [vmem:[%s5570_s9 + $0x1a0] sm:$0xff] %v310_v52  ;;  %v438_v52 = vld [vmem:[%s5565_s8 + $0xae0] sm:$0xff] }
  0x48   : > { %313 = vst [vmem:[%s5570_s9 + $0x1a8] sm:$0xff] %v312_v53  ;;  %v440_v53 = vld [vmem:[%s5565_s8 + $0xae8] sm:$0xff] }
  0x49   : > { %315 = vst [vmem:[%s5570_s9 + $0x1b0] sm:$0xff] %v314_v54  ;;  %v442_v54 = vld [vmem:[%s5565_s8 + $0xaf0] sm:$0xff] }
  0x4a   : > { %317 = vst [vmem:[%s5570_s9 + $0x1b8] sm:$0xff] %v316_v55  ;;  %v444_v55 = vld [vmem:[%s5565_s8 + $0xaf8] sm:$0xff] }
  0x4b   : > { %319 = vst [vmem:[%s5570_s9 + $0x1c0] sm:$0xff] %v318_v56  ;;  %v446_v56 = vld [vmem:[%s5565_s8 + $0xb40] sm:$0xff] }
  0x4c   : > { %321 = vst [vmem:[%s5570_s9 + $0x1c8] sm:$0xff] %v320_v57  ;;  %v448_v57 = vld [vmem:[%s5565_s8 + $0xb48] sm:$0xff] }
  0x4d   : > { %323 = vst [vmem:[%s5570_s9 + $0x1d0] sm:$0xff] %v322_v58  ;;  %v450_v58 = vld [vmem:[%s5565_s8 + $0xb50] sm:$0xff] }
  0x4e   : > { %325 = vst [vmem:[%s5570_s9 + $0x1d8] sm:$0xff] %v324_v59  ;;  %v452_v59 = vld [vmem:[%s5565_s8 + $0xb58] sm:$0xff] }
  0x4f   : > { %327 = vst [vmem:[%s5570_s9 + $0x1e0] sm:$0xff] %v326_v60  ;;  %v454_v60 = vld [vmem:[%s5565_s8 + $0xba0] sm:$0xff] }
  0x50   : > { %329 = vst [vmem:[%s5570_s9 + $0x1e8] sm:$0xff] %v328_v61  ;;  %v456_v61 = vld [vmem:[%s5565_s8 + $0xba8] sm:$0xff] }
  0x51   : > { %331 = vst [vmem:[%s5570_s9 + $0x1f0] sm:$0xff] %v330_v62  ;;  %v458_v62 = vld [vmem:[%s5565_s8 + $0xbb0] sm:$0xff] }
  0x52   : > { %333 = vst [vmem:[%s5570_s9 + $0x1f8] sm:$0xff] %v332_v63  ;;  %v460_v63 = vld [vmem:[%s5565_s8 + $0xbb8] sm:$0xff] }
  0x53   : > { %335 = vst [vmem:[%s5570_s9 + $0x200] sm:$0xff] %v334_v0  ;;  %v462_v0 = vld [vmem:[%s5565_s8 + $0xc00] sm:$0xff] }
  0x54   : > { %337 = vst [vmem:[%s5570_s9 + $0x208] sm:$0xff] %v336_v1  ;;  %v464_v1 = vld [vmem:[%s5565_s8 + $0xc08] sm:$0xff] }
  0x55   : > { %339 = vst [vmem:[%s5570_s9 + $0x210] sm:$0xff] %v338_v2  ;;  %v466_v2 = vld [vmem:[%s5565_s8 + $0xc10] sm:$0xff] }
  0x56   : > { %341 = vst [vmem:[%s5570_s9 + $0x218] sm:$0xff] %v340_v3  ;;  %v468_v3 = vld [vmem:[%s5565_s8 + $0xc18] sm:$0xff] }
  0x57   : > { %343 = vst [vmem:[%s5570_s9 + $0x220] sm:$0xff] %v342_v4  ;;  %v470_v4 = vld [vmem:[%s5565_s8 + $0xc60] sm:$0xff] }
  0x58   : > { %345 = vst [vmem:[%s5570_s9 + $0x228] sm:$0xff] %v344_v5  ;;  %v472_v5 = vld [vmem:[%s5565_s8 + $0xc68] sm:$0xff] }
  0x59   : > { %347 = vst [vmem:[%s5570_s9 + $0x230] sm:$0xff] %v346_v6  ;;  %v474_v6 = vld [vmem:[%s5565_s8 + $0xc70] sm:$0xff] }
  0x5a   : > { %349 = vst [vmem:[%s5570_s9 + $0x238] sm:$0xff] %v348_v7  ;;  %v476_v7 = vld [vmem:[%s5565_s8 + $0xc78] sm:$0xff] }
  0x5b   : > { %351 = vst [vmem:[%s5570_s9 + $0x240] sm:$0xff] %v350_v8  ;;  %v478_v8 = vld [vmem:[%s5565_s8 + $0xcc0] sm:$0xff] }
  0x5c   : > { %353 = vst [vmem:[%s5570_s9 + $0x248] sm:$0xff] %v352_v9  ;;  %v480_v9 = vld [vmem:[%s5565_s8 + $0xcc8] sm:$0xff] }
  0x5d   : > { %355 = vst [vmem:[%s5570_s9 + $0x250] sm:$0xff] %v354_v10  ;;  %v482_v10 = vld [vmem:[%s5565_s8 + $0xcd0] sm:$0xff] }
  0x5e   : > { %357 = vst [vmem:[%s5570_s9 + $0x258] sm:$0xff] %v356_v11  ;;  %v484_v11 = vld [vmem:[%s5565_s8 + $0xcd8] sm:$0xff] }
  0x5f   : > { %359 = vst [vmem:[%s5570_s9 + $0x260] sm:$0xff] %v358_v12  ;;  %v486_v12 = vld [vmem:[%s5565_s8 + $0xd20] sm:$0xff] }
  0x60   : > { %361 = vst [vmem:[%s5570_s9 + $0x268] sm:$0xff] %v360_v13  ;;  %v488_v13 = vld [vmem:[%s5565_s8 + $0xd28] sm:$0xff] }
  0x61   : > { %363 = vst [vmem:[%s5570_s9 + $0x270] sm:$0xff] %v362_v14  ;;  %v490_v14 = vld [vmem:[%s5565_s8 + $0xd30] sm:$0xff] }
  0x62   : > { %365 = vst [vmem:[%s5570_s9 + $0x278] sm:$0xff] %v364_v15  ;;  %v492_v15 = vld [vmem:[%s5565_s8 + $0xd38] sm:$0xff] }
  0x63   : > { %367 = vst [vmem:[%s5570_s9 + $0x280] sm:$0xff] %v366_v16  ;;  %v494_v16 = vld [vmem:[%s5565_s8 + $0xd80] sm:$0xff] }
  0x64   : > { %369 = vst [vmem:[%s5570_s9 + $0x288] sm:$0xff] %v368_v17  ;;  %v496_v17 = vld [vmem:[%s5565_s8 + $0xd88] sm:$0xff] }
  0x65   : > { %371 = vst [vmem:[%s5570_s9 + $0x290] sm:$0xff] %v370_v18  ;;  %v498_v18 = vld [vmem:[%s5565_s8 + $0xd90] sm:$0xff] }
  0x66   : > { %373 = vst [vmem:[%s5570_s9 + $0x298] sm:$0xff] %v372_v19  ;;  %v500_v19 = vld [vmem:[%s5565_s8 + $0xd98] sm:$0xff] }
  0x67   : > { %375 = vst [vmem:[%s5570_s9 + $0x2a0] sm:$0xff] %v374_v20  ;;  %v502_v20 = vld [vmem:[%s5565_s8 + $0xde0] sm:$0xff] }
  0x68   : > { %377 = vst [vmem:[%s5570_s9 + $0x2a8] sm:$0xff] %v376_v21  ;;  %v504_v21 = vld [vmem:[%s5565_s8 + $0xde8] sm:$0xff] }
  0x69   : > { %379 = vst [vmem:[%s5570_s9 + $0x2b0] sm:$0xff] %v378_v22  ;;  %v506_v22 = vld [vmem:[%s5565_s8 + $0xdf0] sm:$0xff] }
  0x6a   : > { %381 = vst [vmem:[%s5570_s9 + $0x2b8] sm:$0xff] %v380_v23  ;;  %v508_v23 = vld [vmem:[%s5565_s8 + $0xdf8] sm:$0xff] }
  0x6b   : > { %383 = vst [vmem:[%s5570_s9 + $0x2c0] sm:$0xff] %v382_v24  ;;  %v510_v24 = vld [vmem:[%s5565_s8 + $0xe40] sm:$0xff] }
  0x6c   : > { %385 = vst [vmem:[%s5570_s9 + $0x2c8] sm:$0xff] %v384_v25  ;;  %v512_v25 = vld [vmem:[%s5565_s8 + $0xe48] sm:$0xff] }
  0x6d   : > { %387 = vst [vmem:[%s5570_s9 + $0x2d0] sm:$0xff] %v386_v26  ;;  %v514_v26 = vld [vmem:[%s5565_s8 + $0xe50] sm:$0xff] }
  0x6e   : > { %389 = vst [vmem:[%s5570_s9 + $0x2d8] sm:$0xff] %v388_v27  ;;  %v516_v27 = vld [vmem:[%s5565_s8 + $0xe58] sm:$0xff] }
  0x6f   : > { %391 = vst [vmem:[%s5570_s9 + $0x2e0] sm:$0xff] %v390_v28  ;;  %v518_v28 = vld [vmem:[%s5565_s8 + $0xea0] sm:$0xff] }
  0x70   : > { %393 = vst [vmem:[%s5570_s9 + $0x2e8] sm:$0xff] %v392_v29  ;;  %v520_v29 = vld [vmem:[%s5565_s8 + $0xea8] sm:$0xff] }
  0x71   : > { %395 = vst [vmem:[%s5570_s9 + $0x2f0] sm:$0xff] %v394_v30  ;;  %v522_v30 = vld [vmem:[%s5565_s8 + $0xeb0] sm:$0xff] }
  0x72   : > { %397 = vst [vmem:[%s5570_s9 + $0x2f8] sm:$0xff] %v396_v31  ;;  %v524_v31 = vld [vmem:[%s5565_s8 + $0xeb8] sm:$0xff] }
  0x73   : > { %399 = vst [vmem:[%s5570_s9 + $0x300] sm:$0xff] %v398_v32  ;;  %v526_v32 = vld [vmem:[%s5565_s8 + $0xf00] sm:$0xff] }
  0x74   : > { %401 = vst [vmem:[%s5570_s9 + $0x308] sm:$0xff] %v400_v33  ;;  %v528_v33 = vld [vmem:[%s5565_s8 + $0xf08] sm:$0xff] }
  0x75   : > { %403 = vst [vmem:[%s5570_s9 + $0x310] sm:$0xff] %v402_v34  ;;  %v530_v34 = vld [vmem:[%s5565_s8 + $0xf10] sm:$0xff] }
  0x76   : > { %405 = vst [vmem:[%s5570_s9 + $0x318] sm:$0xff] %v404_v35  ;;  %v532_v35 = vld [vmem:[%s5565_s8 + $0xf18] sm:$0xff] }
  0x77   : > { %407 = vst [vmem:[%s5570_s9 + $0x320] sm:$0xff] %v406_v36  ;;  %v534_v36 = vld [vmem:[%s5565_s8 + $0xf60] sm:$0xff] }
  0x78   : > { %409 = vst [vmem:[%s5570_s9 + $0x328] sm:$0xff] %v408_v37  ;;  %v536_v37 = vld [vmem:[%s5565_s8 + $0xf68] sm:$0xff] }
  0x79   : > { %411 = vst [vmem:[%s5570_s9 + $0x330] sm:$0xff] %v410_v38  ;;  %v538_v38 = vld [vmem:[%s5565_s8 + $0xf70] sm:$0xff] }
  0x7a   : > { %413 = vst [vmem:[%s5570_s9 + $0x338] sm:$0xff] %v412_v39  ;;  %v540_v39 = vld [vmem:[%s5565_s8 + $0xf78] sm:$0xff] }
  0x7b   : > { %415 = vst [vmem:[%s5570_s9 + $0x340] sm:$0xff] %v414_v40  ;;  %v542_v40 = vld [vmem:[%s5565_s8 + $0xfc0] sm:$0xff] }
  0x7c   : > { %417 = vst [vmem:[%s5570_s9 + $0x348] sm:$0xff] %v416_v41  ;;  %v544_v41 = vld [vmem:[%s5565_s8 + $0xfc8] sm:$0xff] }
  0x7d   : > { %419 = vst [vmem:[%s5570_s9 + $0x350] sm:$0xff] %v418_v42  ;;  %v546_v42 = vld [vmem:[%s5565_s8 + $0xfd0] sm:$0xff] }
  0x7e   : > { %421 = vst [vmem:[%s5570_s9 + $0x358] sm:$0xff] %v420_v43  ;;  %v548_v43 = vld [vmem:[%s5565_s8 + $0xfd8] sm:$0xff] }
  0x7f   : > { %423 = vst [vmem:[%s5570_s9 + $0x360] sm:$0xff] %v422_v44  ;;  %v550_v44 = vld [vmem:[%s5565_s8 + $0x1020] sm:$0xff] }
  0x80   : > { %425 = vst [vmem:[%s5570_s9 + $0x368] sm:$0xff] %v424_v45  ;;  %v552_v45 = vld [vmem:[%s5565_s8 + $0x1028] sm:$0xff] }
  0x81   : > { %427 = vst [vmem:[%s5570_s9 + $0x370] sm:$0xff] %v426_v46  ;;  %v554_v46 = vld [vmem:[%s5565_s8 + $0x1030] sm:$0xff] }
  0x82   : > { %429 = vst [vmem:[%s5570_s9 + $0x378] sm:$0xff] %v428_v47  ;;  %v556_v47 = vld [vmem:[%s5565_s8 + $0x1038] sm:$0xff] }
  0x83   : > { %431 = vst [vmem:[%s5570_s9 + $0x380] sm:$0xff] %v430_v48  ;;  %v558_v48 = vld [vmem:[%s5565_s8 + $0x1080] sm:$0xff] }
  0x84   : > { %433 = vst [vmem:[%s5570_s9 + $0x388] sm:$0xff] %v432_v49  ;;  %v560_v49 = vld [vmem:[%s5565_s8 + $0x1088] sm:$0xff] }
  0x85   : > { %435 = vst [vmem:[%s5570_s9 + $0x390] sm:$0xff] %v434_v50  ;;  %v562_v50 = vld [vmem:[%s5565_s8 + $0x1090] sm:$0xff] }
  0x86   : > { %437 = vst [vmem:[%s5570_s9 + $0x398] sm:$0xff] %v436_v51  ;;  %v564_v51 = vld [vmem:[%s5565_s8 + $0x1098] sm:$0xff] }
  0x87   : > { %439 = vst [vmem:[%s5570_s9 + $0x3a0] sm:$0xff] %v438_v52  ;;  %v566_v52 = vld [vmem:[%s5565_s8 + $0x10e0] sm:$0xff] }
  0x88   : > { %441 = vst [vmem:[%s5570_s9 + $0x3a8] sm:$0xff] %v440_v53  ;;  %v568_v53 = vld [vmem:[%s5565_s8 + $0x10e8] sm:$0xff] }
  0x89   : > { %443 = vst [vmem:[%s5570_s9 + $0x3b0] sm:$0xff] %v442_v54  ;;  %v570_v54 = vld [vmem:[%s5565_s8 + $0x10f0] sm:$0xff] }
  0x8a   : > { %445 = vst [vmem:[%s5570_s9 + $0x3b8] sm:$0xff] %v444_v55  ;;  %v572_v55 = vld [vmem:[%s5565_s8 + $0x10f8] sm:$0xff] }
  0x8b   : > { %447 = vst [vmem:[%s5570_s9 + $0x3c0] sm:$0xff] %v446_v56  ;;  %v574_v56 = vld [vmem:[%s5565_s8 + $0x1140] sm:$0xff] }
  0x8c   : > { %449 = vst [vmem:[%s5570_s9 + $0x3c8] sm:$0xff] %v448_v57  ;;  %v576_v57 = vld [vmem:[%s5565_s8 + $0x1148] sm:$0xff] }
  0x8d   : > { %451 = vst [vmem:[%s5570_s9 + $0x3d0] sm:$0xff] %v450_v58  ;;  %v578_v58 = vld [vmem:[%s5565_s8 + $0x1150] sm:$0xff] }
  0x8e   : > { %453 = vst [vmem:[%s5570_s9 + $0x3d8] sm:$0xff] %v452_v59  ;;  %v580_v59 = vld [vmem:[%s5565_s8 + $0x1158] sm:$0xff] }
  0x8f   : > { %455 = vst [vmem:[%s5570_s9 + $0x3e0] sm:$0xff] %v454_v60  ;;  %v582_v60 = vld [vmem:[%s5565_s8 + $0x11a0] sm:$0xff] }
  0x90   : > { %457 = vst [vmem:[%s5570_s9 + $0x3e8] sm:$0xff] %v456_v61  ;;  %v584_v61 = vld [vmem:[%s5565_s8 + $0x11a8] sm:$0xff] }
  0x91   : > { %459 = vst [vmem:[%s5570_s9 + $0x3f0] sm:$0xff] %v458_v62  ;;  %v586_v62 = vld [vmem:[%s5565_s8 + $0x11b0] sm:$0xff] }
  0x92   : > { %461 = vst [vmem:[%s5570_s9 + $0x3f8] sm:$0xff] %v460_v63  ;;  %v588_v63 = vld [vmem:[%s5565_s8 + $0x11b8] sm:$0xff] }
  0x93   : > { %463 = vst [vmem:[%s5570_s9 + $0x400] sm:$0xff] %v462_v0  ;;  %v590_v0 = vld [vmem:[%s5565_s8 + $0x1200] sm:$0xff] }
  0x94   : > { %465 = vst [vmem:[%s5570_s9 + $0x408] sm:$0xff] %v464_v1  ;;  %v592_v1 = vld [vmem:[%s5565_s8 + $0x1208] sm:$0xff] }
  0x95   : > { %467 = vst [vmem:[%s5570_s9 + $0x410] sm:$0xff] %v466_v2  ;;  %v594_v2 = vld [vmem:[%s5565_s8 + $0x1210] sm:$0xff] }
  0x96   : > { %469 = vst [vmem:[%s5570_s9 + $0x418] sm:$0xff] %v468_v3  ;;  %v596_v3 = vld [vmem:[%s5565_s8 + $0x1218] sm:$0xff] }
  0x97   : > { %471 = vst [vmem:[%s5570_s9 + $0x420] sm:$0xff] %v470_v4  ;;  %v598_v4 = vld [vmem:[%s5565_s8 + $0x1260] sm:$0xff] }
  0x98   : > { %473 = vst [vmem:[%s5570_s9 + $0x428] sm:$0xff] %v472_v5  ;;  %v600_v5 = vld [vmem:[%s5565_s8 + $0x1268] sm:$0xff] }
  0x99   : > { %475 = vst [vmem:[%s5570_s9 + $0x430] sm:$0xff] %v474_v6  ;;  %v602_v6 = vld [vmem:[%s5565_s8 + $0x1270] sm:$0xff] }
  0x9a   : > { %477 = vst [vmem:[%s5570_s9 + $0x438] sm:$0xff] %v476_v7  ;;  %v604_v7 = vld [vmem:[%s5565_s8 + $0x1278] sm:$0xff] }
  0x9b   : > { %479 = vst [vmem:[%s5570_s9 + $0x440] sm:$0xff] %v478_v8  ;;  %v606_v8 = vld [vmem:[%s5565_s8 + $0x12c0] sm:$0xff] }
  0x9c   : > { %481 = vst [vmem:[%s5570_s9 + $0x448] sm:$0xff] %v480_v9  ;;  %v608_v9 = vld [vmem:[%s5565_s8 + $0x12c8] sm:$0xff] }
  0x9d   : > { %483 = vst [vmem:[%s5570_s9 + $0x450] sm:$0xff] %v482_v10  ;;  %v610_v10 = vld [vmem:[%s5565_s8 + $0x12d0] sm:$0xff] }
  0x9e   : > { %485 = vst [vmem:[%s5570_s9 + $0x458] sm:$0xff] %v484_v11  ;;  %v612_v11 = vld [vmem:[%s5565_s8 + $0x12d8] sm:$0xff] }
  0x9f   : > { %487 = vst [vmem:[%s5570_s9 + $0x460] sm:$0xff] %v486_v12  ;;  %v614_v12 = vld [vmem:[%s5565_s8 + $0x1320] sm:$0xff] }
  0xa0   : > { %489 = vst [vmem:[%s5570_s9 + $0x468] sm:$0xff] %v488_v13  ;;  %v616_v13 = vld [vmem:[%s5565_s8 + $0x1328] sm:$0xff] }
  0xa1   : > { %491 = vst [vmem:[%s5570_s9 + $0x470] sm:$0xff] %v490_v14  ;;  %v618_v14 = vld [vmem:[%s5565_s8 + $0x1330] sm:$0xff] }
  0xa2   : > { %493 = vst [vmem:[%s5570_s9 + $0x478] sm:$0xff] %v492_v15  ;;  %v620_v15 = vld [vmem:[%s5565_s8 + $0x1338] sm:$0xff] }
  0xa3   : > { %495 = vst [vmem:[%s5570_s9 + $0x480] sm:$0xff] %v494_v16  ;;  %v622_v16 = vld [vmem:[%s5565_s8 + $0x1380] sm:$0xff] }
  0xa4   : > { %497 = vst [vmem:[%s5570_s9 + $0x488] sm:$0xff] %v496_v17  ;;  %v624_v17 = vld [vmem:[%s5565_s8 + $0x1388] sm:$0xff] }
  0xa5   : > { %499 = vst [vmem:[%s5570_s9 + $0x490] sm:$0xff] %v498_v18  ;;  %v626_v18 = vld [vmem:[%s5565_s8 + $0x1390] sm:$0xff] }
  0xa6   : > { %501 = vst [vmem:[%s5570_s9 + $0x498] sm:$0xff] %v500_v19  ;;  %v628_v19 = vld [vmem:[%s5565_s8 + $0x1398] sm:$0xff] }
  0xa7   : > { %503 = vst [vmem:[%s5570_s9 + $0x4a0] sm:$0xff] %v502_v20  ;;  %v630_v20 = vld [vmem:[%s5565_s8 + $0x13e0] sm:$0xff] }
  0xa8   : > { %505 = vst [vmem:[%s5570_s9 + $0x4a8] sm:$0xff] %v504_v21  ;;  %v632_v21 = vld [vmem:[%s5565_s8 + $0x13e8] sm:$0xff] }
  0xa9   : > { %507 = vst [vmem:[%s5570_s9 + $0x4b0] sm:$0xff] %v506_v22  ;;  %v634_v22 = vld [vmem:[%s5565_s8 + $0x13f0] sm:$0xff] }
  0xaa   : > { %509 = vst [vmem:[%s5570_s9 + $0x4b8] sm:$0xff] %v508_v23  ;;  %v636_v23 = vld [vmem:[%s5565_s8 + $0x13f8] sm:$0xff] }
  0xab   : > { %511 = vst [vmem:[%s5570_s9 + $0x4c0] sm:$0xff] %v510_v24  ;;  %v638_v24 = vld [vmem:[%s5565_s8 + $0x1440] sm:$0xff] }
  0xac   : > { %513 = vst [vmem:[%s5570_s9 + $0x4c8] sm:$0xff] %v512_v25  ;;  %v640_v25 = vld [vmem:[%s5565_s8 + $0x1448] sm:$0xff] }
  0xad   : > { %515 = vst [vmem:[%s5570_s9 + $0x4d0] sm:$0xff] %v514_v26  ;;  %v642_v26 = vld [vmem:[%s5565_s8 + $0x1450] sm:$0xff] }
  0xae   : > { %517 = vst [vmem:[%s5570_s9 + $0x4d8] sm:$0xff] %v516_v27  ;;  %v644_v27 = vld [vmem:[%s5565_s8 + $0x1458] sm:$0xff] }
  0xaf   : > { %519 = vst [vmem:[%s5570_s9 + $0x4e0] sm:$0xff] %v518_v28  ;;  %v646_v28 = vld [vmem:[%s5565_s8 + $0x14a0] sm:$0xff] }
  0xb0   : > { %521 = vst [vmem:[%s5570_s9 + $0x4e8] sm:$0xff] %v520_v29  ;;  %v648_v29 = vld [vmem:[%s5565_s8 + $0x14a8] sm:$0xff] }
  0xb1   : > { %523 = vst [vmem:[%s5570_s9 + $0x4f0] sm:$0xff] %v522_v30  ;;  %v650_v30 = vld [vmem:[%s5565_s8 + $0x14b0] sm:$0xff] }
  0xb2   : > { %525 = vst [vmem:[%s5570_s9 + $0x4f8] sm:$0xff] %v524_v31  ;;  %v652_v31 = vld [vmem:[%s5565_s8 + $0x14b8] sm:$0xff] }
  0xb3   : > { %527 = vst [vmem:[%s5570_s9 + $0x500] sm:$0xff] %v526_v32  ;;  %v654_v32 = vld [vmem:[%s5565_s8 + $0x1500] sm:$0xff] }
  0xb4   : > { %529 = vst [vmem:[%s5570_s9 + $0x508] sm:$0xff] %v528_v33  ;;  %v656_v33 = vld [vmem:[%s5565_s8 + $0x1508] sm:$0xff] }
  0xb5   : > { %531 = vst [vmem:[%s5570_s9 + $0x510] sm:$0xff] %v530_v34  ;;  %v658_v34 = vld [vmem:[%s5565_s8 + $0x1510] sm:$0xff] }
  0xb6   : > { %533 = vst [vmem:[%s5570_s9 + $0x518] sm:$0xff] %v532_v35  ;;  %v660_v35 = vld [vmem:[%s5565_s8 + $0x1518] sm:$0xff] }
  0xb7   : > { %535 = vst [vmem:[%s5570_s9 + $0x520] sm:$0xff] %v534_v36  ;;  %v662_v36 = vld [vmem:[%s5565_s8 + $0x1560] sm:$0xff] }
  0xb8   : > { %537 = vst [vmem:[%s5570_s9 + $0x528] sm:$0xff] %v536_v37  ;;  %v664_v37 = vld [vmem:[%s5565_s8 + $0x1568] sm:$0xff] }
  0xb9   : > { %539 = vst [vmem:[%s5570_s9 + $0x530] sm:$0xff] %v538_v38  ;;  %v666_v38 = vld [vmem:[%s5565_s8 + $0x1570] sm:$0xff] }
  0xba   : > { %541 = vst [vmem:[%s5570_s9 + $0x538] sm:$0xff] %v540_v39  ;;  %v668_v39 = vld [vmem:[%s5565_s8 + $0x1578] sm:$0xff] }
  0xbb   : > { %543 = vst [vmem:[%s5570_s9 + $0x540] sm:$0xff] %v542_v40  ;;  %v670_v40 = vld [vmem:[%s5565_s8 + $0x15c0] sm:$0xff] }
  0xbc   : > { %545 = vst [vmem:[%s5570_s9 + $0x548] sm:$0xff] %v544_v41  ;;  %v672_v41 = vld [vmem:[%s5565_s8 + $0x15c8] sm:$0xff] }
  0xbd   : > { %547 = vst [vmem:[%s5570_s9 + $0x550] sm:$0xff] %v546_v42  ;;  %v674_v42 = vld [vmem:[%s5565_s8 + $0x15d0] sm:$0xff] }
  0xbe   : > { %549 = vst [vmem:[%s5570_s9 + $0x558] sm:$0xff] %v548_v43  ;;  %v676_v43 = vld [vmem:[%s5565_s8 + $0x15d8] sm:$0xff] }
  0xbf   : > { %551 = vst [vmem:[%s5570_s9 + $0x560] sm:$0xff] %v550_v44  ;;  %v678_v44 = vld [vmem:[%s5565_s8 + $0x1620] sm:$0xff] }
  0xc0   : > { %553 = vst [vmem:[%s5570_s9 + $0x568] sm:$0xff] %v552_v45  ;;  %v680_v45 = vld [vmem:[%s5565_s8 + $0x1628] sm:$0xff] }
  0xc1   : > { %555 = vst [vmem:[%s5570_s9 + $0x570] sm:$0xff] %v554_v46  ;;  %v682_v46 = vld [vmem:[%s5565_s8 + $0x1630] sm:$0xff] }
  0xc2   : > { %557 = vst [vmem:[%s5570_s9 + $0x578] sm:$0xff] %v556_v47  ;;  %v684_v47 = vld [vmem:[%s5565_s8 + $0x1638] sm:$0xff] }
  0xc3   : > { %559 = vst [vmem:[%s5570_s9 + $0x580] sm:$0xff] %v558_v48  ;;  %v686_v48 = vld [vmem:[%s5565_s8 + $0x1680] sm:$0xff] }
  0xc4   : > { %561 = vst [vmem:[%s5570_s9 + $0x588] sm:$0xff] %v560_v49  ;;  %v688_v49 = vld [vmem:[%s5565_s8 + $0x1688] sm:$0xff] }
  0xc5   : > { %563 = vst [vmem:[%s5570_s9 + $0x590] sm:$0xff] %v562_v50  ;;  %v690_v50 = vld [vmem:[%s5565_s8 + $0x1690] sm:$0xff] }
  0xc6   : > { %565 = vst [vmem:[%s5570_s9 + $0x598] sm:$0xff] %v564_v51  ;;  %v692_v51 = vld [vmem:[%s5565_s8 + $0x1698] sm:$0xff] }
  0xc7   : > { %567 = vst [vmem:[%s5570_s9 + $0x5a0] sm:$0xff] %v566_v52  ;;  %v694_v52 = vld [vmem:[%s5565_s8 + $0x16e0] sm:$0xff] }
  0xc8   : > { %569 = vst [vmem:[%s5570_s9 + $0x5a8] sm:$0xff] %v568_v53  ;;  %v696_v53 = vld [vmem:[%s5565_s8 + $0x16e8] sm:$0xff] }
  0xc9   : > { %571 = vst [vmem:[%s5570_s9 + $0x5b0] sm:$0xff] %v570_v54  ;;  %v698_v54 = vld [vmem:[%s5565_s8 + $0x16f0] sm:$0xff] }
  0xca   : > { %573 = vst [vmem:[%s5570_s9 + $0x5b8] sm:$0xff] %v572_v55  ;;  %v700_v55 = vld [vmem:[%s5565_s8 + $0x16f8] sm:$0xff] }
  0xcb   : > { %575 = vst [vmem:[%s5570_s9 + $0x5c0] sm:$0xff] %v574_v56  ;;  %v702_v56 = vld [vmem:[%s5565_s8 + $0x1740] sm:$0xff] }
  0xcc   : > { %577 = vst [vmem:[%s5570_s9 + $0x5c8] sm:$0xff] %v576_v57  ;;  %v704_v57 = vld [vmem:[%s5565_s8 + $0x1748] sm:$0xff] }
  0xcd   : > { %579 = vst [vmem:[%s5570_s9 + $0x5d0] sm:$0xff] %v578_v58  ;;  %v706_v58 = vld [vmem:[%s5565_s8 + $0x1750] sm:$0xff] }
  0xce   : > { %581 = vst [vmem:[%s5570_s9 + $0x5d8] sm:$0xff] %v580_v59  ;;  %v708_v59 = vld [vmem:[%s5565_s8 + $0x1758] sm:$0xff] }
  0xcf   : > { %583 = vst [vmem:[%s5570_s9 + $0x5e0] sm:$0xff] %v582_v60  ;;  %v710_v60 = vld [vmem:[%s5565_s8 + $0x17a0] sm:$0xff] }
  0xd0   : > { %585 = vst [vmem:[%s5570_s9 + $0x5e8] sm:$0xff] %v584_v61  ;;  %v712_v61 = vld [vmem:[%s5565_s8 + $0x17a8] sm:$0xff] }
  0xd1   : > { %587 = vst [vmem:[%s5570_s9 + $0x5f0] sm:$0xff] %v586_v62  ;;  %v714_v62 = vld [vmem:[%s5565_s8 + $0x17b0] sm:$0xff] }
  0xd2   : > { %589 = vst [vmem:[%s5570_s9 + $0x5f8] sm:$0xff] %v588_v63  ;;  %v716_v63 = vld [vmem:[%s5565_s8 + $0x17b8] sm:$0xff] }
  0xd3   : > { %591 = vst [vmem:[%s5570_s9 + $0x600] sm:$0xff] %v590_v0  ;;  %v718_v0 = vld [vmem:[%s5565_s8 + $0x1800] sm:$0xff] }
  0xd4   : > { %593 = vst [vmem:[%s5570_s9 + $0x608] sm:$0xff] %v592_v1  ;;  %v720_v1 = vld [vmem:[%s5565_s8 + $0x1808] sm:$0xff] }
  0xd5   : > { %595 = vst [vmem:[%s5570_s9 + $0x610] sm:$0xff] %v594_v2  ;;  %v722_v2 = vld [vmem:[%s5565_s8 + $0x1810] sm:$0xff] }
  0xd6   : > { %597 = vst [vmem:[%s5570_s9 + $0x618] sm:$0xff] %v596_v3  ;;  %v724_v3 = vld [vmem:[%s5565_s8 + $0x1818] sm:$0xff] }
  0xd7   : > { %599 = vst [vmem:[%s5570_s9 + $0x620] sm:$0xff] %v598_v4  ;;  %v726_v4 = vld [vmem:[%s5565_s8 + $0x1860] sm:$0xff] }
  0xd8   : > { %601 = vst [vmem:[%s5570_s9 + $0x628] sm:$0xff] %v600_v5  ;;  %v728_v5 = vld [vmem:[%s5565_s8 + $0x1868] sm:$0xff] }
  0xd9   : > { %603 = vst [vmem:[%s5570_s9 + $0x630] sm:$0xff] %v602_v6  ;;  %v730_v6 = vld [vmem:[%s5565_s8 + $0x1870] sm:$0xff] }
  0xda   : > { %605 = vst [vmem:[%s5570_s9 + $0x638] sm:$0xff] %v604_v7  ;;  %v732_v7 = vld [vmem:[%s5565_s8 + $0x1878] sm:$0xff] }
  0xdb   : > { %607 = vst [vmem:[%s5570_s9 + $0x640] sm:$0xff] %v606_v8  ;;  %v734_v8 = vld [vmem:[%s5565_s8 + $0x18c0] sm:$0xff] }
  0xdc   : > { %609 = vst [vmem:[%s5570_s9 + $0x648] sm:$0xff] %v608_v9  ;;  %v736_v9 = vld [vmem:[%s5565_s8 + $0x18c8] sm:$0xff] }
  0xdd   : > { %611 = vst [vmem:[%s5570_s9 + $0x650] sm:$0xff] %v610_v10  ;;  %v738_v10 = vld [vmem:[%s5565_s8 + $0x18d0] sm:$0xff] }
  0xde   : > { %613 = vst [vmem:[%s5570_s9 + $0x658] sm:$0xff] %v612_v11  ;;  %v740_v11 = vld [vmem:[%s5565_s8 + $0x18d8] sm:$0xff] }
  0xdf   : > { %615 = vst [vmem:[%s5570_s9 + $0x660] sm:$0xff] %v614_v12  ;;  %v742_v12 = vld [vmem:[%s5565_s8 + $0x1920] sm:$0xff] }
  0xe0   : > { %617 = vst [vmem:[%s5570_s9 + $0x668] sm:$0xff] %v616_v13  ;;  %v744_v13 = vld [vmem:[%s5565_s8 + $0x1928] sm:$0xff] }
  0xe1   : > { %619 = vst [vmem:[%s5570_s9 + $0x670] sm:$0xff] %v618_v14  ;;  %v746_v14 = vld [vmem:[%s5565_s8 + $0x1930] sm:$0xff] }
  0xe2   : > { %621 = vst [vmem:[%s5570_s9 + $0x678] sm:$0xff] %v620_v15  ;;  %v748_v15 = vld [vmem:[%s5565_s8 + $0x1938] sm:$0xff] }
  0xe3   : > { %623 = vst [vmem:[%s5570_s9 + $0x680] sm:$0xff] %v622_v16  ;;  %v750_v16 = vld [vmem:[%s5565_s8 + $0x1980] sm:$0xff] }
  0xe4   : > { %625 = vst [vmem:[%s5570_s9 + $0x688] sm:$0xff] %v624_v17  ;;  %v752_v17 = vld [vmem:[%s5565_s8 + $0x1988] sm:$0xff] }
  0xe5   : > { %627 = vst [vmem:[%s5570_s9 + $0x690] sm:$0xff] %v626_v18  ;;  %v754_v18 = vld [vmem:[%s5565_s8 + $0x1990] sm:$0xff] }
  0xe6   : > { %629 = vst [vmem:[%s5570_s9 + $0x698] sm:$0xff] %v628_v19  ;;  %v756_v19 = vld [vmem:[%s5565_s8 + $0x1998] sm:$0xff] }
  0xe7   : > { %631 = vst [vmem:[%s5570_s9 + $0x6a0] sm:$0xff] %v630_v20  ;;  %v758_v20 = vld [vmem:[%s5565_s8 + $0x19e0] sm:$0xff] }
  0xe8   : > { %633 = vst [vmem:[%s5570_s9 + $0x6a8] sm:$0xff] %v632_v21  ;;  %v760_v21 = vld [vmem:[%s5565_s8 + $0x19e8] sm:$0xff] }
  0xe9   : > { %635 = vst [vmem:[%s5570_s9 + $0x6b0] sm:$0xff] %v634_v22  ;;  %v762_v22 = vld [vmem:[%s5565_s8 + $0x19f0] sm:$0xff] }
  0xea   : > { %637 = vst [vmem:[%s5570_s9 + $0x6b8] sm:$0xff] %v636_v23  ;;  %v764_v23 = vld [vmem:[%s5565_s8 + $0x19f8] sm:$0xff] }
  0xeb   : > { %639 = vst [vmem:[%s5570_s9 + $0x6c0] sm:$0xff] %v638_v24  ;;  %v766_v24 = vld [vmem:[%s5565_s8 + $0x1a40] sm:$0xff] }
  0xec   : > { %641 = vst [vmem:[%s5570_s9 + $0x6c8] sm:$0xff] %v640_v25  ;;  %v768_v25 = vld [vmem:[%s5565_s8 + $0x1a48] sm:$0xff] }
  0xed   : > { %643 = vst [vmem:[%s5570_s9 + $0x6d0] sm:$0xff] %v642_v26  ;;  %v770_v26 = vld [vmem:[%s5565_s8 + $0x1a50] sm:$0xff] }
  0xee   : > { %645 = vst [vmem:[%s5570_s9 + $0x6d8] sm:$0xff] %v644_v27  ;;  %v772_v27 = vld [vmem:[%s5565_s8 + $0x1a58] sm:$0xff] }
  0xef   : > { %647 = vst [vmem:[%s5570_s9 + $0x6e0] sm:$0xff] %v646_v28  ;;  %v774_v28 = vld [vmem:[%s5565_s8 + $0x1aa0] sm:$0xff] }
  0xf0   : > { %649 = vst [vmem:[%s5570_s9 + $0x6e8] sm:$0xff] %v648_v29  ;;  %v776_v29 = vld [vmem:[%s5565_s8 + $0x1aa8] sm:$0xff] }
  0xf1   : > { %651 = vst [vmem:[%s5570_s9 + $0x6f0] sm:$0xff] %v650_v30  ;;  %v778_v30 = vld [vmem:[%s5565_s8 + $0x1ab0] sm:$0xff] }
  0xf2   : > { %653 = vst [vmem:[%s5570_s9 + $0x6f8] sm:$0xff] %v652_v31  ;;  %v780_v31 = vld [vmem:[%s5565_s8 + $0x1ab8] sm:$0xff] }
  0xf3   : > { %655 = vst [vmem:[%s5570_s9 + $0x700] sm:$0xff] %v654_v32  ;;  %v782_v32 = vld [vmem:[%s5565_s8 + $0x1b00] sm:$0xff] }
  0xf4   : > { %657 = vst [vmem:[%s5570_s9 + $0x708] sm:$0xff] %v656_v33  ;;  %v784_v33 = vld [vmem:[%s5565_s8 + $0x1b08] sm:$0xff] }
  0xf5   : > { %659 = vst [vmem:[%s5570_s9 + $0x710] sm:$0xff] %v658_v34  ;;  %v786_v34 = vld [vmem:[%s5565_s8 + $0x1b10] sm:$0xff] }
  0xf6   : > { %661 = vst [vmem:[%s5570_s9 + $0x718] sm:$0xff] %v660_v35  ;;  %v788_v35 = vld [vmem:[%s5565_s8 + $0x1b18] sm:$0xff] }
  0xf7   : > { %663 = vst [vmem:[%s5570_s9 + $0x720] sm:$0xff] %v662_v36  ;;  %v790_v36 = vld [vmem:[%s5565_s8 + $0x1b60] sm:$0xff] }
  0xf8   : > { %665 = vst [vmem:[%s5570_s9 + $0x728] sm:$0xff] %v664_v37  ;;  %v792_v37 = vld [vmem:[%s5565_s8 + $0x1b68] sm:$0xff] }
  0xf9   : > { %667 = vst [vmem:[%s5570_s9 + $0x730] sm:$0xff] %v666_v38  ;;  %v794_v38 = vld [vmem:[%s5565_s8 + $0x1b70] sm:$0xff] }
  0xfa   : > { %669 = vst [vmem:[%s5570_s9 + $0x738] sm:$0xff] %v668_v39  ;;  %v796_v39 = vld [vmem:[%s5565_s8 + $0x1b78] sm:$0xff] }
  0xfb   : > { %671 = vst [vmem:[%s5570_s9 + $0x740] sm:$0xff] %v670_v40  ;;  %v798_v40 = vld [vmem:[%s5565_s8 + $0x1bc0] sm:$0xff] }
  0xfc   : > { %673 = vst [vmem:[%s5570_s9 + $0x748] sm:$0xff] %v672_v41  ;;  %v800_v41 = vld [vmem:[%s5565_s8 + $0x1bc8] sm:$0xff] }
  0xfd   : > { %675 = vst [vmem:[%s5570_s9 + $0x750] sm:$0xff] %v674_v42  ;;  %v802_v42 = vld [vmem:[%s5565_s8 + $0x1bd0] sm:$0xff] }
  0xfe   : > { %677 = vst [vmem:[%s5570_s9 + $0x758] sm:$0xff] %v676_v43  ;;  %v804_v43 = vld [vmem:[%s5565_s8 + $0x1bd8] sm:$0xff] }
  0xff   : > { %679 = vst [vmem:[%s5570_s9 + $0x760] sm:$0xff] %v678_v44  ;;  %v806_v44 = vld [vmem:[%s5565_s8 + $0x1c20] sm:$0xff] }
 0x100   : > { %681 = vst [vmem:[%s5570_s9 + $0x768] sm:$0xff] %v680_v45  ;;  %v808_v45 = vld [vmem:[%s5565_s8 + $0x1c28] sm:$0xff] }
 0x101   : > { %683 = vst [vmem:[%s5570_s9 + $0x770] sm:$0xff] %v682_v46  ;;  %v810_v46 = vld [vmem:[%s5565_s8 + $0x1c30] sm:$0xff] }
 0x102   : > { %685 = vst [vmem:[%s5570_s9 + $0x778] sm:$0xff] %v684_v47  ;;  %v812_v47 = vld [vmem:[%s5565_s8 + $0x1c38] sm:$0xff] }
 0x103   : > { %687 = vst [vmem:[%s5570_s9 + $0x780] sm:$0xff] %v686_v48  ;;  %v814_v48 = vld [vmem:[%s5565_s8 + $0x1c80] sm:$0xff] }
 0x104   : > { %689 = vst [vmem:[%s5570_s9 + $0x788] sm:$0xff] %v688_v49  ;;  %v816_v49 = vld [vmem:[%s5565_s8 + $0x1c88] sm:$0xff] }
 0x105   : > { %691 = vst [vmem:[%s5570_s9 + $0x790] sm:$0xff] %v690_v50  ;;  %v818_v50 = vld [vmem:[%s5565_s8 + $0x1c90] sm:$0xff] }
 0x106   : > { %693 = vst [vmem:[%s5570_s9 + $0x798] sm:$0xff] %v692_v51  ;;  %v820_v51 = vld [vmem:[%s5565_s8 + $0x1c98] sm:$0xff] }
 0x107   : > { %695 = vst [vmem:[%s5570_s9 + $0x7a0] sm:$0xff] %v694_v52  ;;  %v822_v52 = vld [vmem:[%s5565_s8 + $0x1ce0] sm:$0xff] }
 0x108   : > { %697 = vst [vmem:[%s5570_s9 + $0x7a8] sm:$0xff] %v696_v53  ;;  %v824_v53 = vld [vmem:[%s5565_s8 + $0x1ce8] sm:$0xff] }
 0x109   : > { %699 = vst [vmem:[%s5570_s9 + $0x7b0] sm:$0xff] %v698_v54  ;;  %v826_v54 = vld [vmem:[%s5565_s8 + $0x1cf0] sm:$0xff] }
 0x10a   : > { %701 = vst [vmem:[%s5570_s9 + $0x7b8] sm:$0xff] %v700_v55  ;;  %v828_v55 = vld [vmem:[%s5565_s8 + $0x1cf8] sm:$0xff] }
 0x10b   : > { %703 = vst [vmem:[%s5570_s9 + $0x7c0] sm:$0xff] %v702_v56  ;;  %v830_v56 = vld [vmem:[%s5565_s8 + $0x1d40] sm:$0xff] }
 0x10c   : > { %705 = vst [vmem:[%s5570_s9 + $0x7c8] sm:$0xff] %v704_v57  ;;  %v832_v57 = vld [vmem:[%s5565_s8 + $0x1d48] sm:$0xff] }
 0x10d   : > { %707 = vst [vmem:[%s5570_s9 + $0x7d0] sm:$0xff] %v706_v58  ;;  %v834_v58 = vld [vmem:[%s5565_s8 + $0x1d50] sm:$0xff] }
 0x10e   : > { %709 = vst [vmem:[%s5570_s9 + $0x7d8] sm:$0xff] %v708_v59  ;;  %v836_v59 = vld [vmem:[%s5565_s8 + $0x1d58] sm:$0xff] }
 0x10f   : > { %711 = vst [vmem:[%s5570_s9 + $0x7e0] sm:$0xff] %v710_v60  ;;  %v838_v60 = vld [vmem:[%s5565_s8 + $0x1da0] sm:$0xff] }
 0x110   : > { %713 = vst [vmem:[%s5570_s9 + $0x7e8] sm:$0xff] %v712_v61  ;;  %v840_v61 = vld [vmem:[%s5565_s8 + $0x1da8] sm:$0xff] }
 0x111   : > { %715 = vst [vmem:[%s5570_s9 + $0x7f0] sm:$0xff] %v714_v62  ;;  %v842_v62 = vld [vmem:[%s5565_s8 + $0x1db0] sm:$0xff] }
 0x112   : > { %717 = vst [vmem:[%s5570_s9 + $0x7f8] sm:$0xff] %v716_v63  ;;  %v844_v63 = vld [vmem:[%s5565_s8 + $0x1db8] sm:$0xff] }
 0x113   : > { %719 = vst [vmem:[%s5570_s9 + $0x800] sm:$0xff] %v718_v0  ;;  %v846_v0 = vld [vmem:[%s5565_s8 + $0x1e00] sm:$0xff] }
 0x114   : > { %721 = vst [vmem:[%s5570_s9 + $0x808] sm:$0xff] %v720_v1  ;;  %v848_v1 = vld [vmem:[%s5565_s8 + $0x1e08] sm:$0xff] }
 0x115   : > { %723 = vst [vmem:[%s5570_s9 + $0x810] sm:$0xff] %v722_v2  ;;  %v850_v2 = vld [vmem:[%s5565_s8 + $0x1e10] sm:$0xff] }
 0x116   : > { %725 = vst [vmem:[%s5570_s9 + $0x818] sm:$0xff] %v724_v3  ;;  %v852_v3 = vld [vmem:[%s5565_s8 + $0x1e18] sm:$0xff] }
 0x117   : > { %727 = vst [vmem:[%s5570_s9 + $0x820] sm:$0xff] %v726_v4  ;;  %v854_v4 = vld [vmem:[%s5565_s8 + $0x1e60] sm:$0xff] }
 0x118   : > { %729 = vst [vmem:[%s5570_s9 + $0x828] sm:$0xff] %v728_v5  ;;  %v856_v5 = vld [vmem:[%s5565_s8 + $0x1e68] sm:$0xff] }
 0x119   : > { %731 = vst [vmem:[%s5570_s9 + $0x830] sm:$0xff] %v730_v6  ;;  %v858_v6 = vld [vmem:[%s5565_s8 + $0x1e70] sm:$0xff] }
 0x11a   : > { %733 = vst [vmem:[%s5570_s9 + $0x838] sm:$0xff] %v732_v7  ;;  %v860_v7 = vld [vmem:[%s5565_s8 + $0x1e78] sm:$0xff] }
 0x11b   : > { %735 = vst [vmem:[%s5570_s9 + $0x840] sm:$0xff] %v734_v8  ;;  %v862_v8 = vld [vmem:[%s5565_s8 + $0x1ec0] sm:$0xff] }
 0x11c   : > { %737 = vst [vmem:[%s5570_s9 + $0x848] sm:$0xff] %v736_v9  ;;  %v864_v9 = vld [vmem:[%s5565_s8 + $0x1ec8] sm:$0xff] }
 0x11d   : > { %739 = vst [vmem:[%s5570_s9 + $0x850] sm:$0xff] %v738_v10  ;;  %v866_v10 = vld [vmem:[%s5565_s8 + $0x1ed0] sm:$0xff] }
 0x11e   : > { %741 = vst [vmem:[%s5570_s9 + $0x858] sm:$0xff] %v740_v11  ;;  %v868_v11 = vld [vmem:[%s5565_s8 + $0x1ed8] sm:$0xff] }
 0x11f   : > { %743 = vst [vmem:[%s5570_s9 + $0x860] sm:$0xff] %v742_v12  ;;  %v870_v12 = vld [vmem:[%s5565_s8 + $0x1f20] sm:$0xff] }
 0x120   : > { %745 = vst [vmem:[%s5570_s9 + $0x868] sm:$0xff] %v744_v13  ;;  %v872_v13 = vld [vmem:[%s5565_s8 + $0x1f28] sm:$0xff] }
 0x121   : > { %747 = vst [vmem:[%s5570_s9 + $0x870] sm:$0xff] %v746_v14  ;;  %v874_v14 = vld [vmem:[%s5565_s8 + $0x1f30] sm:$0xff] }
 0x122   : > { %749 = vst [vmem:[%s5570_s9 + $0x878] sm:$0xff] %v748_v15  ;;  %v876_v15 = vld [vmem:[%s5565_s8 + $0x1f38] sm:$0xff] }
 0x123   : > { %751 = vst [vmem:[%s5570_s9 + $0x880] sm:$0xff] %v750_v16  ;;  %v878_v16 = vld [vmem:[%s5565_s8 + $0x1f80] sm:$0xff] }
 0x124   : > { %753 = vst [vmem:[%s5570_s9 + $0x888] sm:$0xff] %v752_v17  ;;  %v880_v17 = vld [vmem:[%s5565_s8 + $0x1f88] sm:$0xff] }
 0x125   : > { %755 = vst [vmem:[%s5570_s9 + $0x890] sm:$0xff] %v754_v18  ;;  %v882_v18 = vld [vmem:[%s5565_s8 + $0x1f90] sm:$0xff] }
 0x126   : > { %757 = vst [vmem:[%s5570_s9 + $0x898] sm:$0xff] %v756_v19  ;;  %v884_v19 = vld [vmem:[%s5565_s8 + $0x1f98] sm:$0xff] }
 0x127   : > { %759 = vst [vmem:[%s5570_s9 + $0x8a0] sm:$0xff] %v758_v20  ;;  %v886_v20 = vld [vmem:[%s5565_s8 + $0x1fe0] sm:$0xff] }
 0x128   : > { %761 = vst [vmem:[%s5570_s9 + $0x8a8] sm:$0xff] %v760_v21  ;;  %v888_v21 = vld [vmem:[%s5565_s8 + $0x1fe8] sm:$0xff] }
 0x129   : > { %763 = vst [vmem:[%s5570_s9 + $0x8b0] sm:$0xff] %v762_v22  ;;  %v890_v22 = vld [vmem:[%s5565_s8 + $0x1ff0] sm:$0xff] }
 0x12a   : > { %765 = vst [vmem:[%s5570_s9 + $0x8b8] sm:$0xff] %v764_v23  ;;  %v892_v23 = vld [vmem:[%s5565_s8 + $0x1ff8] sm:$0xff] }
 0x12b   : > { %767 = vst [vmem:[%s5570_s9 + $0x8c0] sm:$0xff] %v766_v24  ;;  %v894_v24 = vld [vmem:[%s5565_s8 + $0x2040] sm:$0xff] }
 0x12c   : > { %769 = vst [vmem:[%s5570_s9 + $0x8c8] sm:$0xff] %v768_v25  ;;  %v896_v25 = vld [vmem:[%s5565_s8 + $0x2048] sm:$0xff] }
 0x12d   : > { %771 = vst [vmem:[%s5570_s9 + $0x8d0] sm:$0xff] %v770_v26  ;;  %v898_v26 = vld [vmem:[%s5565_s8 + $0x2050] sm:$0xff] }
 0x12e   : > { %773 = vst [vmem:[%s5570_s9 + $0x8d8] sm:$0xff] %v772_v27  ;;  %v900_v27 = vld [vmem:[%s5565_s8 + $0x2058] sm:$0xff] }
 0x12f   : > { %775 = vst [vmem:[%s5570_s9 + $0x8e0] sm:$0xff] %v774_v28  ;;  %v902_v28 = vld [vmem:[%s5565_s8 + $0x20a0] sm:$0xff] }
 0x130   : > { %777 = vst [vmem:[%s5570_s9 + $0x8e8] sm:$0xff] %v776_v29  ;;  %v904_v29 = vld [vmem:[%s5565_s8 + $0x20a8] sm:$0xff] }
 0x131   : > { %779 = vst [vmem:[%s5570_s9 + $0x8f0] sm:$0xff] %v778_v30  ;;  %v906_v30 = vld [vmem:[%s5565_s8 + $0x20b0] sm:$0xff] }
 0x132   : > { %781 = vst [vmem:[%s5570_s9 + $0x8f8] sm:$0xff] %v780_v31  ;;  %v908_v31 = vld [vmem:[%s5565_s8 + $0x20b8] sm:$0xff] }
 0x133   : > { %783 = vst [vmem:[%s5570_s9 + $0x900] sm:$0xff] %v782_v32  ;;  %v910_v32 = vld [vmem:[%s5565_s8 + $0x2100] sm:$0xff] }
 0x134   : > { %785 = vst [vmem:[%s5570_s9 + $0x908] sm:$0xff] %v784_v33  ;;  %v912_v33 = vld [vmem:[%s5565_s8 + $0x2108] sm:$0xff] }
 0x135   : > { %787 = vst [vmem:[%s5570_s9 + $0x910] sm:$0xff] %v786_v34  ;;  %v914_v34 = vld [vmem:[%s5565_s8 + $0x2110] sm:$0xff] }
 0x136   : > { %789 = vst [vmem:[%s5570_s9 + $0x918] sm:$0xff] %v788_v35  ;;  %v916_v35 = vld [vmem:[%s5565_s8 + $0x2118] sm:$0xff] }
 0x137   : > { %791 = vst [vmem:[%s5570_s9 + $0x920] sm:$0xff] %v790_v36  ;;  %v918_v36 = vld [vmem:[%s5565_s8 + $0x2160] sm:$0xff] }
 0x138   : > { %793 = vst [vmem:[%s5570_s9 + $0x928] sm:$0xff] %v792_v37  ;;  %v920_v37 = vld [vmem:[%s5565_s8 + $0x2168] sm:$0xff] }
 0x139   : > { %795 = vst [vmem:[%s5570_s9 + $0x930] sm:$0xff] %v794_v38  ;;  %v922_v38 = vld [vmem:[%s5565_s8 + $0x2170] sm:$0xff] }
 0x13a   : > { %797 = vst [vmem:[%s5570_s9 + $0x938] sm:$0xff] %v796_v39  ;;  %v924_v39 = vld [vmem:[%s5565_s8 + $0x2178] sm:$0xff] }
 0x13b   : > { %799 = vst [vmem:[%s5570_s9 + $0x940] sm:$0xff] %v798_v40  ;;  %v926_v40 = vld [vmem:[%s5565_s8 + $0x21c0] sm:$0xff] }
 0x13c   : > { %801 = vst [vmem:[%s5570_s9 + $0x948] sm:$0xff] %v800_v41  ;;  %v928_v41 = vld [vmem:[%s5565_s8 + $0x21c8] sm:$0xff] }
 0x13d   : > { %803 = vst [vmem:[%s5570_s9 + $0x950] sm:$0xff] %v802_v42  ;;  %v930_v42 = vld [vmem:[%s5565_s8 + $0x21d0] sm:$0xff] }
 0x13e   : > { %805 = vst [vmem:[%s5570_s9 + $0x958] sm:$0xff] %v804_v43  ;;  %v932_v43 = vld [vmem:[%s5565_s8 + $0x21d8] sm:$0xff] }
 0x13f   : > { %807 = vst [vmem:[%s5570_s9 + $0x960] sm:$0xff] %v806_v44  ;;  %v934_v44 = vld [vmem:[%s5565_s8 + $0x2220] sm:$0xff] }
 0x140   : > { %809 = vst [vmem:[%s5570_s9 + $0x968] sm:$0xff] %v808_v45  ;;  %v936_v45 = vld [vmem:[%s5565_s8 + $0x2228] sm:$0xff] }
 0x141   : > { %811 = vst [vmem:[%s5570_s9 + $0x970] sm:$0xff] %v810_v46  ;;  %v938_v46 = vld [vmem:[%s5565_s8 + $0x2230] sm:$0xff] }
 0x142   : > { %813 = vst [vmem:[%s5570_s9 + $0x978] sm:$0xff] %v812_v47  ;;  %v940_v47 = vld [vmem:[%s5565_s8 + $0x2238] sm:$0xff] }
 0x143   : > { %815 = vst [vmem:[%s5570_s9 + $0x980] sm:$0xff] %v814_v48  ;;  %v942_v48 = vld [vmem:[%s5565_s8 + $0x2280] sm:$0xff] }
 0x144   : > { %817 = vst [vmem:[%s5570_s9 + $0x988] sm:$0xff] %v816_v49  ;;  %v944_v49 = vld [vmem:[%s5565_s8 + $0x2288] sm:$0xff] }
 0x145   : > { %819 = vst [vmem:[%s5570_s9 + $0x990] sm:$0xff] %v818_v50  ;;  %v946_v50 = vld [vmem:[%s5565_s8 + $0x2290] sm:$0xff] }
 0x146   : > { %821 = vst [vmem:[%s5570_s9 + $0x998] sm:$0xff] %v820_v51  ;;  %v948_v51 = vld [vmem:[%s5565_s8 + $0x2298] sm:$0xff] }
 0x147   : > { %823 = vst [vmem:[%s5570_s9 + $0x9a0] sm:$0xff] %v822_v52  ;;  %v950_v52 = vld [vmem:[%s5565_s8 + $0x22e0] sm:$0xff] }
 0x148   : > { %825 = vst [vmem:[%s5570_s9 + $0x9a8] sm:$0xff] %v824_v53  ;;  %v952_v53 = vld [vmem:[%s5565_s8 + $0x22e8] sm:$0xff] }
 0x149   : > { %827 = vst [vmem:[%s5570_s9 + $0x9b0] sm:$0xff] %v826_v54  ;;  %v954_v54 = vld [vmem:[%s5565_s8 + $0x22f0] sm:$0xff] }
 0x14a   : > { %829 = vst [vmem:[%s5570_s9 + $0x9b8] sm:$0xff] %v828_v55  ;;  %v956_v55 = vld [vmem:[%s5565_s8 + $0x22f8] sm:$0xff] }
 0x14b   : > { %831 = vst [vmem:[%s5570_s9 + $0x9c0] sm:$0xff] %v830_v56  ;;  %v958_v56 = vld [vmem:[%s5565_s8 + $0x2340] sm:$0xff] }
 0x14c   : > { %833 = vst [vmem:[%s5570_s9 + $0x9c8] sm:$0xff] %v832_v57  ;;  %v960_v57 = vld [vmem:[%s5565_s8 + $0x2348] sm:$0xff] }
 0x14d   : > { %835 = vst [vmem:[%s5570_s9 + $0x9d0] sm:$0xff] %v834_v58  ;;  %v962_v58 = vld [vmem:[%s5565_s8 + $0x2350] sm:$0xff] }
 0x14e   : > { %837 = vst [vmem:[%s5570_s9 + $0x9d8] sm:$0xff] %v836_v59  ;;  %v964_v59 = vld [vmem:[%s5565_s8 + $0x2358] sm:$0xff] }
 0x14f   : > { %839 = vst [vmem:[%s5570_s9 + $0x9e0] sm:$0xff] %v838_v60  ;;  %v966_v60 = vld [vmem:[%s5565_s8 + $0x23a0] sm:$0xff] }
 0x150   : > { %841 = vst [vmem:[%s5570_s9 + $0x9e8] sm:$0xff] %v840_v61  ;;  %v968_v61 = vld [vmem:[%s5565_s8 + $0x23a8] sm:$0xff] }
 0x151   : > { %843 = vst [vmem:[%s5570_s9 + $0x9f0] sm:$0xff] %v842_v62  ;;  %v970_v62 = vld [vmem:[%s5565_s8 + $0x23b0] sm:$0xff] }
 0x152   : > { %845 = vst [vmem:[%s5570_s9 + $0x9f8] sm:$0xff] %v844_v63  ;;  %v972_v63 = vld [vmem:[%s5565_s8 + $0x23b8] sm:$0xff] }
 0x153   : > { %847 = vst [vmem:[%s5570_s9 + $0xa00] sm:$0xff] %v846_v0  ;;  %v974_v0 = vld [vmem:[%s5565_s8 + $0x2400] sm:$0xff] }
 0x154   : > { %849 = vst [vmem:[%s5570_s9 + $0xa08] sm:$0xff] %v848_v1  ;;  %v976_v1 = vld [vmem:[%s5565_s8 + $0x2408] sm:$0xff] }
 0x155   : > { %851 = vst [vmem:[%s5570_s9 + $0xa10] sm:$0xff] %v850_v2  ;;  %v978_v2 = vld [vmem:[%s5565_s8 + $0x2410] sm:$0xff] }
 0x156   : > { %853 = vst [vmem:[%s5570_s9 + $0xa18] sm:$0xff] %v852_v3  ;;  %v980_v3 = vld [vmem:[%s5565_s8 + $0x2418] sm:$0xff] }
 0x157   : > { %855 = vst [vmem:[%s5570_s9 + $0xa20] sm:$0xff] %v854_v4  ;;  %v982_v4 = vld [vmem:[%s5565_s8 + $0x2460] sm:$0xff] }
 0x158   : > { %857 = vst [vmem:[%s5570_s9 + $0xa28] sm:$0xff] %v856_v5  ;;  %v984_v5 = vld [vmem:[%s5565_s8 + $0x2468] sm:$0xff] }
 0x159   : > { %859 = vst [vmem:[%s5570_s9 + $0xa30] sm:$0xff] %v858_v6  ;;  %v986_v6 = vld [vmem:[%s5565_s8 + $0x2470] sm:$0xff] }
 0x15a   : > { %861 = vst [vmem:[%s5570_s9 + $0xa38] sm:$0xff] %v860_v7  ;;  %v988_v7 = vld [vmem:[%s5565_s8 + $0x2478] sm:$0xff] }
 0x15b   : > { %863 = vst [vmem:[%s5570_s9 + $0xa40] sm:$0xff] %v862_v8  ;;  %v990_v8 = vld [vmem:[%s5565_s8 + $0x24c0] sm:$0xff] }
 0x15c   : > { %865 = vst [vmem:[%s5570_s9 + $0xa48] sm:$0xff] %v864_v9  ;;  %v992_v9 = vld [vmem:[%s5565_s8 + $0x24c8] sm:$0xff] }
 0x15d   : > { %867 = vst [vmem:[%s5570_s9 + $0xa50] sm:$0xff] %v866_v10  ;;  %v994_v10 = vld [vmem:[%s5565_s8 + $0x24d0] sm:$0xff] }
 0x15e   : > { %869 = vst [vmem:[%s5570_s9 + $0xa58] sm:$0xff] %v868_v11  ;;  %v996_v11 = vld [vmem:[%s5565_s8 + $0x24d8] sm:$0xff] }
 0x15f   : > { %871 = vst [vmem:[%s5570_s9 + $0xa60] sm:$0xff] %v870_v12  ;;  %v998_v12 = vld [vmem:[%s5565_s8 + $0x2520] sm:$0xff] }
 0x160   : > { %873 = vst [vmem:[%s5570_s9 + $0xa68] sm:$0xff] %v872_v13  ;;  %v1000_v13 = vld [vmem:[%s5565_s8 + $0x2528] sm:$0xff] }
 0x161   : > { %875 = vst [vmem:[%s5570_s9 + $0xa70] sm:$0xff] %v874_v14  ;;  %v1002_v14 = vld [vmem:[%s5565_s8 + $0x2530] sm:$0xff] }
 0x162   : > { %877 = vst [vmem:[%s5570_s9 + $0xa78] sm:$0xff] %v876_v15  ;;  %v1004_v15 = vld [vmem:[%s5565_s8 + $0x2538] sm:$0xff] }
 0x163   : > { %879 = vst [vmem:[%s5570_s9 + $0xa80] sm:$0xff] %v878_v16  ;;  %v1006_v16 = vld [vmem:[%s5565_s8 + $0x2580] sm:$0xff] }
 0x164   : > { %881 = vst [vmem:[%s5570_s9 + $0xa88] sm:$0xff] %v880_v17  ;;  %v1008_v17 = vld [vmem:[%s5565_s8 + $0x2588] sm:$0xff] }
 0x165   : > { %883 = vst [vmem:[%s5570_s9 + $0xa90] sm:$0xff] %v882_v18  ;;  %v1010_v18 = vld [vmem:[%s5565_s8 + $0x2590] sm:$0xff] }
 0x166   : > { %885 = vst [vmem:[%s5570_s9 + $0xa98] sm:$0xff] %v884_v19  ;;  %v1012_v19 = vld [vmem:[%s5565_s8 + $0x2598] sm:$0xff] }
 0x167   : > { %887 = vst [vmem:[%s5570_s9 + $0xaa0] sm:$0xff] %v886_v20  ;;  %v1014_v20 = vld [vmem:[%s5565_s8 + $0x25e0] sm:$0xff] }
 0x168   : > { %889 = vst [vmem:[%s5570_s9 + $0xaa8] sm:$0xff] %v888_v21  ;;  %v1016_v21 = vld [vmem:[%s5565_s8 + $0x25e8] sm:$0xff] }
 0x169   : > { %891 = vst [vmem:[%s5570_s9 + $0xab0] sm:$0xff] %v890_v22  ;;  %v1018_v22 = vld [vmem:[%s5565_s8 + $0x25f0] sm:$0xff] }
 0x16a   : > { %893 = vst [vmem:[%s5570_s9 + $0xab8] sm:$0xff] %v892_v23  ;;  %v1020_v23 = vld [vmem:[%s5565_s8 + $0x25f8] sm:$0xff] }
 0x16b   : > { %895 = vst [vmem:[%s5570_s9 + $0xac0] sm:$0xff] %v894_v24  ;;  %v1022_v24 = vld [vmem:[%s5565_s8 + $0x2640] sm:$0xff] }
 0x16c   : > { %897 = vst [vmem:[%s5570_s9 + $0xac8] sm:$0xff] %v896_v25  ;;  %v1024_v25 = vld [vmem:[%s5565_s8 + $0x2648] sm:$0xff] }
 0x16d   : > { %899 = vst [vmem:[%s5570_s9 + $0xad0] sm:$0xff] %v898_v26  ;;  %v1026_v26 = vld [vmem:[%s5565_s8 + $0x2650] sm:$0xff] }
 0x16e   : > { %901 = vst [vmem:[%s5570_s9 + $0xad8] sm:$0xff] %v900_v27  ;;  %v1028_v27 = vld [vmem:[%s5565_s8 + $0x2658] sm:$0xff] }
 0x16f   : > { %903 = vst [vmem:[%s5570_s9 + $0xae0] sm:$0xff] %v902_v28  ;;  %v1030_v28 = vld [vmem:[%s5565_s8 + $0x26a0] sm:$0xff] }
 0x170   : > { %905 = vst [vmem:[%s5570_s9 + $0xae8] sm:$0xff] %v904_v29  ;;  %v1032_v29 = vld [vmem:[%s5565_s8 + $0x26a8] sm:$0xff] }
 0x171   : > { %907 = vst [vmem:[%s5570_s9 + $0xaf0] sm:$0xff] %v906_v30  ;;  %v1034_v30 = vld [vmem:[%s5565_s8 + $0x26b0] sm:$0xff] }
 0x172   : > { %909 = vst [vmem:[%s5570_s9 + $0xaf8] sm:$0xff] %v908_v31  ;;  %v1036_v31 = vld [vmem:[%s5565_s8 + $0x26b8] sm:$0xff] }
 0x173   : > { %911 = vst [vmem:[%s5570_s9 + $0xb00] sm:$0xff] %v910_v32  ;;  %v1038_v32 = vld [vmem:[%s5565_s8 + $0x2700] sm:$0xff] }
 0x174   : > { %913 = vst [vmem:[%s5570_s9 + $0xb08] sm:$0xff] %v912_v33  ;;  %v1040_v33 = vld [vmem:[%s5565_s8 + $0x2708] sm:$0xff] }
 0x175   : > { %915 = vst [vmem:[%s5570_s9 + $0xb10] sm:$0xff] %v914_v34  ;;  %v1042_v34 = vld [vmem:[%s5565_s8 + $0x2710] sm:$0xff] }
 0x176   : > { %917 = vst [vmem:[%s5570_s9 + $0xb18] sm:$0xff] %v916_v35  ;;  %v1044_v35 = vld [vmem:[%s5565_s8 + $0x2718] sm:$0xff] }
 0x177   : > { %919 = vst [vmem:[%s5570_s9 + $0xb20] sm:$0xff] %v918_v36  ;;  %v1046_v36 = vld [vmem:[%s5565_s8 + $0x2760] sm:$0xff] }
 0x178   : > { %921 = vst [vmem:[%s5570_s9 + $0xb28] sm:$0xff] %v920_v37  ;;  %v1048_v37 = vld [vmem:[%s5565_s8 + $0x2768] sm:$0xff] }
 0x179   : > { %923 = vst [vmem:[%s5570_s9 + $0xb30] sm:$0xff] %v922_v38  ;;  %v1050_v38 = vld [vmem:[%s5565_s8 + $0x2770] sm:$0xff] }
 0x17a   : > { %925 = vst [vmem:[%s5570_s9 + $0xb38] sm:$0xff] %v924_v39  ;;  %v1052_v39 = vld [vmem:[%s5565_s8 + $0x2778] sm:$0xff] }
 0x17b   : > { %927 = vst [vmem:[%s5570_s9 + $0xb40] sm:$0xff] %v926_v40  ;;  %v1054_v40 = vld [vmem:[%s5565_s8 + $0x27c0] sm:$0xff] }
 0x17c   : > { %929 = vst [vmem:[%s5570_s9 + $0xb48] sm:$0xff] %v928_v41  ;;  %v1056_v41 = vld [vmem:[%s5565_s8 + $0x27c8] sm:$0xff] }
 0x17d   : > { %931 = vst [vmem:[%s5570_s9 + $0xb50] sm:$0xff] %v930_v42  ;;  %v1058_v42 = vld [vmem:[%s5565_s8 + $0x27d0] sm:$0xff] }
 0x17e   : > { %933 = vst [vmem:[%s5570_s9 + $0xb58] sm:$0xff] %v932_v43  ;;  %v1060_v43 = vld [vmem:[%s5565_s8 + $0x27d8] sm:$0xff] }
 0x17f   : > { %935 = vst [vmem:[%s5570_s9 + $0xb60] sm:$0xff] %v934_v44  ;;  %v1062_v44 = vld [vmem:[%s5565_s8 + $0x2820] sm:$0xff] }
 0x180   : > { %937 = vst [vmem:[%s5570_s9 + $0xb68] sm:$0xff] %v936_v45  ;;  %v1064_v45 = vld [vmem:[%s5565_s8 + $0x2828] sm:$0xff] }
 0x181   : > { %939 = vst [vmem:[%s5570_s9 + $0xb70] sm:$0xff] %v938_v46  ;;  %v1066_v46 = vld [vmem:[%s5565_s8 + $0x2830] sm:$0xff] }
 0x182   : > { %941 = vst [vmem:[%s5570_s9 + $0xb78] sm:$0xff] %v940_v47  ;;  %v1068_v47 = vld [vmem:[%s5565_s8 + $0x2838] sm:$0xff] }
 0x183   : > { %943 = vst [vmem:[%s5570_s9 + $0xb80] sm:$0xff] %v942_v48  ;;  %v1070_v48 = vld [vmem:[%s5565_s8 + $0x2880] sm:$0xff] }
 0x184   : > { %945 = vst [vmem:[%s5570_s9 + $0xb88] sm:$0xff] %v944_v49  ;;  %v1072_v49 = vld [vmem:[%s5565_s8 + $0x2888] sm:$0xff] }
 0x185   : > { %947 = vst [vmem:[%s5570_s9 + $0xb90] sm:$0xff] %v946_v50  ;;  %v1074_v50 = vld [vmem:[%s5565_s8 + $0x2890] sm:$0xff] }
 0x186   : > { %949 = vst [vmem:[%s5570_s9 + $0xb98] sm:$0xff] %v948_v51  ;;  %v1076_v51 = vld [vmem:[%s5565_s8 + $0x2898] sm:$0xff] }
 0x187   : > { %951 = vst [vmem:[%s5570_s9 + $0xba0] sm:$0xff] %v950_v52  ;;  %v1078_v52 = vld [vmem:[%s5565_s8 + $0x28e0] sm:$0xff] }
 0x188   : > { %953 = vst [vmem:[%s5570_s9 + $0xba8] sm:$0xff] %v952_v53  ;;  %v1080_v53 = vld [vmem:[%s5565_s8 + $0x28e8] sm:$0xff] }
 0x189   : > { %955 = vst [vmem:[%s5570_s9 + $0xbb0] sm:$0xff] %v954_v54  ;;  %v1082_v54 = vld [vmem:[%s5565_s8 + $0x28f0] sm:$0xff] }
 0x18a   : > { %957 = vst [vmem:[%s5570_s9 + $0xbb8] sm:$0xff] %v956_v55  ;;  %v1084_v55 = vld [vmem:[%s5565_s8 + $0x28f8] sm:$0xff] }
 0x18b   : > { %959 = vst [vmem:[%s5570_s9 + $0xbc0] sm:$0xff] %v958_v56  ;;  %v1086_v56 = vld [vmem:[%s5565_s8 + $0x2940] sm:$0xff] }
 0x18c   : > { %961 = vst [vmem:[%s5570_s9 + $0xbc8] sm:$0xff] %v960_v57  ;;  %v1088_v57 = vld [vmem:[%s5565_s8 + $0x2948] sm:$0xff] }
 0x18d   : > { %963 = vst [vmem:[%s5570_s9 + $0xbd0] sm:$0xff] %v962_v58  ;;  %v1090_v58 = vld [vmem:[%s5565_s8 + $0x2950] sm:$0xff] }
 0x18e   : > { %965 = vst [vmem:[%s5570_s9 + $0xbd8] sm:$0xff] %v964_v59  ;;  %v1092_v59 = vld [vmem:[%s5565_s8 + $0x2958] sm:$0xff] }
 0x18f   : > { %967 = vst [vmem:[%s5570_s9 + $0xbe0] sm:$0xff] %v966_v60  ;;  %v1094_v60 = vld [vmem:[%s5565_s8 + $0x29a0] sm:$0xff] }
 0x190   : > { %969 = vst [vmem:[%s5570_s9 + $0xbe8] sm:$0xff] %v968_v61  ;;  %v1096_v61 = vld [vmem:[%s5565_s8 + $0x29a8] sm:$0xff] }
 0x191   : > { %971 = vst [vmem:[%s5570_s9 + $0xbf0] sm:$0xff] %v970_v62  ;;  %v1098_v62 = vld [vmem:[%s5565_s8 + $0x29b0] sm:$0xff] }
 0x192   : > { %973 = vst [vmem:[%s5570_s9 + $0xbf8] sm:$0xff] %v972_v63  ;;  %v1100_v63 = vld [vmem:[%s5565_s8 + $0x29b8] sm:$0xff] }
 0x193   : > { %975 = vst [vmem:[%s5570_s9 + $0xc00] sm:$0xff] %v974_v0  ;;  %v1102_v0 = vld [vmem:[%s5565_s8 + $0x2a00] sm:$0xff] }
 0x194   : > { %977 = vst [vmem:[%s5570_s9 + $0xc08] sm:$0xff] %v976_v1  ;;  %v1104_v1 = vld [vmem:[%s5565_s8 + $0x2a08] sm:$0xff] }
 0x195   : > { %979 = vst [vmem:[%s5570_s9 + $0xc10] sm:$0xff] %v978_v2  ;;  %v1106_v2 = vld [vmem:[%s5565_s8 + $0x2a10] sm:$0xff] }
 0x196   : > { %981 = vst [vmem:[%s5570_s9 + $0xc18] sm:$0xff] %v980_v3  ;;  %v1108_v3 = vld [vmem:[%s5565_s8 + $0x2a18] sm:$0xff] }
 0x197   : > { %983 = vst [vmem:[%s5570_s9 + $0xc20] sm:$0xff] %v982_v4  ;;  %v1110_v4 = vld [vmem:[%s5565_s8 + $0x2a60] sm:$0xff] }
 0x198   : > { %985 = vst [vmem:[%s5570_s9 + $0xc28] sm:$0xff] %v984_v5  ;;  %v1112_v5 = vld [vmem:[%s5565_s8 + $0x2a68] sm:$0xff] }
 0x199   : > { %987 = vst [vmem:[%s5570_s9 + $0xc30] sm:$0xff] %v986_v6  ;;  %v1114_v6 = vld [vmem:[%s5565_s8 + $0x2a70] sm:$0xff] }
 0x19a   : > { %989 = vst [vmem:[%s5570_s9 + $0xc38] sm:$0xff] %v988_v7  ;;  %v1116_v7 = vld [vmem:[%s5565_s8 + $0x2a78] sm:$0xff] }
 0x19b   : > { %991 = vst [vmem:[%s5570_s9 + $0xc40] sm:$0xff] %v990_v8  ;;  %v1118_v8 = vld [vmem:[%s5565_s8 + $0x2ac0] sm:$0xff] }
 0x19c   : > { %993 = vst [vmem:[%s5570_s9 + $0xc48] sm:$0xff] %v992_v9  ;;  %v1120_v9 = vld [vmem:[%s5565_s8 + $0x2ac8] sm:$0xff] }
 0x19d   : > { %995 = vst [vmem:[%s5570_s9 + $0xc50] sm:$0xff] %v994_v10  ;;  %v1122_v10 = vld [vmem:[%s5565_s8 + $0x2ad0] sm:$0xff] }
 0x19e   : > { %997 = vst [vmem:[%s5570_s9 + $0xc58] sm:$0xff] %v996_v11  ;;  %v1124_v11 = vld [vmem:[%s5565_s8 + $0x2ad8] sm:$0xff] }
 0x19f   : > { %999 = vst [vmem:[%s5570_s9 + $0xc60] sm:$0xff] %v998_v12  ;;  %v1126_v12 = vld [vmem:[%s5565_s8 + $0x2b20] sm:$0xff] }
 0x1a0   : > { %1001 = vst [vmem:[%s5570_s9 + $0xc68] sm:$0xff] %v1000_v13  ;;  %v1128_v13 = vld [vmem:[%s5565_s8 + $0x2b28] sm:$0xff] }
 0x1a1   : > { %1003 = vst [vmem:[%s5570_s9 + $0xc70] sm:$0xff] %v1002_v14  ;;  %v1130_v14 = vld [vmem:[%s5565_s8 + $0x2b30] sm:$0xff] }
 0x1a2   : > { %1005 = vst [vmem:[%s5570_s9 + $0xc78] sm:$0xff] %v1004_v15  ;;  %v1132_v15 = vld [vmem:[%s5565_s8 + $0x2b38] sm:$0xff] }
 0x1a3   : > { %1007 = vst [vmem:[%s5570_s9 + $0xc80] sm:$0xff] %v1006_v16  ;;  %v1134_v16 = vld [vmem:[%s5565_s8 + $0x2b80] sm:$0xff] }
 0x1a4   : > { %1009 = vst [vmem:[%s5570_s9 + $0xc88] sm:$0xff] %v1008_v17  ;;  %v1136_v17 = vld [vmem:[%s5565_s8 + $0x2b88] sm:$0xff] }
 0x1a5   : > { %1011 = vst [vmem:[%s5570_s9 + $0xc90] sm:$0xff] %v1010_v18  ;;  %v1138_v18 = vld [vmem:[%s5565_s8 + $0x2b90] sm:$0xff] }
 0x1a6   : > { %1013 = vst [vmem:[%s5570_s9 + $0xc98] sm:$0xff] %v1012_v19  ;;  %v1140_v19 = vld [vmem:[%s5565_s8 + $0x2b98] sm:$0xff] }
 0x1a7   : > { %1015 = vst [vmem:[%s5570_s9 + $0xca0] sm:$0xff] %v1014_v20  ;;  %v1142_v20 = vld [vmem:[%s5565_s8 + $0x2be0] sm:$0xff] }
 0x1a8   : > { %1017 = vst [vmem:[%s5570_s9 + $0xca8] sm:$0xff] %v1016_v21  ;;  %v1144_v21 = vld [vmem:[%s5565_s8 + $0x2be8] sm:$0xff] }
 0x1a9   : > { %1019 = vst [vmem:[%s5570_s9 + $0xcb0] sm:$0xff] %v1018_v22  ;;  %v1146_v22 = vld [vmem:[%s5565_s8 + $0x2bf0] sm:$0xff] }
 0x1aa   : > { %1021 = vst [vmem:[%s5570_s9 + $0xcb8] sm:$0xff] %v1020_v23  ;;  %v1148_v23 = vld [vmem:[%s5565_s8 + $0x2bf8] sm:$0xff] }
 0x1ab   : > { %1023 = vst [vmem:[%s5570_s9 + $0xcc0] sm:$0xff] %v1022_v24  ;;  %v1150_v24 = vld [vmem:[%s5565_s8 + $0x2c40] sm:$0xff] }
 0x1ac   : > { %1025 = vst [vmem:[%s5570_s9 + $0xcc8] sm:$0xff] %v1024_v25  ;;  %v1152_v25 = vld [vmem:[%s5565_s8 + $0x2c48] sm:$0xff] }
 0x1ad   : > { %1027 = vst [vmem:[%s5570_s9 + $0xcd0] sm:$0xff] %v1026_v26  ;;  %v1154_v26 = vld [vmem:[%s5565_s8 + $0x2c50] sm:$0xff] }
 0x1ae   : > { %1029 = vst [vmem:[%s5570_s9 + $0xcd8] sm:$0xff] %v1028_v27  ;;  %v1156_v27 = vld [vmem:[%s5565_s8 + $0x2c58] sm:$0xff] }
 0x1af   : > { %1031 = vst [vmem:[%s5570_s9 + $0xce0] sm:$0xff] %v1030_v28  ;;  %v1158_v28 = vld [vmem:[%s5565_s8 + $0x2ca0] sm:$0xff] }
 0x1b0   : > { %1033 = vst [vmem:[%s5570_s9 + $0xce8] sm:$0xff] %v1032_v29  ;;  %v1160_v29 = vld [vmem:[%s5565_s8 + $0x2ca8] sm:$0xff] }
 0x1b1   : > { %1035 = vst [vmem:[%s5570_s9 + $0xcf0] sm:$0xff] %v1034_v30  ;;  %v1162_v30 = vld [vmem:[%s5565_s8 + $0x2cb0] sm:$0xff] }
 0x1b2   : > { %1037 = vst [vmem:[%s5570_s9 + $0xcf8] sm:$0xff] %v1036_v31  ;;  %v1164_v31 = vld [vmem:[%s5565_s8 + $0x2cb8] sm:$0xff] }
 0x1b3   : > { %1039 = vst [vmem:[%s5570_s9 + $0xd00] sm:$0xff] %v1038_v32  ;;  %v1166_v32 = vld [vmem:[%s5565_s8 + $0x2d00] sm:$0xff] }
 0x1b4   : > { %1041 = vst [vmem:[%s5570_s9 + $0xd08] sm:$0xff] %v1040_v33  ;;  %v1168_v33 = vld [vmem:[%s5565_s8 + $0x2d08] sm:$0xff] }
 0x1b5   : > { %1043 = vst [vmem:[%s5570_s9 + $0xd10] sm:$0xff] %v1042_v34  ;;  %v1170_v34 = vld [vmem:[%s5565_s8 + $0x2d10] sm:$0xff] }
 0x1b6   : > { %1045 = vst [vmem:[%s5570_s9 + $0xd18] sm:$0xff] %v1044_v35  ;;  %v1172_v35 = vld [vmem:[%s5565_s8 + $0x2d18] sm:$0xff] }
 0x1b7   : > { %1047 = vst [vmem:[%s5570_s9 + $0xd20] sm:$0xff] %v1046_v36  ;;  %v1174_v36 = vld [vmem:[%s5565_s8 + $0x2d60] sm:$0xff] }
 0x1b8   : > { %1049 = vst [vmem:[%s5570_s9 + $0xd28] sm:$0xff] %v1048_v37  ;;  %v1176_v37 = vld [vmem:[%s5565_s8 + $0x2d68] sm:$0xff] }
 0x1b9   : > { %1051 = vst [vmem:[%s5570_s9 + $0xd30] sm:$0xff] %v1050_v38  ;;  %v1178_v38 = vld [vmem:[%s5565_s8 + $0x2d70] sm:$0xff] }
 0x1ba   : > { %1053 = vst [vmem:[%s5570_s9 + $0xd38] sm:$0xff] %v1052_v39  ;;  %v1180_v39 = vld [vmem:[%s5565_s8 + $0x2d78] sm:$0xff] }
 0x1bb   : > { %1055 = vst [vmem:[%s5570_s9 + $0xd40] sm:$0xff] %v1054_v40  ;;  %v1182_v40 = vld [vmem:[%s5565_s8 + $0x2dc0] sm:$0xff] }
 0x1bc   : > { %1057 = vst [vmem:[%s5570_s9 + $0xd48] sm:$0xff] %v1056_v41  ;;  %v1184_v41 = vld [vmem:[%s5565_s8 + $0x2dc8] sm:$0xff] }
 0x1bd   : > { %1059 = vst [vmem:[%s5570_s9 + $0xd50] sm:$0xff] %v1058_v42  ;;  %v1186_v42 = vld [vmem:[%s5565_s8 + $0x2dd0] sm:$0xff] }
 0x1be   : > { %1061 = vst [vmem:[%s5570_s9 + $0xd58] sm:$0xff] %v1060_v43  ;;  %v1188_v43 = vld [vmem:[%s5565_s8 + $0x2dd8] sm:$0xff] }
 0x1bf   : > { %1063 = vst [vmem:[%s5570_s9 + $0xd60] sm:$0xff] %v1062_v44  ;;  %v1190_v44 = vld [vmem:[%s5565_s8 + $0x2e20] sm:$0xff] }
 0x1c0   : > { %1065 = vst [vmem:[%s5570_s9 + $0xd68] sm:$0xff] %v1064_v45  ;;  %v1192_v45 = vld [vmem:[%s5565_s8 + $0x2e28] sm:$0xff] }
 0x1c1   : > { %1067 = vst [vmem:[%s5570_s9 + $0xd70] sm:$0xff] %v1066_v46  ;;  %v1194_v46 = vld [vmem:[%s5565_s8 + $0x2e30] sm:$0xff] }
 0x1c2   : > { %1069 = vst [vmem:[%s5570_s9 + $0xd78] sm:$0xff] %v1068_v47  ;;  %v1196_v47 = vld [vmem:[%s5565_s8 + $0x2e38] sm:$0xff] }
 0x1c3   : > { %1071 = vst [vmem:[%s5570_s9 + $0xd80] sm:$0xff] %v1070_v48  ;;  %v1198_v48 = vld [vmem:[%s5565_s8 + $0x2e80] sm:$0xff] }
 0x1c4   : > { %1073 = vst [vmem:[%s5570_s9 + $0xd88] sm:$0xff] %v1072_v49  ;;  %v1200_v49 = vld [vmem:[%s5565_s8 + $0x2e88] sm:$0xff] }
 0x1c5   : > { %1075 = vst [vmem:[%s5570_s9 + $0xd90] sm:$0xff] %v1074_v50  ;;  %v1202_v50 = vld [vmem:[%s5565_s8 + $0x2e90] sm:$0xff] }
 0x1c6   : > { %1077 = vst [vmem:[%s5570_s9 + $0xd98] sm:$0xff] %v1076_v51  ;;  %v1204_v51 = vld [vmem:[%s5565_s8 + $0x2e98] sm:$0xff] }
 0x1c7   : > { %1079 = vst [vmem:[%s5570_s9 + $0xda0] sm:$0xff] %v1078_v52  ;;  %v1206_v52 = vld [vmem:[%s5565_s8 + $0x2ee0] sm:$0xff] }
 0x1c8   : > { %1081 = vst [vmem:[%s5570_s9 + $0xda8] sm:$0xff] %v1080_v53  ;;  %v1208_v53 = vld [vmem:[%s5565_s8 + $0x2ee8] sm:$0xff] }
 0x1c9   : > { %1083 = vst [vmem:[%s5570_s9 + $0xdb0] sm:$0xff] %v1082_v54  ;;  %v1210_v54 = vld [vmem:[%s5565_s8 + $0x2ef0] sm:$0xff] }
 0x1ca   : > { %1085 = vst [vmem:[%s5570_s9 + $0xdb8] sm:$0xff] %v1084_v55  ;;  %v1212_v55 = vld [vmem:[%s5565_s8 + $0x2ef8] sm:$0xff] }
 0x1cb   : > { %1087 = vst [vmem:[%s5570_s9 + $0xdc0] sm:$0xff] %v1086_v56  ;;  %v1214_v56 = vld [vmem:[%s5565_s8 + $0x2f40] sm:$0xff] }
 0x1cc   : > { %1089 = vst [vmem:[%s5570_s9 + $0xdc8] sm:$0xff] %v1088_v57  ;;  %v1216_v57 = vld [vmem:[%s5565_s8 + $0x2f48] sm:$0xff] }
 0x1cd   : > { %1091 = vst [vmem:[%s5570_s9 + $0xdd0] sm:$0xff] %v1090_v58  ;;  %v1218_v58 = vld [vmem:[%s5565_s8 + $0x2f50] sm:$0xff] }
 0x1ce   : > { %1093 = vst [vmem:[%s5570_s9 + $0xdd8] sm:$0xff] %v1092_v59  ;;  %v1220_v59 = vld [vmem:[%s5565_s8 + $0x2f58] sm:$0xff] }
 0x1cf   : > { %1095 = vst [vmem:[%s5570_s9 + $0xde0] sm:$0xff] %v1094_v60  ;;  %v1222_v60 = vld [vmem:[%s5565_s8 + $0x2fa0] sm:$0xff] }
 0x1d0   : > { %1097 = vst [vmem:[%s5570_s9 + $0xde8] sm:$0xff] %v1096_v61  ;;  %v1224_v61 = vld [vmem:[%s5565_s8 + $0x2fa8] sm:$0xff] }
 0x1d1   : > { %1099 = vst [vmem:[%s5570_s9 + $0xdf0] sm:$0xff] %v1098_v62  ;;  %v1226_v62 = vld [vmem:[%s5565_s8 + $0x2fb0] sm:$0xff] }
 0x1d2   : > { %1101 = vst [vmem:[%s5570_s9 + $0xdf8] sm:$0xff] %v1100_v63  ;;  %v1228_v63 = vld [vmem:[%s5565_s8 + $0x2fb8] sm:$0xff] }
 0x1d3   : > { %1103 = vst [vmem:[%s5570_s9 + $0xe00] sm:$0xff] %v1102_v0  ;;  %v1230_v0 = vld [vmem:[%s5565_s8 + $0x3000] sm:$0xff] }
 0x1d4   : > { %1105 = vst [vmem:[%s5570_s9 + $0xe08] sm:$0xff] %v1104_v1  ;;  %v1232_v1 = vld [vmem:[%s5565_s8 + $0x3008] sm:$0xff] }
 0x1d5   : > { %1107 = vst [vmem:[%s5570_s9 + $0xe10] sm:$0xff] %v1106_v2  ;;  %v1234_v2 = vld [vmem:[%s5565_s8 + $0x3010] sm:$0xff] }
 0x1d6   : > { %1109 = vst [vmem:[%s5570_s9 + $0xe18] sm:$0xff] %v1108_v3  ;;  %v1236_v3 = vld [vmem:[%s5565_s8 + $0x3018] sm:$0xff] }
 0x1d7   : > { %1111 = vst [vmem:[%s5570_s9 + $0xe20] sm:$0xff] %v1110_v4  ;;  %v1238_v4 = vld [vmem:[%s5565_s8 + $0x3060] sm:$0xff] }
 0x1d8   : > { %1113 = vst [vmem:[%s5570_s9 + $0xe28] sm:$0xff] %v1112_v5  ;;  %v1240_v5 = vld [vmem:[%s5565_s8 + $0x3068] sm:$0xff] }
 0x1d9   : > { %1115 = vst [vmem:[%s5570_s9 + $0xe30] sm:$0xff] %v1114_v6  ;;  %v1242_v6 = vld [vmem:[%s5565_s8 + $0x3070] sm:$0xff] }
 0x1da   : > { %1117 = vst [vmem:[%s5570_s9 + $0xe38] sm:$0xff] %v1116_v7  ;;  %v1244_v7 = vld [vmem:[%s5565_s8 + $0x3078] sm:$0xff] }
 0x1db   : > { %1119 = vst [vmem:[%s5570_s9 + $0xe40] sm:$0xff] %v1118_v8  ;;  %v1246_v8 = vld [vmem:[%s5565_s8 + $0x30c0] sm:$0xff] }
 0x1dc   : > { %1121 = vst [vmem:[%s5570_s9 + $0xe48] sm:$0xff] %v1120_v9  ;;  %v1248_v9 = vld [vmem:[%s5565_s8 + $0x30c8] sm:$0xff] }
 0x1dd   : > { %1123 = vst [vmem:[%s5570_s9 + $0xe50] sm:$0xff] %v1122_v10  ;;  %v1250_v10 = vld [vmem:[%s5565_s8 + $0x30d0] sm:$0xff] }
 0x1de   : > { %1125 = vst [vmem:[%s5570_s9 + $0xe58] sm:$0xff] %v1124_v11  ;;  %v1252_v11 = vld [vmem:[%s5565_s8 + $0x30d8] sm:$0xff] }
 0x1df   : > { %1127 = vst [vmem:[%s5570_s9 + $0xe60] sm:$0xff] %v1126_v12  ;;  %v1254_v12 = vld [vmem:[%s5565_s8 + $0x3120] sm:$0xff] }
 0x1e0   : > { %1129 = vst [vmem:[%s5570_s9 + $0xe68] sm:$0xff] %v1128_v13  ;;  %v1256_v13 = vld [vmem:[%s5565_s8 + $0x3128] sm:$0xff] }
 0x1e1   : > { %1131 = vst [vmem:[%s5570_s9 + $0xe70] sm:$0xff] %v1130_v14  ;;  %v1258_v14 = vld [vmem:[%s5565_s8 + $0x3130] sm:$0xff] }
 0x1e2   : > { %1133 = vst [vmem:[%s5570_s9 + $0xe78] sm:$0xff] %v1132_v15  ;;  %v1260_v15 = vld [vmem:[%s5565_s8 + $0x3138] sm:$0xff] }
 0x1e3   : > { %1135 = vst [vmem:[%s5570_s9 + $0xe80] sm:$0xff] %v1134_v16  ;;  %v1262_v16 = vld [vmem:[%s5565_s8 + $0x3180] sm:$0xff] }
 0x1e4   : > { %1137 = vst [vmem:[%s5570_s9 + $0xe88] sm:$0xff] %v1136_v17  ;;  %v1264_v17 = vld [vmem:[%s5565_s8 + $0x3188] sm:$0xff] }
 0x1e5   : > { %1139 = vst [vmem:[%s5570_s9 + $0xe90] sm:$0xff] %v1138_v18  ;;  %v1266_v18 = vld [vmem:[%s5565_s8 + $0x3190] sm:$0xff] }
 0x1e6   : > { %1141 = vst [vmem:[%s5570_s9 + $0xe98] sm:$0xff] %v1140_v19  ;;  %v1268_v19 = vld [vmem:[%s5565_s8 + $0x3198] sm:$0xff] }
 0x1e7   : > { %1143 = vst [vmem:[%s5570_s9 + $0xea0] sm:$0xff] %v1142_v20  ;;  %v1270_v20 = vld [vmem:[%s5565_s8 + $0x31e0] sm:$0xff] }
 0x1e8   : > { %1145 = vst [vmem:[%s5570_s9 + $0xea8] sm:$0xff] %v1144_v21  ;;  %v1272_v21 = vld [vmem:[%s5565_s8 + $0x31e8] sm:$0xff] }
 0x1e9   : > { %1147 = vst [vmem:[%s5570_s9 + $0xeb0] sm:$0xff] %v1146_v22  ;;  %v1274_v22 = vld [vmem:[%s5565_s8 + $0x31f0] sm:$0xff] }
 0x1ea   : > { %1149 = vst [vmem:[%s5570_s9 + $0xeb8] sm:$0xff] %v1148_v23  ;;  %v1276_v23 = vld [vmem:[%s5565_s8 + $0x31f8] sm:$0xff] }
 0x1eb   : > { %1151 = vst [vmem:[%s5570_s9 + $0xec0] sm:$0xff] %v1150_v24  ;;  %v1278_v24 = vld [vmem:[%s5565_s8 + $0x3240] sm:$0xff] }
 0x1ec   : > { %1153 = vst [vmem:[%s5570_s9 + $0xec8] sm:$0xff] %v1152_v25  ;;  %v1280_v25 = vld [vmem:[%s5565_s8 + $0x3248] sm:$0xff] }
 0x1ed   : > { %1155 = vst [vmem:[%s5570_s9 + $0xed0] sm:$0xff] %v1154_v26  ;;  %v1282_v26 = vld [vmem:[%s5565_s8 + $0x3250] sm:$0xff] }
 0x1ee   : > { %1157 = vst [vmem:[%s5570_s9 + $0xed8] sm:$0xff] %v1156_v27  ;;  %v1284_v27 = vld [vmem:[%s5565_s8 + $0x3258] sm:$0xff] }
 0x1ef   : > { %1159 = vst [vmem:[%s5570_s9 + $0xee0] sm:$0xff] %v1158_v28  ;;  %v1286_v28 = vld [vmem:[%s5565_s8 + $0x32a0] sm:$0xff] }
 0x1f0   : > { %1161 = vst [vmem:[%s5570_s9 + $0xee8] sm:$0xff] %v1160_v29  ;;  %v1288_v29 = vld [vmem:[%s5565_s8 + $0x32a8] sm:$0xff] }
 0x1f1   : > { %1163 = vst [vmem:[%s5570_s9 + $0xef0] sm:$0xff] %v1162_v30  ;;  %v1290_v30 = vld [vmem:[%s5565_s8 + $0x32b0] sm:$0xff] }
 0x1f2   : > { %1165 = vst [vmem:[%s5570_s9 + $0xef8] sm:$0xff] %v1164_v31  ;;  %v1292_v31 = vld [vmem:[%s5565_s8 + $0x32b8] sm:$0xff] }
 0x1f3   : > { %1167 = vst [vmem:[%s5570_s9 + $0xf00] sm:$0xff] %v1166_v32  ;;  %v1294_v32 = vld [vmem:[%s5565_s8 + $0x3300] sm:$0xff] }
 0x1f4   : > { %1169 = vst [vmem:[%s5570_s9 + $0xf08] sm:$0xff] %v1168_v33  ;;  %v1296_v33 = vld [vmem:[%s5565_s8 + $0x3308] sm:$0xff] }
 0x1f5   : > { %1171 = vst [vmem:[%s5570_s9 + $0xf10] sm:$0xff] %v1170_v34  ;;  %v1298_v34 = vld [vmem:[%s5565_s8 + $0x3310] sm:$0xff] }
 0x1f6   : > { %1173 = vst [vmem:[%s5570_s9 + $0xf18] sm:$0xff] %v1172_v35  ;;  %v1300_v35 = vld [vmem:[%s5565_s8 + $0x3318] sm:$0xff] }
 0x1f7   : > { %1175 = vst [vmem:[%s5570_s9 + $0xf20] sm:$0xff] %v1174_v36  ;;  %v1302_v36 = vld [vmem:[%s5565_s8 + $0x3360] sm:$0xff] }
 0x1f8   : > { %1177 = vst [vmem:[%s5570_s9 + $0xf28] sm:$0xff] %v1176_v37  ;;  %v1304_v37 = vld [vmem:[%s5565_s8 + $0x3368] sm:$0xff] }
 0x1f9   : > { %1179 = vst [vmem:[%s5570_s9 + $0xf30] sm:$0xff] %v1178_v38  ;;  %v1306_v38 = vld [vmem:[%s5565_s8 + $0x3370] sm:$0xff] }
 0x1fa   : > { %1181 = vst [vmem:[%s5570_s9 + $0xf38] sm:$0xff] %v1180_v39  ;;  %v1308_v39 = vld [vmem:[%s5565_s8 + $0x3378] sm:$0xff] }
 0x1fb   : > { %1183 = vst [vmem:[%s5570_s9 + $0xf40] sm:$0xff] %v1182_v40  ;;  %v1310_v40 = vld [vmem:[%s5565_s8 + $0x33c0] sm:$0xff] }
 0x1fc   : > { %1185 = vst [vmem:[%s5570_s9 + $0xf48] sm:$0xff] %v1184_v41  ;;  %v1312_v41 = vld [vmem:[%s5565_s8 + $0x33c8] sm:$0xff] }
 0x1fd   : > { %1187 = vst [vmem:[%s5570_s9 + $0xf50] sm:$0xff] %v1186_v42  ;;  %v1314_v42 = vld [vmem:[%s5565_s8 + $0x33d0] sm:$0xff] }
 0x1fe   : > { %1189 = vst [vmem:[%s5570_s9 + $0xf58] sm:$0xff] %v1188_v43  ;;  %v1316_v43 = vld [vmem:[%s5565_s8 + $0x33d8] sm:$0xff] }
 0x1ff   : > { %1191 = vst [vmem:[%s5570_s9 + $0xf60] sm:$0xff] %v1190_v44  ;;  %v1318_v44 = vld [vmem:[%s5565_s8 + $0x3420] sm:$0xff] }
 0x200   : > { %1193 = vst [vmem:[%s5570_s9 + $0xf68] sm:$0xff] %v1192_v45  ;;  %v1320_v45 = vld [vmem:[%s5565_s8 + $0x3428] sm:$0xff] }
 0x201   : > { %1195 = vst [vmem:[%s5570_s9 + $0xf70] sm:$0xff] %v1194_v46  ;;  %v1322_v46 = vld [vmem:[%s5565_s8 + $0x3430] sm:$0xff] }
 0x202   : > { %1197 = vst [vmem:[%s5570_s9 + $0xf78] sm:$0xff] %v1196_v47  ;;  %v1324_v47 = vld [vmem:[%s5565_s8 + $0x3438] sm:$0xff] }
 0x203   : > { %1199 = vst [vmem:[%s5570_s9 + $0xf80] sm:$0xff] %v1198_v48  ;;  %v1326_v48 = vld [vmem:[%s5565_s8 + $0x3480] sm:$0xff] }
 0x204   : > { %1201 = vst [vmem:[%s5570_s9 + $0xf88] sm:$0xff] %v1200_v49  ;;  %v1328_v49 = vld [vmem:[%s5565_s8 + $0x3488] sm:$0xff] }
 0x205   : > { %1203 = vst [vmem:[%s5570_s9 + $0xf90] sm:$0xff] %v1202_v50  ;;  %v1330_v50 = vld [vmem:[%s5565_s8 + $0x3490] sm:$0xff] }
 0x206   : > { %1205 = vst [vmem:[%s5570_s9 + $0xf98] sm:$0xff] %v1204_v51  ;;  %v1332_v51 = vld [vmem:[%s5565_s8 + $0x3498] sm:$0xff] }
 0x207   : > { %1207 = vst [vmem:[%s5570_s9 + $0xfa0] sm:$0xff] %v1206_v52  ;;  %v1334_v52 = vld [vmem:[%s5565_s8 + $0x34e0] sm:$0xff] }
 0x208   : > { %1209 = vst [vmem:[%s5570_s9 + $0xfa8] sm:$0xff] %v1208_v53  ;;  %v1336_v53 = vld [vmem:[%s5565_s8 + $0x34e8] sm:$0xff] }
 0x209   : > { %1211 = vst [vmem:[%s5570_s9 + $0xfb0] sm:$0xff] %v1210_v54  ;;  %v1338_v54 = vld [vmem:[%s5565_s8 + $0x34f0] sm:$0xff] }
 0x20a   : > { %1213 = vst [vmem:[%s5570_s9 + $0xfb8] sm:$0xff] %v1212_v55  ;;  %v1340_v55 = vld [vmem:[%s5565_s8 + $0x34f8] sm:$0xff] }
 0x20b   : > { %1215 = vst [vmem:[%s5570_s9 + $0xfc0] sm:$0xff] %v1214_v56  ;;  %v1342_v56 = vld [vmem:[%s5565_s8 + $0x3540] sm:$0xff] }
 0x20c   : > { %1217 = vst [vmem:[%s5570_s9 + $0xfc8] sm:$0xff] %v1216_v57  ;;  %v1344_v57 = vld [vmem:[%s5565_s8 + $0x3548] sm:$0xff] }
 0x20d   : > { %1219 = vst [vmem:[%s5570_s9 + $0xfd0] sm:$0xff] %v1218_v58  ;;  %v1346_v58 = vld [vmem:[%s5565_s8 + $0x3550] sm:$0xff] }
 0x20e   : > { %1221 = vst [vmem:[%s5570_s9 + $0xfd8] sm:$0xff] %v1220_v59  ;;  %v1348_v59 = vld [vmem:[%s5565_s8 + $0x3558] sm:$0xff] }
 0x20f   : > { %1223 = vst [vmem:[%s5570_s9 + $0xfe0] sm:$0xff] %v1222_v60  ;;  %v1350_v60 = vld [vmem:[%s5565_s8 + $0x35a0] sm:$0xff] }
 0x210   : > { %1225 = vst [vmem:[%s5570_s9 + $0xfe8] sm:$0xff] %v1224_v61  ;;  %v1352_v61 = vld [vmem:[%s5565_s8 + $0x35a8] sm:$0xff] }
 0x211   : > { %1227 = vst [vmem:[%s5570_s9 + $0xff0] sm:$0xff] %v1226_v62  ;;  %v1354_v62 = vld [vmem:[%s5565_s8 + $0x35b0] sm:$0xff] }
 0x212   : > { %1229 = vst [vmem:[%s5570_s9 + $0xff8] sm:$0xff] %v1228_v63  ;;  %v1356_v63 = vld [vmem:[%s5565_s8 + $0x35b8] sm:$0xff] }
 0x213   : > { %1231 = vst [vmem:[%s5570_s9 + $0x1000] sm:$0xff] %v1230_v0  ;;  %v1358_v0 = vld [vmem:[%s5565_s8 + $0x3600] sm:$0xff] }
 0x214   : > { %1233 = vst [vmem:[%s5570_s9 + $0x1008] sm:$0xff] %v1232_v1  ;;  %v1360_v1 = vld [vmem:[%s5565_s8 + $0x3608] sm:$0xff] }
 0x215   : > { %1235 = vst [vmem:[%s5570_s9 + $0x1010] sm:$0xff] %v1234_v2  ;;  %v1362_v2 = vld [vmem:[%s5565_s8 + $0x3610] sm:$0xff] }
 0x216   : > { %1237 = vst [vmem:[%s5570_s9 + $0x1018] sm:$0xff] %v1236_v3  ;;  %v1364_v3 = vld [vmem:[%s5565_s8 + $0x3618] sm:$0xff] }
 0x217   : > { %1239 = vst [vmem:[%s5570_s9 + $0x1020] sm:$0xff] %v1238_v4  ;;  %v1366_v4 = vld [vmem:[%s5565_s8 + $0x3660] sm:$0xff] }
 0x218   : > { %1241 = vst [vmem:[%s5570_s9 + $0x1028] sm:$0xff] %v1240_v5  ;;  %v1368_v5 = vld [vmem:[%s5565_s8 + $0x3668] sm:$0xff] }
 0x219   : > { %1243 = vst [vmem:[%s5570_s9 + $0x1030] sm:$0xff] %v1242_v6  ;;  %v1370_v6 = vld [vmem:[%s5565_s8 + $0x3670] sm:$0xff] }
 0x21a   : > { %1245 = vst [vmem:[%s5570_s9 + $0x1038] sm:$0xff] %v1244_v7  ;;  %v1372_v7 = vld [vmem:[%s5565_s8 + $0x3678] sm:$0xff] }
 0x21b   : > { %1247 = vst [vmem:[%s5570_s9 + $0x1040] sm:$0xff] %v1246_v8  ;;  %v1374_v8 = vld [vmem:[%s5565_s8 + $0x36c0] sm:$0xff] }
 0x21c   : > { %1249 = vst [vmem:[%s5570_s9 + $0x1048] sm:$0xff] %v1248_v9  ;;  %v1376_v9 = vld [vmem:[%s5565_s8 + $0x36c8] sm:$0xff] }
 0x21d   : > { %1251 = vst [vmem:[%s5570_s9 + $0x1050] sm:$0xff] %v1250_v10  ;;  %v1378_v10 = vld [vmem:[%s5565_s8 + $0x36d0] sm:$0xff] }
 0x21e   : > { %1253 = vst [vmem:[%s5570_s9 + $0x1058] sm:$0xff] %v1252_v11  ;;  %v1380_v11 = vld [vmem:[%s5565_s8 + $0x36d8] sm:$0xff] }
 0x21f   : > { %1255 = vst [vmem:[%s5570_s9 + $0x1060] sm:$0xff] %v1254_v12  ;;  %v1382_v12 = vld [vmem:[%s5565_s8 + $0x3720] sm:$0xff] }
 0x220   : > { %1257 = vst [vmem:[%s5570_s9 + $0x1068] sm:$0xff] %v1256_v13  ;;  %v1384_v13 = vld [vmem:[%s5565_s8 + $0x3728] sm:$0xff] }
 0x221   : > { %1259 = vst [vmem:[%s5570_s9 + $0x1070] sm:$0xff] %v1258_v14  ;;  %v1386_v14 = vld [vmem:[%s5565_s8 + $0x3730] sm:$0xff] }
 0x222   : > { %1261 = vst [vmem:[%s5570_s9 + $0x1078] sm:$0xff] %v1260_v15  ;;  %v1388_v15 = vld [vmem:[%s5565_s8 + $0x3738] sm:$0xff] }
 0x223   : > { %1263 = vst [vmem:[%s5570_s9 + $0x1080] sm:$0xff] %v1262_v16  ;;  %v1390_v16 = vld [vmem:[%s5565_s8 + $0x3780] sm:$0xff] }
 0x224   : > { %1265 = vst [vmem:[%s5570_s9 + $0x1088] sm:$0xff] %v1264_v17  ;;  %v1392_v17 = vld [vmem:[%s5565_s8 + $0x3788] sm:$0xff] }
 0x225   : > { %1267 = vst [vmem:[%s5570_s9 + $0x1090] sm:$0xff] %v1266_v18  ;;  %v1394_v18 = vld [vmem:[%s5565_s8 + $0x3790] sm:$0xff] }
 0x226   : > { %1269 = vst [vmem:[%s5570_s9 + $0x1098] sm:$0xff] %v1268_v19  ;;  %v1396_v19 = vld [vmem:[%s5565_s8 + $0x3798] sm:$0xff] }
 0x227   : > { %1271 = vst [vmem:[%s5570_s9 + $0x10a0] sm:$0xff] %v1270_v20  ;;  %v1398_v20 = vld [vmem:[%s5565_s8 + $0x37e0] sm:$0xff] }
 0x228   : > { %1273 = vst [vmem:[%s5570_s9 + $0x10a8] sm:$0xff] %v1272_v21  ;;  %v1400_v21 = vld [vmem:[%s5565_s8 + $0x37e8] sm:$0xff] }
 0x229   : > { %1275 = vst [vmem:[%s5570_s9 + $0x10b0] sm:$0xff] %v1274_v22  ;;  %v1402_v22 = vld [vmem:[%s5565_s8 + $0x37f0] sm:$0xff] }
 0x22a   : > { %1277 = vst [vmem:[%s5570_s9 + $0x10b8] sm:$0xff] %v1276_v23  ;;  %v1404_v23 = vld [vmem:[%s5565_s8 + $0x37f8] sm:$0xff] }
 0x22b   : > { %1279 = vst [vmem:[%s5570_s9 + $0x10c0] sm:$0xff] %v1278_v24  ;;  %v1406_v24 = vld [vmem:[%s5565_s8 + $0x3840] sm:$0xff] }
 0x22c   : > { %1281 = vst [vmem:[%s5570_s9 + $0x10c8] sm:$0xff] %v1280_v25  ;;  %v1408_v25 = vld [vmem:[%s5565_s8 + $0x3848] sm:$0xff] }
 0x22d   : > { %1283 = vst [vmem:[%s5570_s9 + $0x10d0] sm:$0xff] %v1282_v26  ;;  %v1410_v26 = vld [vmem:[%s5565_s8 + $0x3850] sm:$0xff] }
 0x22e   : > { %1285 = vst [vmem:[%s5570_s9 + $0x10d8] sm:$0xff] %v1284_v27  ;;  %v1412_v27 = vld [vmem:[%s5565_s8 + $0x3858] sm:$0xff] }
 0x22f   : > { %1287 = vst [vmem:[%s5570_s9 + $0x10e0] sm:$0xff] %v1286_v28  ;;  %v1414_v28 = vld [vmem:[%s5565_s8 + $0x38a0] sm:$0xff] }
 0x230   : > { %1289 = vst [vmem:[%s5570_s9 + $0x10e8] sm:$0xff] %v1288_v29  ;;  %v1416_v29 = vld [vmem:[%s5565_s8 + $0x38a8] sm:$0xff] }
 0x231   : > { %1291 = vst [vmem:[%s5570_s9 + $0x10f0] sm:$0xff] %v1290_v30  ;;  %v1418_v30 = vld [vmem:[%s5565_s8 + $0x38b0] sm:$0xff] }
 0x232   : > { %1293 = vst [vmem:[%s5570_s9 + $0x10f8] sm:$0xff] %v1292_v31  ;;  %v1420_v31 = vld [vmem:[%s5565_s8 + $0x38b8] sm:$0xff] }
 0x233   : > { %1295 = vst [vmem:[%s5570_s9 + $0x1100] sm:$0xff] %v1294_v32  ;;  %v1422_v32 = vld [vmem:[%s5565_s8 + $0x3900] sm:$0xff] }
 0x234   : > { %1297 = vst [vmem:[%s5570_s9 + $0x1108] sm:$0xff] %v1296_v33  ;;  %v1424_v33 = vld [vmem:[%s5565_s8 + $0x3908] sm:$0xff] }
 0x235   : > { %1299 = vst [vmem:[%s5570_s9 + $0x1110] sm:$0xff] %v1298_v34  ;;  %v1426_v34 = vld [vmem:[%s5565_s8 + $0x3910] sm:$0xff] }
 0x236   : > { %1301 = vst [vmem:[%s5570_s9 + $0x1118] sm:$0xff] %v1300_v35  ;;  %v1428_v35 = vld [vmem:[%s5565_s8 + $0x3918] sm:$0xff] }
 0x237   : > { %1303 = vst [vmem:[%s5570_s9 + $0x1120] sm:$0xff] %v1302_v36  ;;  %v1430_v36 = vld [vmem:[%s5565_s8 + $0x3960] sm:$0xff] }
 0x238   : > { %1305 = vst [vmem:[%s5570_s9 + $0x1128] sm:$0xff] %v1304_v37  ;;  %v1432_v37 = vld [vmem:[%s5565_s8 + $0x3968] sm:$0xff] }
 0x239   : > { %1307 = vst [vmem:[%s5570_s9 + $0x1130] sm:$0xff] %v1306_v38  ;;  %v1434_v38 = vld [vmem:[%s5565_s8 + $0x3970] sm:$0xff] }
 0x23a   : > { %1309 = vst [vmem:[%s5570_s9 + $0x1138] sm:$0xff] %v1308_v39  ;;  %v1436_v39 = vld [vmem:[%s5565_s8 + $0x3978] sm:$0xff] }
 0x23b   : > { %1311 = vst [vmem:[%s5570_s9 + $0x1140] sm:$0xff] %v1310_v40  ;;  %v1438_v40 = vld [vmem:[%s5565_s8 + $0x39c0] sm:$0xff] }
 0x23c   : > { %1313 = vst [vmem:[%s5570_s9 + $0x1148] sm:$0xff] %v1312_v41  ;;  %v1440_v41 = vld [vmem:[%s5565_s8 + $0x39c8] sm:$0xff] }
 0x23d   : > { %1315 = vst [vmem:[%s5570_s9 + $0x1150] sm:$0xff] %v1314_v42  ;;  %v1442_v42 = vld [vmem:[%s5565_s8 + $0x39d0] sm:$0xff] }
 0x23e   : > { %1317 = vst [vmem:[%s5570_s9 + $0x1158] sm:$0xff] %v1316_v43  ;;  %v1444_v43 = vld [vmem:[%s5565_s8 + $0x39d8] sm:$0xff] }
 0x23f   : > { %1319 = vst [vmem:[%s5570_s9 + $0x1160] sm:$0xff] %v1318_v44  ;;  %v1446_v44 = vld [vmem:[%s5565_s8 + $0x3a20] sm:$0xff] }
 0x240   : > { %1321 = vst [vmem:[%s5570_s9 + $0x1168] sm:$0xff] %v1320_v45  ;;  %v1448_v45 = vld [vmem:[%s5565_s8 + $0x3a28] sm:$0xff] }
 0x241   : > { %1323 = vst [vmem:[%s5570_s9 + $0x1170] sm:$0xff] %v1322_v46  ;;  %v1450_v46 = vld [vmem:[%s5565_s8 + $0x3a30] sm:$0xff] }
 0x242   : > { %1325 = vst [vmem:[%s5570_s9 + $0x1178] sm:$0xff] %v1324_v47  ;;  %v1452_v47 = vld [vmem:[%s5565_s8 + $0x3a38] sm:$0xff] }
 0x243   : > { %1327 = vst [vmem:[%s5570_s9 + $0x1180] sm:$0xff] %v1326_v48  ;;  %v1454_v48 = vld [vmem:[%s5565_s8 + $0x3a80] sm:$0xff] }
 0x244   : > { %1329 = vst [vmem:[%s5570_s9 + $0x1188] sm:$0xff] %v1328_v49  ;;  %v1456_v49 = vld [vmem:[%s5565_s8 + $0x3a88] sm:$0xff] }
 0x245   : > { %1331 = vst [vmem:[%s5570_s9 + $0x1190] sm:$0xff] %v1330_v50  ;;  %v1458_v50 = vld [vmem:[%s5565_s8 + $0x3a90] sm:$0xff] }
 0x246   : > { %1333 = vst [vmem:[%s5570_s9 + $0x1198] sm:$0xff] %v1332_v51  ;;  %v1460_v51 = vld [vmem:[%s5565_s8 + $0x3a98] sm:$0xff] }
 0x247   : > { %1335 = vst [vmem:[%s5570_s9 + $0x11a0] sm:$0xff] %v1334_v52  ;;  %v1462_v52 = vld [vmem:[%s5565_s8 + $0x3ae0] sm:$0xff] }
 0x248   : > { %1337 = vst [vmem:[%s5570_s9 + $0x11a8] sm:$0xff] %v1336_v53  ;;  %v1464_v53 = vld [vmem:[%s5565_s8 + $0x3ae8] sm:$0xff] }
 0x249   : > { %1339 = vst [vmem:[%s5570_s9 + $0x11b0] sm:$0xff] %v1338_v54  ;;  %v1466_v54 = vld [vmem:[%s5565_s8 + $0x3af0] sm:$0xff] }
 0x24a   : > { %1341 = vst [vmem:[%s5570_s9 + $0x11b8] sm:$0xff] %v1340_v55  ;;  %v1468_v55 = vld [vmem:[%s5565_s8 + $0x3af8] sm:$0xff] }
 0x24b   : > { %1343 = vst [vmem:[%s5570_s9 + $0x11c0] sm:$0xff] %v1342_v56  ;;  %v1470_v56 = vld [vmem:[%s5565_s8 + $0x3b40] sm:$0xff] }
 0x24c   : > { %1345 = vst [vmem:[%s5570_s9 + $0x11c8] sm:$0xff] %v1344_v57  ;;  %v1472_v57 = vld [vmem:[%s5565_s8 + $0x3b48] sm:$0xff] }
 0x24d   : > { %1347 = vst [vmem:[%s5570_s9 + $0x11d0] sm:$0xff] %v1346_v58  ;;  %v1474_v58 = vld [vmem:[%s5565_s8 + $0x3b50] sm:$0xff] }
 0x24e   : > { %1349 = vst [vmem:[%s5570_s9 + $0x11d8] sm:$0xff] %v1348_v59  ;;  %v1476_v59 = vld [vmem:[%s5565_s8 + $0x3b58] sm:$0xff] }
 0x24f   : > { %1351 = vst [vmem:[%s5570_s9 + $0x11e0] sm:$0xff] %v1350_v60  ;;  %v1478_v60 = vld [vmem:[%s5565_s8 + $0x3ba0] sm:$0xff] }
 0x250   : > { %1353 = vst [vmem:[%s5570_s9 + $0x11e8] sm:$0xff] %v1352_v61  ;;  %v1480_v61 = vld [vmem:[%s5565_s8 + $0x3ba8] sm:$0xff] }
 0x251   : > { %1355 = vst [vmem:[%s5570_s9 + $0x11f0] sm:$0xff] %v1354_v62  ;;  %v1482_v62 = vld [vmem:[%s5565_s8 + $0x3bb0] sm:$0xff] }
 0x252   : > { %1357 = vst [vmem:[%s5570_s9 + $0x11f8] sm:$0xff] %v1356_v63  ;;  %v1484_v63 = vld [vmem:[%s5565_s8 + $0x3bb8] sm:$0xff] }
 0x253   : > { %1359 = vst [vmem:[%s5570_s9 + $0x1200] sm:$0xff] %v1358_v0  ;;  %v1486_v0 = vld [vmem:[%s5565_s8 + $0x3c00] sm:$0xff] }
 0x254   : > { %1361 = vst [vmem:[%s5570_s9 + $0x1208] sm:$0xff] %v1360_v1  ;;  %v1488_v1 = vld [vmem:[%s5565_s8 + $0x3c08] sm:$0xff] }
 0x255   : > { %1363 = vst [vmem:[%s5570_s9 + $0x1210] sm:$0xff] %v1362_v2  ;;  %v1490_v2 = vld [vmem:[%s5565_s8 + $0x3c10] sm:$0xff] }
 0x256   : > { %1365 = vst [vmem:[%s5570_s9 + $0x1218] sm:$0xff] %v1364_v3  ;;  %v1492_v3 = vld [vmem:[%s5565_s8 + $0x3c18] sm:$0xff] }
 0x257   : > { %1367 = vst [vmem:[%s5570_s9 + $0x1220] sm:$0xff] %v1366_v4  ;;  %v1494_v4 = vld [vmem:[%s5565_s8 + $0x3c60] sm:$0xff] }
 0x258   : > { %1369 = vst [vmem:[%s5570_s9 + $0x1228] sm:$0xff] %v1368_v5  ;;  %v1496_v5 = vld [vmem:[%s5565_s8 + $0x3c68] sm:$0xff] }
 0x259   : > { %1371 = vst [vmem:[%s5570_s9 + $0x1230] sm:$0xff] %v1370_v6  ;;  %v1498_v6 = vld [vmem:[%s5565_s8 + $0x3c70] sm:$0xff] }
 0x25a   : > { %1373 = vst [vmem:[%s5570_s9 + $0x1238] sm:$0xff] %v1372_v7  ;;  %v1500_v7 = vld [vmem:[%s5565_s8 + $0x3c78] sm:$0xff] }
 0x25b   : > { %1375 = vst [vmem:[%s5570_s9 + $0x1240] sm:$0xff] %v1374_v8  ;;  %v1502_v8 = vld [vmem:[%s5565_s8 + $0x3cc0] sm:$0xff] }
 0x25c   : > { %1377 = vst [vmem:[%s5570_s9 + $0x1248] sm:$0xff] %v1376_v9  ;;  %v1504_v9 = vld [vmem:[%s5565_s8 + $0x3cc8] sm:$0xff] }
 0x25d   : > { %1379 = vst [vmem:[%s5570_s9 + $0x1250] sm:$0xff] %v1378_v10  ;;  %v1506_v10 = vld [vmem:[%s5565_s8 + $0x3cd0] sm:$0xff] }
 0x25e   : > { %1381 = vst [vmem:[%s5570_s9 + $0x1258] sm:$0xff] %v1380_v11  ;;  %v1508_v11 = vld [vmem:[%s5565_s8 + $0x3cd8] sm:$0xff] }
 0x25f   : > { %1383 = vst [vmem:[%s5570_s9 + $0x1260] sm:$0xff] %v1382_v12  ;;  %v1510_v12 = vld [vmem:[%s5565_s8 + $0x3d20] sm:$0xff] }
 0x260   : > { %1385 = vst [vmem:[%s5570_s9 + $0x1268] sm:$0xff] %v1384_v13  ;;  %v1512_v13 = vld [vmem:[%s5565_s8 + $0x3d28] sm:$0xff] }
 0x261   : > { %1387 = vst [vmem:[%s5570_s9 + $0x1270] sm:$0xff] %v1386_v14  ;;  %v1514_v14 = vld [vmem:[%s5565_s8 + $0x3d30] sm:$0xff] }
 0x262   : > { %1389 = vst [vmem:[%s5570_s9 + $0x1278] sm:$0xff] %v1388_v15  ;;  %v1516_v15 = vld [vmem:[%s5565_s8 + $0x3d38] sm:$0xff] }
 0x263   : > { %1391 = vst [vmem:[%s5570_s9 + $0x1280] sm:$0xff] %v1390_v16  ;;  %v1518_v16 = vld [vmem:[%s5565_s8 + $0x3d80] sm:$0xff] }
 0x264   : > { %1393 = vst [vmem:[%s5570_s9 + $0x1288] sm:$0xff] %v1392_v17  ;;  %v1520_v17 = vld [vmem:[%s5565_s8 + $0x3d88] sm:$0xff] }
 0x265   : > { %1395 = vst [vmem:[%s5570_s9 + $0x1290] sm:$0xff] %v1394_v18  ;;  %v1522_v18 = vld [vmem:[%s5565_s8 + $0x3d90] sm:$0xff] }
 0x266   : > { %1397 = vst [vmem:[%s5570_s9 + $0x1298] sm:$0xff] %v1396_v19  ;;  %v1524_v19 = vld [vmem:[%s5565_s8 + $0x3d98] sm:$0xff] }
 0x267   : > { %1399 = vst [vmem:[%s5570_s9 + $0x12a0] sm:$0xff] %v1398_v20  ;;  %v1526_v20 = vld [vmem:[%s5565_s8 + $0x3de0] sm:$0xff] }
 0x268   : > { %1401 = vst [vmem:[%s5570_s9 + $0x12a8] sm:$0xff] %v1400_v21  ;;  %v1528_v21 = vld [vmem:[%s5565_s8 + $0x3de8] sm:$0xff] }
 0x269   : > { %1403 = vst [vmem:[%s5570_s9 + $0x12b0] sm:$0xff] %v1402_v22  ;;  %v1530_v22 = vld [vmem:[%s5565_s8 + $0x3df0] sm:$0xff] }
 0x26a   : > { %1405 = vst [vmem:[%s5570_s9 + $0x12b8] sm:$0xff] %v1404_v23  ;;  %v1532_v23 = vld [vmem:[%s5565_s8 + $0x3df8] sm:$0xff] }
 0x26b   : > { %1407 = vst [vmem:[%s5570_s9 + $0x12c0] sm:$0xff] %v1406_v24  ;;  %v1534_v24 = vld [vmem:[%s5565_s8 + $0x3e40] sm:$0xff] }
 0x26c   : > { %1409 = vst [vmem:[%s5570_s9 + $0x12c8] sm:$0xff] %v1408_v25  ;;  %v1536_v25 = vld [vmem:[%s5565_s8 + $0x3e48] sm:$0xff] }
 0x26d   : > { %1411 = vst [vmem:[%s5570_s9 + $0x12d0] sm:$0xff] %v1410_v26  ;;  %v1538_v26 = vld [vmem:[%s5565_s8 + $0x3e50] sm:$0xff] }
 0x26e   : > { %1413 = vst [vmem:[%s5570_s9 + $0x12d8] sm:$0xff] %v1412_v27  ;;  %v1540_v27 = vld [vmem:[%s5565_s8 + $0x3e58] sm:$0xff] }
 0x26f   : > { %1415 = vst [vmem:[%s5570_s9 + $0x12e0] sm:$0xff] %v1414_v28  ;;  %v1542_v28 = vld [vmem:[%s5565_s8 + $0x3ea0] sm:$0xff] }
 0x270   : > { %1417 = vst [vmem:[%s5570_s9 + $0x12e8] sm:$0xff] %v1416_v29  ;;  %v1544_v29 = vld [vmem:[%s5565_s8 + $0x3ea8] sm:$0xff] }
 0x271   : > { %1419 = vst [vmem:[%s5570_s9 + $0x12f0] sm:$0xff] %v1418_v30  ;;  %v1546_v30 = vld [vmem:[%s5565_s8 + $0x3eb0] sm:$0xff] }
 0x272   : > { %1421 = vst [vmem:[%s5570_s9 + $0x12f8] sm:$0xff] %v1420_v31  ;;  %v1548_v31 = vld [vmem:[%s5565_s8 + $0x3eb8] sm:$0xff] }
 0x273   : > { %1423 = vst [vmem:[%s5570_s9 + $0x1300] sm:$0xff] %v1422_v32  ;;  %v1550_v32 = vld [vmem:[%s5565_s8 + $0x3f00] sm:$0xff] }
 0x274   : > { %1425 = vst [vmem:[%s5570_s9 + $0x1308] sm:$0xff] %v1424_v33  ;;  %v1552_v33 = vld [vmem:[%s5565_s8 + $0x3f08] sm:$0xff] }
 0x275   : > { %1427 = vst [vmem:[%s5570_s9 + $0x1310] sm:$0xff] %v1426_v34  ;;  %v1554_v34 = vld [vmem:[%s5565_s8 + $0x3f10] sm:$0xff] }
 0x276   : > { %1429 = vst [vmem:[%s5570_s9 + $0x1318] sm:$0xff] %v1428_v35  ;;  %v1556_v35 = vld [vmem:[%s5565_s8 + $0x3f18] sm:$0xff] }
 0x277   : > { %1431 = vst [vmem:[%s5570_s9 + $0x1320] sm:$0xff] %v1430_v36  ;;  %v1558_v36 = vld [vmem:[%s5565_s8 + $0x3f60] sm:$0xff] }
 0x278   : > { %1433 = vst [vmem:[%s5570_s9 + $0x1328] sm:$0xff] %v1432_v37  ;;  %v1560_v37 = vld [vmem:[%s5565_s8 + $0x3f68] sm:$0xff] }
 0x279   : > { %1435 = vst [vmem:[%s5570_s9 + $0x1330] sm:$0xff] %v1434_v38  ;;  %v1562_v38 = vld [vmem:[%s5565_s8 + $0x3f70] sm:$0xff] }
 0x27a   : > { %1437 = vst [vmem:[%s5570_s9 + $0x1338] sm:$0xff] %v1436_v39  ;;  %v1564_v39 = vld [vmem:[%s5565_s8 + $0x3f78] sm:$0xff] }
 0x27b   : > { %1439 = vst [vmem:[%s5570_s9 + $0x1340] sm:$0xff] %v1438_v40  ;;  %v1566_v40 = vld [vmem:[%s5565_s8 + $0x3fc0] sm:$0xff] }
 0x27c   : > { %1441 = vst [vmem:[%s5570_s9 + $0x1348] sm:$0xff] %v1440_v41  ;;  %v1568_v41 = vld [vmem:[%s5565_s8 + $0x3fc8] sm:$0xff] }
 0x27d   : > { %1443 = vst [vmem:[%s5570_s9 + $0x1350] sm:$0xff] %v1442_v42  ;;  %v1570_v42 = vld [vmem:[%s5565_s8 + $0x3fd0] sm:$0xff] }
 0x27e   : > { %1445 = vst [vmem:[%s5570_s9 + $0x1358] sm:$0xff] %v1444_v43  ;;  %v1572_v43 = vld [vmem:[%s5565_s8 + $0x3fd8] sm:$0xff] }
 0x27f   : > { %1447 = vst [vmem:[%s5570_s9 + $0x1360] sm:$0xff] %v1446_v44  ;;  %v1574_v44 = vld [vmem:[%s5565_s8 + $0x4020] sm:$0xff] }
 0x280   : > { %1449 = vst [vmem:[%s5570_s9 + $0x1368] sm:$0xff] %v1448_v45  ;;  %v1576_v45 = vld [vmem:[%s5565_s8 + $0x4028] sm:$0xff] }
 0x281   : > { %1451 = vst [vmem:[%s5570_s9 + $0x1370] sm:$0xff] %v1450_v46  ;;  %v1578_v46 = vld [vmem:[%s5565_s8 + $0x4030] sm:$0xff] }
 0x282   : > { %1453 = vst [vmem:[%s5570_s9 + $0x1378] sm:$0xff] %v1452_v47  ;;  %v1580_v47 = vld [vmem:[%s5565_s8 + $0x4038] sm:$0xff] }
 0x283   : > { %1455 = vst [vmem:[%s5570_s9 + $0x1380] sm:$0xff] %v1454_v48  ;;  %v1582_v48 = vld [vmem:[%s5565_s8 + $0x4080] sm:$0xff] }
 0x284   : > { %1457 = vst [vmem:[%s5570_s9 + $0x1388] sm:$0xff] %v1456_v49  ;;  %v1584_v49 = vld [vmem:[%s5565_s8 + $0x4088] sm:$0xff] }
 0x285   : > { %1459 = vst [vmem:[%s5570_s9 + $0x1390] sm:$0xff] %v1458_v50  ;;  %v1586_v50 = vld [vmem:[%s5565_s8 + $0x4090] sm:$0xff] }
 0x286   : > { %1461 = vst [vmem:[%s5570_s9 + $0x1398] sm:$0xff] %v1460_v51  ;;  %v1588_v51 = vld [vmem:[%s5565_s8 + $0x4098] sm:$0xff] }
 0x287   : > { %1463 = vst [vmem:[%s5570_s9 + $0x13a0] sm:$0xff] %v1462_v52  ;;  %v1590_v52 = vld [vmem:[%s5565_s8 + $0x40e0] sm:$0xff] }
 0x288   : > { %1465 = vst [vmem:[%s5570_s9 + $0x13a8] sm:$0xff] %v1464_v53  ;;  %v1592_v53 = vld [vmem:[%s5565_s8 + $0x40e8] sm:$0xff] }
 0x289   : > { %1467 = vst [vmem:[%s5570_s9 + $0x13b0] sm:$0xff] %v1466_v54  ;;  %v1594_v54 = vld [vmem:[%s5565_s8 + $0x40f0] sm:$0xff] }
 0x28a   : > { %1469 = vst [vmem:[%s5570_s9 + $0x13b8] sm:$0xff] %v1468_v55  ;;  %v1596_v55 = vld [vmem:[%s5565_s8 + $0x40f8] sm:$0xff] }
 0x28b   : > { %1471 = vst [vmem:[%s5570_s9 + $0x13c0] sm:$0xff] %v1470_v56  ;;  %v1598_v56 = vld [vmem:[%s5565_s8 + $0x4140] sm:$0xff] }
 0x28c   : > { %1473 = vst [vmem:[%s5570_s9 + $0x13c8] sm:$0xff] %v1472_v57  ;;  %v1600_v57 = vld [vmem:[%s5565_s8 + $0x4148] sm:$0xff] }
 0x28d   : > { %1475 = vst [vmem:[%s5570_s9 + $0x13d0] sm:$0xff] %v1474_v58  ;;  %v1602_v58 = vld [vmem:[%s5565_s8 + $0x4150] sm:$0xff] }
 0x28e   : > { %1477 = vst [vmem:[%s5570_s9 + $0x13d8] sm:$0xff] %v1476_v59  ;;  %v1604_v59 = vld [vmem:[%s5565_s8 + $0x4158] sm:$0xff] }
 0x28f   : > { %1479 = vst [vmem:[%s5570_s9 + $0x13e0] sm:$0xff] %v1478_v60  ;;  %v1606_v60 = vld [vmem:[%s5565_s8 + $0x41a0] sm:$0xff] }
 0x290   : > { %1481 = vst [vmem:[%s5570_s9 + $0x13e8] sm:$0xff] %v1480_v61  ;;  %v1608_v61 = vld [vmem:[%s5565_s8 + $0x41a8] sm:$0xff] }
 0x291   : > { %1483 = vst [vmem:[%s5570_s9 + $0x13f0] sm:$0xff] %v1482_v62  ;;  %v1610_v62 = vld [vmem:[%s5565_s8 + $0x41b0] sm:$0xff] }
 0x292   : > { %1485 = vst [vmem:[%s5570_s9 + $0x13f8] sm:$0xff] %v1484_v63  ;;  %v1612_v63 = vld [vmem:[%s5565_s8 + $0x41b8] sm:$0xff] }
 0x293   : > { %1487 = vst [vmem:[%s5570_s9 + $0x1400] sm:$0xff] %v1486_v0  ;;  %v1614_v0 = vld [vmem:[%s5565_s8 + $0x4200] sm:$0xff] }
 0x294   : > { %1489 = vst [vmem:[%s5570_s9 + $0x1408] sm:$0xff] %v1488_v1  ;;  %v1616_v1 = vld [vmem:[%s5565_s8 + $0x4208] sm:$0xff] }
 0x295   : > { %1491 = vst [vmem:[%s5570_s9 + $0x1410] sm:$0xff] %v1490_v2  ;;  %v1618_v2 = vld [vmem:[%s5565_s8 + $0x4210] sm:$0xff] }
 0x296   : > { %1493 = vst [vmem:[%s5570_s9 + $0x1418] sm:$0xff] %v1492_v3  ;;  %v1620_v3 = vld [vmem:[%s5565_s8 + $0x4218] sm:$0xff] }
 0x297   : > { %1495 = vst [vmem:[%s5570_s9 + $0x1420] sm:$0xff] %v1494_v4  ;;  %v1622_v4 = vld [vmem:[%s5565_s8 + $0x4260] sm:$0xff] }
 0x298   : > { %1497 = vst [vmem:[%s5570_s9 + $0x1428] sm:$0xff] %v1496_v5  ;;  %v1624_v5 = vld [vmem:[%s5565_s8 + $0x4268] sm:$0xff] }
 0x299   : > { %1499 = vst [vmem:[%s5570_s9 + $0x1430] sm:$0xff] %v1498_v6  ;;  %v1626_v6 = vld [vmem:[%s5565_s8 + $0x4270] sm:$0xff] }
 0x29a   : > { %1501 = vst [vmem:[%s5570_s9 + $0x1438] sm:$0xff] %v1500_v7  ;;  %v1628_v7 = vld [vmem:[%s5565_s8 + $0x4278] sm:$0xff] }
 0x29b   : > { %1503 = vst [vmem:[%s5570_s9 + $0x1440] sm:$0xff] %v1502_v8  ;;  %v1630_v8 = vld [vmem:[%s5565_s8 + $0x42c0] sm:$0xff] }
 0x29c   : > { %1505 = vst [vmem:[%s5570_s9 + $0x1448] sm:$0xff] %v1504_v9  ;;  %v1632_v9 = vld [vmem:[%s5565_s8 + $0x42c8] sm:$0xff] }
 0x29d   : > { %1507 = vst [vmem:[%s5570_s9 + $0x1450] sm:$0xff] %v1506_v10  ;;  %v1634_v10 = vld [vmem:[%s5565_s8 + $0x42d0] sm:$0xff] }
 0x29e   : > { %1509 = vst [vmem:[%s5570_s9 + $0x1458] sm:$0xff] %v1508_v11  ;;  %v1636_v11 = vld [vmem:[%s5565_s8 + $0x42d8] sm:$0xff] }
 0x29f   : > { %1511 = vst [vmem:[%s5570_s9 + $0x1460] sm:$0xff] %v1510_v12  ;;  %v1638_v12 = vld [vmem:[%s5565_s8 + $0x4320] sm:$0xff] }
 0x2a0   : > { %1513 = vst [vmem:[%s5570_s9 + $0x1468] sm:$0xff] %v1512_v13  ;;  %v1640_v13 = vld [vmem:[%s5565_s8 + $0x4328] sm:$0xff] }
 0x2a1   : > { %1515 = vst [vmem:[%s5570_s9 + $0x1470] sm:$0xff] %v1514_v14  ;;  %v1642_v14 = vld [vmem:[%s5565_s8 + $0x4330] sm:$0xff] }
 0x2a2   : > { %1517 = vst [vmem:[%s5570_s9 + $0x1478] sm:$0xff] %v1516_v15  ;;  %v1644_v15 = vld [vmem:[%s5565_s8 + $0x4338] sm:$0xff] }
 0x2a3   : > { %1519 = vst [vmem:[%s5570_s9 + $0x1480] sm:$0xff] %v1518_v16  ;;  %v1646_v16 = vld [vmem:[%s5565_s8 + $0x4380] sm:$0xff] }
 0x2a4   : > { %1521 = vst [vmem:[%s5570_s9 + $0x1488] sm:$0xff] %v1520_v17  ;;  %v1648_v17 = vld [vmem:[%s5565_s8 + $0x4388] sm:$0xff] }
 0x2a5   : > { %1523 = vst [vmem:[%s5570_s9 + $0x1490] sm:$0xff] %v1522_v18  ;;  %v1650_v18 = vld [vmem:[%s5565_s8 + $0x4390] sm:$0xff] }
 0x2a6   : > { %1525 = vst [vmem:[%s5570_s9 + $0x1498] sm:$0xff] %v1524_v19  ;;  %v1652_v19 = vld [vmem:[%s5565_s8 + $0x4398] sm:$0xff] }
 0x2a7   : > { %1527 = vst [vmem:[%s5570_s9 + $0x14a0] sm:$0xff] %v1526_v20  ;;  %v1654_v20 = vld [vmem:[%s5565_s8 + $0x43e0] sm:$0xff] }
 0x2a8   : > { %1529 = vst [vmem:[%s5570_s9 + $0x14a8] sm:$0xff] %v1528_v21  ;;  %v1656_v21 = vld [vmem:[%s5565_s8 + $0x43e8] sm:$0xff] }
 0x2a9   : > { %1531 = vst [vmem:[%s5570_s9 + $0x14b0] sm:$0xff] %v1530_v22  ;;  %v1658_v22 = vld [vmem:[%s5565_s8 + $0x43f0] sm:$0xff] }
 0x2aa   : > { %1533 = vst [vmem:[%s5570_s9 + $0x14b8] sm:$0xff] %v1532_v23  ;;  %v1660_v23 = vld [vmem:[%s5565_s8 + $0x43f8] sm:$0xff] }
 0x2ab   : > { %1535 = vst [vmem:[%s5570_s9 + $0x14c0] sm:$0xff] %v1534_v24  ;;  %v1662_v24 = vld [vmem:[%s5565_s8 + $0x4440] sm:$0xff] }
 0x2ac   : > { %1537 = vst [vmem:[%s5570_s9 + $0x14c8] sm:$0xff] %v1536_v25  ;;  %v1664_v25 = vld [vmem:[%s5565_s8 + $0x4448] sm:$0xff] }
 0x2ad   : > { %1539 = vst [vmem:[%s5570_s9 + $0x14d0] sm:$0xff] %v1538_v26  ;;  %v1666_v26 = vld [vmem:[%s5565_s8 + $0x4450] sm:$0xff] }
 0x2ae   : > { %1541 = vst [vmem:[%s5570_s9 + $0x14d8] sm:$0xff] %v1540_v27  ;;  %v1668_v27 = vld [vmem:[%s5565_s8 + $0x4458] sm:$0xff] }
 0x2af   : > { %1543 = vst [vmem:[%s5570_s9 + $0x14e0] sm:$0xff] %v1542_v28  ;;  %v1670_v28 = vld [vmem:[%s5565_s8 + $0x44a0] sm:$0xff] }
 0x2b0   : > { %1545 = vst [vmem:[%s5570_s9 + $0x14e8] sm:$0xff] %v1544_v29  ;;  %v1672_v29 = vld [vmem:[%s5565_s8 + $0x44a8] sm:$0xff] }
 0x2b1   : > { %1547 = vst [vmem:[%s5570_s9 + $0x14f0] sm:$0xff] %v1546_v30  ;;  %v1674_v30 = vld [vmem:[%s5565_s8 + $0x44b0] sm:$0xff] }
 0x2b2   : > { %1549 = vst [vmem:[%s5570_s9 + $0x14f8] sm:$0xff] %v1548_v31  ;;  %v1676_v31 = vld [vmem:[%s5565_s8 + $0x44b8] sm:$0xff] }
 0x2b3   : > { %1551 = vst [vmem:[%s5570_s9 + $0x1500] sm:$0xff] %v1550_v32  ;;  %v1678_v32 = vld [vmem:[%s5565_s8 + $0x4500] sm:$0xff] }
 0x2b4   : > { %1553 = vst [vmem:[%s5570_s9 + $0x1508] sm:$0xff] %v1552_v33  ;;  %v1680_v33 = vld [vmem:[%s5565_s8 + $0x4508] sm:$0xff] }
 0x2b5   : > { %1555 = vst [vmem:[%s5570_s9 + $0x1510] sm:$0xff] %v1554_v34  ;;  %v1682_v34 = vld [vmem:[%s5565_s8 + $0x4510] sm:$0xff] }
 0x2b6   : > { %1557 = vst [vmem:[%s5570_s9 + $0x1518] sm:$0xff] %v1556_v35  ;;  %v1684_v35 = vld [vmem:[%s5565_s8 + $0x4518] sm:$0xff] }
 0x2b7   : > { %1559 = vst [vmem:[%s5570_s9 + $0x1520] sm:$0xff] %v1558_v36  ;;  %v1686_v36 = vld [vmem:[%s5565_s8 + $0x4560] sm:$0xff] }
 0x2b8   : > { %1561 = vst [vmem:[%s5570_s9 + $0x1528] sm:$0xff] %v1560_v37  ;;  %v1688_v37 = vld [vmem:[%s5565_s8 + $0x4568] sm:$0xff] }
 0x2b9   : > { %1563 = vst [vmem:[%s5570_s9 + $0x1530] sm:$0xff] %v1562_v38  ;;  %v1690_v38 = vld [vmem:[%s5565_s8 + $0x4570] sm:$0xff] }
 0x2ba   : > { %1565 = vst [vmem:[%s5570_s9 + $0x1538] sm:$0xff] %v1564_v39  ;;  %v1692_v39 = vld [vmem:[%s5565_s8 + $0x4578] sm:$0xff] }
 0x2bb   : > { %1567 = vst [vmem:[%s5570_s9 + $0x1540] sm:$0xff] %v1566_v40  ;;  %v1694_v40 = vld [vmem:[%s5565_s8 + $0x45c0] sm:$0xff] }
 0x2bc   : > { %1569 = vst [vmem:[%s5570_s9 + $0x1548] sm:$0xff] %v1568_v41  ;;  %v1696_v41 = vld [vmem:[%s5565_s8 + $0x45c8] sm:$0xff] }
 0x2bd   : > { %1571 = vst [vmem:[%s5570_s9 + $0x1550] sm:$0xff] %v1570_v42  ;;  %v1698_v42 = vld [vmem:[%s5565_s8 + $0x45d0] sm:$0xff] }
 0x2be   : > { %1573 = vst [vmem:[%s5570_s9 + $0x1558] sm:$0xff] %v1572_v43  ;;  %v1700_v43 = vld [vmem:[%s5565_s8 + $0x45d8] sm:$0xff] }
 0x2bf   : > { %1575 = vst [vmem:[%s5570_s9 + $0x1560] sm:$0xff] %v1574_v44  ;;  %v1702_v44 = vld [vmem:[%s5565_s8 + $0x4620] sm:$0xff] }
 0x2c0   : > { %1577 = vst [vmem:[%s5570_s9 + $0x1568] sm:$0xff] %v1576_v45  ;;  %v1704_v45 = vld [vmem:[%s5565_s8 + $0x4628] sm:$0xff] }
 0x2c1   : > { %1579 = vst [vmem:[%s5570_s9 + $0x1570] sm:$0xff] %v1578_v46  ;;  %v1706_v46 = vld [vmem:[%s5565_s8 + $0x4630] sm:$0xff] }
 0x2c2   : > { %1581 = vst [vmem:[%s5570_s9 + $0x1578] sm:$0xff] %v1580_v47  ;;  %v1708_v47 = vld [vmem:[%s5565_s8 + $0x4638] sm:$0xff] }
 0x2c3   : > { %1583 = vst [vmem:[%s5570_s9 + $0x1580] sm:$0xff] %v1582_v48  ;;  %v1710_v48 = vld [vmem:[%s5565_s8 + $0x4680] sm:$0xff] }
 0x2c4   : > { %1585 = vst [vmem:[%s5570_s9 + $0x1588] sm:$0xff] %v1584_v49  ;;  %v1712_v49 = vld [vmem:[%s5565_s8 + $0x4688] sm:$0xff] }
 0x2c5   : > { %1587 = vst [vmem:[%s5570_s9 + $0x1590] sm:$0xff] %v1586_v50  ;;  %v1714_v50 = vld [vmem:[%s5565_s8 + $0x4690] sm:$0xff] }
 0x2c6   : > { %1589 = vst [vmem:[%s5570_s9 + $0x1598] sm:$0xff] %v1588_v51  ;;  %v1716_v51 = vld [vmem:[%s5565_s8 + $0x4698] sm:$0xff] }
 0x2c7   : > { %1591 = vst [vmem:[%s5570_s9 + $0x15a0] sm:$0xff] %v1590_v52 }
 0x2c8   : > { %1593 = vst [vmem:[%s5570_s9 + $0x15a8] sm:$0xff] %v1592_v53 }
 0x2c9   : > { %1595 = vst [vmem:[%s5570_s9 + $0x15b0] sm:$0xff] %v1594_v54 }
 0x2ca   : > { %1597 = vst [vmem:[%s5570_s9 + $0x15b8] sm:$0xff] %v1596_v55 }
 0x2cb   : > { %1599 = vst [vmem:[%s5570_s9 + $0x15c0] sm:$0xff] %v1598_v56 }
 0x2cc   : > { %1601 = vst [vmem:[%s5570_s9 + $0x15c8] sm:$0xff] %v1600_v57 }
 0x2cd   : > { %1603 = vst [vmem:[%s5570_s9 + $0x15d0] sm:$0xff] %v1602_v58 }
 0x2ce   : > { %1605 = vst [vmem:[%s5570_s9 + $0x15d8] sm:$0xff] %v1604_v59 }
 0x2cf   : > { %1607 = vst [vmem:[%s5570_s9 + $0x15e0] sm:$0xff] %v1606_v60 }
 0x2d0   : > { %1609 = vst [vmem:[%s5570_s9 + $0x15e8] sm:$0xff] %v1608_v61 }
 0x2d1   : > { %1611 = vst [vmem:[%s5570_s9 + $0x15f0] sm:$0xff] %v1610_v62 }
 0x2d2   : > { %1613 = vst [vmem:[%s5570_s9 + $0x15f8] sm:$0xff] %v1612_v63 }
 0x2d3   : > { %1615 = vst [vmem:[%s5570_s9 + $0x1600] sm:$0xff] %v1614_v0 }
 0x2d4   : > { %1617 = vst [vmem:[%s5570_s9 + $0x1608] sm:$0xff] %v1616_v1 }
 0x2d5   : > { %1619 = vst [vmem:[%s5570_s9 + $0x1610] sm:$0xff] %v1618_v2 }
 0x2d6   : > { %1621 = vst [vmem:[%s5570_s9 + $0x1618] sm:$0xff] %v1620_v3 }
 0x2d7   : > { %1623 = vst [vmem:[%s5570_s9 + $0x1620] sm:$0xff] %v1622_v4 }
 0x2d8   : > { %1625 = vst [vmem:[%s5570_s9 + $0x1628] sm:$0xff] %v1624_v5 }
 0x2d9   : > { %1627 = vst [vmem:[%s5570_s9 + $0x1630] sm:$0xff] %v1626_v6 }
 0x2da   : > { %1629 = vst [vmem:[%s5570_s9 + $0x1638] sm:$0xff] %v1628_v7 }
 0x2db   : > { %1631 = vst [vmem:[%s5570_s9 + $0x1640] sm:$0xff] %v1630_v8 }
 0x2dc   : > { %1633 = vst [vmem:[%s5570_s9 + $0x1648] sm:$0xff] %v1632_v9 }
 0x2dd   : > { %1635 = vst [vmem:[%s5570_s9 + $0x1650] sm:$0xff] %v1634_v10 }
 0x2de   : > { %1637 = vst [vmem:[%s5570_s9 + $0x1658] sm:$0xff] %v1636_v11 }
 0x2df   : > { %1639 = vst [vmem:[%s5570_s9 + $0x1660] sm:$0xff] %v1638_v12 }
 0x2e0   : > { %1641 = vst [vmem:[%s5570_s9 + $0x1668] sm:$0xff] %v1640_v13 }
 0x2e1   : > { %1643 = vst [vmem:[%s5570_s9 + $0x1670] sm:$0xff] %v1642_v14 }
 0x2e2   : > { %1645 = vst [vmem:[%s5570_s9 + $0x1678] sm:$0xff] %v1644_v15 }
 0x2e3   : > { %1647 = vst [vmem:[%s5570_s9 + $0x1680] sm:$0xff] %v1646_v16 }
 0x2e4   : > { %1649 = vst [vmem:[%s5570_s9 + $0x1688] sm:$0xff] %v1648_v17 }
 0x2e5   : > { %1651 = vst [vmem:[%s5570_s9 + $0x1690] sm:$0xff] %v1650_v18 }
 0x2e6   : > { %1653 = vst [vmem:[%s5570_s9 + $0x1698] sm:$0xff] %v1652_v19 }
 0x2e7   : > { %1655 = vst [vmem:[%s5570_s9 + $0x16a0] sm:$0xff] %v1654_v20 }
 0x2e8   : > { %1657 = vst [vmem:[%s5570_s9 + $0x16a8] sm:$0xff] %v1656_v21 }
 0x2e9   : > { %1659 = vst [vmem:[%s5570_s9 + $0x16b0] sm:$0xff] %v1658_v22 }
 0x2ea   : > { %1661 = vst [vmem:[%s5570_s9 + $0x16b8] sm:$0xff] %v1660_v23 }
 0x2eb   : > { %1663 = vst [vmem:[%s5570_s9 + $0x16c0] sm:$0xff] %v1662_v24 }
 0x2ec   : > { %1665 = vst [vmem:[%s5570_s9 + $0x16c8] sm:$0xff] %v1664_v25 }
 0x2ed   : > { %1667 = vst [vmem:[%s5570_s9 + $0x16d0] sm:$0xff] %v1666_v26 }
 0x2ee   : > { %1669 = vst [vmem:[%s5570_s9 + $0x16d8] sm:$0xff] %v1668_v27 }
 0x2ef   : > { %1671 = vst [vmem:[%s5570_s9 + $0x16e0] sm:$0xff] %v1670_v28 }
 0x2f0   : > { %1673 = vst [vmem:[%s5570_s9 + $0x16e8] sm:$0xff] %v1672_v29 }
 0x2f1   : > { %1675 = vst [vmem:[%s5570_s9 + $0x16f0] sm:$0xff] %v1674_v30 }
 0x2f2   : > { %1677 = vst [vmem:[%s5570_s9 + $0x16f8] sm:$0xff] %v1676_v31 }
 0x2f3   : > { %1679 = vst [vmem:[%s5570_s9 + $0x1700] sm:$0xff] %v1678_v32 }
 0x2f4   : > { %1681 = vst [vmem:[%s5570_s9 + $0x1708] sm:$0xff] %v1680_v33 }
 0x2f5   : > { %1683 = vst [vmem:[%s5570_s9 + $0x1710] sm:$0xff] %v1682_v34 }
 0x2f6   : > { %1685 = vst [vmem:[%s5570_s9 + $0x1718] sm:$0xff] %v1684_v35 }
 0x2f7   : > { %1687 = vst [vmem:[%s5570_s9 + $0x1720] sm:$0xff] %v1686_v36 }
 0x2f8   : > { %1689 = vst [vmem:[%s5570_s9 + $0x1728] sm:$0xff] %v1688_v37 }
 0x2f9   : > { %1691 = vst [vmem:[%s5570_s9 + $0x1730] sm:$0xff] %v1690_v38 }
 0x2fa   : > { %1693 = vst [vmem:[%s5570_s9 + $0x1738] sm:$0xff] %v1692_v39 }
 0x2fb   : > { %1695 = vst [vmem:[%s5570_s9 + $0x1740] sm:$0xff] %v1694_v40 }
 0x2fc   : > { %1697 = vst [vmem:[%s5570_s9 + $0x1748] sm:$0xff] %v1696_v41 }
 0x2fd   : > { %1699 = vst [vmem:[%s5570_s9 + $0x1750] sm:$0xff] %v1698_v42 }
 0x2fe   : > { %1701 = vst [vmem:[%s5570_s9 + $0x1758] sm:$0xff] %v1700_v43 }
 0x2ff   : > { %1703 = vst [vmem:[%s5570_s9 + $0x1760] sm:$0xff] %v1702_v44 }
 0x300   : > { %1705 = vst [vmem:[%s5570_s9 + $0x1768] sm:$0xff] %v1704_v45 }
 0x301   : > { %1707 = vst [vmem:[%s5570_s9 + $0x1770] sm:$0xff] %v1706_v46 }
 0x302   : > { %1709 = vst [vmem:[%s5570_s9 + $0x1778] sm:$0xff] %v1708_v47 }
 0x303   : > { %1711 = vst [vmem:[%s5570_s9 + $0x1780] sm:$0xff] %v1710_v48 }
 0x304   : > { %1713 = vst [vmem:[%s5570_s9 + $0x1788] sm:$0xff] %v1712_v49 }
 0x305   : > { %1715 = vst [vmem:[%s5570_s9 + $0x1790] sm:$0xff] %v1714_v50 }
 0x306   : > { %1717 = vst [vmem:[%s5570_s9 + $0x1798] sm:$0xff] %v1716_v51 }
 0x307 PF: > { %1723 = sbr.rel (!%p5549_p4) target bundleno = 807 (0x327), region = 47  ;;  %s1725_s10 = sand.u32 (%p5549_p4), 1, %s5482_s19  }
 0x308   : > { %s5174_s11 = sshll.u32 (%p5549_p4), %s5486_s20, 5  ;;  %s5177_s12 = smul.u32 (%p5549_p4), 224, %s1725_s10 }
 0x309   : > { %s7088_s15 = scalar_lea.vmem (%p5549_p4), %s9603_s2, %s5174_s11 }
 0x30a   : > { %v1743_v52 = vld [vmem:[%s7088_s15] sm:$0xff] (%p5549_p4)  ;;  %v1745_v53 = vld [vmem:[%s7088_s15 + $0x8] sm:$0xff] (%p5549_p4)  ;;  %v1747_v54 = vld [vmem:[%s7088_s15 + $0x10] sm:$0xff] (%p5549_p4)  ;;  %s7093_s16 = scalar_lea.vmem (%p5549_p4), [#allocation3], %s5177_s12 }
 0x30b   : > { %1744 = vst [vmem:[%s7093_s16] sm:$0xff] (%p5549_p4), %v1743_v52  ;;  %v1749_v55 = vld [vmem:[%s7088_s15 + $0x18] sm:$0xff] (%p5549_p4)  ;;  %v1751_v56 = vld [vmem:[%s7088_s15 + $0x60] sm:$0xff] (%p5549_p4)  ;;  %v1753_v57 = vld [vmem:[%s7088_s15 + $0x68] sm:$0xff] (%p5549_p4) }
 0x30c   : > { %1746 = vst [vmem:[%s7093_s16 + $0x8] sm:$0xff] %v1745_v53  ;;  %v1755_v58 = vld [vmem:[%s7088_s15 + $0x70] sm:$0xff]  ;;  %v1757_v59 = vld [vmem:[%s7088_s15 + $0x78] sm:$0xff]  ;;  %v1759_v60 = vld [vmem:[%s7088_s15 + $0xc0] sm:$0xff] }
 0x30d   : > { %1748 = vst [vmem:[%s7093_s16 + $0x10] sm:$0xff] %v1747_v54  ;;  %v1761_v61 = vld [vmem:[%s7088_s15 + $0xc8] sm:$0xff]  ;;  %v1763_v62 = vld [vmem:[%s7088_s15 + $0xd0] sm:$0xff]  ;;  %v1765_v63 = vld [vmem:[%s7088_s15 + $0xd8] sm:$0xff] }
 0x30e   : > { %1750 = vst [vmem:[%s7093_s16 + $0x18] sm:$0xff] %v1749_v55  ;;  %v1767_v0 = vld [vmem:[%s7088_s15 + $0x120] sm:$0xff]  ;;  %v1769_v1 = vld [vmem:[%s7088_s15 + $0x128] sm:$0xff]  ;;  %v1771_v2 = vld [vmem:[%s7088_s15 + $0x130] sm:$0xff] }
 0x30f   : > { %1752 = vst [vmem:[%s7093_s16 + $0x20] sm:$0xff] %v1751_v56  ;;  %v1773_v3 = vld [vmem:[%s7088_s15 + $0x138] sm:$0xff]  ;;  %v1775_v4 = vld [vmem:[%s7088_s15 + $0x180] sm:$0xff]  ;;  %v1777_v5 = vld [vmem:[%s7088_s15 + $0x188] sm:$0xff] }
 0x310   : > { %1754 = vst [vmem:[%s7093_s16 + $0x28] sm:$0xff] %v1753_v57  ;;  %v1779_v6 = vld [vmem:[%s7088_s15 + $0x190] sm:$0xff]  ;;  %v1781_v7 = vld [vmem:[%s7088_s15 + $0x198] sm:$0xff]  ;;  %v1783_v8 = vld [vmem:[%s7088_s15 + $0x1e0] sm:$0xff] }
 0x311   : > { %1756 = vst [vmem:[%s7093_s16 + $0x30] sm:$0xff] %v1755_v58  ;;  %v1785_v9 = vld [vmem:[%s7088_s15 + $0x1e8] sm:$0xff]  ;;  %v1787_v10 = vld [vmem:[%s7088_s15 + $0x1f0] sm:$0xff]  ;;  %v1789_v11 = vld [vmem:[%s7088_s15 + $0x1f8] sm:$0xff] }
 0x312   : > { %1758 = vst [vmem:[%s7093_s16 + $0x38] sm:$0xff] %v1757_v59  ;;  %v1791_v12 = vld [vmem:[%s7088_s15 + $0x240] sm:$0xff]  ;;  %v1793_v13 = vld [vmem:[%s7088_s15 + $0x248] sm:$0xff]  ;;  %v1795_v14 = vld [vmem:[%s7088_s15 + $0x250] sm:$0xff] }
 0x313   : > { %1760 = vst [vmem:[%s7093_s16 + $0x40] sm:$0xff] %v1759_v60  ;;  %v1797_v15 = vld [vmem:[%s7088_s15 + $0x258] sm:$0xff] }
 0x314   : > { %1762 = vst [vmem:[%s7093_s16 + $0x48] sm:$0xff] %v1761_v61 }
 0x315   : > { %1764 = vst [vmem:[%s7093_s16 + $0x50] sm:$0xff] %v1763_v62 }
 0x316   : > { %1766 = vst [vmem:[%s7093_s16 + $0x58] sm:$0xff] %v1765_v63 }
 0x317   : > { %1768 = vst [vmem:[%s7093_s16 + $0x60] sm:$0xff] %v1767_v0 }
 0x318   : > { %1770 = vst [vmem:[%s7093_s16 + $0x68] sm:$0xff] %v1769_v1 }
 0x319   : > { %1772 = vst [vmem:[%s7093_s16 + $0x70] sm:$0xff] %v1771_v2 }
 0x31a   : > { %1774 = vst [vmem:[%s7093_s16 + $0x78] sm:$0xff] %v1773_v3 }
 0x31b   : > { %1776 = vst [vmem:[%s7093_s16 + $0x80] sm:$0xff] %v1775_v4 }
 0x31c   : > { %1778 = vst [vmem:[%s7093_s16 + $0x88] sm:$0xff] %v1777_v5 }
 0x31d   : > { %1780 = vst [vmem:[%s7093_s16 + $0x90] sm:$0xff] %v1779_v6 }
 0x31e   : > { %1782 = vst [vmem:[%s7093_s16 + $0x98] sm:$0xff] %v1781_v7 }
 0x31f   : > { %1784 = vst [vmem:[%s7093_s16 + $0xa0] sm:$0xff] %v1783_v8 }
 0x320   : > { %1786 = vst [vmem:[%s7093_s16 + $0xa8] sm:$0xff] %v1785_v9 }
 0x321   : > { %1788 = vst [vmem:[%s7093_s16 + $0xb0] sm:$0xff] %v1787_v10 }
 0x322   : > { %1790 = vst [vmem:[%s7093_s16 + $0xb8] sm:$0xff] %v1789_v11 }
 0x323   : > { %1792 = vst [vmem:[%s7093_s16 + $0xc0] sm:$0xff] %v1791_v12 }
 0x324   : > { %1794 = vst [vmem:[%s7093_s16 + $0xc8] sm:$0xff] %v1793_v13 }
 0x325   : > { %1796 = vst [vmem:[%s7093_s16 + $0xd0] sm:$0xff] %v1795_v14 }
 0x326   : > { %1798 = vst [vmem:[%s7093_s16 + $0xd8] sm:$0xff] %v1797_v15 }
 0x327 PF: > { %p5138_p7 = scmp.ge.s32.totalorder %s5486_s20, 1  ;;  %p1819_p8 = scmp.lt.s32.totalorder %s5486_s20, 4 }
 0x329   : > { %p1820_p9 = pnand %p5138_p7, %p1819_p8 }
 0x32a   : > { %s1826_s17 = sand.u32 (!%p1820_p9), 1, %s5478_s18   ;;  %s5139_s30 = sshll.u32 (!%p1820_p9), %s5534_s21, 2 }
 0x32b   : > { %1823 = sbr.rel (%p1820_p9) target bundleno = 1907 (0x773), region = 78  ;;  %p1874_p10 = scmp.lt.s32.totalorder (!%p1820_p9), %s5139_s30, 11 }
 0x32c   : > { %s5178_s23 = smul.u32 (!%p1820_p9), 6048, %s1826_s17 }
 0x32d   : > { %s9359_s9 = smul.u32 (!%p1820_p9), 224, %s1826_s17 }
 0x32e   : > { %s7153_s24 = scalar_lea.vmem (!%p1820_p9), [#allocation2], %s5178_s23 }
 0x32f   : > { %s9405_s11 = scalar_lea.vmem (!%p1820_p9), [#allocation3], %s9359_s9  ;;  %s9433_s12 = scalar_lea.vmem (!%p1820_p9), [#allocation4], %s9359_s9 }
 0x330   : > { %v2028_v16 = vld [vmem:[%s7153_s24 + $0x1e0] sm:$0xff]  ;;  %v1886_v15 = vld [vmem:[%s9601_s0 + $0x10] sm:$0xff]  ;;  %vm2724_vm0 = vcmask 850944   ;;  %vm4575_vm1 = vcmask 1040384   ;;  %s9615_s30 = smov (!%p1874_p10, %s5139_s30), 11  ;;  %vm4792_vm14 = vcmask 1042434  }
 0x331   : > { %v2156_v17 = vld [vmem:[%s7153_s24 + $0x5e0] sm:$0xff]  ;;  %2746 = vmatpush.msra.mxu0 %v2028_v16  ;;  %s1876_s8 = scalar_lea.vmem %s9604_s3, %s9615_s30  ;;  %vm4794_vm15 = vcmask 1041408   ;;  %s1881_s10 = scalar_lea.vmem %s9605_s4, %s9615_s30 }
 0x332   : > { %v2024_v18 = vld [vmem:[%s7153_s24 + $0x1c0] sm:$0xff]  ;;  %2822 = vmatpush.msra.mxu2 %v2156_v17  ;;  %s5175_s13 = sshll.u32 (%p5553_p5), %s5534_s21, 5 }
 0x333   : > { %v2092_v19 = vld [vmem:[%s7153_s24 + $0x3e0] sm:$0xff]  ;;  %2747 = vmatpush.msra.mxu0 %v2024_v18  ;;  %s9535_s15 = scalar_lea.vmem (%p5553_p5), %s9606_s5, %s5175_s13 }
 0x334   : > { %v2152_v20 = vld [vmem:[%s7153_s24 + $0x5c0] sm:$0xff]  ;;  %2784 = vmatpush.msra.mxu1 %v2092_v19  ;;  %v1885_v19 = vld [vmem:[%s9601_s0 + $0x8] sm:$0xff] }
 0x335   : > { %v2220_v21 = vld [vmem:[%s7153_s24 + $0x7e0] sm:$0xff]  ;;  %2823 = vmatpush.msra.mxu2 %v2152_v20  ;;  %v1887_v20 = vld [vmem:[%s9601_s0 + $0x18] sm:$0xff] }
 0x336   : > { %2860 = vmatpush.msra.mxu3 %v2220_v21  ;;  %v2020_v22 = vld [vmem:[%s7153_s24 + $0x1a0] sm:$0xff] }
 0x337   : > { %v2088_v23 = vld [vmem:[%s7153_s24 + $0x3c0] sm:$0xff]  ;;  %2748 = vmatpush.msra.mxu0 %v2020_v22 }
 0x338   : > { %v2148_v24 = vld [vmem:[%s7153_s24 + $0x5a0] sm:$0xff]  ;;  %2785 = vmatpush.msra.mxu1 %v2088_v23 }
 0x339   : > { %v2216_v25 = vld [vmem:[%s7153_s24 + $0x7c0] sm:$0xff]  ;;  %2824 = vmatpush.msra.mxu2 %v2148_v24 }
 0x33a   : > { %v2084_v26 = vld [vmem:[%s7153_s24 + $0x3a0] sm:$0xff]  ;;  %2861 = vmatpush.msra.mxu3 %v2216_v25 }
 0x33b   : > { %v2016_v27 = vld [vmem:[%s7153_s24 + $0x180] sm:$0xff]  ;;  %2786 = vmatpush.msra.mxu1 %v2084_v26 }
 0x33c   : > { %v2144_v28 = vld [vmem:[%s7153_s24 + $0x580] sm:$0xff]  ;;  %2749 = vmatpush.msra.mxu0 %v2016_v27 }
 0x33d   : > { %v2212_v29 = vld [vmem:[%s7153_s24 + $0x7a0] sm:$0xff]  ;;  %2825 = vmatpush.msra.mxu2 %v2144_v28 }
 0x33e   : > { %v2080_v30 = vld [vmem:[%s7153_s24 + $0x380] sm:$0xff]  ;;  %2862 = vmatpush.msra.mxu3 %v2212_v29 }
 0x33f   : > { %v2208_v31 = vld [vmem:[%s7153_s24 + $0x780] sm:$0xff]  ;;  %2787 = vmatpush.msra.mxu1 %v2080_v30 }
 0x340   : > { %v2012_v32 = vld [vmem:[%s7153_s24 + $0x160] sm:$0xff]  ;;  %2863 = vmatpush.msra.mxu3 %v2208_v31  ;;  %v1898_v31 = vld [vmem:[%s9601_s0 + $0x70] sm:$0xff] }
 0x341   : > { %v2140_v33 = vld [vmem:[%s7153_s24 + $0x560] sm:$0xff]  ;;  %2750 = vmatpush.msra.mxu0 %v2012_v32 }
 0x342   : > { %v2076_v34 = vld [vmem:[%s7153_s24 + $0x360] sm:$0xff]  ;;  %2826 = vmatpush.msra.mxu2 %v2140_v33 }
 0x343   : > { %v2204_v35 = vld [vmem:[%s7153_s24 + $0x760] sm:$0xff]  ;;  %2788 = vmatpush.msra.mxu1 %v2076_v34  ;;  %v1897_v34 = vld [vmem:[%s9601_s0 + $0x68] sm:$0xff] }
 0x344   : > { %v2008_v36 = vld [vmem:[%s7153_s24 + $0x140] sm:$0xff]  ;;  %2864 = vmatpush.msra.mxu3 %v2204_v35 }
 0x345   : > { %v2136_v37 = vld [vmem:[%s7153_s24 + $0x540] sm:$0xff]  ;;  %2751 = vmatpush.msra.mxu0 %v2008_v36  ;;  %v1899_v36 = vld [vmem:[%s9601_s0 + $0x78] sm:$0xff] }
 0x346   : > { %v2072_v38 = vld [vmem:[%s7153_s24 + $0x340] sm:$0xff]  ;;  %2827 = vmatpush.msra.mxu2 %v2136_v37 }
 0x347   : > { %v2200_v39 = vld [vmem:[%s7153_s24 + $0x740] sm:$0xff]  ;;  %2789 = vmatpush.msra.mxu1 %v2072_v38 }
 0x348   : > { %v2004_v40 = vld [vmem:[%s7153_s24 + $0x120] sm:$0xff]  ;;  %2865 = vmatpush.msra.mxu3 %v2200_v39 }
 0x349   : > { %v2132_v41 = vld [vmem:[%s7153_s24 + $0x520] sm:$0xff]  ;;  %2752 = vmatpush.msra.mxu0 %v2004_v40 }
 0x34a   : > { %v2068_v42 = vld [vmem:[%s7153_s24 + $0x320] sm:$0xff]  ;;  %2828 = vmatpush.msra.mxu2 %v2132_v41 }
 0x34b   : > { %v2196_v43 = vld [vmem:[%s7153_s24 + $0x720] sm:$0xff]  ;;  %2790 = vmatpush.msra.mxu1 %v2068_v42 }
 0x34c   : > { %v2000_v44 = vld [vmem:[%s7153_s24 + $0x100] sm:$0xff]  ;;  %2866 = vmatpush.msra.mxu3 %v2196_v43 }
 0x34d   : > { %v2128_v45 = vld [vmem:[%s7153_s24 + $0x500] sm:$0xff]  ;;  %2753 = vmatpush.msra.mxu0 %v2000_v44 }
 0x34e   : > { %v2064_v46 = vld [vmem:[%s7153_s24 + $0x300] sm:$0xff]  ;;  %2829 = vmatpush.msra.mxu2 %v2128_v45 }
 0x34f   : > { %v2192_v47 = vld [vmem:[%s7153_s24 + $0x700] sm:$0xff]  ;;  %2791 = vmatpush.msra.mxu1 %v2064_v46 }
 0x350   : > { %v1996_v48 = vld [vmem:[%s7153_s24 + $0xe0] sm:$0xff]  ;;  %2867 = vmatpush.msra.mxu3 %v2192_v47  ;;  %v1910_v47 = vld [vmem:[%s9601_s0 + $0xd0] sm:$0xff] }
 0x351   : > { %v2124_v49 = vld [vmem:[%s7153_s24 + $0x4e0] sm:$0xff]  ;;  %2754 = vmatpush.msra.mxu0 %v1996_v48 }
 0x352   : > { %v2060_v50 = vld [vmem:[%s7153_s24 + $0x2e0] sm:$0xff]  ;;  %2830 = vmatpush.msra.mxu2 %v2124_v49 }
 0x353   : > { %v2188_v51 = vld [vmem:[%s7153_s24 + $0x6e0] sm:$0xff]  ;;  %2792 = vmatpush.msra.mxu1 %v2060_v50  ;;  %v1909_v50 = vld [vmem:[%s9601_s0 + $0xc8] sm:$0xff] }
 0x354   : > { %v1992_v52 = vld [vmem:[%s7153_s24 + $0xc0] sm:$0xff]  ;;  %2868 = vmatpush.msra.mxu3 %v2188_v51 }
 0x355   : > { %v2120_v53 = vld [vmem:[%s7153_s24 + $0x4c0] sm:$0xff]  ;;  %2755 = vmatpush.msra.mxu0 %v1992_v52  ;;  %v1911_v52 = vld [vmem:[%s9601_s0 + $0xd8] sm:$0xff] }
 0x356   : > { %v2056_v54 = vld [vmem:[%s7153_s24 + $0x2c0] sm:$0xff]  ;;  %2831 = vmatpush.msra.mxu2 %v2120_v53 }
 0x357   : > { %v2184_v55 = vld [vmem:[%s7153_s24 + $0x6c0] sm:$0xff]  ;;  %2793 = vmatpush.msra.mxu1 %v2056_v54 }
 0x358   : > { %v1988_v56 = vld [vmem:[%s7153_s24 + $0xa0] sm:$0xff]  ;;  %2869 = vmatpush.msra.mxu3 %v2184_v55 }
 0x359   : > { %v2116_v57 = vld [vmem:[%s7153_s24 + $0x4a0] sm:$0xff]  ;;  %2756 = vmatpush.msra.mxu0 %v1988_v56 }
 0x35a   : > { %v2052_v58 = vld [vmem:[%s7153_s24 + $0x2a0] sm:$0xff]  ;;  %2832 = vmatpush.msra.mxu2 %v2116_v57 }
 0x35b   : > { %v2180_v59 = vld [vmem:[%s7153_s24 + $0x6a0] sm:$0xff]  ;;  %2794 = vmatpush.msra.mxu1 %v2052_v58 }
 0x35c   : > { %v1984_v60 = vld [vmem:[%s7153_s24 + $0x80] sm:$0xff]  ;;  %2870 = vmatpush.msra.mxu3 %v2180_v59 }
 0x35d   : > { %v2112_v61 = vld [vmem:[%s7153_s24 + $0x480] sm:$0xff]  ;;  %2757 = vmatpush.msra.mxu0 %v1984_v60 }
 0x35e   : > { %v2048_v62 = vld [vmem:[%s7153_s24 + $0x280] sm:$0xff]  ;;  %2833 = vmatpush.msra.mxu2 %v2112_v61 }
 0x35f   : > { %v2176_v63 = vld [vmem:[%s7153_s24 + $0x680] sm:$0xff]  ;;  %2795 = vmatpush.msra.mxu1 %v2048_v62 }
 0x360   : > { %v1980_v0 = vld [vmem:[%s7153_s24 + $0x60] sm:$0xff]  ;;  %2871 = vmatpush.msra.mxu3 %v2176_v63  ;;  %v1922_v63 = vld [vmem:[%s9601_s0 + $0x130] sm:$0xff] }
 0x361   : > { %v2108_v1 = vld [vmem:[%s7153_s24 + $0x460] sm:$0xff]  ;;  %2758 = vmatpush.msra.mxu0 %v1980_v0 }
 0x362   : > { %v2044_v2 = vld [vmem:[%s7153_s24 + $0x260] sm:$0xff]  ;;  %2834 = vmatpush.msra.mxu2 %v2108_v1 }
 0x363   : > { %v2172_v3 = vld [vmem:[%s7153_s24 + $0x660] sm:$0xff]  ;;  %2796 = vmatpush.msra.mxu1 %v2044_v2  ;;  %v1921_v2 = vld [vmem:[%s9601_s0 + $0x128] sm:$0xff] }
 0x364   : > { %v1976_v4 = vld [vmem:[%s7153_s24 + $0x40] sm:$0xff]  ;;  %2872 = vmatpush.msra.mxu3 %v2172_v3 }
 0x365   : > { %v2104_v5 = vld [vmem:[%s7153_s24 + $0x440] sm:$0xff]  ;;  %2759 = vmatpush.msra.mxu0 %v1976_v4  ;;  %v1923_v4 = vld [vmem:[%s9601_s0 + $0x138] sm:$0xff] }
 0x366   : > { %v2040_v6 = vld [vmem:[%s7153_s24 + $0x240] sm:$0xff]  ;;  %2835 = vmatpush.msra.mxu2 %v2104_v5 }
 0x367   : > { %v2168_v7 = vld [vmem:[%s7153_s24 + $0x640] sm:$0xff]  ;;  %2797 = vmatpush.msra.mxu1 %v2040_v6 }
 0x368   : > { %v1972_v8 = vld [vmem:[%s7153_s24 + $0x20] sm:$0xff]  ;;  %2873 = vmatpush.msra.mxu3 %v2168_v7 }
 0x369   : > { %v2100_v9 = vld [vmem:[%s7153_s24 + $0x420] sm:$0xff]  ;;  %2760 = vmatpush.msra.mxu0 %v1972_v8 }
 0x36a   : > { %v2036_v10 = vld [vmem:[%s7153_s24 + $0x220] sm:$0xff]  ;;  %2836 = vmatpush.msra.mxu2 %v2100_v9 }
 0x36b   : > { %v2164_v11 = vld [vmem:[%s7153_s24 + $0x620] sm:$0xff]  ;;  %2798 = vmatpush.msra.mxu1 %v2036_v10 }
 0x36c   : > { %v1968_v12 = vld [vmem:[%s7153_s24] sm:$0xff]  ;;  %2874 = vmatpush.msra.mxu3 %v2164_v11 }
 0x36d   : > { %v2096_v13 = vld [vmem:[%s7153_s24 + $0x400] sm:$0xff]  ;;  %2761 = vmatpush.msra.mxu0 %v1968_v12 }
 0x36e   : > { %v1884_v14 = vld [vmem:[%s9601_s0] sm:$0xff]  ;;  %2837 = vmatpush.msra.mxu2 %v2096_v13 }
 0x36f   : > { %v2412_v16 = vld [vmem:[%s7153_s24 + $0xde0] sm:$0xff]  ;;  %2762 = vmatmul.f32.vlgmr.msra.gmra.mxu0 %v1884_v14  ;;  %2838 = vmatmul.f32.vlgmr.msra.gmra.mxu2 %v1886_v15  ;;  %v1934_v15 = vld [vmem:[%s9601_s0 + $0x190] sm:$0xff] }
 0x370   : > { %v2032_v17 = vld [vmem:[%s7153_s24 + $0x200] sm:$0xff]  ;;  %2974 = vmatpush.msrb.mxu2 %v2412_v16 }
 0x371   : > { %v2160_v18 = vld [vmem:[%s7153_s24 + $0x600] sm:$0xff]  ;;  %2799 = vmatpush.msra.mxu1 %v2032_v17 }
 0x372   : > { %v2284_v21 = vld [vmem:[%s7153_s24 + $0x9e0] sm:$0xff]  ;;  %2875 = vmatpush.msra.mxu3 %v2160_v18  ;;  %2800 = vmatmul.f32.vlgmr.msra.gmra.mxu1 %v1885_v19  ;;  %v1933_v18 = vld [vmem:[%s9601_s0 + $0x188] sm:$0xff] }
 0x373   : > { %v2476_v22 = vld [vmem:[%s7153_s24 + $0xfe0] sm:$0xff]  ;;  %2876 = vmatmul.f32.vlgmr.msra.gmra.mxu3 %v1887_v20  ;;  %2898 = vmatpush.msrb.mxu0 %v2284_v21  ;;  %v1935_v20 = vld [vmem:[%s9601_s0 + $0x198] sm:$0xff] }
 0x374   : > { %v2348_v23 = vld [vmem:[%s7153_s24 + $0xbe0] sm:$0xff]  ;;  %3012 = vmatpush.msrb.mxu3 %v2476_v22 }
 0x375   : > { %v2408_v24 = vld [vmem:[%s7153_s24 + $0xdc0] sm:$0xff]  ;;  %2936 = vmatpush.msrb.mxu1 %v2348_v23 }
 0x376   : > { %v2280_v25 = vld [vmem:[%s7153_s24 + $0x9c0] sm:$0xff]  ;;  %2975 = vmatpush.msrb.mxu2 %v2408_v24 }
 0x377   : > { %v2472_v26 = vld [vmem:[%s7153_s24 + $0xfc0] sm:$0xff]  ;;  %2899 = vmatpush.msrb.mxu0 %v2280_v25  ;;  %2841 = vmatmul.f32.gmra.mxu2 %v1898_v31  ;;  %v1946_v31 = vld [vmem:[%s9601_s0 + $0x1f0] sm:$0xff] }
 0x378   : > { %v2344_v27 = vld [vmem:[%s7153_s24 + $0xbc0] sm:$0xff]  ;;  %3013 = vmatpush.msrb.mxu3 %v2472_v26 }
 0x379   : > { %v2404_v28 = vld [vmem:[%s7153_s24 + $0xda0] sm:$0xff]  ;;  %2937 = vmatpush.msrb.mxu1 %v2344_v27 }
 0x37a   : > { %v2276_v29 = vld [vmem:[%s7153_s24 + $0x9a0] sm:$0xff]  ;;  %2976 = vmatpush.msrb.mxu2 %v2404_v28  ;;  %2803 = vmatmul.f32.gmra.mxu1 %v1897_v34  ;;  %v1945_v34 = vld [vmem:[%s9601_s0 + $0x1e8] sm:$0xff] }
 0x37b   : > { %v1896_v30 = vld [vmem:[%s9601_s0 + $0x60] sm:$0xff]  ;;  %2900 = vmatpush.msrb.mxu0 %v2276_v29  ;;  %2879 = vmatmul.f32.gmra.mxu3 %v1899_v36  ;;  %v1947_v36 = vld [vmem:[%s9601_s0 + $0x1f8] sm:$0xff] }
 0x37c   : > { %v2468_v32 = vld [vmem:[%s7153_s24 + $0xfa0] sm:$0xff]  ;;  %2765 = vmatmul.f32.gmra.mxu0 %v1896_v30 }
 0x37d   : > { %v2340_v33 = vld [vmem:[%s7153_s24 + $0xba0] sm:$0xff]  ;;  %3014 = vmatpush.msrb.mxu3 %v2468_v32 }
 0x37e   : > { %v2400_v35 = vld [vmem:[%s7153_s24 + $0xd80] sm:$0xff]  ;;  %2938 = vmatpush.msrb.mxu1 %v2340_v33 }
 0x37f   : > { %v2272_v37 = vld [vmem:[%s7153_s24 + $0x980] sm:$0xff]  ;;  %2977 = vmatpush.msrb.mxu2 %v2400_v35 }
 0x380   : > { %v2464_v38 = vld [vmem:[%s7153_s24 + $0xf80] sm:$0xff]  ;;  %2901 = vmatpush.msrb.mxu0 %v2272_v37  ;;  %2844 = vmatmul.f32.gmra.mxu2 %v1910_v47  ;;  %v1958_v47 = vld [vmem:[%s9601_s0 + $0x250] sm:$0x1] }
 0x381   : > { %v2396_v39 = vld [vmem:[%s7153_s24 + $0xd60] sm:$0xff]  ;;  %3015 = vmatpush.msrb.mxu3 %v2464_v38 }
 0x382   : > { %v2336_v40 = vld [vmem:[%s7153_s24 + $0xb80] sm:$0xff]  ;;  %2978 = vmatpush.msrb.mxu2 %v2396_v39  ;;  %2806 = vmatmul.f32.gmra.mxu1 %v1909_v50  ;;  %v1957_v50 = vld [vmem:[%s9601_s0 + $0x248] sm:$0x1] }
 0x383   : > { %v2268_v41 = vld [vmem:[%s7153_s24 + $0x960] sm:$0xff]  ;;  %2939 = vmatpush.msrb.mxu1 %v2336_v40  ;;  %2882 = vmatmul.f32.gmra.mxu3 %v1911_v52  ;;  %v1959_v52 = vld [vmem:[%s9601_s0 + $0x258] sm:$0x1] }
 0x384   : > { %v2460_v42 = vld [vmem:[%s7153_s24 + $0xf60] sm:$0xff]  ;;  %2902 = vmatpush.msrb.mxu0 %v2268_v41 }
 0x385   : > { %v2392_v43 = vld [vmem:[%s7153_s24 + $0xd40] sm:$0xff]  ;;  %3016 = vmatpush.msrb.mxu3 %v2460_v42 }
 0x386   : > { %v2332_v44 = vld [vmem:[%s7153_s24 + $0xb60] sm:$0xff]  ;;  %2979 = vmatpush.msrb.mxu2 %v2392_v43 }
 0x387   : > { %v2264_v45 = vld [vmem:[%s7153_s24 + $0x940] sm:$0xff]  ;;  %2940 = vmatpush.msrb.mxu1 %v2332_v44 }
 0x388   : > { %v1908_v46 = vld [vmem:[%s9601_s0 + $0xc0] sm:$0xff]  ;;  %2903 = vmatpush.msrb.mxu0 %v2264_v45  ;;  %2847 = vmatmul.f32.gmra.mxu2 %v1922_v63  ;;  %v1890_v63 = vld [vmem:[%s9601_s0 + $0x30] sm:$0xff] }
 0x389   : > { %v2456_v48 = vld [vmem:[%s7153_s24 + $0xf40] sm:$0xff]  ;;  %2768 = vmatmul.f32.gmra.mxu0 %v1908_v46 }
 0x38a   : > { %v2388_v49 = vld [vmem:[%s7153_s24 + $0xd20] sm:$0xff]  ;;  %3017 = vmatpush.msrb.mxu3 %v2456_v48  ;;  %2809 = vmatmul.f32.gmra.mxu1 %v1921_v2  ;;  %v1889_v2 = vld [vmem:[%s9601_s0 + $0x28] sm:$0xff] }
 0x38b   : > { %v2260_v51 = vld [vmem:[%s7153_s24 + $0x920] sm:$0xff]  ;;  %2980 = vmatpush.msrb.mxu2 %v2388_v49  ;;  %2885 = vmatmul.f32.gmra.mxu3 %v1923_v4  ;;  %v1891_v4 = vld [vmem:[%s9601_s0 + $0x38] sm:$0xff] }
 0x38c   : > { %v2328_v53 = vld [vmem:[%s7153_s24 + $0xb40] sm:$0xff]  ;;  %2904 = vmatpush.msrb.mxu0 %v2260_v51 }
 0x38d   : > { %v2452_v54 = vld [vmem:[%s7153_s24 + $0xf20] sm:$0xff]  ;;  %2941 = vmatpush.msrb.mxu1 %v2328_v53 }
 0x38e   : > { %v2384_v55 = vld [vmem:[%s7153_s24 + $0xd00] sm:$0xff]  ;;  %3018 = vmatpush.msrb.mxu3 %v2452_v54 }
 0x38f   : > { %v2324_v56 = vld [vmem:[%s7153_s24 + $0xb20] sm:$0xff]  ;;  %2981 = vmatpush.msrb.mxu2 %v2384_v55 }
 0x390   : > { %v2256_v57 = vld [vmem:[%s7153_s24 + $0x900] sm:$0xff]  ;;  %2942 = vmatpush.msrb.mxu1 %v2324_v56  ;;  %2850 = vmatmul.f32.gmra.mxu2 %v1934_v15  ;;  %v1902_v15 = vld [vmem:[%s9601_s0 + $0x90] sm:$0xff] }
 0x391   : > { %v2448_v58 = vld [vmem:[%s7153_s24 + $0xf00] sm:$0xff]  ;;  %2905 = vmatpush.msrb.mxu0 %v2256_v57 }
 0x392   : > { %v2380_v59 = vld [vmem:[%s7153_s24 + $0xce0] sm:$0xff]  ;;  %3019 = vmatpush.msrb.mxu3 %v2448_v58  ;;  %2812 = vmatmul.f32.gmra.mxu1 %v1933_v18  ;;  %v1901_v18 = vld [vmem:[%s9601_s0 + $0x88] sm:$0xff] }
 0x393   : > { %v2320_v60 = vld [vmem:[%s7153_s24 + $0xb00] sm:$0xff]  ;;  %2982 = vmatpush.msrb.mxu2 %v2380_v59  ;;  %2888 = vmatmul.f32.gmra.mxu3 %v1935_v20  ;;  %v1903_v20 = vld [vmem:[%s9601_s0 + $0x98] sm:$0xff] }
 0x394   : > { %v2252_v61 = vld [vmem:[%s7153_s24 + $0x8e0] sm:$0xff]  ;;  %2943 = vmatpush.msrb.mxu1 %v2320_v60 }
 0x395   : > { %v1920_v62 = vld [vmem:[%s9601_s0 + $0x120] sm:$0xff]  ;;  %2906 = vmatpush.msrb.mxu0 %v2252_v61 }
 0x396   : > { %v2444_v0 = vld [vmem:[%s7153_s24 + $0xee0] sm:$0xff]  ;;  %2771 = vmatmul.f32.gmra.mxu0 %v1920_v62 }
 0x397   : > { %v2316_v1 = vld [vmem:[%s7153_s24 + $0xae0] sm:$0xff]  ;;  %3020 = vmatpush.msrb.mxu3 %v2444_v0 }
 0x398   : > { %v2376_v3 = vld [vmem:[%s7153_s24 + $0xcc0] sm:$0xff]  ;;  %2944 = vmatpush.msrb.mxu1 %v2316_v1  ;;  %2853 = vmatmul.f32.gmra.mxu2 %v1946_v31  ;;  %v1914_v31 = vld [vmem:[%s9601_s0 + $0xf0] sm:$0xff] }
 0x399   : > { %v2248_v5 = vld [vmem:[%s7153_s24 + $0x8c0] sm:$0xff]  ;;  %2983 = vmatpush.msrb.mxu2 %v2376_v3 }
 0x39a   : > { %v2440_v6 = vld [vmem:[%s7153_s24 + $0xec0] sm:$0xff]  ;;  %2907 = vmatpush.msrb.mxu0 %v2248_v5  ;;  %2815 = vmatmul.f32.gmra.mxu1 %v1945_v34  ;;  %v1913_v34 = vld [vmem:[%s9601_s0 + $0xe8] sm:$0xff] }
 0x39b   : > { %v2372_v7 = vld [vmem:[%s7153_s24 + $0xca0] sm:$0xff]  ;;  %3021 = vmatpush.msrb.mxu3 %v2440_v6 }
 0x39c   : > { %v2312_v8 = vld [vmem:[%s7153_s24 + $0xac0] sm:$0xff]  ;;  %2984 = vmatpush.msrb.mxu2 %v2372_v7  ;;  %2891 = vmatmul.f32.gmra.mxu3 %v1947_v36  ;;  %v1915_v36 = vld [vmem:[%s9601_s0 + $0xf8] sm:$0xff] }
 0x39d   : > { %v2244_v9 = vld [vmem:[%s7153_s24 + $0x8a0] sm:$0xff]  ;;  %2945 = vmatpush.msrb.mxu1 %v2312_v8 }
 0x39e   : > { %v2436_v10 = vld [vmem:[%s7153_s24 + $0xea0] sm:$0xff]  ;;  %2908 = vmatpush.msrb.mxu0 %v2244_v9 }
 0x39f   : > { %v2368_v11 = vld [vmem:[%s7153_s24 + $0xc80] sm:$0xff]  ;;  %3022 = vmatpush.msrb.mxu3 %v2436_v10 }
 0x3a0   : > { %v2308_v12 = vld [vmem:[%s7153_s24 + $0xaa0] sm:$0xff]  ;;  %2985 = vmatpush.msrb.mxu2 %v2368_v11 }
 0x3a1   : > { %v2240_v13 = vld [vmem:[%s7153_s24 + $0x880] sm:$0xff]  ;;  %2946 = vmatpush.msrb.mxu1 %v2308_v12  ;;  %2856 = vmatmul.f32.gmra.mxu2 %v1958_v47  ;;  %v1926_v47 = vld [vmem:[%s9601_s0 + $0x150] sm:$0xff] }
 0x3a2   : > { %v1932_v14 = vld [vmem:[%s9601_s0 + $0x180] sm:$0xff]  ;;  %2909 = vmatpush.msrb.mxu0 %v2240_v13  ;;  %2818 = vmatmul.f32.gmra.mxu1 %v1957_v50  ;;  %v1925_v50 = vld [vmem:[%s9601_s0 + $0x148] sm:$0xff] }
 0x3a3   : > { %v2432_v16 = vld [vmem:[%s7153_s24 + $0xe80] sm:$0xff]  ;;  %2774 = vmatmul.f32.gmra.mxu0 %v1932_v14 }
 0x3a4   : > { %v2364_v17 = vld [vmem:[%s7153_s24 + $0xc60] sm:$0xff]  ;;  %3023 = vmatpush.msrb.mxu3 %v2432_v16 }
 0x3a5   : > { %v2236_v19 = vld [vmem:[%s7153_s24 + $0x860] sm:$0xff]  ;;  %2986 = vmatpush.msrb.mxu2 %v2364_v17  ;;  %2894 = vmatmul.f32.gmra.mxu3 %v1959_v52  ;;  %v1927_v52 = vld [vmem:[%s9601_s0 + $0x158] sm:$0xff] }
 0x3a6   : > { %v2304_v21 = vld [vmem:[%s7153_s24 + $0xa80] sm:$0xff]  ;;  %2910 = vmatpush.msrb.mxu0 %v2236_v19 }
 0x3a7   : > { %v2428_v22 = vld [vmem:[%s7153_s24 + $0xe60] sm:$0xff]  ;;  %2947 = vmatpush.msrb.mxu1 %v2304_v21 }
 0x3a8   : > { %v2360_v23 = vld [vmem:[%s7153_s24 + $0xc40] sm:$0xff]  ;;  %3024 = vmatpush.msrb.mxu3 %v2428_v22 }
 0x3a9   : > { %v2300_v24 = vld [vmem:[%s7153_s24 + $0xa60] sm:$0xff]  ;;  %2987 = vmatpush.msrb.mxu2 %v2360_v23 }
 0x3aa   : > { %v2232_v25 = vld [vmem:[%s7153_s24 + $0x840] sm:$0xff]  ;;  %2948 = vmatpush.msrb.mxu1 %v2300_v24 }
 0x3ab   : > { %v2424_v26 = vld [vmem:[%s7153_s24 + $0xe40] sm:$0xff]  ;;  %2911 = vmatpush.msrb.mxu0 %v2232_v25 }
 0x3ac   : > { %v2356_v27 = vld [vmem:[%s7153_s24 + $0xc20] sm:$0xff]  ;;  %3025 = vmatpush.msrb.mxu3 %v2424_v26 }
 0x3ad   : > { %v2296_v28 = vld [vmem:[%s7153_s24 + $0xa40] sm:$0xff]  ;;  %2988 = vmatpush.msrb.mxu2 %v2356_v27 }
 0x3ae   : > { %v2228_v29 = vld [vmem:[%s7153_s24 + $0x820] sm:$0xff]  ;;  %2949 = vmatpush.msrb.mxu1 %v2296_v28 }
 0x3af   : > { %v1944_v30 = vld [vmem:[%s9601_s0 + $0x1e0] sm:$0xff]  ;;  %2912 = vmatpush.msrb.mxu0 %v2228_v29 }
 0x3b0   : > { %v2420_v32 = vld [vmem:[%s7153_s24 + $0xe20] sm:$0xff]  ;;  %2777 = vmatmul.f32.gmra.mxu0 %v1944_v30 }
 0x3b1   : > { %v2292_v33 = vld [vmem:[%s7153_s24 + $0xa20] sm:$0xff]  ;;  %3026 = vmatpush.msrb.mxu3 %v2420_v32 }
 0x3b2   : > { %v2352_v35 = vld [vmem:[%s7153_s24 + $0xc00] sm:$0xff]  ;;  %2950 = vmatpush.msrb.mxu1 %v2292_v33 }
 0x3b3   : > { %v2224_v37 = vld [vmem:[%s7153_s24 + $0x800] sm:$0xff]  ;;  %2989 = vmatpush.msrb.mxu2 %v2352_v35 }
 0x3b4   : > { %v2416_v38 = vld [vmem:[%s7153_s24 + $0xe00] sm:$0xff]  ;;  %2913 = vmatpush.msrb.mxu0 %v2224_v37  ;;  %2990 = vmatmul.f32.vlgmr.msrb.gmra.mxu2 %v1890_v63  ;;  %v1938_v63 = vld [vmem:[%s9601_s0 + $0x1b0] sm:$0xff] }
 0x3b5   : > { %v2668_v39 = vld [vmem:[%s7153_s24 + $0x15e0] sm:$0xff]  ;;  %3027 = vmatpush.msrb.mxu3 %v2416_v38 }
 0x3b6   : > { %v2288_v40 = vld [vmem:[%s7153_s24 + $0xa00] sm:$0xff]  ;;  %3126 = vmatpush.msra.mxu2 %v2668_v39  ;;  %3028 = vmatmul.f32.vlgmr.msrb.gmra.mxu3 %v1891_v4  ;;  %v1939_v4 = vld [vmem:[%s9601_s0 + $0x1b8] sm:$0xff] }
 0x3b7   : > { %v2540_v41 = vld [vmem:[%s7153_s24 + $0x11e0] sm:$0xff]  ;;  %2951 = vmatpush.msrb.mxu1 %v2288_v40 }
 0x3b8   : > { %v2720_v42 = vld [vmem:[%s7153_s24 + $0x1780] sm:$0xff]  ;;  %3050 = vmatpush.msra.mxu0 %v2540_v41  ;;  %2952 = vmatmul.f32.vlgmr.msrb.gmra.mxu1 %v1889_v2  ;;  %v1937_v2 = vld [vmem:[%s9601_s0 + $0x1a8] sm:$0xff] }
 0x3b9   : > { %v2604_v43 = vld [vmem:[%s7153_s24 + $0x13e0] sm:$0xff]  ;;  %3167 = vmatpush.msra.mxu3 %v2720_v42 }
 0x3ba   : > { %v2664_v44 = vld [vmem:[%s7153_s24 + $0x15c0] sm:$0xff]  ;;  %3088 = vmatpush.msra.mxu1 %v2604_v43 }
 0x3bb   : > { %v2536_v45 = vld [vmem:[%s7153_s24 + $0x11c0] sm:$0xff]  ;;  %3127 = vmatpush.msra.mxu2 %v2664_v44 }
 0x3bc   : > { %v1956_v46 = vld [vmem:[%s9601_s0 + $0x240] sm:$0x1]  ;;  %3051 = vmatpush.msra.mxu0 %v2536_v45  ;;  %2993 = vmatmul.f32.gmra.mxu2 %v1902_v15  ;;  %v1949_v15 = vld [vmem:[%s9601_s0 + $0x208] sm:$0xff] }
 0x3bd   : > { %v2660_v48 = vld [vmem:[%s7153_s24 + $0x15a0] sm:$0xff]  ;;  %2780 = vmatmul.f32.gmra.mxu0 %v1956_v46 }
 0x3be   : > { %v2716_v49 = vld [vmem:[%s7153_s24 + $0x1760] sm:$0xff]  ;;  %3128 = vmatpush.msra.mxu2 %v2660_v48  ;;  %3031 = vmatmul.f32.gmra.mxu3 %v1903_v20  ;;  %v2077_v20 = vld [vmem:[%s7153_s24 + $0x368] sm:$0xff] }
 0x3bf   : > { %v2532_v51 = vld [vmem:[%s7153_s24 + $0x11a0] sm:$0xff]  ;;  %3168 = vmatpush.msra.mxu3 %v2716_v49 }
 0x3c0   : > { %v2600_v53 = vld [vmem:[%s7153_s24 + $0x13c0] sm:$0xff]  ;;  %3052 = vmatpush.msra.mxu0 %v2532_v51  ;;  %2955 = vmatmul.f32.gmra.mxu1 %v1901_v18  ;;  %v2013_v18 = vld [vmem:[%s7153_s24 + $0x168] sm:$0xff] }
 0x3c1   : > { %v2656_v54 = vld [vmem:[%s7153_s24 + $0x1580] sm:$0xff]  ;;  %3089 = vmatpush.msra.mxu1 %v2600_v53 }
 0x3c2   : > { %v2712_v55 = vld [vmem:[%s7153_s24 + $0x1740] sm:$0xff]  ;;  %3129 = vmatpush.msra.mxu2 %v2656_v54 }
 0x3c3   : > { %v2596_v56 = vld [vmem:[%s7153_s24 + $0x13a0] sm:$0xff]  ;;  %3169 = vmatpush.msra.mxu3 %v2712_v55 }
 0x3c4   : > { %v2528_v57 = vld [vmem:[%s7153_s24 + $0x1180] sm:$0xff]  ;;  %3090 = vmatpush.msra.mxu1 %v2596_v56  ;;  %2996 = vmatmul.f32.gmra.mxu2 %v1914_v31  ;;  %v2157_v56 = vld [vmem:[%s7153_s24 + $0x5e8] sm:$0xff] }
 0x3c5   : > { %v2652_v58 = vld [vmem:[%s7153_s24 + $0x1560] sm:$0xff]  ;;  %3053 = vmatpush.msra.mxu0 %v2528_v57  ;;  %v2197_v31 = vld [vmem:[%s7153_s24 + $0x728] sm:$0xff] }
 0x3c6   : > { %v2708_v59 = vld [vmem:[%s7153_s24 + $0x1720] sm:$0xff]  ;;  %3130 = vmatpush.msra.mxu2 %v2652_v58  ;;  %3034 = vmatmul.f32.gmra.mxu3 %v1915_v36  ;;  %v2029_v58 = vld [vmem:[%s7153_s24 + $0x1e8] sm:$0xff] }
 0x3c7   : > { %v2592_v60 = vld [vmem:[%s7153_s24 + $0x1380] sm:$0xff]  ;;  %3170 = vmatpush.msra.mxu3 %v2708_v59  ;;  %v2221_v59 = vld [vmem:[%s7153_s24 + $0x7e8] sm:$0xff] }
 0x3c8   : > { %v2524_v61 = vld [vmem:[%s7153_s24 + $0x1160] sm:$0xff]  ;;  %3091 = vmatpush.msra.mxu1 %v2592_v60  ;;  %v2093_v60 = vld [vmem:[%s7153_s24 + $0x3e8] sm:$0xff] }
 0x3c9   : > { %v1888_v62 = vld [vmem:[%s9601_s0 + $0x20] sm:$0xff]  ;;  %3054 = vmatpush.msra.mxu0 %v2524_v61  ;;  %2958 = vmatmul.f32.gmra.mxu1 %v1913_v34  ;;  %v2153_v61 = vld [vmem:[%s7153_s24 + $0x5c8] sm:$0xff] }
 0x3ca   : > { %v2588_v0 = vld [vmem:[%s7153_s24 + $0x1360] sm:$0xff]  ;;  %2914 = vmatmul.f32.vlgmr.msrb.gmra.mxu0 %v1888_v62  ;;  %v2001_v34 = vld [vmem:[%s7153_s24 + $0x108] sm:$0xff] }
 0x3cb   : > { %v2648_v1 = vld [vmem:[%s7153_s24 + $0x1540] sm:$0xff]  ;;  %3092 = vmatpush.msra.mxu1 %v2588_v0  ;;  %v2025_v0 = vld [vmem:[%s7153_s24 + $0x1c8] sm:$0xff] }
 0x3cc   : > { %v2520_v3 = vld [vmem:[%s7153_s24 + $0x1140] sm:$0xff]  ;;  %3131 = vmatpush.msra.mxu2 %v2648_v1  ;;  %v2217_v1 = vld [vmem:[%s7153_s24 + $0x7c8] sm:$0xff] }
 0x3cd   : > { %v2644_v5 = vld [vmem:[%s7153_s24 + $0x1520] sm:$0xff]  ;;  %3055 = vmatpush.msra.mxu0 %v2520_v3  ;;  %2999 = vmatmul.f32.gmra.mxu2 %v1926_v47  ;;  %v2149_v3 = vld [vmem:[%s7153_s24 + $0x5a8] sm:$0xff] }
 0x3ce   : > { %v2704_v6 = vld [vmem:[%s7153_s24 + $0x1700] sm:$0xff]  ;;  %3132 = vmatpush.msra.mxu2 %v2644_v5  ;;  %3037 = vmatmul.f32.gmra.mxu3 %v1927_v52  ;;  %v2089_v5 = vld [vmem:[%s7153_s24 + $0x3c8] sm:$0xff] }
 0x3cf   : > { %v2584_v7 = vld [vmem:[%s7153_s24 + $0x1340] sm:$0xff]  ;;  %3171 = vmatpush.msra.mxu3 %v2704_v6  ;;  %v2021_v6 = vld [vmem:[%s7153_s24 + $0x1a8] sm:$0xff] }
 0x3d0   : > { %v2516_v8 = vld [vmem:[%s7153_s24 + $0x1120] sm:$0xff]  ;;  %3093 = vmatpush.msra.mxu1 %v2584_v7  ;;  %v2213_v7 = vld [vmem:[%s7153_s24 + $0x7a8] sm:$0xff] }
 0x3d1   : > { %v2640_v9 = vld [vmem:[%s7153_s24 + $0x1500] sm:$0xff]  ;;  %3056 = vmatpush.msra.mxu0 %v2516_v8  ;;  %2961 = vmatmul.f32.gmra.mxu1 %v1925_v50  ;;  %v2085_v8 = vld [vmem:[%s7153_s24 + $0x3a8] sm:$0xff] }
 0x3d2   : > { %v2700_v10 = vld [vmem:[%s7153_s24 + $0x16e0] sm:$0xff]  ;;  %3133 = vmatpush.msra.mxu2 %v2640_v9  ;;  %v2145_v9 = vld [vmem:[%s7153_s24 + $0x588] sm:$0xff] }
 0x3d3   : > { %v2580_v11 = vld [vmem:[%s7153_s24 + $0x1320] sm:$0xff]  ;;  %3172 = vmatpush.msra.mxu3 %v2700_v10  ;;  %v2125_v36 = vld [vmem:[%s7153_s24 + $0x4e8] sm:$0xff] }
 0x3d4   : > { %v2512_v12 = vld [vmem:[%s7153_s24 + $0x1100] sm:$0xff]  ;;  %3094 = vmatpush.msra.mxu1 %v2580_v11  ;;  %v1950_v11 = vld [vmem:[%s9601_s0 + $0x210] sm:$0xff]  ;;  %v2185_v47 = vld [vmem:[%s7153_s24 + $0x6c8] sm:$0xff] }
 0x3d5   : > { %v2636_v13 = vld [vmem:[%s7153_s24 + $0x14e0] sm:$0xff]  ;;  %3057 = vmatpush.msra.mxu0 %v2512_v12  ;;  %3002 = vmatmul.f32.gmra.mxu2 %v1938_v63  ;;  %v2017_v12 = vld [vmem:[%s7153_s24 + $0x188] sm:$0xff] }
 0x3d6   : > { %v1900_v14 = vld [vmem:[%s9601_s0 + $0x80] sm:$0xff]  ;;  %3134 = vmatpush.msra.mxu2 %v2636_v13  ;;  %3040 = vmatmul.f32.gmra.mxu3 %v1939_v4  ;;  %v2209_v13 = vld [vmem:[%s7153_s24 + $0x788] sm:$0xff] }
 0x3d7   : > { %v2696_v16 = vld [vmem:[%s7153_s24 + $0x16c0] sm:$0xff]  ;;  %2917 = vmatmul.f32.gmra.mxu0 %v1900_v14  ;;  %v2141_v14 = vld [vmem:[%s7153_s24 + $0x568] sm:$0xff] }
 0x3d8   : > { %v2576_v17 = vld [vmem:[%s7153_s24 + $0x1300] sm:$0xff]  ;;  %3173 = vmatpush.msra.mxu3 %v2696_v16  ;;  %v1951_v16 = vld [vmem:[%s9601_s0 + $0x218] sm:$0xff]  ;;  %v1905_v52 = vld [vmem:[%s9601_s0 + $0xa8] sm:$0xff] }
 0x3d9   : > { %v2508_v19 = vld [vmem:[%s7153_s24 + $0x10e0] sm:$0xff]  ;;  %3095 = vmatpush.msra.mxu1 %v2576_v17  ;;  %v2081_v17 = vld [vmem:[%s7153_s24 + $0x388] sm:$0xff] }
 0x3da   : > { %v2572_v21 = vld [vmem:[%s7153_s24 + $0x12e0] sm:$0xff]  ;;  %3058 = vmatpush.msra.mxu0 %v2508_v19  ;;  %2964 = vmatmul.f32.gmra.mxu1 %v1937_v2  ;;  %v2205_v19 = vld [vmem:[%s7153_s24 + $0x768] sm:$0xff]  ;;  %v1918_v2 = vld [vmem:[%s9601_s0 + $0x110] sm:$0xff] }
 0x3db   : > { %v2632_v22 = vld [vmem:[%s7153_s24 + $0x14c0] sm:$0xff]  ;;  %3096 = vmatpush.msra.mxu1 %v2572_v21  ;;  %v2137_v21 = vld [vmem:[%s7153_s24 + $0x548] sm:$0xff] }
 0x3dc   : > { %v2692_v23 = vld [vmem:[%s7153_s24 + $0x16a0] sm:$0xff]  ;;  %3135 = vmatpush.msra.mxu2 %v2632_v22  ;;  %v2009_v22 = vld [vmem:[%s7153_s24 + $0x148] sm:$0xff] }
 0x3dd   : > { %v2504_v24 = vld [vmem:[%s7153_s24 + $0x10c0] sm:$0xff]  ;;  %3174 = vmatpush.msra.mxu3 %v2692_v23  ;;  %3005 = vmatmul.f32.gmra.mxu2 %v1950_v11  ;;  %v2201_v23 = vld [vmem:[%s7153_s24 + $0x748] sm:$0xff] }
 0x3de   : > { %v2568_v25 = vld [vmem:[%s7153_s24 + $0x12c0] sm:$0xff]  ;;  %3059 = vmatpush.msra.mxu0 %v2504_v24  ;;  %3043 = vmatmul.f32.gmra.mxu3 %v1951_v16  ;;  %v2173_v63 = vld [vmem:[%s7153_s24 + $0x668] sm:$0xff] }
 0x3df   : > { %v2628_v26 = vld [vmem:[%s7153_s24 + $0x14a0] sm:$0xff]  ;;  %3097 = vmatpush.msra.mxu1 %v2568_v25  ;;  %v1962_v25 = vld [vmem:[%s9601_s0 + $0x270] sm:$0x1]  ;;  %v1917_v4 = vld [vmem:[%s9601_s0 + $0x108] sm:$0xff] }
 0x3e0   : > { %v2688_v27 = vld [vmem:[%s7153_s24 + $0x1680] sm:$0xff]  ;;  %3136 = vmatpush.msra.mxu2 %v2628_v26  ;;  %v1961_v26 = vld [vmem:[%s9601_s0 + $0x268] sm:$0x1] }
 0x3e1   : > { %v2500_v28 = vld [vmem:[%s7153_s24 + $0x10a0] sm:$0xff]  ;;  %3175 = vmatpush.msra.mxu3 %v2688_v27  ;;  %v2133_v27 = vld [vmem:[%s7153_s24 + $0x528] sm:$0xff] }
 0x3e2   : > { %v2564_v29 = vld [vmem:[%s7153_s24 + $0x12a0] sm:$0xff]  ;;  %3060 = vmatpush.msra.mxu0 %v2500_v28  ;;  %2967 = vmatmul.f32.gmra.mxu1 %v1949_v15  ;;  %v2073_v28 = vld [vmem:[%s7153_s24 + $0x348] sm:$0xff] }
 0x3e3   : > { %v1912_v30 = vld [vmem:[%s9601_s0 + $0xe0] sm:$0xff]  ;;  %3098 = vmatpush.msra.mxu1 %v2564_v29  ;;  %v1963_v29 = vld [vmem:[%s9601_s0 + $0x278] sm:$0x1]  ;;  %v1973_v15 = vld [vmem:[%s7153_s24 + $0x28] sm:$0xff] }
 0x3e4   : > { %v2624_v32 = vld [vmem:[%s7153_s24 + $0x1480] sm:$0xff]  ;;  %2920 = vmatmul.f32.gmra.mxu0 %v1912_v30  ;;  %v2005_v30 = vld [vmem:[%s7153_s24 + $0x128] sm:$0xff] }
 0x3e5   : > { %v2496_v33 = vld [vmem:[%s7153_s24 + $0x1080] sm:$0xff]  ;;  %3137 = vmatpush.msra.mxu2 %v2624_v32  ;;  %v2069_v32 = vld [vmem:[%s7153_s24 + $0x328] sm:$0xff] }
 0x3e6   : > { %v2684_v35 = vld [vmem:[%s7153_s24 + $0x1660] sm:$0xff]  ;;  %3061 = vmatpush.msra.mxu0 %v2496_v33  ;;  %3008 = vmatmul.f32.gmra.mxu2 %v1962_v25  ;;  %v2129_v33 = vld [vmem:[%s7153_s24 + $0x508] sm:$0xff] }
 0x3e7   : > { %v2620_v37 = vld [vmem:[%s7153_s24 + $0x1460] sm:$0xff]  ;;  %3176 = vmatpush.msra.mxu3 %v2684_v35  ;;  %v2193_v35 = vld [vmem:[%s7153_s24 + $0x708] sm:$0xff] }
 0x3e8   : > { %v2560_v38 = vld [vmem:[%s7153_s24 + $0x1280] sm:$0xff]  ;;  %3138 = vmatpush.msra.mxu2 %v2620_v37  ;;  %3046 = vmatmul.f32.gmra.mxu3 %v1963_v29  ;;  %v2165_v16 = vld [vmem:[%s7153_s24 + $0x628] sm:$0xff] }
 0x3e9   : > { %v2492_v39 = vld [vmem:[%s7153_s24 + $0x1060] sm:$0xff]  ;;  %3099 = vmatpush.msra.mxu1 %v2560_v38  ;;  %v1894_v38 = vld [vmem:[%s9601_s0 + $0x50] sm:$0xff]  ;;  %v2097_v25 = vld [vmem:[%s7153_s24 + $0x408] sm:$0xff] }
 0x3ea   : > { %v2616_v40 = vld [vmem:[%s7153_s24 + $0x1440] sm:$0xff]  ;;  %3062 = vmatpush.msra.mxu0 %v2492_v39  ;;  %2970 = vmatmul.f32.gmra.mxu1 %v1961_v26  ;;  %v1893_v39 = vld [vmem:[%s9601_s0 + $0x48] sm:$0xff] }
 0x3eb   : > { %v2680_v41 = vld [vmem:[%s7153_s24 + $0x1640] sm:$0xff]  ;;  %3139 = vmatpush.msra.mxu2 %v2616_v40  ;;  %v2065_v40 = vld [vmem:[%s7153_s24 + $0x308] sm:$0xff] }
 0x3ec   : > { %v2556_v42 = vld [vmem:[%s7153_s24 + $0x1260] sm:$0xff]  ;;  %3177 = vmatpush.msra.mxu3 %v2680_v41  ;;  %v1997_v41 = vld [vmem:[%s7153_s24 + $0xe8] sm:$0xff] }
 0x3ed   : > { %v2488_v43 = vld [vmem:[%s7153_s24 + $0x1040] sm:$0xff]  ;;  %3100 = vmatpush.msra.mxu1 %v2556_v42  ;;  %v2189_v42 = vld [vmem:[%s7153_s24 + $0x6e8] sm:$0xff] }
 0x3ee   : > { %v2612_v44 = vld [vmem:[%s7153_s24 + $0x1420] sm:$0xff]  ;;  %3063 = vmatpush.msra.mxu0 %v2488_v43  ;;  %v1895_v43 = vld [vmem:[%s9601_s0 + $0x58] sm:$0xff]  ;;  %v1969_v26 = vld [vmem:[%s7153_s24 + $0x8] sm:$0xff] }
 0x3ef   : > { %v2676_v45 = vld [vmem:[%s7153_s24 + $0x1620] sm:$0xff]  ;;  %3140 = vmatpush.msra.mxu2 %v2612_v44  ;;  %v2061_v44 = vld [vmem:[%s7153_s24 + $0x2e8] sm:$0xff] }
 0x3f0   : > { %v1924_v46 = vld [vmem:[%s9601_s0 + $0x140] sm:$0xff]  ;;  %3178 = vmatpush.msra.mxu3 %v2676_v45  ;;  %v2121_v45 = vld [vmem:[%s7153_s24 + $0x4c8] sm:$0xff] }
 0x3f1   : > { %v2552_v48 = vld [vmem:[%s7153_s24 + $0x1240] sm:$0xff]  ;;  %2923 = vmatmul.f32.gmra.mxu0 %v1924_v46  ;;  %v1993_v46 = vld [vmem:[%s7153_s24 + $0xc8] sm:$0xff] }
 0x3f2   : > { %v2484_v49 = vld [vmem:[%s7153_s24 + $0x1020] sm:$0xff]  ;;  %3101 = vmatpush.msra.mxu1 %v2552_v48  ;;  %v2117_v48 = vld [vmem:[%s7153_s24 + $0x4a8] sm:$0xff] }
 0x3f3   : > { %v2608_v51 = vld [vmem:[%s7153_s24 + $0x1400] sm:$0xff]  ;;  %3064 = vmatpush.msra.mxu0 %v2484_v49  ;;  %v2057_v49 = vld [vmem:[%s7153_s24 + $0x2c8] sm:$0xff] }
 0x3f4   : > { %v2548_v53 = vld [vmem:[%s7153_s24 + $0x1220] sm:$0xff]  ;;  %3141 = vmatpush.msra.mxu2 %v2608_v51  ;;  %v1906_v51 = vld [vmem:[%s9601_s0 + $0xb0] sm:$0xff]  ;;  %v2161_v29 = vld [vmem:[%s7153_s24 + $0x608] sm:$0xff] }
 0x3f5   : > { %v2672_v54 = vld [vmem:[%s7153_s24 + $0x1600] sm:$0xff]  ;;  %3102 = vmatpush.msra.mxu1 %v2548_v53  ;;  %3142 = vmatmul.f32.vlgmr.msra.gmra.mxu2 %v1894_v38  ;;  %v1989_v53 = vld [vmem:[%s7153_s24 + $0xa8] sm:$0xff] }
 0x3f6   : > { %v2480_v55 = vld [vmem:[%s7153_s24 + $0x1000] sm:$0xff]  ;;  %3179 = vmatpush.msra.mxu3 %v2672_v54  ;;  %3278 = vmatpush.msrb.mxu2 %v2157_v56  ;;  %v2181_v54 = vld [vmem:[%s7153_s24 + $0x6a8] sm:$0xff] }
 0x3f7   : > { %v2544_v57 = vld [vmem:[%s7153_s24 + $0x1200] sm:$0xff]  ;;  %3065 = vmatpush.msra.mxu0 %v2480_v55  ;;  %5141 = vmatmul.msk.f32.vlgmr.msra.gmra.mxu3 %vm2724_vm0, %v1895_v43  ;;  %v1907_v55 = vld [vmem:[%s9601_s0 + $0xb8] sm:$0xff]  ;;  %v2053_v56 = vld [vmem:[%s7153_s24 + $0x2a8] sm:$0xff] }
 0x3f8   : > { %v1936_v62 = vld [vmem:[%s9601_s0 + $0x1a0] sm:$0xff]  ;;  %3103 = vmatpush.msra.mxu1 %v2544_v57  ;;  %3316 = vmatpush.msrb.mxu3 %v2221_v59  ;;  %v2113_v57 = vld [vmem:[%s7153_s24 + $0x488] sm:$0xff] }
 0x3f9   : > { %3202 = vmatpush.msrb.mxu0 %v2029_v58  ;;  %3279 = vmatpush.msrb.mxu2 %v2153_v61  ;;  %v1948_v10 = vld [vmem:[%s9601_s0 + $0x200] sm:$0xff]  ;;  %v1985_v58 = vld [vmem:[%s7153_s24 + $0x88] sm:$0xff] }
 0x3fa   : > { %3240 = vmatpush.msrb.mxu1 %v2093_v60  ;;  %2926 = vmatmul.f32.gmra.mxu0 %v1936_v62  ;;  %v1960_v24 = vld [vmem:[%s9601_s0 + $0x260] sm:$0x1]  ;;  %v2177_v59 = vld [vmem:[%s7153_s24 + $0x688] sm:$0xff] }
 0x3fb   : > { %3203 = vmatpush.msrb.mxu0 %v2025_v0  ;;  %3317 = vmatpush.msrb.mxu3 %v2217_v1  ;;  %v1892_v37 = vld [vmem:[%s9601_s0 + $0x40] sm:$0xff]  ;;  %v2109_v60 = vld [vmem:[%s7153_s24 + $0x468] sm:$0xff]  ;;  %v2763_v0 = vpop.f32.mrf.mxu0 }
 0x3fc   : > { %3280 = vmatpush.msrb.mxu2 %v2149_v3  ;;  %3241 = vmatpush.msrb.mxu1 %v2089_v5  ;;  %v1904_v50 = vld [vmem:[%s9601_s0 + $0xa0] sm:$0xff]  ;;  %v2049_v61 = vld [vmem:[%s7153_s24 + $0x288] sm:$0xff]  ;;  %v2801_v3 = vpop.f32.mrf.mxu1 }
 0x3fd   : > { %3204 = vmatpush.msrb.mxu0 %v2021_v6  ;;  %3318 = vmatpush.msrb.mxu3 %v2213_v7  ;;  %v1981_v62 = vld [vmem:[%s7153_s24 + $0x68] sm:$0xff]  ;;  %v1916_v1 = vld [vmem:[%s9601_s0 + $0x100] sm:$0xff]  ;;  %v1919_v7 = vld [vmem:[%s9601_s0 + $0x118] sm:$0xff]  ;;  %v2802_v11 = vadd.f32 %v2801_v3, %v2763_v0 }
 0x3fe   : > { %3242 = vmatpush.msrb.mxu1 %v2085_v8  ;;  %3281 = vmatpush.msrb.mxu2 %v2145_v9  ;;  %v2045_v5 = vld [vmem:[%s7153_s24 + $0x268] sm:$0xff]  ;;  %v1955_v3 = vld [vmem:[%s9601_s0 + $0x238] sm:$0xff] }
 0x3ff   : > { %3205 = vmatpush.msrb.mxu0 %v2017_v12  ;;  %3319 = vmatpush.msrb.mxu3 %v2209_v13  ;;  %v2105_v6 = vld [vmem:[%s7153_s24 + $0x448] sm:$0xff]  ;;  %v2839_v12 = vpop.f32.mrf.mxu2 }
 0x400   : > { %3282 = vmatpush.msrb.mxu2 %v2141_v14  ;;  %3243 = vmatpush.msrb.mxu1 %v2081_v17  ;;  %v1977_v8 = vld [vmem:[%s7153_s24 + $0x48] sm:$0xff]  ;;  %v2840_v14 = vadd.f32 %v2839_v12, %v2802_v11 }
 0x401   : > { %3206 = vmatpush.msrb.mxu0 %v2013_v18  ;;  %3320 = vmatpush.msrb.mxu3 %v2205_v19  ;;  %v2169_v9 = vld [vmem:[%s7153_s24 + $0x648] sm:$0xff]  ;;  %v1928_v18 = vld [vmem:[%s9601_s0 + $0x160] sm:$0xff]  ;;  %v1930_v19 = vld [vmem:[%s9601_s0 + $0x170] sm:$0xff] }
 0x402   : > { %2929 = vmatmul.f32.gmra.mxu0 %v1948_v10  ;;  %3244 = vmatpush.msrb.mxu1 %v2077_v20  ;;  %v2101_v10 = vld [vmem:[%s7153_s24 + $0x428] sm:$0xff]  ;;  %v2877_v20 = vpop.f32.mrf.mxu3 }
 0x403   : > { %3283 = vmatpush.msrb.mxu2 %v2137_v21  ;;  %3207 = vmatpush.msrb.mxu0 %v2009_v22  ;;  %v2041_v13 = vld [vmem:[%s7153_s24 + $0x248] sm:$0xff]  ;;  %v2766_v17 = vpop.f32.mrf.mxu0  ;;  %v7619_v22 = vadd.f32 %v2877_v20, %v2840_v14 }
 0x404   : > { %3321 = vmatpush.msrb.mxu3 %v2201_v23  ;;  %3245 = vmatpush.msrb.mxu1 %v2073_v28  ;;  %v1929_v21 = vld [vmem:[%s9601_s0 + $0x168] sm:$0xff]  ;;  %v2804_v23 = vpop.f32.mrf.mxu1 }
 0x405   : > { %3284 = vmatpush.msrb.mxu2 %v2133_v27  ;;  %3208 = vmatpush.msrb.mxu0 %v2005_v30  ;;  %v1931_v27 = vld [vmem:[%s9601_s0 + $0x178] sm:$0xff]  ;;  %v2413_v28 = vld [vmem:[%s7153_s24 + $0xde8] sm:$0xff] }
 0x406   : > { %3246 = vmatpush.msrb.mxu1 %v2069_v32  ;;  %3322 = vmatpush.msrb.mxu3 %v2197_v31  ;;  %v2033_v30 = vld [vmem:[%s7153_s24 + $0x208] sm:$0xff]  ;;  %v2805_v31 = vadd.f32 %v2804_v23, %v2766_v17 }
 0x407   : > { %3285 = vmatpush.msrb.mxu2 %v2129_v33  ;;  %3209 = vmatpush.msrb.mxu0 %v2001_v34  ;;  %v2842_v32 = vpop.f32.mrf.mxu2  ;;  %v2285_v33 = vld [vmem:[%s7153_s24 + $0x9e8] sm:$0xff] }
 0x408   : > { %3323 = vmatpush.msrb.mxu3 %v2193_v35  ;;  %3247 = vmatpush.msrb.mxu1 %v2065_v40  ;;  %v2477_v34 = vld [vmem:[%s7153_s24 + $0xfe8] sm:$0xff]  ;;  %v2843_v35 = vadd.f32 %v2842_v32, %v2805_v31  ;;  %v1942_v40 = vld [vmem:[%s9601_s0 + $0x1d0] sm:$0xff] }
 0x409   : > { %3286 = vmatpush.msrb.mxu2 %v2125_v36  ;;  %3210 = vmatpush.msrb.mxu0 %v1997_v41  ;;  %v2349_v36 = vld [vmem:[%s7153_s24 + $0xbe8] sm:$0xff] }
 0x40a   : > { %2932 = vmatmul.f32.gmra.mxu0 %v1960_v24  ;;  %3104 = vmatmul.f32.vlgmr.msra.gmra.mxu1 %v1893_v39  ;;  %v2037_v24 = vld [vmem:[%s7153_s24 + $0x228] sm:$0xff]  ;;  %v1940_v39 = vld [vmem:[%s9601_s0 + $0x1c0] sm:$0xff]  ;;  %v2880_v41 = vpop.f32.mrf.mxu3 }
 0x40b   : > { %3324 = vmatpush.msrb.mxu3 %v2189_v42  ;;  %3248 = vmatpush.msrb.mxu1 %v2061_v44  ;;  %v2769_v38 = vpop.f32.mrf.mxu0  ;;  %v7641_v42 = vadd.f32 %v2880_v41, %v2843_v35  ;;  %v1941_v44 = vld [vmem:[%s9601_s0 + $0x1c8] sm:$0xff] }
 0x40c   : > { %3287 = vmatpush.msrb.mxu2 %v2121_v45  ;;  %3211 = vmatpush.msrb.mxu0 %v1993_v46  ;;  %v2807_v43 = vpop.f32.mrf.mxu1  ;;  %v2281_v45 = vld [vmem:[%s7153_s24 + $0x9c8] sm:$0xff] }
 0x40d   : > { %3325 = vmatpush.msrb.mxu3 %v2185_v47  ;;  %3249 = vmatpush.msrb.mxu1 %v2057_v49  ;;  %v2473_v46 = vld [vmem:[%s7153_s24 + $0xfc8] sm:$0xff]  ;;  %v1943_v47 = vld [vmem:[%s9601_s0 + $0x1d8] sm:$0xff] }
 0x40e   : > { %3288 = vmatpush.msrb.mxu2 %v2117_v48  ;;  %3212 = vmatpush.msrb.mxu0 %v1989_v53  ;;  %v2405_v48 = vld [vmem:[%s7153_s24 + $0xda8] sm:$0xff] }
 0x40f   : > { %3145 = vmatmul.f32.gmra.mxu2 %v1906_v51  ;;  %3326 = vmatpush.msrb.mxu3 %v2181_v54  ;;  %v2345_v49 = vld [vmem:[%s7153_s24 + $0xbc8] sm:$0xff]  ;;  %v2845_v53 = vpop.f32.mrf.mxu2 }
 0x410   : > { %3289 = vmatpush.msrb.mxu2 %v2113_v57  ;;  %5142 = vmatmul.msk.f32.gmra.mxu3 %vm2724_vm0, %v1907_v55  ;;  %v2469_v51 = vld [vmem:[%s7153_s24 + $0xfa8] sm:$0xff] }
 0x411   : > { %3250 = vmatpush.msrb.mxu1 %v2053_v56  ;;  %3213 = vmatpush.msrb.mxu0 %v1985_v58  ;;  %v2341_v55 = vld [vmem:[%s7153_s24 + $0xba8] sm:$0xff]  ;;  %v1952_v58 = vld [vmem:[%s9601_s0 + $0x220] sm:$0xff] }
 0x412   : > { %3066 = vmatmul.f32.vlgmr.msra.gmra.mxu0 %v1892_v37  ;;  %3107 = vmatmul.f32.gmra.mxu1 %v1905_v52  ;;  %v2409_v37 = vld [vmem:[%s7153_s24 + $0xdc8] sm:$0xff]  ;;  %v2808_v52 = vadd.f32 %v2807_v43, %v2769_v38  ;;  %v5212_v43 = vld [vmem:[%s9601_s0] sm:$0xff] }
 0x413   : > { %3327 = vmatpush.msrb.mxu3 %v2177_v59  ;;  %3290 = vmatpush.msrb.mxu2 %v2109_v60  ;;  %v2401_v56 = vld [vmem:[%s7153_s24 + $0xd88] sm:$0xff]  ;;  %v2772_v57 = vpop.f32.mrf.mxu0  ;;  %v1954_v59 = vld [vmem:[%s9601_s0 + $0x230] sm:$0xff]  ;;  %v2883_v60 = vpop.f32.mrf.mxu3 }
 0x414   : > { %3251 = vmatpush.msrb.mxu1 %v2049_v61  ;;  %3214 = vmatpush.msrb.mxu0 %v1981_v62  ;;  %v2846_v54 = vadd.f32 %v2845_v53, %v2808_v52  ;;  %v1953_v61 = vld [vmem:[%s9601_s0 + $0x228] sm:$0xff] }
 0x415   : > { %3328 = vmatpush.msrb.mxu3 %v2173_v63  ;;  %3291 = vmatpush.msrb.mxu2 %v2105_v6  ;;  %v2810_v63 = vpop.f32.mrf.mxu1  ;;  %v2273_v0 = vld [vmem:[%s7153_s24 + $0x988] sm:$0xff] }
 0x416   : > { %3252 = vmatpush.msrb.mxu1 %v2045_v5  ;;  %3215 = vmatpush.msrb.mxu0 %v1977_v8  ;;  %v7667_v62 = vadd.f32 %v2883_v60, %v2846_v54  ;;  %v2269_v5 = vld [vmem:[%s7153_s24 + $0x968] sm:$0xff] }
 0x417   : > { %3148 = vmatmul.f32.gmra.mxu2 %v1918_v2  ;;  %3329 = vmatpush.msrb.mxu3 %v2169_v9  ;;  %v2397_v2 = vld [vmem:[%s7153_s24 + $0xd68] sm:$0xff]  ;;  %v2848_v8 = vpop.f32.mrf.mxu2 }
 0x418   : > { %5143 = vmatmul.msk.f32.gmra.mxu3 %vm2724_vm0, %v1919_v7  ;;  %3292 = vmatpush.msrb.mxu2 %v2101_v10  ;;  %v2461_v6 = vld [vmem:[%s7153_s24 + $0xf68] sm:$0xff]  ;;  %v2811_v7 = vadd.f32 %v2810_v63, %v2772_v57  ;;  %v5216_v63 = vld [vmem:[%s9601_s0 + $0x60] sm:$0xff] }
 0x419   : > { %3253 = vmatpush.msrb.mxu1 %v2041_v13  ;;  %3216 = vmatpush.msrb.mxu0 %v1973_v15  ;;  %v2333_v9 = vld [vmem:[%s7153_s24 + $0xb68] sm:$0xff]  ;;  %v1964_v15 = vld [vmem:[%s9601_s0 + $0x280] sm:$0x1] }
 0x41a   : > { %3069 = vmatmul.f32.gmra.mxu0 %v1904_v50  ;;  %3110 = vmatmul.f32.gmra.mxu1 %v1917_v4  ;;  %v2277_v50 = vld [vmem:[%s7153_s24 + $0x9a8] sm:$0xff]  ;;  %v2849_v11 = vadd.f32 %v2848_v8, %v2811_v7  ;;  %v5219_v7 = vld [vmem:[%s9601_s0 + $0x78] sm:$0xff] }
 0x41b   : > { %3330 = vmatpush.msrb.mxu3 %v2165_v16  ;;  %3254 = vmatpush.msrb.mxu1 %v2037_v24  ;;  %v2337_v4 = vld [vmem:[%s7153_s24 + $0xb88] sm:$0xff]  ;;  %v1966_v16 = vld [vmem:[%s9601_s0 + $0x290] sm:$0x1]  ;;  %v2886_v17 = vpop.f32.mrf.mxu3  ;;  %v1967_v24 = vld [vmem:[%s9601_s0 + $0x298] sm:$0x1] }
 0x41c   : > { %3293 = vmatpush.msrb.mxu2 %v2097_v25  ;;  %3217 = vmatpush.msrb.mxu0 %v1969_v26  ;;  %v2393_v10 = vld [vmem:[%s7153_s24 + $0xd48] sm:$0xff] }
 0x41d   : > { %3331 = vmatpush.msrb.mxu3 %v2161_v29  ;;  %3255 = vmatpush.msrb.mxu1 %v2033_v30  ;;  %v2265_v12 = vld [vmem:[%s7153_s24 + $0x948] sm:$0xff] }
 0x41e   : > { %3430 = vmatpush.msra.mxu2 %v2413_v28  ;;  %3354 = vmatpush.msra.mxu0 %v2285_v33  ;;  %v2457_v13 = vld [vmem:[%s7153_s24 + $0xf48] sm:$0xff] }
 0x41f   : > { %3151 = vmatmul.f32.gmra.mxu2 %v1930_v19  ;;  %3468 = vmatpush.msra.mxu3 %v2477_v34  ;;  %v2813_v19 = vpop.f32.mrf.mxu1  ;;  %v1965_v20 = vld [vmem:[%s9601_s0 + $0x288] sm:$0x1]  ;;  %v2851_v30 = vpop.f32.mrf.mxu2 }
 0x420   : > { %5144 = vmatmul.msk.f32.gmra.mxu3 %vm2724_vm0, %v1931_v27  ;;  %3392 = vmatpush.msra.mxu1 %v2349_v36  ;;  %v2775_v14 = vpop.f32.mrf.mxu0  ;;  %v2329_v23 = vld [vmem:[%s7153_s24 + $0xb48] sm:$0xff] }
 0x421   : > { %3431 = vmatpush.msra.mxu2 %v2409_v37  ;;  %3355 = vmatpush.msra.mxu0 %v2281_v45  ;;  %v2261_v25 = vld [vmem:[%s7153_s24 + $0x928] sm:$0xff]  ;;  %v2814_v29 = vadd.f32 %v2813_v19, %v2775_v14 }
 0x422   : > { %3072 = vmatmul.f32.gmra.mxu0 %v1916_v1  ;;  %3113 = vmatmul.f32.gmra.mxu1 %v1929_v21  ;;  %v2465_v1 = vld [vmem:[%s7153_s24 + $0xf88] sm:$0xff] }
 0x423   : > { %3469 = vmatpush.msra.mxu3 %v2473_v46  ;;  %3432 = vmatpush.msra.mxu2 %v2405_v48  ;;  %v2389_v21 = vld [vmem:[%s7153_s24 + $0xd28] sm:$0xff]  ;;  %v2852_v31 = vadd.f32 %v2851_v30, %v2814_v29  ;;  %v2889_v36 = vpop.f32.mrf.mxu3  ;;  %v5223_v29 = vld [vmem:[%s9601_s0 + $0xd8] sm:$0xff] }
 0x424   : > { %3393 = vmatpush.msra.mxu1 %v2345_v49  ;;  %3356 = vmatpush.msra.mxu0 %v2277_v50  ;;  %v2325_v26 = vld [vmem:[%s7153_s24 + $0xb28] sm:$0xff]  ;;  %v5215_v49 = vld [vmem:[%s9601_s0 + $0x18] sm:$0xff] }
 0x425   : > { %3470 = vmatpush.msra.mxu3 %v2469_v51  ;;  %3433 = vmatpush.msra.mxu2 %v2401_v56  ;;  %v2453_v27 = vld [vmem:[%s7153_s24 + $0xf28] sm:$0xff]  ;;  %v7707_v37 = vadd.f32 %v2889_v36, %v2852_v31 }
 0x426   : > { %3394 = vmatpush.msra.mxu1 %v2341_v55  ;;  %3357 = vmatpush.msra.mxu0 %v2273_v0  ;;  %v2385_v28 = vld [vmem:[%s7153_s24 + $0xd08] sm:$0xff]  ;;  %v5217_v0 = vld [vmem:[%s9601_s0 + $0x70] sm:$0xff] }
 0x427   : > { %3154 = vmatmul.f32.gmra.mxu2 %v1942_v40  ;;  %3471 = vmatpush.msra.mxu3 %v2465_v1  ;;  %v2257_v32 = vld [vmem:[%s7153_s24 + $0x908] sm:$0xff]  ;;  %v2816_v38 = vpop.f32.mrf.mxu1  ;;  %v2854_v50 = vpop.f32.mrf.mxu2 }
 0x428   : > { %5145 = vmatmul.msk.f32.gmra.mxu3 %vm2724_vm0, %v1943_v47  ;;  %3434 = vmatpush.msra.mxu2 %v2397_v2  ;;  %v2449_v33 = vld [vmem:[%s7153_s24 + $0xf08] sm:$0xff] }
 0x429   : > { %3395 = vmatpush.msra.mxu1 %v2337_v4  ;;  %3358 = vmatpush.msra.mxu0 %v2269_v5  ;;  %v2381_v34 = vld [vmem:[%s7153_s24 + $0xce8] sm:$0xff] }
 0x42a   : > { %3075 = vmatmul.f32.gmra.mxu0 %v1928_v18  ;;  %3116 = vmatmul.f32.gmra.mxu1 %v1941_v44  ;;  %v7689_v18 = vadd.f32 %v2886_v17, %v2849_v11  ;;  %v2253_v40 = vld [vmem:[%s7153_s24 + $0x8e8] sm:$0xff]  ;;  %v5213_v44 = vld [vmem:[%s9601_s0 + $0x10] sm:$0xff] }
 0x42b   : > { %3472 = vmatpush.msra.mxu3 %v2461_v6  ;;  %3396 = vmatpush.msra.mxu1 %v2333_v9  ;;  %v2445_v41 = vld [vmem:[%s7153_s24 + $0xee8] sm:$0xff]  ;;  %v2892_v57 = vpop.f32.mrf.mxu3 }
 0x42c   : > { %3435 = vmatpush.msra.mxu2 %v2393_v10  ;;  %3359 = vmatpush.msra.mxu0 %v2265_v12  ;;  %v2317_v45 = vld [vmem:[%s7153_s24 + $0xae8] sm:$0xff] }
 0x42d   : > { %3473 = vmatpush.msra.mxu3 %v2457_v13  ;;  %3397 = vmatpush.msra.mxu1 %v2329_v23  ;;  %v2778_v35 = vpop.f32.mrf.mxu0  ;;  %v2377_v46 = vld [vmem:[%s7153_s24 + $0xcc8] sm:$0xff]  ;;  %v5220_v23 = vld [vmem:[%s9601_s0 + $0xc0] sm:$0xff] }
 0x42e   : > { %3436 = vmatpush.msra.mxu2 %v2389_v21  ;;  %3360 = vmatpush.msra.mxu0 %v2261_v25  ;;  %v2817_v47 = vadd.f32 %v2816_v38, %v2778_v35  ;;  %v5214_v48 = vld [vmem:[%s9601_s0 + $0x8] sm:$0xff] }
 0x42f   : > { %3157 = vmatmul.f32.gmra.mxu2 %v1954_v59  ;;  %3398 = vmatpush.msra.mxu1 %v2325_v26  ;;  %v2249_v51 = vld [vmem:[%s7153_s24 + $0x8c8] sm:$0xff]  ;;  %v2819_v59 = vpop.f32.mrf.mxu1  ;;  %v2857_v8 = vpop.f32.mrf.mxu2 }
 0x430   : > { %5146 = vmatmul.msk.f32.gmra.mxu3 %vm2724_vm0, %v1955_v3  ;;  %3437 = vmatpush.msra.mxu2 %v2385_v28  ;;  %v2441_v52 = vld [vmem:[%s7153_s24 + $0xec8] sm:$0xff]  ;;  %v2855_v53 = vadd.f32 %v2854_v50, %v2817_v47 }
 0x431   : > { %3474 = vmatpush.msra.mxu3 %v2453_v27  ;;  %3361 = vmatpush.msra.mxu0 %v2257_v32  ;;  %v2373_v54 = vld [vmem:[%s7153_s24 + $0xca8] sm:$0xff] }
 0x432   : > { %3078 = vmatmul.f32.gmra.mxu0 %v1940_v39  ;;  %3119 = vmatmul.f32.gmra.mxu1 %v1953_v61  ;;  %v2321_v39 = vld [vmem:[%s7153_s24 + $0xb08] sm:$0xff] }
 0x433   : > { %3475 = vmatpush.msra.mxu3 %v2449_v33  ;;  %3438 = vmatpush.msra.mxu2 %v2381_v34  ;;  %v2313_v55 = vld [vmem:[%s7153_s24 + $0xac8] sm:$0xff] }
 0x434   : > { %3399 = vmatpush.msra.mxu1 %v2321_v39  ;;  %3362 = vmatpush.msra.mxu0 %v2253_v40  ;;  %v2245_v60 = vld [vmem:[%s7153_s24 + $0x8a8] sm:$0xff] }
 0x435   : > { %3476 = vmatpush.msra.mxu3 %v2445_v41  ;;  %3439 = vmatpush.msra.mxu2 %v2377_v46  ;;  %v2437_v61 = vld [vmem:[%s7153_s24 + $0xea8] sm:$0xff]  ;;  %v5225_v46 = vld [vmem:[%s9601_s0 + $0x130] sm:$0xff] }
 0x436   : > { %3400 = vmatpush.msra.mxu1 %v2317_v45  ;;  %3363 = vmatpush.msra.mxu0 %v2249_v51  ;;  %v2309_v1 = vld [vmem:[%s7153_s24 + $0xaa8] sm:$0xff]  ;;  %v5224_v45 = vld [vmem:[%s9601_s0 + $0x120] sm:$0xff]  ;;  %v5227_v51 = vld [vmem:[%s9601_s0 + $0x138] sm:$0xff] }
 0x437   : > { %3160 = vmatmul.f32.gmra.mxu2 %v1966_v16  ;;  %3477 = vmatpush.msra.mxu3 %v2441_v52  ;;  %v2369_v2 = vld [vmem:[%s7153_s24 + $0xc88] sm:$0xff]  ;;  %v2953_v19 = vpop.f32.mrf.mxu1  ;;  %v2991_v30 = vpop.f32.mrf.mxu2 }
 0x438   : > { %5147 = vmatmul.msk.f32.gmra.mxu3 %vm2724_vm0, %v1967_v24  ;;  %3401 = vmatpush.msra.mxu1 %v2313_v55  ;;  %v2241_v3 = vld [vmem:[%s7153_s24 + $0x888] sm:$0xff]  ;;  %v5221_v24 = vld [vmem:[%s9601_s0 + $0xd0] sm:$0xff] }
 0x439   : > { %3440 = vmatpush.msra.mxu2 %v2373_v54  ;;  %3364 = vmatpush.msra.mxu0 %v2245_v60  ;;  %v2433_v4 = vld [vmem:[%s7153_s24 + $0xe88] sm:$0xff] }
 0x43a   : > { %3081 = vmatmul.f32.gmra.mxu0 %v1952_v58  ;;  %3122 = vmatmul.f32.gmra.mxu1 %v1965_v20  ;;  %v2781_v56 = vpop.f32.mrf.mxu0  ;;  %v7730_v58 = vadd.f32 %v2892_v57, %v2855_v53  ;;  %v5218_v6 = vld [vmem:[%s9601_s0 + $0x68] sm:$0xff] }
 0x43b   : > { %3478 = vmatpush.msra.mxu3 %v2437_v61  ;;  %v2820_v5 = vadd.f32 %v2819_v59, %v2781_v56  ;;  %3441 = vmatpush.msra.mxu2 %v2369_v2  ;;  %v2365_v9 = vld [vmem:[%s7153_s24 + $0xc68] sm:$0xff]  ;;  %v5228_v2 = vld [vmem:[%s9601_s0 + $0x180] sm:$0xff] }
 0x43c   : > { %3402 = vmatpush.msra.mxu1 %v2309_v1  ;;  %3365 = vmatpush.msra.mxu0 %v2241_v3  ;;  %v2305_v11 = vld [vmem:[%s7153_s24 + $0xa88] sm:$0xff]  ;;  %v5229_v3 = vld [vmem:[%s9601_s0 + $0x190] sm:$0xff] }
 0x43d   : > { %v2858_v10 = vadd.f32 %v2857_v8, %v2820_v5  ;;  %3479 = vmatpush.msra.mxu3 %v2433_v4  ;;  %v2237_v12 = vld [vmem:[%s7153_s24 + $0x868] sm:$0xff]  ;;  %3442 = vmatpush.msra.mxu2 %v2365_v9  ;;  %v5231_v9 = vld [vmem:[%s9601_s0 + $0x198] sm:$0xff] }
 0x43e   : > { %v2429_v13 = vld [vmem:[%s7153_s24 + $0xe68] sm:$0xff]  ;;  %3403 = vmatpush.msra.mxu1 %v2305_v11  ;;  %3366 = vmatpush.msra.mxu0 %v2237_v12 }
 0x43f   : > { %3294 = vmatmul.f32.vlgmr.msrb.gmra.mxu2 %v5213_v44  ;;  %3480 = vmatpush.msra.mxu3 %v2429_v13  ;;  %v2301_v20 = vld [vmem:[%s7153_s24 + $0xa68] sm:$0xff]  ;;  %v2956_v40 = vpop.f32.mrf.mxu1  ;;  %v2994_v52 = vpop.f32.mrf.mxu2 }
 0x440   : > { %3332 = vmatmul.f32.vlgmr.msrb.gmra.mxu3 %v5215_v49  ;;  %v2361_v21 = vld [vmem:[%s7153_s24 + $0xc48] sm:$0xff]  ;;  %3404 = vmatpush.msra.mxu1 %v2301_v20 }
 0x441   : > { %v2233_v25 = vld [vmem:[%s7153_s24 + $0x848] sm:$0xff]  ;;  %3443 = vmatpush.msra.mxu2 %v2361_v21 }
 0x442   : > { %3084 = vmatmul.f32.gmra.mxu0 %v1964_v15  ;;  %3256 = vmatmul.f32.vlgmr.msrb.gmra.mxu1 %v5214_v48  ;;  %v2895_v15 = vpop.f32.mrf.mxu3  ;;  %v2425_v26 = vld [vmem:[%s7153_s24 + $0xe48] sm:$0xff] }
 0x443   : > { %v7755_v17 = vadd.f32 %v2895_v15, %v2858_v10  ;;  %v5222_v28 = vld [vmem:[%s9601_s0 + $0xc8] sm:$0xff]  ;;  %3367 = vmatpush.msra.mxu0 %v2233_v25  ;;  %3481 = vmatpush.msra.mxu3 %v2425_v26  ;;  %v5232_v25 = vld [vmem:[%s9601_s0 + $0x1e0] sm:$0xff] }
 0x444   : > { %v2297_v31 = vld [vmem:[%s7153_s24 + $0xa48] sm:$0xff] }
 0x445   : > { %3405 = vmatpush.msra.mxu1 %v2297_v31  ;;  %v2229_v33 = vld [vmem:[%s7153_s24 + $0x828] sm:$0xff] }
 0x446   : > { %v2421_v34 = vld [vmem:[%s7153_s24 + $0xe28] sm:$0xff]  ;;  %3368 = vmatpush.msra.mxu0 %v2229_v33 }
 0x447   : > { %3297 = vmatmul.f32.gmra.mxu2 %v5217_v0  ;;  %v2915_v14 = vpop.f32.mrf.mxu0  ;;  %3482 = vmatpush.msra.mxu3 %v2421_v34  ;;  %v2293_v41 = vld [vmem:[%s7153_s24 + $0xa28] sm:$0xff]  ;;  %v2959_v0 = vpop.f32.mrf.mxu1 }
 0x448   : > { %3335 = vmatmul.f32.gmra.mxu3 %v5219_v7  ;;  %v2916_v16 = vadd.f32 %v2915_v14, %v7619_v22  ;;  %v2357_v22 = vld [vmem:[%s7153_s24 + $0xc28] sm:$0xff]  ;;  %3406 = vmatpush.msra.mxu1 %v2293_v41  ;;  %v2997_v10 = vpop.f32.mrf.mxu2 }
 0x449   : > { %3444 = vmatpush.msra.mxu2 %v2357_v22  ;;  %v2225_v44 = vld [vmem:[%s7153_s24 + $0x808] sm:$0xff]  ;;  %v5233_v22 = vld [vmem:[%s9601_s0 + $0x1f0] sm:$0xff] }
 0x44a   : > { %3218 = vmatmul.f32.vlgmr.msrb.gmra.mxu0 %v5212_v43  ;;  %3259 = vmatmul.f32.gmra.mxu1 %v5218_v6  ;;  %v2954_v27 = vadd.f32 %v2953_v19, %v2916_v16  ;;  %v3029_v38 = vpop.f32.mrf.mxu3  ;;  %v2353_v43 = vld [vmem:[%s7153_s24 + $0xc08] sm:$0xff] }
 0x44b   : > { %3445 = vmatpush.msra.mxu2 %v2353_v43  ;;  %v2417_v47 = vld [vmem:[%s7153_s24 + $0xe08] sm:$0xff]  ;;  %3369 = vmatpush.msra.mxu0 %v2225_v44 }
 0x44c   : > { %v2992_v32 = vadd.f32 %v2991_v30, %v2954_v27  ;;  %v2289_v48 = vld [vmem:[%s7153_s24 + $0xa08] sm:$0xff]  ;;  %3483 = vmatpush.msra.mxu3 %v2417_v47  ;;  %v5235_v30 = vld [vmem:[%s9601_s0 + $0x1f8] sm:$0xff]  ;;  %v5237_v47 = vld [vmem:[%s9601_s0 + $0x250] sm:$0x1] }
 0x44d   : > { %v5226_v50 = vld [vmem:[%s9601_s0 + $0x128] sm:$0xff]  ;;  %3407 = vmatpush.msra.mxu1 %v2289_v48 }
 0x44e   : > { %v7778_v39 = vadd.f32 %v3029_v38, %v2992_v32  ;;  %v2541_v53 = vld [vmem:[%s7153_s24 + $0x11e8] sm:$0xff] }
 0x44f   : > { %3300 = vmatmul.f32.gmra.mxu2 %v5221_v24  ;;  %v2721_v54 = vld [vmem:[%s7153_s24 + $0x1788] sm:$0xff]  ;;  %3506 = vmatpush.msrb.mxu0 %v2541_v53  ;;  %v2962_v21 = vpop.f32.mrf.mxu1  ;;  %v5239_v53 = vld [vmem:[%s9601_s0 + $0x258] sm:$0x1] }
 0x450   : > { %3338 = vmatmul.f32.gmra.mxu3 %v5223_v29  ;;  %v2605_v56 = vld [vmem:[%s7153_s24 + $0x13e8] sm:$0xff]  ;;  %v3000_v31 = vpop.f32.mrf.mxu2 }
 0x451   : > { %v2665_v57 = vld [vmem:[%s7153_s24 + $0x15c8] sm:$0xff]  ;;  %3623 = vmatpush.msrb.mxu3 %v2721_v54  ;;  %3544 = vmatpush.msrb.mxu1 %v2605_v56 }
 0x452   : > { %3221 = vmatmul.f32.gmra.mxu0 %v5216_v63  ;;  %3262 = vmatmul.f32.gmra.mxu1 %v5222_v28  ;;  %v3032_v61 = vpop.f32.mrf.mxu3  ;;  %v2537_v1 = vld [vmem:[%s7153_s24 + $0x11c8] sm:$0xff] }
 0x453   : > { %v2661_v4 = vld [vmem:[%s7153_s24 + $0x15a8] sm:$0xff]  ;;  %3507 = vmatpush.msrb.mxu0 %v2537_v1 }
 0x454   : > { %v2918_v35 = vpop.f32.mrf.mxu0  ;;  %v2601_v5 = vld [vmem:[%s7153_s24 + $0x13c8] sm:$0xff] }
 0x455   : > { %v2919_v36 = vadd.f32 %v2918_v35, %v7641_v42  ;;  %v2669_v42 = vld [vmem:[%s7153_s24 + $0x15e8] sm:$0xff]  ;;  %3545 = vmatpush.msrb.mxu1 %v2601_v5 }
 0x456   : > { %3582 = vmatpush.msrb.mxu2 %v2669_v42  ;;  %v2533_v6 = vld [vmem:[%s7153_s24 + $0x11a8] sm:$0xff]  ;;  %v5236_v42 = vld [vmem:[%s9601_s0 + $0x240] sm:$0x1] }
 0x457   : > { %3303 = vmatmul.f32.gmra.mxu2 %v5225_v46  ;;  %v2957_v49 = vadd.f32 %v2956_v40, %v2919_v36  ;;  %v5230_v8 = vld [vmem:[%s9601_s0 + $0x188] sm:$0xff]  ;;  %3508 = vmatpush.msrb.mxu0 %v2533_v6  ;;  %v2965_v44 = vpop.f32.mrf.mxu1 }
 0x458   : > { %3341 = vmatmul.f32.gmra.mxu3 %v5227_v51  ;;  %3583 = vmatpush.msrb.mxu2 %v2665_v57  ;;  %v2597_v12 = vld [vmem:[%s7153_s24 + $0x13a8] sm:$0xff]  ;;  %v3003_v54 = vpop.f32.mrf.mxu2 }
 0x459   : > { %v2995_v55 = vadd.f32 %v2994_v52, %v2957_v49  ;;  %v2657_v13 = vld [vmem:[%s7153_s24 + $0x1588] sm:$0xff]  ;;  %3546 = vmatpush.msrb.mxu1 %v2597_v12 }
 0x45a   : > { %3224 = vmatmul.f32.gmra.mxu0 %v5220_v23  ;;  %3265 = vmatmul.f32.gmra.mxu1 %v5226_v50  ;;  %v2713_v14 = vld [vmem:[%s7153_s24 + $0x1748] sm:$0xff]  ;;  %v3035_v19 = vpop.f32.mrf.mxu3 }
 0x45b   : > { %v7803_v63 = vadd.f32 %v3032_v61, %v2995_v55  ;;  %3584 = vmatpush.msrb.mxu2 %v2661_v4  ;;  %v2529_v23 = vld [vmem:[%s7153_s24 + $0x1188] sm:$0xff]  ;;  %v5241_v4 = vld [vmem:[%s9601_s0 + $0x30] sm:$0xff] }
 0x45c   : > { %v2653_v24 = vld [vmem:[%s7153_s24 + $0x1568] sm:$0xff]  ;;  %3509 = vmatpush.msrb.mxu0 %v2529_v23 }
 0x45d   : > { %3585 = vmatpush.msrb.mxu2 %v2657_v13  ;;  %v2709_v26 = vld [vmem:[%s7153_s24 + $0x1728] sm:$0xff] }
 0x45e   : > { %v2525_v27 = vld [vmem:[%s7153_s24 + $0x1168] sm:$0xff] }
 0x45f   : > { %3306 = vmatmul.f32.gmra.mxu2 %v5229_v3  ;;  %v5234_v29 = vld [vmem:[%s9601_s0 + $0x1e8] sm:$0xff]  ;;  %3510 = vmatpush.msrb.mxu0 %v2525_v27  ;;  %v5240_v3 = vld [vmem:[%s9601_s0 + $0x20] sm:$0xff] }
 0x460   : > { %3344 = vmatmul.f32.gmra.mxu3 %v5231_v9  ;;  %3586 = vmatpush.msrb.mxu2 %v2653_v24  ;;  %v2589_v32 = vld [vmem:[%s7153_s24 + $0x1368] sm:$0xff] }
 0x461   : > { %v2921_v59 = vpop.f32.mrf.mxu0  ;;  %v2649_v33 = vld [vmem:[%s7153_s24 + $0x1548] sm:$0xff] }
 0x462   : > { %3227 = vmatmul.f32.gmra.mxu0 %v5224_v45  ;;  %v2922_v60 = vadd.f32 %v2921_v59, %v7667_v62  ;;  %v2717_v62 = vld [vmem:[%s7153_s24 + $0x1768] sm:$0xff]  ;;  %3268 = vmatmul.f32.gmra.mxu1 %v5230_v8  ;;  %v3038_v41 = vpop.f32.mrf.mxu3 }
 0x463   : > { %3624 = vmatpush.msrb.mxu3 %v2717_v62  ;;  %3587 = vmatpush.msrb.mxu2 %v2649_v33  ;;  %v2521_v35 = vld [vmem:[%s7153_s24 + $0x1148] sm:$0xff] }
 0x464   : > { %v2960_v7 = vadd.f32 %v2959_v0, %v2922_v60  ;;  %v2705_v36 = vld [vmem:[%s7153_s24 + $0x1708] sm:$0xff]  ;;  %3511 = vmatpush.msrb.mxu0 %v2521_v35 }
 0x465   : > { %3625 = vmatpush.msrb.mxu3 %v2713_v14  ;;  %v2645_v45 = vld [vmem:[%s7153_s24 + $0x1528] sm:$0xff] }
 0x466   : > { %v2998_v11 = vadd.f32 %v2997_v10, %v2960_v7  ;;  %v2585_v46 = vld [vmem:[%s7153_s24 + $0x1348] sm:$0xff]  ;;  %3588 = vmatpush.msrb.mxu2 %v2645_v45  ;;  %v5243_v10 = vld [vmem:[%s9601_s0 + $0x38] sm:$0xff] }
 0x467   : > { %3309 = vmatmul.f32.gmra.mxu2 %v5233_v22  ;;  %3626 = vmatpush.msrb.mxu3 %v2709_v26  ;;  %v2517_v48 = vld [vmem:[%s7153_s24 + $0x1128] sm:$0xff]  ;;  %v5245_v22 = vld [vmem:[%s9601_s0 + $0x90] sm:$0xff] }
 0x468   : > { %v7826_v20 = vadd.f32 %v3035_v19, %v2998_v11  ;;  %3347 = vmatmul.f32.gmra.mxu3 %v5235_v30  ;;  %v2701_v49 = vld [vmem:[%s7153_s24 + $0x16e8] sm:$0xff]  ;;  %3512 = vmatpush.msrb.mxu0 %v2517_v48  ;;  %v3006_v11 = vpop.f32.mrf.mxu2 }
 0x469   : > { %3627 = vmatpush.msrb.mxu3 %v2705_v36  ;;  %v2641_v50 = vld [vmem:[%s7153_s24 + $0x1508] sm:$0xff] }
 0x46a   : > { %3230 = vmatmul.f32.gmra.mxu0 %v5228_v2  ;;  %3271 = vmatmul.f32.gmra.mxu1 %v5234_v29  ;;  %v5238_v52 = vld [vmem:[%s9601_s0 + $0x248] sm:$0x1]  ;;  %v3041_v0 = vpop.f32.mrf.mxu3  ;;  %v2968_v2 = vpop.f32.mrf.mxu1 }
 0x46b   : > { %3628 = vmatpush.msrb.mxu3 %v2701_v49  ;;  %3589 = vmatpush.msrb.mxu2 %v2641_v50  ;;  %v2513_v56 = vld [vmem:[%s7153_s24 + $0x1108] sm:$0xff] }
 0x46c   : > { %v2637_v57 = vld [vmem:[%s7153_s24 + $0x14e8] sm:$0xff]  ;;  %3513 = vmatpush.msrb.mxu0 %v2513_v56 }
 0x46d   : > { %v2697_v59 = vld [vmem:[%s7153_s24 + $0x16c8] sm:$0xff]  ;;  %3590 = vmatpush.msrb.mxu2 %v2637_v57 }
 0x46e   : > { %v2924_v15 = vpop.f32.mrf.mxu0  ;;  %3629 = vmatpush.msrb.mxu3 %v2697_v59  ;;  %v2509_v62 = vld [vmem:[%s7153_s24 + $0x10e8] sm:$0xff] }
 0x46f   : > { %v2925_v16 = vadd.f32 %v2924_v15, %v7689_v18  ;;  %v2593_v18 = vld [vmem:[%s7153_s24 + $0x1388] sm:$0xff]  ;;  %3312 = vmatmul.f32.gmra.mxu2 %v5237_v47  ;;  %3514 = vmatpush.msrb.mxu0 %v2509_v62  ;;  %v5249_v47 = vld [vmem:[%s9601_s0 + $0xf0] sm:$0xff]  ;;  %v5252_v62 = vld [vmem:[%s9601_s0 + $0x140] sm:$0xff] }
 0x470   : > { %3547 = vmatpush.msrb.mxu1 %v2593_v18  ;;  %3350 = vmatmul.f32.gmra.mxu3 %v5239_v53  ;;  %v5242_v6 = vld [vmem:[%s9601_s0 + $0x28] sm:$0xff]  ;;  %v5251_v53 = vld [vmem:[%s9601_s0 + $0xf8] sm:$0xff] }
 0x471   : > { %v2963_v28 = vadd.f32 %v2962_v21, %v2925_v16  ;;  %v2573_v7 = vld [vmem:[%s7153_s24 + $0x12e8] sm:$0xff] }
 0x472   : > { %3233 = vmatmul.f32.gmra.mxu0 %v5232_v25  ;;  %3548 = vmatpush.msrb.mxu1 %v2589_v32  ;;  %v2633_v8 = vld [vmem:[%s7153_s24 + $0x14c8] sm:$0xff]  ;;  %v3044_v21 = vpop.f32.mrf.mxu3  ;;  %v2971_v24 = vpop.f32.mrf.mxu1  ;;  %v5244_v25 = vld [vmem:[%s9601_s0 + $0x80] sm:$0xff] }
 0x473   : > { %v3001_v34 = vadd.f32 %v3000_v31, %v2963_v28  ;;  %3274 = vmatmul.f32.gmra.mxu1 %v5238_v52  ;;  %v2693_v9 = vld [vmem:[%s7153_s24 + $0x16a8] sm:$0xff]  ;;  %3591 = vmatpush.msrb.mxu2 %v2633_v8  ;;  %v5247_v31 = vld [vmem:[%s9601_s0 + $0x98] sm:$0xff]  ;;  %v3009_v32 = vpop.f32.mrf.mxu2 }
 0x474   : > { %3549 = vmatpush.msrb.mxu1 %v2585_v46  ;;  %v2505_v12 = vld [vmem:[%s7153_s24 + $0x10c8] sm:$0xff]  ;;  %3630 = vmatpush.msrb.mxu3 %v2693_v9 }
 0x475   : > { %v7850_v43 = vadd.f32 %v3038_v41, %v3001_v34  ;;  %v2629_v14 = vld [vmem:[%s7153_s24 + $0x14a8] sm:$0xff]  ;;  %3515 = vmatpush.msrb.mxu0 %v2505_v12 }
 0x476   : > { %v2569_v15 = vld [vmem:[%s7153_s24 + $0x12c8] sm:$0xff]  ;;  %3592 = vmatpush.msrb.mxu2 %v2629_v14  ;;  %v2222_v14 = vld [vmem:[%s7153_s24 + $0x7f0] sm:$0xff] }
 0x477   : > { %v2927_v38 = vpop.f32.mrf.mxu0  ;;  %3446 = vmatmul.f32.vlgmr.msra.gmra.mxu2 %v5241_v4  ;;  %v2689_v18 = vld [vmem:[%s7153_s24 + $0x1688] sm:$0xff] }
 0x478   : > { %v2928_v40 = vadd.f32 %v2927_v38, %v7707_v37  ;;  %v2581_v37 = vld [vmem:[%s7153_s24 + $0x1328] sm:$0xff]  ;;  %3484 = vmatmul.f32.vlgmr.msra.gmra.mxu3 %v5243_v10 }
 0x479   : > { %3550 = vmatpush.msrb.mxu1 %v2581_v37  ;;  %v2565_v26 = vld [vmem:[%s7153_s24 + $0x12a8] sm:$0xff]  ;;  %3631 = vmatpush.msrb.mxu3 %v2689_v18  ;;  %v5256_v18 = vld [vmem:[%s9601_s0 + $0x1a0] sm:$0xff] }
 0x47a   : > { %3236 = vmatmul.f32.gmra.mxu0 %v5236_v42  ;;  %v2966_v51 = vadd.f32 %v2965_v44, %v2928_v40  ;;  %v5246_v28 = vld [vmem:[%s9601_s0 + $0x88] sm:$0xff]  ;;  %v3047_v41 = vpop.f32.mrf.mxu3  ;;  %v5248_v42 = vld [vmem:[%s9601_s0 + $0xe0] sm:$0xff] }
 0x47b   : > { %3408 = vmatmul.f32.vlgmr.msra.gmra.mxu1 %v5242_v6  ;;  %v2625_v29 = vld [vmem:[%s7153_s24 + $0x1488] sm:$0xff] }
 0x47c   : > { %v3004_v55 = vadd.f32 %v3003_v54, %v2966_v51  ;;  %v2497_v30 = vld [vmem:[%s7153_s24 + $0x1088] sm:$0xff]  ;;  %3593 = vmatpush.msrb.mxu2 %v2625_v29  ;;  %v3143_v54 = vpop.f32.mrf.mxu2  ;;  %v2150_v29 = vld [vmem:[%s7153_s24 + $0x5b0] sm:$0xff] }
 0x47d   : > { %v2685_v33 = vld [vmem:[%s7153_s24 + $0x1668] sm:$0xff] }
 0x47e   : > { %v7874_v1 = vadd.f32 %v3041_v0, %v3004_v55  ;;  %v2621_v34 = vld [vmem:[%s7153_s24 + $0x1468] sm:$0xff]  ;;  %3632 = vmatpush.msrb.mxu3 %v2685_v33  ;;  %v2022_v33 = vld [vmem:[%s7153_s24 + $0x1b0] sm:$0xff] }
 0x47f   : > { %v2930_v60 = vpop.f32.mrf.mxu0  ;;  %3449 = vmatmul.f32.gmra.mxu2 %v5245_v22  ;;  %v2561_v36 = vld [vmem:[%s7153_s24 + $0x1288] sm:$0xff] }
 0x480   : > { %v2931_v61 = vadd.f32 %v2930_v60, %v7730_v58  ;;  %v2577_v58 = vld [vmem:[%s7153_s24 + $0x1308] sm:$0xff]  ;;  %3487 = vmatmul.f32.gmra.mxu3 %v5247_v31  ;;  %3594 = vmatpush.msrb.mxu2 %v2621_v34  ;;  %v5259_v34 = vld [vmem:[%s9601_s0 + $0x1b8] sm:$0xff] }
 0x481   : > { %3551 = vmatpush.msrb.mxu1 %v2577_v58  ;;  %v2493_v38 = vld [vmem:[%s7153_s24 + $0x1068] sm:$0xff] }
 0x482   : > { %3370 = vmatmul.f32.vlgmr.msra.gmra.mxu0 %v5240_v3  ;;  %v2969_v5 = vadd.f32 %v2968_v2, %v2931_v61  ;;  %v2617_v48 = vld [vmem:[%s7153_s24 + $0x1448] sm:$0xff]  ;;  %v3181_v0 = vpop.f32.mrf.mxu3 }
 0x483   : > { %3552 = vmatpush.msrb.mxu1 %v2573_v7  ;;  %v2681_v37 = vld [vmem:[%s7153_s24 + $0x1648] sm:$0xff]  ;;  %3595 = vmatpush.msrb.mxu2 %v2617_v48  ;;  %v2158_v7 = vld [vmem:[%s7153_s24 + $0x5f0] sm:$0xff]  ;;  %v5260_v48 = vld [vmem:[%s9601_s0 + $0x200] sm:$0xff] }
 0x484   : > { %v3007_v13 = vadd.f32 %v3006_v11, %v2969_v5  ;;  %3411 = vmatmul.f32.gmra.mxu1 %v5246_v28  ;;  %v5250_v50 = vld [vmem:[%s9601_s0 + $0xe8] sm:$0xff]  ;;  %3633 = vmatpush.msrb.mxu3 %v2681_v37  ;;  %v5253_v5 = vld [vmem:[%s9601_s0 + $0x150] sm:$0xff]  ;;  %v5255_v11 = vld [vmem:[%s9601_s0 + $0x158] sm:$0xff] }
 0x485   : > { %3553 = vmatpush.msrb.mxu1 %v2569_v15  ;;  %v2489_v51 = vld [vmem:[%s7153_s24 + $0x1048] sm:$0xff]  ;;  %v2218_v28 = vld [vmem:[%s7153_s24 + $0x7d0] sm:$0xff] }
 0x486   : > { %v7897_v23 = vadd.f32 %v3044_v21, %v3007_v13  ;;  %v2613_v52 = vld [vmem:[%s7153_s24 + $0x1428] sm:$0xff]  ;;  %v2030_v13 = vld [vmem:[%s7153_s24 + $0x1f0] sm:$0xff] }
 0x487   : > { %v2933_v16 = vpop.f32.mrf.mxu0  ;;  %3554 = vmatpush.msrb.mxu1 %v2565_v26  ;;  %v3105_v46 = vpop.f32.mrf.mxu1  ;;  %3452 = vmatmul.f32.gmra.mxu2 %v5249_v47  ;;  %v2553_v55 = vld [vmem:[%s7153_s24 + $0x1248] sm:$0xff]  ;;  %v5257_v26 = vld [vmem:[%s9601_s0 + $0x1b0] sm:$0xff] }
 0x488   : > { %v2934_v19 = vadd.f32 %v2933_v16, %v7755_v17  ;;  %v2501_v17 = vld [vmem:[%s7153_s24 + $0x10a8] sm:$0xff]  ;;  %3490 = vmatmul.f32.gmra.mxu3 %v5251_v53  ;;  %3596 = vmatpush.msrb.mxu2 %v2613_v52  ;;  %v2094_v16 = vld [vmem:[%s7153_s24 + $0x3f0] sm:$0xff] }
 0x489   : > { %3516 = vmatpush.msrb.mxu0 %v2501_v17  ;;  %3555 = vmatpush.msrb.mxu1 %v2561_v36  ;;  %v2677_v56 = vld [vmem:[%s7153_s24 + $0x1628] sm:$0xff]  ;;  %v2214_v36 = vld [vmem:[%s7153_s24 + $0x7b0] sm:$0xff] }
 0x48a   : > { %3373 = vmatmul.f32.gmra.mxu0 %v5244_v25  ;;  %v2972_v27 = vadd.f32 %v2971_v24, %v2934_v19  ;;  %v2485_v59 = vld [vmem:[%s7153_s24 + $0x1028] sm:$0xff]  ;;  %3634 = vmatpush.msrb.mxu3 %v2677_v56  ;;  %v2154_v19 = vld [vmem:[%s7153_s24 + $0x5d0] sm:$0xff] }
 0x48b   : > { %3517 = vmatpush.msrb.mxu0 %v2497_v30  ;;  %v2549_v4 = vld [vmem:[%s7153_s24 + $0x1228] sm:$0xff]  ;;  %v5261_v37 = vld [vmem:[%s9601_s0 + $0x210] sm:$0xff] }
 0x48c   : > { %v3010_v35 = vadd.f32 %v3009_v32, %v2972_v27  ;;  %3414 = vmatmul.f32.gmra.mxu1 %v5250_v50  ;;  %v2609_v58 = vld [vmem:[%s7153_s24 + $0x1408] sm:$0xff]  ;;  %v2026_v27 = vld [vmem:[%s7153_s24 + $0x1d0] sm:$0xff] }
 0x48d   : > { %3518 = vmatpush.msrb.mxu0 %v2493_v38  ;;  %3597 = vmatpush.msrb.mxu2 %v2609_v58  ;;  %v2673_v6 = vld [vmem:[%s7153_s24 + $0x1608] sm:$0xff]  ;;  %v2090_v32 = vld [vmem:[%s7153_s24 + $0x3d0] sm:$0xff] }
 0x48e   : > { %v7921_v45 = vadd.f32 %v3047_v41, %v3010_v35  ;;  %v2545_v8 = vld [vmem:[%s7153_s24 + $0x1208] sm:$0xff]  ;;  %3635 = vmatpush.msrb.mxu3 %v2673_v6  ;;  %v2146_v41 = vld [vmem:[%s7153_s24 + $0x590] sm:$0xff] }
 0x48f   : > { %v3067_v40 = vpop.f32.mrf.mxu0  ;;  %3519 = vmatpush.msrb.mxu0 %v2489_v51  ;;  %v3108_v3 = vpop.f32.mrf.mxu1  ;;  %3455 = vmatmul.f32.gmra.mxu2 %v5253_v5  ;;  %v5254_v10 = vld [vmem:[%s9601_s0 + $0x148] sm:$0xff]  ;;  %v5263_v51 = vld [vmem:[%s9601_s0 + $0x218] sm:$0xff] }
 0x490   : > { %v3068_v44 = vadd.f32 %v3067_v40, %v7778_v39  ;;  %v2557_v39 = vld [vmem:[%s7153_s24 + $0x1268] sm:$0xff]  ;;  %3493 = vmatmul.f32.gmra.mxu3 %v5255_v11  ;;  %3734 = vmatpush.msra.mxu2 %v2158_v7  ;;  %v2086_v40 = vld [vmem:[%s7153_s24 + $0x3b0] sm:$0xff] }
 0x491   : > { %3556 = vmatpush.msrb.mxu1 %v2557_v39  ;;  %3520 = vmatpush.msrb.mxu0 %v2485_v59  ;;  %v5258_v31 = vld [vmem:[%s9601_s0 + $0x1a8] sm:$0xff]  ;;  %v2018_v11 = vld [vmem:[%s7153_s24 + $0x190] sm:$0xff] }
 0x492   : > { %3376 = vmatmul.f32.gmra.mxu0 %v5248_v42  ;;  %v3106_v49 = vadd.f32 %v3105_v46, %v3068_v44  ;;  %v3146_v12 = vpop.f32.mrf.mxu2  ;;  %3772 = vmatpush.msra.mxu3 %v2222_v14  ;;  %v2210_v14 = vld [vmem:[%s7153_s24 + $0x790] sm:$0xff] }
 0x493   : > { %3557 = vmatpush.msrb.mxu1 %v2553_v55  ;;  %v3184_v25 = vpop.f32.mrf.mxu3  ;;  %3735 = vmatpush.msra.mxu2 %v2154_v19  ;;  %v5271_v19 = vld [vmem:[%s9601_s0 + $0x58] sm:$0xff] }
 0x494   : > { %v3144_v57 = vadd.f32 %v3143_v54, %v3106_v49  ;;  %3417 = vmatmul.f32.gmra.mxu1 %v5254_v10  ;;  %3773 = vmatpush.msra.mxu3 %v2218_v28  ;;  %v5269_v10 = vld [vmem:[%s9601_s0 + $0x50] sm:$0xff] }
 0x495   : > { %3558 = vmatpush.msrb.mxu1 %v2549_v4  ;;  %3736 = vmatpush.msra.mxu2 %v2150_v29  ;;  %v5267_v4 = vld [vmem:[%s9601_s0 + $0x278] sm:$0x1] }
 0x496   : > { %v7944_v2 = vadd.f32 %v3181_v0, %v3144_v57  ;;  %3774 = vmatpush.msra.mxu3 %v2214_v36  ;;  %v5273_v36 = vld [vmem:[%s9601_s0 + $0xb0] sm:$0xff] }
 0x497   : > { %v3070_v60 = vpop.f32.mrf.mxu0  ;;  %3559 = vmatpush.msrb.mxu1 %v2545_v8  ;;  %v3111_v17 = vpop.f32.mrf.mxu1  ;;  %3458 = vmatmul.f32.gmra.mxu2 %v5257_v26  ;;  %v2138_v26 = vld [vmem:[%s7153_s24 + $0x550] sm:$0xff] }
 0x498   : > { %v3071_v61 = vadd.f32 %v3070_v60, %v7803_v63  ;;  %v2481_v63 = vld [vmem:[%s7153_s24 + $0x1008] sm:$0xff]  ;;  %3496 = vmatmul.f32.gmra.mxu3 %v5259_v34  ;;  %3737 = vmatpush.msra.mxu2 %v2146_v41  ;;  %v5264_v60 = vld [vmem:[%s9601_s0 + $0x260] sm:$0x1]  ;;  %v2198_v41 = vld [vmem:[%s7153_s24 + $0x730] sm:$0xff] }
 0x499   : > { %3521 = vmatpush.msrb.mxu0 %v2481_v63  ;;  %3696 = vmatpush.msra.mxu1 %v2094_v16  ;;  %v2082_v16 = vld [vmem:[%s7153_s24 + $0x390] sm:$0xff] }
 0x49a   : > { %3379 = vmatmul.f32.gmra.mxu0 %v5252_v62  ;;  %v3109_v9 = vadd.f32 %v3108_v3, %v3071_v61  ;;  %v3149_v35 = vpop.f32.mrf.mxu2  ;;  %v5265_v61 = vld [vmem:[%s9601_s0 + $0x270] sm:$0x1]  ;;  %3775 = vmatpush.msra.mxu3 %v2210_v14 }
 0x49b   : > { %3658 = vmatpush.msra.mxu0 %v2030_v13  ;;  %3697 = vmatpush.msra.mxu1 %v2090_v32  ;;  %v3187_v42 = vpop.f32.mrf.mxu3  ;;  %v5270_v13 = vld [vmem:[%s9601_s0 + $0x48] sm:$0xff]  ;;  %v2074_v32 = vld [vmem:[%s7153_s24 + $0x350] sm:$0xff] }
 0x49c   : > { %v3147_v15 = vadd.f32 %v3146_v12, %v3109_v9  ;;  %3420 = vmatmul.f32.gmra.mxu1 %v5258_v31  ;;  %v5268_v9 = vld [vmem:[%s9601_s0 + $0x40] sm:$0xff]  ;;  %v2134_v31 = vld [vmem:[%s7153_s24 + $0x530] sm:$0xff] }
 0x49d   : > { %3659 = vmatpush.msra.mxu0 %v2026_v27  ;;  %3698 = vmatpush.msra.mxu1 %v2086_v40  ;;  %v2010_v27 = vld [vmem:[%s7153_s24 + $0x150] sm:$0xff] }
 0x49e   : > { %v7969_v22 = vadd.f32 %v3184_v25, %v3147_v15  ;;  %v2142_v15 = vld [vmem:[%s7153_s24 + $0x570] sm:$0xff] }
 0x49f   : > { %v3073_v21 = vpop.f32.mrf.mxu0  ;;  %3660 = vmatpush.msra.mxu0 %v2022_v33  ;;  %v3114_v39 = vpop.f32.mrf.mxu1  ;;  %3461 = vmatmul.f32.gmra.mxu2 %v5261_v37  ;;  %v5275_v37 = vld [vmem:[%s9601_s0 + $0xb8] sm:$0xff] }
 0x4a0   : > { %v3074_v24 = vadd.f32 %v3073_v21, %v7826_v20  ;;  %v4570_v20 = vadd.f32 %v7969_v22, %v7944_v2  ;;  %3499 = vmatmul.f32.gmra.mxu3 %v5263_v51  ;;  %3738 = vmatpush.msra.mxu2 %v2142_v15 }
 0x4a1   : > { %3661 = vmatpush.msra.mxu0 %v2018_v11  ;;  %3699 = vmatpush.msra.mxu1 %v2082_v16  ;;  %v5279_v11 = vld [vmem:[%s9601_s0 + $0x118] sm:$0xff]  ;;  %v1986_v16 = vld [vmem:[%s7153_s24 + $0x90] sm:$0xff] }
 0x4a2   : > { %3382 = vmatmul.f32.gmra.mxu0 %v5256_v18  ;;  %v3112_v30 = vadd.f32 %v3111_v17, %v3074_v24  ;;  %v3152_v52 = vpop.f32.mrf.mxu2  ;;  %v2014_v24 = vld [vmem:[%s7153_s24 + $0x170] sm:$0xff]  ;;  %3739 = vmatpush.msra.mxu2 %v2138_v26 }
 0x4a3   : > { %v3190_v56 = vpop.f32.mrf.mxu3  ;;  %v2206_v17 = vld [vmem:[%s7153_s24 + $0x770] sm:$0xff]  ;;  %3662 = vmatpush.msra.mxu0 %v2014_v24 }
 0x4a4   : > { %v3150_v38 = vadd.f32 %v3149_v35, %v3112_v30  ;;  %v2078_v18 = vld [vmem:[%s7153_s24 + $0x370] sm:$0xff]  ;;  %3776 = vmatpush.msra.mxu3 %v2206_v17  ;;  %3740 = vmatpush.msra.mxu2 %v2134_v31 }
 0x4a5   : > { %3700 = vmatpush.msra.mxu1 %v2078_v18  ;;  %v2202_v30 = vld [vmem:[%s7153_s24 + $0x750] sm:$0xff]  ;;  %3663 = vmatpush.msra.mxu0 %v2010_v27 }
 0x4a6   : > { %v7994_v47 = vadd.f32 %v3187_v42, %v3150_v38  ;;  %v2006_v35 = vld [vmem:[%s7153_s24 + $0x130] sm:$0xff]  ;;  %3777 = vmatpush.msra.mxu3 %v2202_v30  ;;  %v5274_v42 = vld [vmem:[%s9601_s0 + $0xa8] sm:$0xff] }
 0x4a7   : > { %v3076_v44 = vpop.f32.mrf.mxu0  ;;  %v3117_v59 = vpop.f32.mrf.mxu1  ;;  %3464 = vmatmul.f32.gmra.mxu2 %v5265_v61  ;;  %v2070_v38 = vld [vmem:[%s7153_s24 + $0x330] sm:$0xff]  ;;  %3701 = vmatpush.msra.mxu1 %v2074_v32 }
 0x4a8   : > { %v3077_v46 = vadd.f32 %v3076_v44, %v7850_v43  ;;  %v4571_v49 = vadd.f32 %v4570_v20, %v7994_v47  ;;  %v5262_v43 = vld [vmem:[%s9601_s0 + $0x208] sm:$0xff]  ;;  %3502 = vmatmul.f32.gmra.mxu3 %v5267_v4  ;;  %v2130_v44 = vld [vmem:[%s7153_s24 + $0x510] sm:$0xff]  ;;  %3664 = vmatpush.msra.mxu0 %v2006_v35 }
 0x4a9   : > { %3423 = vmatmul.f32.gmra.mxu1 %v5262_v43  ;;  %v2126_v43 = vld [vmem:[%s7153_s24 + $0x4f0] sm:$0xff]  ;;  %3778 = vmatpush.msra.mxu3 %v2198_v41  ;;  %v5283_v41 = vld [vmem:[%s9601_s0 + $0x178] sm:$0xff] }
 0x4aa   : > { %3385 = vmatmul.f32.gmra.mxu0 %v5260_v48  ;;  %v3115_v50 = vadd.f32 %v3114_v39, %v3077_v46  ;;  %v3155_v58 = vpop.f32.mrf.mxu2  ;;  %v2002_v39 = vld [vmem:[%s7153_s24 + $0x110] sm:$0xff]  ;;  %3702 = vmatpush.msra.mxu1 %v2070_v38 }
 0x4ab   : > { %v3193_v6 = vpop.f32.mrf.mxu3  ;;  %v2066_v48 = vld [vmem:[%s7153_s24 + $0x310] sm:$0xff]  ;;  %3741 = vmatpush.msra.mxu2 %v2130_v44  ;;  %3665 = vmatpush.msra.mxu0 %v2002_v39 }
 0x4ac   : > { %v3153_v53 = vadd.f32 %v3152_v52, %v3115_v50  ;;  %v2194_v50 = vld [vmem:[%s7153_s24 + $0x710] sm:$0xff]  ;;  %3703 = vmatpush.msra.mxu1 %v2066_v48 }
 0x4ad   : > { %v1998_v52 = vld [vmem:[%s7153_s24 + $0xf0] sm:$0xff]  ;;  %3779 = vmatpush.msra.mxu3 %v2194_v50  ;;  %3742 = vmatpush.msra.mxu2 %v2126_v43 }
 0x4ae   : > { %v8010_v57 = vadd.f32 %v3190_v56, %v3153_v53  ;;  %v2062_v53 = vld [vmem:[%s7153_s24 + $0x2f0] sm:$0xff]  ;;  %3666 = vmatpush.msra.mxu0 %v1998_v52 }
 0x4af   : > { %v3079_v54 = vpop.f32.mrf.mxu0  ;;  %v3120_v8 = vpop.f32.mrf.mxu1  ;;  %3598 = vmatmul.f32.vlgmr.msrb.gmra.mxu2 %v5269_v10  ;;  %v2190_v56 = vld [vmem:[%s7153_s24 + $0x6f0] sm:$0xff]  ;;  %3704 = vmatpush.msra.mxu1 %v2062_v53 }
 0x4b0   : > { %v3080_v55 = vadd.f32 %v3079_v54, %v7874_v1  ;;  %v4572_v0 = vadd.f32 %v4571_v49, %v8010_v57  ;;  %v5266_v1 = vld [vmem:[%s9601_s0 + $0x268] sm:$0x1]  ;;  %5148 = vmatmul.msk.f32.vlgmr.msrb.gmra.mxu3 %vm2724_vm0, %v5271_v19  ;;  %v2118_v4 = vld [vmem:[%s7153_s24 + $0x4b0] sm:$0xff] }
 0x4b1   : > { %3426 = vmatmul.f32.gmra.mxu1 %v5266_v1  ;;  %v5277_v1 = vld [vmem:[%s9601_s0 + $0x110] sm:$0xff]  ;;  %3780 = vmatpush.msra.mxu3 %v2190_v56 }
 0x4b2   : > { %3388 = vmatmul.f32.gmra.mxu0 %v5264_v60  ;;  %v3118_v3 = vadd.f32 %v3117_v59, %v3080_v55  ;;  %v3158_v21 = vpop.f32.mrf.mxu2  ;;  %v2122_v59 = vld [vmem:[%s7153_s24 + $0x4d0] sm:$0xff] }
 0x4b3   : > { %v3196_v29 = vpop.f32.mrf.mxu3  ;;  %3743 = vmatpush.msra.mxu2 %v2122_v59  ;;  %v2114_v10 = vld [vmem:[%s7153_s24 + $0x490] sm:$0xff]  ;;  %v5284_v59 = vld [vmem:[%s9601_s0 + $0x1c0] sm:$0xff] }
 0x4b4   : > { %v3156_v62 = vadd.f32 %v3155_v58, %v3118_v3  ;;  %v5276_v3 = vld [vmem:[%s9601_s0 + $0x100] sm:$0xff]  ;;  %v2110_v19 = vld [vmem:[%s7153_s24 + $0x470] sm:$0xff] }
 0x4b5   : > { %3744 = vmatpush.msra.mxu2 %v2118_v4  ;;  %v2178_v17 = vld [vmem:[%s7153_s24 + $0x690] sm:$0xff] }
 0x4b6   : > { %v8026_v7 = vadd.f32 %v3193_v6, %v3156_v62  ;;  %v2186_v62 = vld [vmem:[%s7153_s24 + $0x6d0] sm:$0xff] }
 0x4b7   : > { %v3082_v5 = vpop.f32.mrf.mxu0  ;;  %v3123_v34 = vpop.f32.mrf.mxu1  ;;  %3601 = vmatmul.f32.gmra.mxu2 %v5273_v36  ;;  %3781 = vmatpush.msra.mxu3 %v2186_v62  ;;  %v2050_v18 = vld [vmem:[%s7153_s24 + $0x290] sm:$0xff]  ;;  %v5282_v36 = vld [vmem:[%s9601_s0 + $0x168] sm:$0xff] }
 0x4b8   : > { %v3083_v63 = vadd.f32 %v3082_v5, %v7897_v23  ;;  %v4573_v12 = vadd.f32 %v4572_v0, %v8026_v7  ;;  %5149 = vmatmul.msk.f32.gmra.mxu3 %vm2724_vm0, %v5275_v37  ;;  %v1994_v0 = vld [vmem:[%s7153_s24 + $0xd0] sm:$0xff]  ;;  %3745 = vmatpush.msra.mxu2 %v2114_v10 }
 0x4b9   : > { %3560 = vmatmul.f32.vlgmr.msrb.gmra.mxu1 %v5270_v13  ;;  %v2058_v5 = vld [vmem:[%s7153_s24 + $0x2d0] sm:$0xff]  ;;  %3667 = vmatpush.msra.mxu0 %v1994_v0 }
 0x4ba   : > { %3522 = vmatmul.f32.vlgmr.msrb.gmra.mxu0 %v5268_v9  ;;  %v3121_v23 = vadd.f32 %v3120_v8, %v3083_v63  ;;  %v3161_v49 = vpop.f32.mrf.mxu2  ;;  %v5278_v8 = vld [vmem:[%s9601_s0 + $0x108] sm:$0xff]  ;;  %v1990_v9 = vld [vmem:[%s7153_s24 + $0xb0] sm:$0xff]  ;;  %3705 = vmatpush.msra.mxu1 %v2058_v5 }
 0x4bb   : > { %v3199_v55 = vpop.f32.mrf.mxu3  ;;  %v2054_v13 = vld [vmem:[%s7153_s24 + $0x2b0] sm:$0xff]  ;;  %3668 = vmatpush.msra.mxu0 %v1990_v9  ;;  %3746 = vmatpush.msra.mxu2 %v2110_v19 }
 0x4bc   : > { %v3159_v25 = vadd.f32 %v3158_v21, %v3121_v23  ;;  %v2182_v23 = vld [vmem:[%s7153_s24 + $0x6b0] sm:$0xff]  ;;  %3706 = vmatpush.msra.mxu1 %v2054_v13 }
 0x4bd   : > { %3782 = vmatpush.msra.mxu3 %v2182_v23  ;;  %3669 = vmatpush.msra.mxu0 %v1986_v16  ;;  %v1982_v27 = vld [vmem:[%s7153_s24 + $0x70] sm:$0xff]  ;;  %v5288_v16 = vld [vmem:[%s9601_s0 + $0x220] sm:$0xff] }
 0x4be   : > { %v8055_v33 = vadd.f32 %v3196_v29, %v3159_v25  ;;  %v5280_v29 = vld [vmem:[%s9601_s0 + $0x160] sm:$0xff]  ;;  %v5281_v30 = vld [vmem:[%s9601_s0 + $0x170] sm:$0xff]  ;;  %3707 = vmatpush.msra.mxu1 %v2050_v18  ;;  %v5291_v18 = vld [vmem:[%s9601_s0 + $0x238] sm:$0xff] }
 0x4bf   : > { %v3085_v20 = vpop.f32.mrf.mxu0  ;;  %v3257_v61 = vpop.f32.mrf.mxu1  ;;  %3604 = vmatmul.f32.gmra.mxu2 %v5277_v1  ;;  %v2046_v31 = vld [vmem:[%s7153_s24 + $0x270] sm:$0xff]  ;;  %3783 = vmatpush.msra.mxu3 %v2178_v17  ;;  %v5290_v17 = vld [vmem:[%s9601_s0 + $0x228] sm:$0xff] }
 0x4c0   : > { %v3086_v28 = vadd.f32 %v3085_v20, %v7921_v45  ;;  %v5272_v45 = vld [vmem:[%s9601_s0 + $0xa0] sm:$0xff]  ;;  %v4574_v40 = vadd.f32 %v4573_v12, %v8055_v33  ;;  %5150 = vmatmul.msk.f32.gmra.mxu3 %vm2724_vm0, %v5279_v11  ;;  %v2174_v32 = vld [vmem:[%s7153_s24 + $0x670] sm:$0xff]  ;;  %3670 = vmatpush.msra.mxu0 %v1982_v27 }
 0x4c1   : > { %3563 = vmatmul.f32.gmra.mxu1 %v5274_v42  ;;  %v1978_v38 = vld [vmem:[%s7153_s24 + $0x50] sm:$0xff]  ;;  %3784 = vmatpush.msra.mxu3 %v2174_v32 }
 0x4c2   : > { %3525 = vmatmul.f32.gmra.mxu0 %v5272_v45  ;;  %v3124_v46 = vadd.f32 %v3123_v34, %v3086_v28  ;;  %v3295_v12 = vpop.f32.mrf.mxu2  ;;  %v2106_v34 = vld [vmem:[%s7153_s24 + $0x450] sm:$0xff]  ;;  %3708 = vmatpush.msra.mxu1 %v2046_v31 }
 0x4c3   : > { %v3333_v25 = vpop.f32.mrf.mxu3  ;;  %v2102_v42 = vld [vmem:[%s7153_s24 + $0x430] sm:$0xff]  ;;  %3747 = vmatpush.msra.mxu2 %v2106_v34  ;;  %3671 = vmatpush.msra.mxu0 %v1978_v38  ;;  %v5292_v34 = vld [vmem:[%s9601_s0 + $0x280] sm:$0x1] }
 0x4c4   : > { %v3162_v51 = vadd.f32 %v3161_v49, %v3124_v46  ;;  %v2170_v46 = vld [vmem:[%s7153_s24 + $0x650] sm:$0xff] }
 0x4c5   : > { %v1974_v37 = vld [vmem:[%s7153_s24 + $0x30] sm:$0xff]  ;;  %3785 = vmatpush.msra.mxu3 %v2170_v46  ;;  %3748 = vmatpush.msra.mxu2 %v2102_v42 }
 0x4c6   : > { %v8083_v60 = vadd.f32 %v3199_v55, %v3162_v51  ;;  %v2038_v49 = vld [vmem:[%s7153_s24 + $0x230] sm:$0xff]  ;;  %3672 = vmatpush.msra.mxu0 %v1974_v37 }
 0x4c7   : > { %v3219_v54 = vpop.f32.mrf.mxu0  ;;  %v3260_v20 = vpop.f32.mrf.mxu1  ;;  %3607 = vmatmul.f32.gmra.mxu2 %v5281_v30  ;;  %v2166_v52 = vld [vmem:[%s7153_s24 + $0x630] sm:$0xff] }
 0x4c8   : > { %v4576_v58 = vsel %vm4575_vm1, %v8083_v60, 0.0  ;;  %v3258_v6 = vadd.f32 %v3257_v61, %v3219_v54  ;;  %5151 = vmatmul.msk.f32.gmra.mxu3 %vm2724_vm0, %v5283_v41  ;;  %v2098_v53 = vld [vmem:[%s7153_s24 + $0x410] sm:$0xff]  ;;  %v5295_v41 = vld [vmem:[%s9601_s0 + $0x298] sm:$0x1] }
 0x4c9   : > { %v4577_v63 = vadd.f32 %v4576_v58, %v4574_v40  ;;  %3566 = vmatmul.f32.gmra.mxu1 %v5278_v8  ;;  %v2042_v40 = vld [vmem:[%s7153_s24 + $0x250] sm:$0xff]  ;;  %3786 = vmatpush.msra.mxu3 %v2166_v52 }
 0x4ca   : > { %3528 = vmatmul.f32.gmra.mxu0 %v5276_v3  ;;  %v3296_v15 = vadd.f32 %v3295_v12, %v3258_v6  ;;  %v3298_v44 = vpop.f32.mrf.mxu2  ;;  %3709 = vmatpush.msra.mxu1 %v2042_v40  ;;  %v5285_v61 = vld [vmem:[%s9601_s0 + $0x1d0] sm:$0xff] }
 0x4cb   : > { %v4578_v14 = vrot.slane %v4577_v63, 4  ;;  %v3336_v51 = vpop.f32.mrf.mxu3  ;;  %v1970_v0 = vld [vmem:[%s7153_s24 + $0x10] sm:$0xff]  ;;  %3749 = vmatpush.msra.mxu2 %v2098_v53 }
 0x4cc   : > { %v8112_v26 = vadd.f32 %v3333_v25, %v3296_v15  ;;  %3710 = vmatpush.msra.mxu1 %v2038_v49  ;;  %v2162_v1 = vld [vmem:[%s7153_s24 + $0x610] sm:$0xff]  ;;  %3673 = vmatpush.msra.mxu0 %v1970_v0  ;;  %v5296_v0 = vld [vmem:[%s9601_s0] sm:$0xff] }
 0x4cd   : > { %v4579_v24 = vadd.f32 %v4578_v14, %v4577_v63  ;;  %v5286_v63 = vld [vmem:[%s9601_s0 + $0x1c8] sm:$0xff]  ;;  %v2034_v6 = vld [vmem:[%s7153_s24 + $0x210] sm:$0xff]  ;;  %3787 = vmatpush.msra.mxu3 %v2162_v1 }
 0x4ce   : > { %3711 = vmatpush.msra.mxu1 %v2034_v6  ;;  %v5289_v19 = vld [vmem:[%s9601_s0 + $0x230] sm:$0xff] }
 0x4cf   : > { %v3222_v21 = vpop.f32.mrf.mxu0  ;;  %v4580_v28 = vrot.slane %v4579_v24, 2  ;;  %v3263_v55 = vpop.f32.mrf.mxu1  ;;  %3610 = vmatmul.f32.gmra.mxu2 %v5285_v61  ;;  %v2414_v38 = vld [vmem:[%s7153_s24 + $0xdf0] sm:$0xff] }
 0x4d0   : > { %v3261_v45 = vadd.f32 %v3260_v20, %v3222_v21  ;;  %v2286_v40 = vld [vmem:[%s7153_s24 + $0x9f0] sm:$0xff]  ;;  %3886 = vmatpush.msrb.mxu2 %v2414_v38 }
 0x4d1   : > { %v4581_v35 = vadd.f32 %v4580_v28, %v4579_v24  ;;  %3569 = vmatmul.f32.gmra.mxu1 %v5282_v36  ;;  %v5294_v36 = vld [vmem:[%s9601_s0 + $0x288] sm:$0x1]  ;;  %v2478_v46 = vld [vmem:[%s7153_s24 + $0xff0] sm:$0xff]  ;;  %3810 = vmatpush.msrb.mxu0 %v2286_v40 }
 0x4d2   : > { %3531 = vmatmul.f32.gmra.mxu0 %v5280_v29  ;;  %v3299_v48 = vadd.f32 %v3298_v44, %v3261_v45  ;;  %v2350_v42 = vld [vmem:[%s7153_s24 + $0xbf0] sm:$0xff]  ;;  %3924 = vmatpush.msrb.mxu3 %v2478_v46 }
 0x4d3   : > { %v4582_v39 = vrot.slane %v4581_v35, 1  ;;  %v3339_v12 = vpop.f32.mrf.mxu3  ;;  %v2282_v37 = vld [vmem:[%s7153_s24 + $0x9d0] sm:$0xff]  ;;  %3848 = vmatpush.msrb.mxu1 %v2350_v42 }
 0x4d4   : > { %v8139_v54 = vadd.f32 %v3336_v51, %v3299_v48  ;;  %v2474_v49 = vld [vmem:[%s7153_s24 + $0xfd0] sm:$0xff]  ;;  %3811 = vmatpush.msrb.mxu0 %v2282_v37 }
 0x4d5   : > { %v4583_v43 = vadd.f32 %v4582_v39, %v4581_v35  ;;  %v5293_v35 = vld [vmem:[%s9601_s0 + $0x290] sm:$0x1]  ;;  %3925 = vmatpush.msrb.mxu3 %v2474_v49 }
 0x4d6   : > { %v2410_v39 = vld [vmem:[%s7153_s24 + $0xdd0] sm:$0xff] }
 0x4d7   : > { %v3225_v50 = vpop.f32.mrf.mxu0  ;;  %v4623_v56 = vmul.f32 0.020408163, %v4583_v43  ;;  %v3266_v13 = vpop.f32.mrf.mxu1  ;;  %3613 = vmatmul.f32.gmra.mxu2 %v5289_v19  ;;  %v2346_v51 = vld [vmem:[%s7153_s24 + $0xbd0] sm:$0xff] }
 0x4d8   : > { %v3264_v3 = vadd.f32 %v3263_v55, %v3225_v50  ;;  %v2406_v50 = vld [vmem:[%s7153_s24 + $0xdb0] sm:$0xff]  ;;  %3887 = vmatpush.msrb.mxu2 %v2410_v39  ;;  %3849 = vmatpush.msrb.mxu1 %v2346_v51 }
 0x4d9   : > { %v8150_v4 = vsub.f32 %v7944_v2, %v4623_v56  ;;  %v8153_v58 = vsub.f32 %v7969_v22, %v4623_v56  ;;  %v8156_v62 = vsub.f32 %v7994_v47, %v4623_v56  ;;  %v8159_v5 = vsub.f32 %v8010_v57, %v4623_v56  ;;  %3572 = vmatmul.f32.gmra.mxu1 %v5286_v63  ;;  %v5287_v47 = vld [vmem:[%s9601_s0 + $0x1d8] sm:$0xff]  ;;  %v3301_v57 = vpop.f32.mrf.mxu2  ;;  %v2278_v53 = vld [vmem:[%s7153_s24 + $0x9b0] sm:$0xff] }
 0x4da   : > { %3534 = vmatmul.f32.gmra.mxu0 %v5284_v59  ;;  %v8166_v8 = vsub.f32 %v8026_v7, %v4623_v56  ;;  %v8169_v2 = vsub.f32 %v8055_v33, %v4623_v56  ;;  %v8172_v22 = vsub.f32 %v8083_v60, %v4623_v56  ;;  %5152 = vmatmul.msk.f32.gmra.mxu3 %vm2724_vm0, %v5287_v47  ;;  %v2470_v55 = vld [vmem:[%s7153_s24 + $0xfb0] sm:$0xff] }
 0x4db   : > { %v4655_v9 = vmul.f32 %v8150_v4, %v8150_v4  ;;  %v4659_v7 = vmul.f32 %v8153_v58, %v8153_v58  ;;  %v3302_v33 = vadd.f32 %v3301_v57, %v3264_v3  ;;  %v4663_v60 = vmul.f32 %v8156_v62, %v8156_v62  ;;  %v3342_v30 = vpop.f32.mrf.mxu3  ;;  %3888 = vmatpush.msrb.mxu2 %v2406_v50  ;;  %v2402_v61 = vld [vmem:[%s7153_s24 + $0xd90] sm:$0xff]  ;;  %v5298_v57 = vld [vmem:[%s9601_s0 + $0x8] sm:$0xff] }
 0x4dc   : > { %v4667_v14 = vmul.f32 %v8159_v5, %v8159_v5  ;;  %v4671_v21 = vmul.f32 %v8166_v8, %v8166_v8  ;;  %v5297_v3 = vld [vmem:[%s9601_s0 + $0x10] sm:$0xff]  ;;  %3812 = vmatpush.msrb.mxu0 %v2278_v53  ;;  %3926 = vmatpush.msrb.mxu3 %v2470_v55  ;;  %v5304_v53 = vld [vmem:[%s9601_s0 + $0xc0] sm:$0xff] }
 0x4dd   : > { %v4683_v11 = vadd.f32 %v4659_v7, %v4655_v9  ;;  %v8184_v23 = vadd.f32 %v3339_v12, %v3302_v33  ;;  %v2342_v1 = vld [vmem:[%s7153_s24 + $0xbb0] sm:$0xff]  ;;  %3889 = vmatpush.msrb.mxu2 %v2402_v61  ;;  %v5299_v33 = vld [vmem:[%s9601_s0 + $0x18] sm:$0xff] }
 0x4de   : > { %v2274_v63 = vld [vmem:[%s7153_s24 + $0x990] sm:$0xff]  ;;  %3850 = vmatpush.msrb.mxu1 %v2342_v1 }
 0x4df   : > { %v3228_v10 = vpop.f32.mrf.mxu0  ;;  %v4684_v15 = vadd.f32 %v4683_v11, %v4663_v60  ;;  %v3269_v32 = vpop.f32.mrf.mxu1  ;;  %3616 = vmatmul.f32.gmra.mxu2 %v5293_v35  ;;  %v2466_v6 = vld [vmem:[%s7153_s24 + $0xf90] sm:$0xff]  ;;  %3813 = vmatpush.msrb.mxu0 %v2274_v63 }
 0x4e0   : > { %v3267_v25 = vadd.f32 %v3266_v13, %v3228_v10  ;;  %v2398_v9 = vld [vmem:[%s7153_s24 + $0xd70] sm:$0xff]  ;;  %3927 = vmatpush.msrb.mxu3 %v2466_v6  ;;  %v5307_v6 = vld [vmem:[%s9601_s0 + $0xd8] sm:$0xff] }
 0x4e1   : > { %v4685_v24 = vadd.f32 %v4684_v15, %v4667_v14  ;;  %3575 = vmatmul.f32.gmra.mxu1 %v5290_v17  ;;  %v3304_v20 = vpop.f32.mrf.mxu2  ;;  %v2338_v7 = vld [vmem:[%s7153_s24 + $0xb90] sm:$0xff]  ;;  %3890 = vmatpush.msrb.mxu2 %v2398_v9 }
 0x4e2   : > { %3537 = vmatmul.f32.gmra.mxu0 %v5288_v16  ;;  %5153 = vmatmul.msk.f32.gmra.mxu3 %vm2724_vm0, %v5291_v18  ;;  %v3305_v28 = vadd.f32 %v3304_v20, %v3267_v25  ;;  %v2270_v60 = vld [vmem:[%s7153_s24 + $0x970] sm:$0xff]  ;;  %v5300_v18 = vld [vmem:[%s9601_s0 + $0x60] sm:$0xff] }
 0x4e3   : > { %v8203_v27 = vadd.f32 %v4685_v24, %v4671_v21  ;;  %v3345_v52 = vpop.f32.mrf.mxu3  ;;  %v2462_v11 = vld [vmem:[%s7153_s24 + $0xf70] sm:$0xff]  ;;  %3851 = vmatpush.msrb.mxu1 %v2338_v7  ;;  %3814 = vmatpush.msrb.mxu0 %v2270_v60 }
 0x4e4   : > { %v8205_v31 = vadd.f32 %v3342_v30, %v3305_v28  ;;  %v2334_v13 = vld [vmem:[%s7153_s24 + $0xb70] sm:$0xff]  ;;  %3928 = vmatpush.msrb.mxu3 %v2462_v11 }
 0x4e5   : > { %v2394_v14 = vld [vmem:[%s7153_s24 + $0xd50] sm:$0xff]  ;;  %3852 = vmatpush.msrb.mxu1 %v2334_v13 }
 0x4e6   : > { %v2266_v19 = vld [vmem:[%s7153_s24 + $0x950] sm:$0xff]  ;;  %3891 = vmatpush.msrb.mxu2 %v2394_v14 }
 0x4e7   : > { %v3231_v29 = vpop.f32.mrf.mxu0  ;;  %v3272_v59 = vpop.f32.mrf.mxu1  ;;  %3750 = vmatmul.f32.vlgmr.msra.gmra.mxu2 %v5297_v3  ;;  %v2458_v21 = vld [vmem:[%s7153_s24 + $0xf50] sm:$0xff]  ;;  %3815 = vmatpush.msrb.mxu0 %v2266_v19  ;;  %v5306_v3 = vld [vmem:[%s9601_s0 + $0xc8] sm:$0xff] }
 0x4e8   : > { %v3270_v45 = vadd.f32 %v3269_v32, %v3231_v29  ;;  %v2390_v17 = vld [vmem:[%s7153_s24 + $0xd30] sm:$0xff]  ;;  %3929 = vmatpush.msrb.mxu3 %v2458_v21  ;;  %v5308_v21 = vld [vmem:[%s9601_s0 + $0x120] sm:$0xff] }
 0x4e9   : > { %3578 = vmatmul.f32.gmra.mxu1 %v5294_v36  ;;  %v3307_v44 = vpop.f32.mrf.mxu2  ;;  %v5301_v20 = vld [vmem:[%s9601_s0 + $0x70] sm:$0xff]  ;;  %3892 = vmatpush.msrb.mxu2 %v2390_v17  ;;  %v5303_v36 = vld [vmem:[%s9601_s0 + $0x78] sm:$0xff] }
 0x4ea   : > { %3540 = vmatmul.f32.gmra.mxu0 %v5292_v34  ;;  %5154 = vmatmul.msk.f32.gmra.mxu3 %vm2724_vm0, %v5295_v41  ;;  %v3308_v48 = vadd.f32 %v3307_v44, %v3270_v45  ;;  %v2330_v28 = vld [vmem:[%s7153_s24 + $0xb50] sm:$0xff]  ;;  %v5302_v34 = vld [vmem:[%s9601_s0 + $0x68] sm:$0xff] }
 0x4eb   : > { %v3348_v16 = vpop.f32.mrf.mxu3  ;;  %v2262_v29 = vld [vmem:[%s7153_s24 + $0x930] sm:$0xff]  ;;  %3853 = vmatpush.msrb.mxu1 %v2330_v28  ;;  %v5310_v28 = vld [vmem:[%s9601_s0 + $0x128] sm:$0xff] }
 0x4ec   : > { %v8231_v56 = vadd.f32 %v3345_v52, %v3308_v48  ;;  %v2454_v30 = vld [vmem:[%s7153_s24 + $0xf30] sm:$0xff]  ;;  %3816 = vmatpush.msrb.mxu0 %v2262_v29 }
 0x4ed   : > { %v2326_v35 = vld [vmem:[%s7153_s24 + $0xb30] sm:$0xff]  ;;  %3930 = vmatpush.msrb.mxu3 %v2454_v30 }
 0x4ee   : > { %v2386_v45 = vld [vmem:[%s7153_s24 + $0xd10] sm:$0xff]  ;;  %3854 = vmatpush.msrb.mxu1 %v2326_v35 }
 0x4ef   : > { %v3234_v43 = vpop.f32.mrf.mxu0  ;;  %3753 = vmatmul.f32.gmra.mxu2 %v5301_v20  ;;  %v2258_v40 = vld [vmem:[%s7153_s24 + $0x910] sm:$0xff] }
 0x4f0   : > { %v3273_v47 = vadd.f32 %v3272_v59, %v3234_v43  ;;  %v3275_v25 = vpop.f32.mrf.mxu1  ;;  %v2450_v41 = vld [vmem:[%s7153_s24 + $0xf10] sm:$0xff]  ;;  %3893 = vmatpush.msrb.mxu2 %v2386_v45  ;;  %3817 = vmatpush.msrb.mxu0 %v2258_v40 }
 0x4f1   : > { %3712 = vmatmul.f32.vlgmr.msra.gmra.mxu1 %v5298_v57  ;;  %v3310_v10 = vpop.f32.mrf.mxu2  ;;  %v2382_v46 = vld [vmem:[%s7153_s24 + $0xcf0] sm:$0xff]  ;;  %3931 = vmatpush.msrb.mxu3 %v2450_v41 }
 0x4f2   : > { %3674 = vmatmul.f32.vlgmr.msra.gmra.mxu0 %v5296_v0  ;;  %3788 = vmatmul.f32.vlgmr.msra.gmra.mxu3 %v5299_v33  ;;  %v3311_v12 = vadd.f32 %v3310_v10, %v3273_v47  ;;  %v2322_v42 = vld [vmem:[%s7153_s24 + $0xb10] sm:$0xff] }
 0x4f3   : > { %v3351_v48 = vpop.f32.mrf.mxu3  ;;  %v2254_v49 = vld [vmem:[%s7153_s24 + $0x8f0] sm:$0xff]  ;;  %3894 = vmatpush.msrb.mxu2 %v2382_v46  ;;  %3855 = vmatpush.msrb.mxu1 %v2322_v42 }
 0x4f4   : > { %v8257_v24 = vadd.f32 %v3348_v16, %v3311_v12  ;;  %v2446_v50 = vld [vmem:[%s7153_s24 + $0xef0] sm:$0xff]  ;;  %3818 = vmatpush.msrb.mxu0 %v2254_v49 }
 0x4f5   : > { %v2378_v52 = vld [vmem:[%s7153_s24 + $0xcd0] sm:$0xff]  ;;  %3932 = vmatpush.msrb.mxu3 %v2446_v50  ;;  %v5312_v50 = vld [vmem:[%s9601_s0 + $0x180] sm:$0xff] }
 0x4f6   : > { %v2318_v55 = vld [vmem:[%s7153_s24 + $0xaf0] sm:$0xff]  ;;  %3895 = vmatpush.msrb.mxu2 %v2378_v52 }
 0x4f7   : > { %v3237_v15 = vpop.f32.mrf.mxu0  ;;  %v2250_v59 = vld [vmem:[%s7153_s24 + $0x8d0] sm:$0xff]  ;;  %3856 = vmatpush.msrb.mxu1 %v2318_v55  ;;  %v5314_v55 = vld [vmem:[%s9601_s0 + $0x188] sm:$0xff] }
 0x4f8   : > { %v3276_v32 = vadd.f32 %v3275_v25, %v3237_v15  ;;  %v3409_v51 = vpop.f32.mrf.mxu1  ;;  %v2442_v61 = vld [vmem:[%s7153_s24 + $0xed0] sm:$0xff]  ;;  %3819 = vmatpush.msrb.mxu0 %v2250_v59 }
 0x4f9   : > { %3715 = vmatmul.f32.gmra.mxu1 %v5302_v34  ;;  %v3313_v38 = vpop.f32.mrf.mxu2  ;;  %v2374_v1 = vld [vmem:[%s7153_s24 + $0xcb0] sm:$0xff]  ;;  %3933 = vmatpush.msrb.mxu3 %v2442_v61 }
 0x4fa   : > { %3677 = vmatmul.f32.gmra.mxu0 %v5300_v18  ;;  %3791 = vmatmul.f32.gmra.mxu3 %v5303_v36  ;;  %v3314_v44 = vadd.f32 %v3313_v38, %v3276_v32  ;;  %v2314_v63 = vld [vmem:[%s7153_s24 + $0xad0] sm:$0xff]  ;;  %v5311_v32 = vld [vmem:[%s9601_s0 + $0x138] sm:$0xff] }
 0x4fb   : > { %v2246_v57 = vld [vmem:[%s7153_s24 + $0x8b0] sm:$0xff]  ;;  %3896 = vmatpush.msrb.mxu2 %v2374_v1  ;;  %3857 = vmatpush.msrb.mxu1 %v2314_v63  ;;  %v3485_v12 = vpop.f32.mrf.mxu3 }
 0x4fc   : > { %v8284_v43 = vadd.f32 %v3351_v48, %v3314_v44  ;;  %v2438_v9 = vld [vmem:[%s7153_s24 + $0xeb0] sm:$0xff]  ;;  %3820 = vmatpush.msrb.mxu0 %v2246_v57 }
 0x4fd   : > { %v2310_v33 = vld [vmem:[%s7153_s24 + $0xab0] sm:$0xff]  ;;  %3934 = vmatpush.msrb.mxu3 %v2438_v9 }
 0x4fe   : > { %v2370_v10 = vld [vmem:[%s7153_s24 + $0xc90] sm:$0xff]  ;;  %3858 = vmatpush.msrb.mxu1 %v2310_v33 }
 0x4ff   : > { %v3371_v39 = vpop.f32.mrf.mxu0  ;;  %v2242_v13 = vld [vmem:[%s7153_s24 + $0x890] sm:$0xff]  ;;  %3897 = vmatpush.msrb.mxu2 %v2370_v10 }
 0x500   : > { %v3372_v37 = vadd.f32 %v3371_v39, %v8112_v26  ;;  %v5305_v26 = vld [vmem:[%s9601_s0 + $0xd0] sm:$0xff]  ;;  %3821 = vmatpush.msrb.mxu0 %v2242_v13 }
 0x501   : > { %3756 = vmatmul.f32.gmra.mxu2 %v5305_v26  ;;  %3718 = vmatmul.f32.gmra.mxu1 %v5306_v3  ;;  %v3447_v47 = vpop.f32.mrf.mxu2  ;;  %v2434_v14 = vld [vmem:[%s7153_s24 + $0xe90] sm:$0xff]  ;;  %v3412_v16 = vpop.f32.mrf.mxu1 }
 0x502   : > { %3680 = vmatmul.f32.gmra.mxu0 %v5304_v53  ;;  %v3410_v0 = vadd.f32 %v3409_v51, %v3372_v37  ;;  %3794 = vmatmul.f32.gmra.mxu3 %v5307_v6  ;;  %v2366_v19 = vld [vmem:[%s7153_s24 + $0xc70] sm:$0xff] }
 0x503   : > { %v2306_v25 = vld [vmem:[%s7153_s24 + $0xa90] sm:$0xff]  ;;  %3935 = vmatpush.msrb.mxu3 %v2434_v14  ;;  %3898 = vmatpush.msrb.mxu2 %v2366_v19  ;;  %v3488_v46 = vpop.f32.mrf.mxu3  ;;  %v5316_v14 = vld [vmem:[%s9601_s0 + $0x1e0] sm:$0xff] }
 0x504   : > { %v3448_v7 = vadd.f32 %v3447_v47, %v3410_v0  ;;  %v2238_v17 = vld [vmem:[%s7153_s24 + $0x870] sm:$0xff]  ;;  %3859 = vmatpush.msrb.mxu1 %v2306_v25  ;;  %v5315_v0 = vld [vmem:[%s9601_s0 + $0x198] sm:$0xff]  ;;  %v5318_v25 = vld [vmem:[%s9601_s0 + $0x1e8] sm:$0xff] }
 0x505   : > { %v2430_v18 = vld [vmem:[%s7153_s24 + $0xe70] sm:$0xff]  ;;  %3822 = vmatpush.msrb.mxu0 %v2238_v17 }
 0x506   : > { %v8311_v15 = vadd.f32 %v3485_v12, %v3448_v7  ;;  %v2302_v29 = vld [vmem:[%s7153_s24 + $0xa70] sm:$0xff]  ;;  %3936 = vmatpush.msrb.mxu3 %v2430_v18 }
 0x507   : > { %v3374_v60 = vpop.f32.mrf.mxu0  ;;  %v2362_v30 = vld [vmem:[%s7153_s24 + $0xc50] sm:$0xff]  ;;  %3860 = vmatpush.msrb.mxu1 %v2302_v29 }
 0x508   : > { %v3375_v11 = vadd.f32 %v3374_v60, %v8139_v54  ;;  %v5309_v54 = vld [vmem:[%s9601_s0 + $0x130] sm:$0xff]  ;;  %3899 = vmatpush.msrb.mxu2 %v2362_v30 }
 0x509   : > { %3759 = vmatmul.f32.gmra.mxu2 %v5309_v54  ;;  %3721 = vmatmul.f32.gmra.mxu1 %v5310_v28  ;;  %v3450_v34 = vpop.f32.mrf.mxu2  ;;  %v2234_v35 = vld [vmem:[%s7153_s24 + $0x850] sm:$0xff]  ;;  %v3415_v37 = vpop.f32.mrf.mxu1 }
 0x50a   : > { %3683 = vmatmul.f32.gmra.mxu0 %v5308_v21  ;;  %v3413_v20 = vadd.f32 %v3412_v16, %v3375_v11  ;;  %3797 = vmatmul.f32.gmra.mxu3 %v5311_v32  ;;  %v2426_v45 = vld [vmem:[%s7153_s24 + $0xe50] sm:$0xff] }
 0x50b   : > { %v2358_v38 = vld [vmem:[%s7153_s24 + $0xc30] sm:$0xff]  ;;  %3823 = vmatpush.msrb.mxu0 %v2234_v35  ;;  %3937 = vmatpush.msrb.mxu3 %v2426_v45  ;;  %v3491_v33 = vpop.f32.mrf.mxu3 }
 0x50c   : > { %v3451_v36 = vadd.f32 %v3450_v34, %v3413_v20  ;;  %v2298_v40 = vld [vmem:[%s7153_s24 + $0xa50] sm:$0xff]  ;;  %3900 = vmatpush.msrb.mxu2 %v2358_v38  ;;  %v5319_v20 = vld [vmem:[%s9601_s0 + $0x1f8] sm:$0xff] }
 0x50d   : > { %v2230_v42 = vld [vmem:[%s7153_s24 + $0x830] sm:$0xff]  ;;  %3861 = vmatpush.msrb.mxu1 %v2298_v40 }
 0x50e   : > { %v2422_v39 = vld [vmem:[%s7153_s24 + $0xe30] sm:$0xff]  ;;  %v8338_v48 = vadd.f32 %v3488_v46, %v3451_v36  ;;  %3824 = vmatpush.msrb.mxu0 %v2230_v42 }
 0x50f   : > { %v3377_v41 = vpop.f32.mrf.mxu0  ;;  %v2354_v49 = vld [vmem:[%s7153_s24 + $0xc10] sm:$0xff]  ;;  %3938 = vmatpush.msrb.mxu3 %v2422_v39  ;;  %v5320_v39 = vld [vmem:[%s9601_s0 + $0x240] sm:$0x1] }
 0x510   : > { %v3378_v44 = vadd.f32 %v3377_v41, %v8184_v23  ;;  %v5313_v23 = vld [vmem:[%s9601_s0 + $0x190] sm:$0xff]  ;;  %3901 = vmatpush.msrb.mxu2 %v2354_v49 }
 0x511   : > { %3762 = vmatmul.f32.gmra.mxu2 %v5313_v23  ;;  %v2294_v51 = vld [vmem:[%s7153_s24 + $0xa30] sm:$0xff]  ;;  %3724 = vmatmul.f32.gmra.mxu1 %v5314_v55  ;;  %v3453_v3 = vpop.f32.mrf.mxu2  ;;  %v3418_v12 = vpop.f32.mrf.mxu1 }
 0x512   : > { %3686 = vmatmul.f32.gmra.mxu0 %v5312_v50  ;;  %v2226_v52 = vld [vmem:[%s7153_s24 + $0x810] sm:$0xff]  ;;  %v3416_v26 = vadd.f32 %v3415_v37, %v3378_v44  ;;  %3800 = vmatmul.f32.gmra.mxu3 %v5315_v0 }
 0x513   : > { %v2418_v53 = vld [vmem:[%s7153_s24 + $0xe10] sm:$0xff]  ;;  %3862 = vmatpush.msrb.mxu1 %v2294_v51  ;;  %3825 = vmatpush.msrb.mxu0 %v2226_v52  ;;  %v3494_v38 = vpop.f32.mrf.mxu3  ;;  %v5322_v51 = vld [vmem:[%s9601_s0 + $0x248] sm:$0x1] }
 0x514   : > { %v2670_v59 = vld [vmem:[%s7153_s24 + $0x15f0] sm:$0xff]  ;;  %v3454_v6 = vadd.f32 %v3453_v3, %v3416_v26  ;;  %3939 = vmatpush.msrb.mxu3 %v2418_v53  ;;  %v5323_v26 = vld [vmem:[%s9601_s0 + $0x258] sm:$0x1] }
 0x515   : > { %v2290_v61 = vld [vmem:[%s7153_s24 + $0xa10] sm:$0xff]  ;;  %4038 = vmatpush.msra.mxu2 %v2670_v59 }
 0x516   : > { %v2542_v1 = vld [vmem:[%s7153_s24 + $0x11f0] sm:$0xff]  ;;  %3863 = vmatpush.msrb.mxu1 %v2290_v61  ;;  %v8365_v11 = vadd.f32 %v3491_v33, %v3454_v6 }
 0x517   : > { %v2722_v63 = vld [vmem:[%s7153_s24 + $0x1790] sm:$0xff]  ;;  %v3380_v9 = vpop.f32.mrf.mxu0  ;;  %3962 = vmatpush.msra.mxu0 %v2542_v1 }
 0x518   : > { %v2606_v47 = vld [vmem:[%s7153_s24 + $0x13f0] sm:$0xff]  ;;  %v3381_v7 = vadd.f32 %v3380_v9, %v8205_v31  ;;  %4079 = vmatpush.msra.mxu3 %v2722_v63 }
 0x519   : > { %v2666_v57 = vld [vmem:[%s7153_s24 + $0x15d0] sm:$0xff]  ;;  %4000 = vmatpush.msra.mxu1 %v2606_v47  ;;  %v3456_v28 = vpop.f32.mrf.mxu2  ;;  %v3421_v46 = vpop.f32.mrf.mxu1 }
 0x51a   : > { %v2538_v10 = vld [vmem:[%s7153_s24 + $0x11d0] sm:$0xff]  ;;  %4039 = vmatpush.msra.mxu2 %v2666_v57  ;;  %3689 = vmatmul.f32.gmra.mxu0 %v5316_v14  ;;  %v3419_v54 = vadd.f32 %v3418_v12, %v3381_v7  ;;  %v5326_v14 = vld [vmem:[%s9601_s0 + $0x28] sm:$0xff] }
 0x51b   : > { %v2662_v60 = vld [vmem:[%s7153_s24 + $0x15b0] sm:$0xff]  ;;  %3963 = vmatpush.msra.mxu0 %v2538_v10  ;;  %3727 = vmatmul.f32.gmra.mxu1 %v5318_v25  ;;  %v3497_v47 = vpop.f32.mrf.mxu3  ;;  %v5324_v10 = vld [vmem:[%s9601_s0 + $0x20] sm:$0xff] }
 0x51c   : > { %v2718_v13 = vld [vmem:[%s7153_s24 + $0x1770] sm:$0xff]  ;;  %4040 = vmatpush.msra.mxu2 %v2662_v60  ;;  %3803 = vmatmul.f32.gmra.mxu3 %v5319_v20  ;;  %v3457_v32 = vadd.f32 %v3456_v28, %v3419_v54 }
 0x51d   : > { %v5317_v31 = vld [vmem:[%s9601_s0 + $0x1f0] sm:$0xff]  ;;  %4080 = vmatpush.msra.mxu3 %v2718_v13 }
 0x51e   : > { %3765 = vmatmul.f32.gmra.mxu2 %v5317_v31  ;;  %v2602_v16 = vld [vmem:[%s7153_s24 + $0x13d0] sm:$0xff]  ;;  %v8392_v44 = vadd.f32 %v3494_v38, %v3457_v32 }
 0x51f   : > { %v2534_v19 = vld [vmem:[%s7153_s24 + $0x11b0] sm:$0xff]  ;;  %4001 = vmatpush.msra.mxu1 %v2602_v16  ;;  %v3383_v45 = vpop.f32.mrf.mxu0 }
 0x520   : > { %v2658_v21 = vld [vmem:[%s7153_s24 + $0x1590] sm:$0xff]  ;;  %3964 = vmatpush.msra.mxu0 %v2534_v19  ;;  %v3384_v36 = vadd.f32 %v3383_v45, %v8231_v56 }
 0x521   : > { %v2598_v17 = vld [vmem:[%s7153_s24 + $0x13b0] sm:$0xff]  ;;  %4041 = vmatpush.msra.mxu2 %v2658_v21  ;;  %v3459_v55 = vpop.f32.mrf.mxu2  ;;  %v5327_v21 = vld [vmem:[%s9601_s0 + $0x38] sm:$0xff] }
 0x522   : > { %v2714_v18 = vld [vmem:[%s7153_s24 + $0x1750] sm:$0xff]  ;;  %4002 = vmatpush.msra.mxu1 %v2598_v17  ;;  %3692 = vmatmul.f32.gmra.mxu0 %v5320_v39  ;;  %v3422_v23 = vadd.f32 %v3421_v46, %v3384_v36  ;;  %v5331_v39 = vld [vmem:[%s9601_s0 + $0x98] sm:$0xff] }
 0x523   : > { %v2530_v29 = vld [vmem:[%s7153_s24 + $0x1190] sm:$0xff]  ;;  %4081 = vmatpush.msra.mxu3 %v2714_v18  ;;  %3730 = vmatmul.f32.gmra.mxu1 %v5322_v51 }
 0x524   : > { %v2654_v30 = vld [vmem:[%s7153_s24 + $0x1570] sm:$0xff]  ;;  %3965 = vmatpush.msra.mxu0 %v2530_v29  ;;  %3806 = vmatmul.f32.gmra.mxu3 %v5323_v26  ;;  %v3460_v0 = vadd.f32 %v3459_v55, %v3422_v23 }
 0x525   : > { %v2594_v34 = vld [vmem:[%s7153_s24 + $0x1390] sm:$0xff]  ;;  %4042 = vmatpush.msra.mxu2 %v2654_v30  ;;  %v3500_v30 = vpop.f32.mrf.mxu3 }
 0x526   : > { %v2710_v35 = vld [vmem:[%s7153_s24 + $0x1730] sm:$0xff]  ;;  %4003 = vmatpush.msra.mxu1 %v2594_v34  ;;  %v8419_v7 = vadd.f32 %v3497_v47, %v3460_v0  ;;  %v3424_v33 = vpop.f32.mrf.mxu1 }
 0x527   : > { %v2526_v40 = vld [vmem:[%s7153_s24 + $0x1170] sm:$0xff]  ;;  %4082 = vmatpush.msra.mxu3 %v2710_v35  ;;  %v3386_v63 = vpop.f32.mrf.mxu0  ;;  %v5328_v35 = vld [vmem:[%s9601_s0 + $0x80] sm:$0xff] }
 0x528   : > { %v2590_v41 = vld [vmem:[%s7153_s24 + $0x1370] sm:$0xff]  ;;  %3966 = vmatpush.msra.mxu0 %v2526_v40  ;;  %v3387_v6 = vadd.f32 %v3386_v63, %v8257_v24 }
 0x529   : > { %v2650_v42 = vld [vmem:[%s7153_s24 + $0x1550] sm:$0xff]  ;;  %4004 = vmatpush.msra.mxu1 %v2590_v41  ;;  %v3462_v54 = vpop.f32.mrf.mxu2  ;;  %v5330_v41 = vld [vmem:[%s9601_s0 + $0x88] sm:$0xff] }
 0x52a   : > { %v5321_v56 = vld [vmem:[%s9601_s0 + $0x250] sm:$0x1]  ;;  %4043 = vmatpush.msra.mxu2 %v2650_v42  ;;  %3826 = vmatmul.f32.vlgmr.msrb.gmra.mxu0 %v5324_v10  ;;  %v3425_v13 = vadd.f32 %v3424_v33, %v3387_v6  ;;  %v5334_v6 = vld [vmem:[%s9601_s0 + $0xe8] sm:$0xff] }
 0x52b   : > { %3768 = vmatmul.f32.gmra.mxu2 %v5321_v56  ;;  %v2522_v37 = vld [vmem:[%s7153_s24 + $0x1150] sm:$0xff]  ;;  %3864 = vmatmul.f32.vlgmr.msrb.gmra.mxu1 %v5326_v14 }
 0x52c   : > { %v2706_v49 = vld [vmem:[%s7153_s24 + $0x1710] sm:$0xff]  ;;  %3967 = vmatpush.msra.mxu0 %v2522_v37  ;;  %3940 = vmatmul.f32.vlgmr.msrb.gmra.mxu3 %v5327_v21  ;;  %v3463_v17 = vadd.f32 %v3462_v54, %v3425_v13  ;;  %v5336_v21 = vld [vmem:[%s9601_s0 + $0x140] sm:$0xff] }
 0x52d   : > { %v2646_v50 = vld [vmem:[%s7153_s24 + $0x1530] sm:$0xff]  ;;  %4083 = vmatpush.msra.mxu3 %v2706_v49 }
 0x52e   : > { %v2586_v52 = vld [vmem:[%s7153_s24 + $0x1350] sm:$0xff]  ;;  %4044 = vmatpush.msra.mxu2 %v2646_v50  ;;  %v8442_v32 = vadd.f32 %v3500_v30, %v3463_v17  ;;  %v3427_v34 = vpop.f32.mrf.mxu1  ;;  %v5338_v30 = vld [vmem:[%s9601_s0 + $0x148] sm:$0xff] }
 0x52f   : > { %v2518_v53 = vld [vmem:[%s7153_s24 + $0x1130] sm:$0xff]  ;;  %4005 = vmatpush.msra.mxu1 %v2586_v52  ;;  %v3389_v28 = vpop.f32.mrf.mxu0 }
 0x530   : > { %v2702_v59 = vld [vmem:[%s7153_s24 + $0x16f0] sm:$0xff]  ;;  %3968 = vmatpush.msra.mxu0 %v2518_v53  ;;  %v3390_v29 = vadd.f32 %v3389_v28, %v8284_v43  ;;  %v3503_v53 = vpop.f32.mrf.mxu3 }
 0x531   : > { %v2642_v61 = vld [vmem:[%s7153_s24 + $0x1510] sm:$0xff]  ;;  %4084 = vmatpush.msra.mxu3 %v2702_v59  ;;  %v3465_v56 = vpop.f32.mrf.mxu2 }
 0x532   : > { %v2582_v3 = vld [vmem:[%s7153_s24 + $0x1330] sm:$0xff]  ;;  %4045 = vmatpush.msra.mxu2 %v2642_v61  ;;  %3829 = vmatmul.f32.gmra.mxu0 %v5328_v35  ;;  %v3428_v40 = vadd.f32 %v3427_v34, %v3390_v29  ;;  %v5332_v61 = vld [vmem:[%s9601_s0 + $0xe0] sm:$0xff]  ;;  %v5339_v34 = vld [vmem:[%s9601_s0 + $0x158] sm:$0xff] }
 0x533   : > { %v2514_v1 = vld [vmem:[%s7153_s24 + $0x1110] sm:$0xff]  ;;  %4006 = vmatpush.msra.mxu1 %v2582_v3 }
 0x534   : > { %v2638_v57 = vld [vmem:[%s7153_s24 + $0x14f0] sm:$0xff]  ;;  %3969 = vmatpush.msra.mxu0 %v2514_v1  ;;  %3867 = vmatmul.f32.gmra.mxu1 %v5330_v41  ;;  %v3466_v50 = vadd.f32 %v3465_v56, %v3428_v40  ;;  %v2155_v40 = vld [vmem:[%s7153_s24 + $0x5d8] sm:$0xff] }
 0x535   : > { %v2698_v9 = vld [vmem:[%s7153_s24 + $0x16d0] sm:$0xff]  ;;  %4046 = vmatpush.msra.mxu2 %v2638_v57  ;;  %3943 = vmatmul.f32.gmra.mxu3 %v5331_v39 }
 0x536   : > { %v5325_v24 = vld [vmem:[%s9601_s0 + $0x30] sm:$0xff]  ;;  %4085 = vmatpush.msra.mxu3 %v2698_v9  ;;  %v8466_v55 = vadd.f32 %v3503_v53, %v3466_v50  ;;  %v3561_v59 = vpop.f32.mrf.mxu1  ;;  %v5335_v9 = vld [vmem:[%s9601_s0 + $0xf8] sm:$0xff]  ;;  %v5342_v53 = vld [vmem:[%s9601_s0 + $0x1a8] sm:$0xff] }
 0x537   : > { %3902 = vmatmul.f32.vlgmr.msrb.gmra.mxu2 %v5325_v24  ;;  %v2578_v60 = vld [vmem:[%s7153_s24 + $0x1310] sm:$0xff]  ;;  %v3523_v52 = vpop.f32.mrf.mxu0  ;;  %v2027_v50 = vld [vmem:[%s7153_s24 + $0x1d8] sm:$0xff] }
 0x538   : > { %v2510_v12 = vld [vmem:[%s7153_s24 + $0x10f0] sm:$0xff]  ;;  %4007 = vmatpush.msra.mxu1 %v2578_v60  ;;  %v3524_v26 = vadd.f32 %v3523_v52, %v8311_v15 }
 0x539   : > { %3970 = vmatpush.msra.mxu0 %v2510_v12  ;;  %v2574_v31 = vld [vmem:[%s7153_s24 + $0x12f0] sm:$0xff]  ;;  %v3599_v33 = vpop.f32.mrf.mxu2 }
 0x53a   : > { %v2634_v16 = vld [vmem:[%s7153_s24 + $0x14d0] sm:$0xff]  ;;  %4008 = vmatpush.msra.mxu1 %v2574_v31  ;;  %3832 = vmatmul.f32.gmra.mxu0 %v5332_v61  ;;  %v3562_v63 = vadd.f32 %v3561_v59, %v3524_v26  ;;  %v3637_v31 = vpop.f32.mrf.mxu3  ;;  %v2091_v26 = vld [vmem:[%s7153_s24 + $0x3d8] sm:$0xff] }
 0x53b   : > { %v2694_v19 = vld [vmem:[%s7153_s24 + $0x16b0] sm:$0xff]  ;;  %4047 = vmatpush.msra.mxu2 %v2634_v16  ;;  %v2023_v59 = vld [vmem:[%s7153_s24 + $0x1b8] sm:$0xff] }
 0x53c   : > { %v2506_v25 = vld [vmem:[%s7153_s24 + $0x10d0] sm:$0xff]  ;;  %4086 = vmatpush.msra.mxu3 %v2694_v19  ;;  %3870 = vmatmul.f32.gmra.mxu1 %v5334_v6  ;;  %v3600_v60 = vadd.f32 %v3599_v33, %v3562_v63  ;;  %v5343_v61 = vld [vmem:[%s9601_s0 + $0x1b8] sm:$0xff] }
 0x53d   : > { %v2630_v18 = vld [vmem:[%s7153_s24 + $0x14b0] sm:$0xff]  ;;  %3971 = vmatpush.msra.mxu0 %v2506_v25  ;;  %3946 = vmatmul.f32.gmra.mxu3 %v5335_v9  ;;  %v2147_v63 = vld [vmem:[%s7153_s24 + $0x598] sm:$0xff] }
 0x53e   : > { %v2570_v20 = vld [vmem:[%s7153_s24 + $0x12d0] sm:$0xff]  ;;  %4048 = vmatpush.msra.mxu2 %v2630_v18  ;;  %v8489_v16 = vadd.f32 %v3637_v31, %v3600_v60  ;;  %v3564_v19 = vpop.f32.mrf.mxu1 }
 0x53f   : > { %4009 = vmatpush.msra.mxu1 %v2570_v20  ;;  %v5329_v45 = vld [vmem:[%s9601_s0 + $0x90] sm:$0xff]  ;;  %v3526_v13 = vpop.f32.mrf.mxu0  ;;  %v2159_v20 = vld [vmem:[%s7153_s24 + $0x5f8] sm:$0xff] }
 0x540   : > { %3905 = vmatmul.f32.gmra.mxu2 %v5329_v45  ;;  %v2502_v43 = vld [vmem:[%s7153_s24 + $0x10b0] sm:$0xff]  ;;  %v3527_v14 = vadd.f32 %v3526_v13, %v8338_v48  ;;  %v2031_v45 = vld [vmem:[%s7153_s24 + $0x1f8] sm:$0xff] }
 0x541   : > { %v2690_v36 = vld [vmem:[%s7153_s24 + $0x1690] sm:$0xff]  ;;  %3972 = vmatpush.msra.mxu0 %v2502_v43  ;;  %v3602_v35 = vpop.f32.mrf.mxu2  ;;  %v2223_v43 = vld [vmem:[%s7153_s24 + $0x7f8] sm:$0xff] }
 0x542   : > { %v2566_v38 = vld [vmem:[%s7153_s24 + $0x12b0] sm:$0xff]  ;;  %4087 = vmatpush.msra.mxu3 %v2690_v36  ;;  %3835 = vmatmul.f32.gmra.mxu0 %v5336_v21  ;;  %v3565_v29 = vadd.f32 %v3564_v19, %v3527_v14  ;;  %v5347_v13 = vld [vmem:[%s9601_s0 + $0x218] sm:$0xff] }
 0x543   : > { %v2626_v46 = vld [vmem:[%s7153_s24 + $0x1490] sm:$0xff]  ;;  %4010 = vmatpush.msra.mxu1 %v2566_v38  ;;  %v2095_v38 = vld [vmem:[%s7153_s24 + $0x3f8] sm:$0xff] }
 0x544   : > { %v2498_v42 = vld [vmem:[%s7153_s24 + $0x1090] sm:$0xff]  ;;  %4049 = vmatpush.msra.mxu2 %v2626_v46  ;;  %3873 = vmatmul.f32.gmra.mxu1 %v5338_v30  ;;  %v3603_v36 = vadd.f32 %v3602_v35, %v3565_v29  ;;  %v5351_v29 = vld [vmem:[%s9601_s0 + $0x278] sm:$0x1] }
 0x545   : > { %v2686_v37 = vld [vmem:[%s7153_s24 + $0x1670] sm:$0xff]  ;;  %3973 = vmatpush.msra.mxu0 %v2498_v42  ;;  %3949 = vmatmul.f32.gmra.mxu3 %v5339_v34  ;;  %v3640_v42 = vpop.f32.mrf.mxu3 }
 0x546   : > { %v2622_v49 = vld [vmem:[%s7153_s24 + $0x1470] sm:$0xff]  ;;  %4088 = vmatpush.msra.mxu3 %v2686_v37  ;;  %v8514_v39 = vadd.f32 %v3640_v42, %v3603_v36  ;;  %v3567_v56 = vpop.f32.mrf.mxu1  ;;  %v5340_v37 = vld [vmem:[%s9601_s0 + $0x1a0] sm:$0xff] }
 0x547   : > { %v2562_v23 = vld [vmem:[%s7153_s24 + $0x1290] sm:$0xff]  ;;  %4050 = vmatpush.msra.mxu2 %v2622_v49  ;;  %v3529_v41 = vpop.f32.mrf.mxu0 }
 0x548   : > { %v2494_v51 = vld [vmem:[%s7153_s24 + $0x1070] sm:$0xff]  ;;  %4011 = vmatpush.msra.mxu1 %v2562_v23  ;;  %v3530_v46 = vadd.f32 %v3529_v41, %v8365_v11  ;;  %v4584_v11 = vadd.f32 %v8514_v39, %v8489_v16  ;;  %v2219_v23 = vld [vmem:[%s7153_s24 + $0x7d8] sm:$0xff] }
 0x549   : > { %3974 = vmatpush.msra.mxu0 %v2494_v51  ;;  %v5333_v0 = vld [vmem:[%s9601_s0 + $0xf0] sm:$0xff]  ;;  %v2151_v51 = vld [vmem:[%s7153_s24 + $0x5b8] sm:$0xff] }
 0x54a   : > { %3908 = vmatmul.f32.gmra.mxu2 %v5333_v0  ;;  %v2558_v15 = vld [vmem:[%s7153_s24 + $0x1270] sm:$0xff]  ;;  %3838 = vmatmul.f32.gmra.mxu0 %v5340_v37  ;;  %v3568_v52 = vadd.f32 %v3567_v56, %v3530_v46  ;;  %v3605_v0 = vpop.f32.mrf.mxu2  ;;  %v2019_v46 = vld [vmem:[%s7153_s24 + $0x198] sm:$0xff]  ;;  %v5354_v56 = vld [vmem:[%s9601_s0 + $0x48] sm:$0xff] }
 0x54b   : > { %v2618_v3 = vld [vmem:[%s7153_s24 + $0x1450] sm:$0xff]  ;;  %4012 = vmatpush.msra.mxu1 %v2558_v15  ;;  %v2215_v15 = vld [vmem:[%s7153_s24 + $0x7b8] sm:$0xff] }
 0x54c   : > { %v2682_v1 = vld [vmem:[%s7153_s24 + $0x1650] sm:$0xff]  ;;  %4051 = vmatpush.msra.mxu2 %v2618_v3  ;;  %3876 = vmatmul.f32.gmra.mxu1 %v5342_v53  ;;  %v3606_v3 = vadd.f32 %v3605_v0, %v3568_v52  ;;  %v2211_v37 = vld [vmem:[%s7153_s24 + $0x798] sm:$0xff] }
 0x54d   : > { %v2490_v47 = vld [vmem:[%s7153_s24 + $0x1050] sm:$0xff]  ;;  %4089 = vmatpush.msra.mxu3 %v2682_v1  ;;  %v2087_v1 = vld [vmem:[%s7153_s24 + $0x3b8] sm:$0xff] }
 0x54e   : > { %v2614_v57 = vld [vmem:[%s7153_s24 + $0x1430] sm:$0xff]  ;;  %3975 = vmatpush.msra.mxu0 %v2490_v47  ;;  %3952 = vmatmul.f32.gmra.mxu3 %v5343_v61  ;;  %v3570_v33 = vpop.f32.mrf.mxu1  ;;  %v2207_v53 = vld [vmem:[%s7153_s24 + $0x778] sm:$0xff] }
 0x54f   : > { %v2554_v10 = vld [vmem:[%s7153_s24 + $0x1250] sm:$0xff]  ;;  %4052 = vmatpush.msra.mxu2 %v2614_v57  ;;  %v3532_v6 = vpop.f32.mrf.mxu0  ;;  %v3643_v57 = vpop.f32.mrf.mxu3  ;;  %v2011_v0 = vld [vmem:[%s7153_s24 + $0x158] sm:$0xff] }
 0x550   : > { %v2678_v24 = vld [vmem:[%s7153_s24 + $0x1630] sm:$0xff]  ;;  %4013 = vmatpush.msra.mxu1 %v2554_v10  ;;  %v3533_v47 = vadd.f32 %v3532_v6, %v8392_v44  ;;  %v8539_v9 = vadd.f32 %v3643_v57, %v3606_v3  ;;  %v5344_v10 = vld [vmem:[%s9601_s0 + $0x200] sm:$0xff]  ;;  %v5346_v44 = vld [vmem:[%s9601_s0 + $0x208] sm:$0xff] }
 0x551   : > { %v2486_v12 = vld [vmem:[%s7153_s24 + $0x1030] sm:$0xff]  ;;  %4090 = vmatpush.msra.mxu3 %v2678_v24  ;;  %v2075_v6 = vld [vmem:[%s7153_s24 + $0x358] sm:$0xff] }
 0x552   : > { %3976 = vmatpush.msra.mxu0 %v2486_v12  ;;  %v5337_v54 = vld [vmem:[%s9601_s0 + $0x150] sm:$0xff]  ;;  %v4585_v60 = vadd.f32 %v4584_v11, %v8539_v9  ;;  %v3571_v12 = vadd.f32 %v3570_v33, %v3533_v47  ;;  %v3608_v14 = vpop.f32.mrf.mxu2  ;;  %v2083_v11 = vld [vmem:[%s7153_s24 + $0x398] sm:$0xff] }
 0x553   : > { %3911 = vmatmul.f32.gmra.mxu2 %v5337_v54  ;;  %v2550_v25 = vld [vmem:[%s7153_s24 + $0x1230] sm:$0xff]  ;;  %3841 = vmatmul.f32.gmra.mxu0 %v5344_v10  ;;  %v2007_v33 = vld [vmem:[%s7153_s24 + $0x138] sm:$0xff] }
 0x554   : > { %v2610_v48 = vld [vmem:[%s7153_s24 + $0x1410] sm:$0xff]  ;;  %4014 = vmatpush.msra.mxu1 %v2550_v25  ;;  %v3609_v31 = vadd.f32 %v3608_v14, %v3571_v12  ;;  %v2199_v12 = vld [vmem:[%s7153_s24 + $0x738] sm:$0xff]  ;;  %v5358_v14 = vld [vmem:[%s9601_s0 + $0xa8] sm:$0xff] }
 0x555   : > { %v2482_v17 = vld [vmem:[%s7153_s24 + $0x1010] sm:$0xff]  ;;  %4053 = vmatpush.msra.mxu2 %v2610_v48  ;;  %3879 = vmatmul.f32.gmra.mxu1 %v5346_v44  ;;  %v2131_v44 = vld [vmem:[%s7153_s24 + $0x518] sm:$0xff] }
 0x556   : > { %v2674_v18 = vld [vmem:[%s7153_s24 + $0x1610] sm:$0xff]  ;;  %3977 = vmatpush.msra.mxu0 %v2482_v17  ;;  %3955 = vmatmul.f32.gmra.mxu3 %v5347_v13  ;;  %v3573_v48 = vpop.f32.mrf.mxu1  ;;  %v5348_v17 = vld [vmem:[%s9601_s0 + $0x260] sm:$0x1] }
 0x557   : > { %v2546_v28 = vld [vmem:[%s7153_s24 + $0x1210] sm:$0xff]  ;;  %4091 = vmatpush.msra.mxu3 %v2674_v18  ;;  %4190 = vmatpush.msrb.mxu2 %v2159_v20  ;;  %v3535_v19 = vpop.f32.mrf.mxu0  ;;  %v3646_v54 = vpop.f32.mrf.mxu3 }
 0x558   : > { %4015 = vmatpush.msra.mxu1 %v2546_v28  ;;  %4114 = vmatpush.msrb.mxu0 %v2031_v45  ;;  %v5341_v49 = vld [vmem:[%s9601_s0 + $0x1b0] sm:$0xff]  ;;  %v3536_v21 = vadd.f32 %v3535_v19, %v8419_v7  ;;  %v8555_v25 = vadd.f32 %v3646_v54, %v3609_v31  ;;  %v5350_v7 = vld [vmem:[%s9601_s0 + $0x268] sm:$0x1]  ;;  %v2003_v31 = vld [vmem:[%s7153_s24 + $0x118] sm:$0xff] }
 0x559   : > { %4228 = vmatpush.msrb.mxu3 %v2223_v43  ;;  %4191 = vmatpush.msrb.mxu2 %v2155_v40  ;;  %v5345_v24 = vld [vmem:[%s9601_s0 + $0x210] sm:$0xff]  ;;  %v5352_v40 = vld [vmem:[%s9601_s0 + $0x40] sm:$0xff]  ;;  %v2067_v19 = vld [vmem:[%s7153_s24 + $0x318] sm:$0xff] }
 0x55a   : > { %4152 = vmatpush.msrb.mxu1 %v2095_v38  ;;  %4115 = vmatpush.msrb.mxu0 %v2027_v50  ;;  %v5349_v18 = vld [vmem:[%s9601_s0 + $0x270] sm:$0x1]  ;;  %v4586_v20 = vadd.f32 %v4585_v60, %v8555_v25  ;;  %v3574_v28 = vadd.f32 %v3573_v48, %v3536_v21  ;;  %v3611_v30 = vpop.f32.mrf.mxu2  ;;  %v5355_v50 = vld [vmem:[%s9601_s0 + $0x58] sm:$0xff] }
 0x55b   : > { %3914 = vmatmul.f32.gmra.mxu2 %v5341_v49  ;;  %4229 = vmatpush.msrb.mxu3 %v2219_v23  ;;  %v5353_v41 = vld [vmem:[%s9601_s0 + $0x50] sm:$0xff]  ;;  %v2143_v49 = vld [vmem:[%s7153_s24 + $0x578] sm:$0xff] }
 0x55c   : > { %4192 = vmatpush.msrb.mxu2 %v2151_v51  ;;  %4153 = vmatpush.msrb.mxu1 %v2091_v26  ;;  %v3612_v34 = vadd.f32 %v3611_v30, %v3574_v28  ;;  %v2015_v51 = vld [vmem:[%s7153_s24 + $0x178] sm:$0xff]  ;;  %v5357_v10 = vld [vmem:[%s9601_s0 + $0xb0] sm:$0xff] }
 0x55d   : > { %4116 = vmatpush.msrb.mxu0 %v2023_v59  ;;  %4230 = vmatpush.msrb.mxu3 %v2215_v15  ;;  %v2079_v26 = vld [vmem:[%s7153_s24 + $0x378] sm:$0xff] }
 0x55e   : > { %4193 = vmatpush.msrb.mxu2 %v2147_v63  ;;  %4154 = vmatpush.msrb.mxu1 %v2087_v1  ;;  %v3576_v38 = vpop.f32.mrf.mxu1  ;;  %v2139_v59 = vld [vmem:[%s7153_s24 + $0x558] sm:$0xff] }
 0x55f   : > { %3844 = vmatmul.f32.gmra.mxu0 %v5348_v17  ;;  %3882 = vmatmul.f32.gmra.mxu1 %v5350_v7  ;;  %v3538_v35 = vpop.f32.mrf.mxu0  ;;  %v3649_v43 = vpop.f32.mrf.mxu3  ;;  %v2203_v1 = vld [vmem:[%s7153_s24 + $0x758] sm:$0xff] }
 0x560   : > { %3958 = vmatmul.f32.gmra.mxu3 %v5351_v29  ;;  %v3539_v45 = vadd.f32 %v3538_v35, %v8442_v32  ;;  %v8571_v36 = vadd.f32 %v3649_v43, %v3612_v34  ;;  %4117 = vmatpush.msrb.mxu0 %v2019_v46  ;;  %v2135_v63 = vld [vmem:[%s7153_s24 + $0x538] sm:$0xff]  ;;  %v4675_v29 = vmul.f32 %v8169_v2, %v8169_v2  ;;  %v5360_v46 = vld [vmem:[%s9601_s0 + $0x100] sm:$0xff] }
 0x561   : > { %4194 = vmatpush.msrb.mxu2 %v2143_v49  ;;  %4231 = vmatpush.msrb.mxu3 %v2211_v37  ;;  %v5359_v21 = vld [vmem:[%s9601_s0 + $0xb8] sm:$0xff] }
 0x562   : > { %v4587_v42 = vadd.f32 %v4586_v20, %v8571_v36  ;;  %v3577_v32 = vadd.f32 %v3576_v38, %v3539_v45  ;;  %v3614_v23 = vpop.f32.mrf.mxu2  ;;  %4155 = vmatpush.msrb.mxu1 %v2083_v11  ;;  %4118 = vmatpush.msrb.mxu0 %v2015_v51  ;;  %v2195_v48 = vld [vmem:[%s7153_s24 + $0x718] sm:$0xff]  ;;  %v4679_v45 = vmul.f32 %v8172_v22, %v8172_v22 }
 0x563   : > { %3917 = vmatmul.f32.gmra.mxu2 %v5345_v24  ;;  %4232 = vmatpush.msrb.mxu3 %v2207_v53  ;;  %v2071_v24 = vld [vmem:[%s7153_s24 + $0x338] sm:$0xff] }
 0x564   : > { %v3615_v52 = vadd.f32 %v3614_v23, %v3577_v32  ;;  %4195 = vmatpush.msrb.mxu2 %v2139_v59  ;;  %4156 = vmatpush.msrb.mxu1 %v2079_v26  ;;  %v2127_v17 = vld [vmem:[%s7153_s24 + $0x4f8] sm:$0xff] }
 0x565   : > { %4119 = vmatpush.msrb.mxu0 %v2011_v0  ;;  %4233 = vmatpush.msrb.mxu3 %v2203_v1  ;;  %v1999_v20 = vld [vmem:[%s7153_s24 + $0xf8] sm:$0xff] }
 0x566   : > { %v3579_v57 = vpop.f32.mrf.mxu1  ;;  %4196 = vmatpush.msrb.mxu2 %v2135_v63  ;;  %4157 = vmatpush.msrb.mxu1 %v2075_v6  ;;  %v2063_v28 = vld [vmem:[%s7153_s24 + $0x2f8] sm:$0xff] }
 0x567   : > { %3978 = vmatmul.f32.vlgmr.msra.gmra.mxu0 %v5352_v40  ;;  %4016 = vmatmul.f32.vlgmr.msra.gmra.mxu1 %v5354_v56  ;;  %v3541_v61 = vpop.f32.mrf.mxu0  ;;  %v3652_v3 = vpop.f32.mrf.mxu3  ;;  %v2191_v34 = vld [vmem:[%s7153_s24 + $0x6f8] sm:$0xff] }
 0x568   : > { %5155 = vmatmul.msk.f32.vlgmr.msra.gmra.mxu3 %vm2724_vm0, %v5355_v50  ;;  %v3542_v15 = vadd.f32 %v3541_v61, %v8466_v55  ;;  %v8600_v47 = vadd.f32 %v3652_v3, %v3615_v52  ;;  %v5356_v55 = vld [vmem:[%s9601_s0 + $0xa0] sm:$0xff]  ;;  %4120 = vmatpush.msrb.mxu0 %v2007_v33  ;;  %v2123_v35 = vld [vmem:[%s7153_s24 + $0x4d8] sm:$0xff]  ;;  %v5362_v50 = vld [vmem:[%s9601_s0 + $0x108] sm:$0xff]  ;;  %v4688_v52 = vsel %vm4575_vm1, %v4679_v45, 0.0 }
 0x569   : > { %4158 = vmatpush.msrb.mxu1 %v2071_v24  ;;  %4234 = vmatpush.msrb.mxu3 %v2199_v12  ;;  %v1995_v40 = vld [vmem:[%s7153_s24 + $0xd8] sm:$0xff] }
 0x56a   : > { %v4588_v60 = vadd.f32 %v4587_v42, %v8600_v47  ;;  %v3580_v13 = vadd.f32 %v3579_v57, %v3542_v15  ;;  %v3617_v54 = vpop.f32.mrf.mxu2  ;;  %4197 = vmatpush.msrb.mxu2 %v2131_v44  ;;  %4121 = vmatpush.msrb.mxu0 %v2003_v31  ;;  %v5361_v42 = vld [vmem:[%s9601_s0 + $0x110] sm:$0xff]  ;;  %v2119_v32 = vld [vmem:[%s7153_s24 + $0x4b8] sm:$0xff] }
 0x56b   : > { %3920 = vmatmul.f32.gmra.mxu2 %v5349_v18  ;;  %4159 = vmatpush.msrb.mxu1 %v2067_v19  ;;  %v2059_v37 = vld [vmem:[%s7153_s24 + $0x2d8] sm:$0xff]  ;;  %v5365_v31 = vld [vmem:[%s9601_s0 + $0x170] sm:$0xff] }
 0x56c   : > { %v3618_v18 = vadd.f32 %v3617_v54, %v3580_v13  ;;  %4235 = vmatpush.msrb.mxu3 %v2195_v48  ;;  %4198 = vmatpush.msrb.mxu2 %v2127_v17  ;;  %v1991_v23 = vld [vmem:[%s7153_s24 + $0xb8] sm:$0xff] }
 0x56d   : > { %4122 = vmatpush.msrb.mxu0 %v1999_v20  ;;  %4160 = vmatpush.msrb.mxu1 %v2063_v28  ;;  %v2115_v51 = vld [vmem:[%s7153_s24 + $0x498] sm:$0xff] }
 0x56e   : > { %v3713_v38 = vpop.f32.mrf.mxu1  ;;  %4236 = vmatpush.msrb.mxu3 %v2191_v34  ;;  %4199 = vmatpush.msrb.mxu2 %v2123_v35  ;;  %v5363_v53 = vld [vmem:[%s9601_s0 + $0x118] sm:$0xff] }
 0x56f   : > { %3981 = vmatmul.f32.gmra.mxu0 %v5356_v55  ;;  %4019 = vmatmul.f32.gmra.mxu1 %v5358_v14  ;;  %v3675_v7 = vpop.f32.mrf.mxu0  ;;  %v3655_v30 = vpop.f32.mrf.mxu3  ;;  %v2183_v59 = vld [vmem:[%s7153_s24 + $0x6b8] sm:$0xff]  ;;  %v5364_v14 = vld [vmem:[%s9601_s0 + $0x160] sm:$0xff] }
 0x570   : > { %5156 = vmatmul.msk.f32.gmra.mxu3 %vm2724_vm0, %v5359_v21  ;;  %v8632_v43 = vadd.f32 %v3655_v30, %v3618_v18  ;;  %v3714_v11 = vadd.f32 %v3713_v38, %v3675_v7  ;;  %4123 = vmatpush.msrb.mxu0 %v1995_v40  ;;  %v2055_v61 = vld [vmem:[%s7153_s24 + $0x2b8] sm:$0xff]  ;;  %v5366_v18 = vld [vmem:[%s9601_s0 + $0x168] sm:$0xff] }
 0x571   : > { %4200 = vmatpush.msrb.mxu2 %v2119_v32  ;;  %4161 = vmatpush.msrb.mxu1 %v2059_v37  ;;  %v1987_v1 = vld [vmem:[%s7153_s24 + $0x98] sm:$0xff] }
 0x572   : > { %v4589_v56 = vsel %vm4575_vm1, %v8632_v43, 0.0  ;;  %v3751_v26 = vpop.f32.mrf.mxu2  ;;  %v2111_v63 = vld [vmem:[%s7153_s24 + $0x478] sm:$0xff]  ;;  %4124 = vmatpush.msrb.mxu0 %v1991_v23  ;;  %v5368_v23 = vld [vmem:[%s9601_s0 + $0x1c0] sm:$0xff] }
 0x573   : > { %4054 = vmatmul.f32.vlgmr.msra.gmra.mxu2 %v5353_v41  ;;  %v4687_v41 = vadd.f32 %v8203_v27, %v4675_v29  ;;  %v2187_v27 = vld [vmem:[%s7153_s24 + $0x6d8] sm:$0xff]  ;;  %v4590_v49 = vadd.f32 %v4589_v56, %v4588_v60  ;;  %v3752_v3 = vadd.f32 %v3751_v26, %v3714_v11  ;;  %4162 = vmatpush.msrb.mxu1 %v2055_v61 }
 0x574   : > { %4237 = vmatpush.msrb.mxu3 %v2187_v27  ;;  %4201 = vmatpush.msrb.mxu2 %v2115_v51  ;;  %v2179_v55 = vld [vmem:[%s7153_s24 + $0x698] sm:$0xff]  ;;  %v5369_v51 = vld [vmem:[%s9601_s0 + $0x1d0] sm:$0xff] }
 0x575   : > { %v4689_v0 = vadd.f32 %v4688_v52, %v4687_v41  ;;  %v4591_v15 = vrot.slane %v4590_v49, 4  ;;  %4125 = vmatpush.msrb.mxu0 %v1987_v1  ;;  %v1983_v12 = vld [vmem:[%s7153_s24 + $0x78] sm:$0xff] }
 0x576   : > { %4238 = vmatpush.msrb.mxu3 %v2183_v59  ;;  %v3716_v60 = vpop.f32.mrf.mxu1  ;;  %4202 = vmatpush.msrb.mxu2 %v2111_v63  ;;  %v2047_v19 = vld [vmem:[%s7153_s24 + $0x278] sm:$0xff] }
 0x577   : > { %3984 = vmatmul.f32.gmra.mxu0 %v5360_v46  ;;  %4022 = vmatmul.f32.gmra.mxu1 %v5362_v50  ;;  %v3678_v6 = vpop.f32.mrf.mxu0  ;;  %v4592_v57 = vadd.f32 %v4591_v15, %v4590_v49  ;;  %v3789_v33 = vpop.f32.mrf.mxu3  ;;  %v4690_v44 = vrot.slane %v4689_v0, 4  ;;  %v2175_v21 = vld [vmem:[%s7153_s24 + $0x678] sm:$0xff] }
 0x578   : > { %5157 = vmatmul.msk.f32.gmra.mxu3 %vm2724_vm0, %v5363_v53  ;;  %v8663_v24 = vadd.f32 %v3789_v33, %v3752_v3  ;;  %v2107_v54 = vld [vmem:[%s7153_s24 + $0x458] sm:$0xff]  ;;  %v3717_v17 = vadd.f32 %v3716_v60, %v3678_v6  ;;  %4126 = vmatpush.msrb.mxu0 %v1983_v12  ;;  %v5370_v3 = vld [vmem:[%s9601_s0 + $0x1c8] sm:$0xff] }
 0x579   : > { %v4593_v13 = vrot.slane %v4592_v57, 2  ;;  %4239 = vmatpush.msrb.mxu3 %v2179_v55  ;;  %v1979_v20 = vld [vmem:[%s7153_s24 + $0x58] sm:$0xff]  ;;  %v4691_v35 = vadd.f32 %v4690_v44, %v4689_v0  ;;  %4203 = vmatpush.msrb.mxu2 %v2107_v54 }
 0x57a   : > { %v2043_v28 = vld [vmem:[%s7153_s24 + $0x258] sm:$0xff]  ;;  %v3754_v29 = vpop.f32.mrf.mxu2  ;;  %4127 = vmatpush.msrb.mxu0 %v1979_v20 }
 0x57b   : > { %4057 = vmatmul.f32.gmra.mxu2 %v5357_v10  ;;  %v2051_v10 = vld [vmem:[%s7153_s24 + $0x298] sm:$0xff]  ;;  %v4594_v48 = vadd.f32 %v4593_v13, %v4592_v57  ;;  %v3755_v38 = vadd.f32 %v3754_v29, %v3717_v17  ;;  %4240 = vmatpush.msrb.mxu3 %v2175_v21  ;;  %v4692_v11 = vrot.slane %v4691_v35, 2  ;;  %v5374_v17 = vld [vmem:[%s9601_s0 + $0x228] sm:$0xff] }
 0x57c   : > { %4163 = vmatpush.msrb.mxu1 %v2051_v10  ;;  %v5367_v7 = vld [vmem:[%s9601_s0 + $0x178] sm:$0xff] }
 0x57d   : > { %v2171_v30 = vld [vmem:[%s7153_s24 + $0x658] sm:$0xff]  ;;  %v4595_v45 = vrot.slane %v4594_v48, 1  ;;  %v4693_v6 = vadd.f32 %v4692_v11, %v4691_v35 }
 0x57e   : > { %4164 = vmatpush.msrb.mxu1 %v2047_v19  ;;  %v2103_v34 = vld [vmem:[%s7153_s24 + $0x438] sm:$0xff]  ;;  %4241 = vmatpush.msrb.mxu3 %v2171_v30  ;;  %v3719_v49 = vpop.f32.mrf.mxu1  ;;  %v5373_v19 = vld [vmem:[%s9601_s0 + $0x230] sm:$0xff] }
 0x57f   : > { %3987 = vmatmul.f32.gmra.mxu0 %v5364_v14  ;;  %4025 = vmatmul.f32.gmra.mxu1 %v5366_v18  ;;  %v1975_v40 = vld [vmem:[%s7153_s24 + $0x38] sm:$0xff]  ;;  %v3681_v46 = vpop.f32.mrf.mxu0  ;;  %v3792_v32 = vpop.f32.mrf.mxu3  ;;  %v4694_v44 = vrot.slane %v4693_v6, 1 }
 0x580   : > { %5158 = vmatmul.msk.f32.gmra.mxu3 %vm2724_vm0, %v5367_v7  ;;  %v2039_v41 = vld [vmem:[%s7153_s24 + $0x238] sm:$0xff]  ;;  %4165 = vmatpush.msrb.mxu1 %v2043_v28  ;;  %v8690_v37 = vadd.f32 %v3792_v32, %v3755_v38  ;;  %v3720_v53 = vadd.f32 %v3719_v49, %v3681_v46 }
 0x581   : > { %4204 = vmatpush.msrb.mxu2 %v2103_v34  ;;  %v2167_v56 = vld [vmem:[%s7153_s24 + $0x638] sm:$0xff]  ;;  %4128 = vmatpush.msrb.mxu0 %v1975_v40  ;;  %v4695_v7 = vadd.f32 %v4694_v44, %v4693_v6 }
 0x582   : > { %v2099_v27 = vld [vmem:[%s7153_s24 + $0x418] sm:$0xff]  ;;  %4166 = vmatpush.msrb.mxu1 %v2039_v41  ;;  %4242 = vmatpush.msrb.mxu3 %v2167_v56  ;;  %v5376_v56 = vld [vmem:[%s9601_s0 + $0x280] sm:$0x1] }
 0x583   : > { %4060 = vmatmul.f32.gmra.mxu2 %v5361_v42  ;;  %v4596_v42 = vadd.f32 %v4595_v45, %v4594_v48  ;;  %v1971_v52 = vld [vmem:[%s7153_s24 + $0x18] sm:$0xff] }
 0x584   : > { %4205 = vmatpush.msrb.mxu2 %v2099_v27  ;;  %v2163_v26 = vld [vmem:[%s7153_s24 + $0x618] sm:$0xff]  ;;  %4129 = vmatpush.msrb.mxu0 %v1971_v52  ;;  %v5377_v27 = vld [vmem:[%s9601_s0 + $0x290] sm:$0x1] }
 0x585   : > { %v4624_v50 = vmul.f32 0.020408163, %v4596_v42  ;;  %v2035_v1 = vld [vmem:[%s7153_s24 + $0x218] sm:$0xff]  ;;  %4243 = vmatpush.msrb.mxu3 %v2163_v26  ;;  %v4735_v42 = vmul.f32 0.020408163, %v4695_v7 }
 0x586   : > { %4167 = vmatpush.msrb.mxu1 %v2035_v1  ;;  %v3722_v12 = vpop.f32.mrf.mxu1  ;;  %v5375_v20 = vld [vmem:[%s9601_s0 + $0x238] sm:$0xff] }
 0x587   : > { %3990 = vmatmul.f32.gmra.mxu0 %v5368_v23  ;;  %v8701_v59 = vsub.f32 %v8489_v16, %v4624_v50  ;;  %v8704_v61 = vsub.f32 %v8514_v39, %v4624_v50  ;;  %v8707_v0 = vsub.f32 %v8539_v9, %v4624_v50  ;;  %v8710_v15 = vsub.f32 %v8555_v25, %v4624_v50  ;;  %v5371_v9 = vld [vmem:[%s9601_s0 + $0x1d8] sm:$0xff]  ;;  %v3757_v25 = vpop.f32.mrf.mxu2  ;;  %v3684_v33 = vpop.f32.mrf.mxu0 }
 0x588   : > { %4028 = vmatmul.f32.gmra.mxu1 %v5370_v3  ;;  %v8717_v63 = vsub.f32 %v8571_v36, %v4624_v50  ;;  %v8720_v16 = vsub.f32 %v8600_v47, %v4624_v50  ;;  %v8723_v39 = vsub.f32 %v8632_v43, %v4624_v50  ;;  %5159 = vmatmul.msk.f32.gmra.mxu3 %vm2724_vm0, %v5371_v9  ;;  %v3795_v10 = vpop.f32.mrf.mxu3  ;;  %v5378_v50 = vld [vmem:[%s9601_s0 + $0x288] sm:$0x1]  ;;  %v2415_v23 = vld [vmem:[%s7153_s24 + $0xdf8] sm:$0xff]  ;;  %v8776_v26 = vadd.f32 1e-05, %v4735_v42 }
 0x589   : > { %v4656_v57 = vmul.f32 %v8701_v59, %v8701_v59  ;;  %v4660_v36 = vmul.f32 %v8704_v61, %v8704_v61  ;;  %v3758_v47 = vadd.f32 %v3757_v25, %v3720_v53  ;;  %v4664_v43 = vmul.f32 %v8707_v0, %v8707_v0  ;;  %v5379_v52 = vld [vmem:[%s9601_s0 + $0x298] sm:$0x1]  ;;  %4342 = vmatpush.msra.mxu2 %v2415_v23 }
 0x58a   : > { %v4668_v13 = vmul.f32 %v8710_v15, %v8710_v15  ;;  %v4672_v21 = vmul.f32 %v8717_v63, %v8717_v63  ;;  %v3723_v48 = vadd.f32 %v3722_v12, %v3684_v33  ;;  %v4680_v18 = vmul.f32 %v8723_v39, %v8723_v39  ;;  %v2479_v9 = vld [vmem:[%s7153_s24 + $0xff8] sm:$0xff] }
 0x58b   : > { %4063 = vmatmul.f32.gmra.mxu2 %v5365_v31  ;;  %v4696_v55 = vadd.f32 %v4660_v36, %v4656_v57  ;;  %v8735_v60 = vadd.f32 %v3795_v10, %v3758_v47  ;;  %v5372_v31 = vld [vmem:[%s9601_s0 + $0x220] sm:$0xff]  ;;  %v4676_v29 = vmul.f32 %v8720_v16, %v8720_v16  ;;  %v2351_v25 = vld [vmem:[%s7153_s24 + $0xbf8] sm:$0xff]  ;;  %4380 = vmatpush.msra.mxu3 %v2479_v9  ;;  %5204 = vrsqrt.f32 %v8776_v26 }
 0x58c   : > { %v4701_v40 = vsel %vm4575_vm1, %v4680_v18, 0.0  ;;  %v2411_v6 = vld [vmem:[%s7153_s24 + $0xdd8] sm:$0xff]  ;;  %4304 = vmatpush.msra.mxu1 %v2351_v25  ;;  %vm4750_vm6 = vweird.f32 %v8776_v26 }
 0x58d   : > { %v4697_v14 = vadd.f32 %v4696_v55, %v4664_v43  ;;  %v2283_v36 = vld [vmem:[%s7153_s24 + $0x9d8] sm:$0xff]  ;;  %4343 = vmatpush.msra.mxu2 %v2411_v6 }
 0x58e   : > { %v3725_v46 = vpop.f32.mrf.mxu1  ;;  %v2475_v43 = vld [vmem:[%s7153_s24 + $0xfd8] sm:$0xff] }
 0x58f   : > { %3993 = vmatmul.f32.gmra.mxu0 %v5372_v31  ;;  %v4698_v54 = vadd.f32 %v4697_v14, %v4668_v13  ;;  %v3760_v28 = vpop.f32.mrf.mxu2  ;;  %v3687_v35 = vpop.f32.mrf.mxu0  ;;  %v2407_v55 = vld [vmem:[%s7153_s24 + $0xdb8] sm:$0xff]  ;;  %4381 = vmatpush.msra.mxu3 %v2475_v43 }
 0x590   : > { %4031 = vmatmul.f32.gmra.mxu1 %v5374_v17  ;;  %5160 = vmatmul.msk.f32.gmra.mxu3 %vm2724_vm0, %v5375_v20  ;;  %v3761_v34 = vadd.f32 %v3760_v28, %v3723_v48  ;;  %v3798_v38 = vpop.f32.mrf.mxu3  ;;  %v3726_v11 = vadd.f32 %v3725_v46, %v3687_v35  ;;  %v2347_v10 = vld [vmem:[%s7153_s24 + $0xbd8] sm:$0xff]  ;;  %v5382_v28 = vld [vmem:[%s9601_s0 + $0x8] sm:$0xff] }
 0x591   : > { %v4699_v30 = vadd.f32 %v4698_v54, %v4672_v21  ;;  %4305 = vmatpush.msra.mxu1 %v2347_v10  ;;  %v2279_v13 = vld [vmem:[%s7153_s24 + $0x9b8] sm:$0xff]  ;;  %v5381_v21 = vld [vmem:[%s9601_s0 + $0x10] sm:$0xff]  ;;  %4344 = vmatpush.msra.mxu2 %v2407_v55 }
 0x592   : > { %v8759_v41 = vadd.f32 %v3798_v38, %v3761_v34  ;;  %v2471_v14 = vld [vmem:[%s7153_s24 + $0xfb8] sm:$0xff] }
 0x593   : > { %4066 = vmatmul.f32.gmra.mxu2 %v5369_v51  ;;  %v4700_v45 = vadd.f32 %v4699_v30, %v4676_v29  ;;  %v2287_v51 = vld [vmem:[%s7153_s24 + $0x9f8] sm:$0xff]  ;;  %4382 = vmatpush.msra.mxu3 %v2471_v14 }
 0x594   : > { %4266 = vmatpush.msra.mxu0 %v2287_v51  ;;  %v2343_v54 = vld [vmem:[%s7153_s24 + $0xbb8] sm:$0xff] }
 0x595   : > { %v4702_v32 = vadd.f32 %v4701_v40, %v4700_v45  ;;  %v2403_v48 = vld [vmem:[%s7153_s24 + $0xd98] sm:$0xff]  ;;  %4306 = vmatpush.msra.mxu1 %v2343_v54 }
 0x596   : > { %4267 = vmatpush.msra.mxu0 %v2283_v36  ;;  %v2275_v17 = vld [vmem:[%s7153_s24 + $0x998] sm:$0xff]  ;;  %4345 = vmatpush.msra.mxu2 %v2403_v48 }
 0x597   : > { %3996 = vmatmul.f32.gmra.mxu0 %v5376_v56  ;;  %v4703_v49 = vrot.slane %v4702_v32, 4  ;;  %v3763_v53 = vpop.f32.mrf.mxu2  ;;  %v3690_v57 = vpop.f32.mrf.mxu0  ;;  %v2467_v7 = vld [vmem:[%s7153_s24 + $0xf98] sm:$0xff] }
 0x598   : > { %4034 = vmatmul.f32.gmra.mxu1 %v5378_v50  ;;  %5161 = vmatmul.msk.f32.gmra.mxu3 %vm2724_vm0, %v5379_v52  ;;  %v3764_v1 = vadd.f32 %v3763_v53, %v3726_v11  ;;  %v3801_v33 = vpop.f32.mrf.mxu3  ;;  %v3728_v44 = vpop.f32.mrf.mxu1  ;;  %v2339_v29 = vld [vmem:[%s7153_s24 + $0xb98] sm:$0xff] }
 0x599   : > { %v4704_v3 = vadd.f32 %v4703_v49, %v4702_v32  ;;  %4268 = vmatpush.msra.mxu0 %v2279_v13  ;;  %v3729_v20 = vadd.f32 %v3728_v44, %v3690_v57  ;;  %v5383_v30 = vld [vmem:[%s9601_s0 + $0x18] sm:$0xff]  ;;  %4383 = vmatpush.msra.mxu3 %v2467_v7  ;;  %v8811_v56 = vpop.eup %5204 }
 0x59a   : > { %v8785_v12 = vadd.f32 %v3801_v33, %v3764_v1  ;;  %v2399_v35 = vld [vmem:[%s7153_s24 + $0xd78] sm:$0xff]  ;;  %4307 = vmatpush.msra.mxu1 %v2339_v29  ;;  %v5385_v1 = vld [vmem:[%s9601_s0 + $0x70] sm:$0xff]  ;;  %v4745_v25 = vmul.f32 %v8811_v56, %v8776_v26  ;;  %vm4751_vm3 = vweird.f32 %v8811_v56 }
 0x59b   : > { %4069 = vmatmul.f32.gmra.mxu2 %v5373_v19  ;;  %v4705_v47 = vrot.slane %v4704_v3, 2  ;;  %v5380_v19 = vld [vmem:[%s9601_s0] sm:$0xff]  ;;  %v2271_v45 = vld [vmem:[%s7153_s24 + $0x978] sm:$0xff]  ;;  %4269 = vmatpush.msra.mxu0 %v2275_v17  ;;  %vm4752_vm7 = vmor %vm4750_vm6, %vm4751_vm3 }
 0x59c   : > { %v2463_v46 = vld [vmem:[%s7153_s24 + $0xf78] sm:$0xff]  ;;  %4346 = vmatpush.msra.mxu2 %v2399_v35 }
 0x59d   : > { %v4706_v31 = vadd.f32 %v4705_v47, %v4704_v3  ;;  %v2335_v42 = vld [vmem:[%s7153_s24 + $0xb78] sm:$0xff]  ;;  %4270 = vmatpush.msra.mxu0 %v2271_v45  ;;  %4384 = vmatpush.msra.mxu3 %v2463_v46  ;;  %v5384_v3 = vld [vmem:[%s9601_s0 + $0x60] sm:$0xff]  ;;  %v5386_v47 = vld [vmem:[%s9601_s0 + $0x68] sm:$0xff] }
 0x59e   : > { %v2395_v11 = vld [vmem:[%s7153_s24 + $0xd58] sm:$0xff]  ;;  %4308 = vmatpush.msra.mxu1 %v2335_v42 }
 0x59f   : > { %4130 = vmatmul.f32.vlgmr.msrb.gmra.mxu0 %v5380_v19  ;;  %v4707_v18 = vrot.slane %v4706_v31, 1  ;;  %v3693_v32 = vpop.f32.mrf.mxu0  ;;  %v2267_v50 = vld [vmem:[%s7153_s24 + $0x958] sm:$0xff]  ;;  %4347 = vmatpush.msra.mxu2 %v2395_v11 }
 0x5a0   : > { %4168 = vmatmul.f32.vlgmr.msrb.gmra.mxu1 %v5382_v28  ;;  %4244 = vmatmul.f32.vlgmr.msrb.gmra.mxu3 %v5383_v30  ;;  %v3804_v49 = vpop.f32.mrf.mxu3  ;;  %v3731_v51 = vpop.f32.mrf.mxu1  ;;  %v2459_v52 = vld [vmem:[%s7153_s24 + $0xf58] sm:$0xff] }
 0x5a1   : > { %v3766_v34 = vpop.f32.mrf.mxu2  ;;  %v4708_v38 = vadd.f32 %v4707_v18, %v4706_v31  ;;  %v2391_v9 = vld [vmem:[%s7153_s24 + $0xd38] sm:$0xff]  ;;  %4271 = vmatpush.msra.mxu0 %v2267_v50  ;;  %v3732_v36 = vadd.f32 %v3731_v51, %v3693_v32  ;;  %4385 = vmatpush.msra.mxu3 %v2459_v52  ;;  %v5390_v32 = vld [vmem:[%s9601_s0 + $0xc8] sm:$0xff] }
 0x5a2   : > { %v3767_v40 = vadd.f32 %v3766_v34, %v3729_v20  ;;  %v2331_v6 = vld [vmem:[%s7153_s24 + $0xb58] sm:$0xff]  ;;  %4348 = vmatpush.msra.mxu2 %v2391_v9  ;;  %v5388_v34 = vld [vmem:[%s9601_s0 + $0xc0] sm:$0xff] }
 0x5a3   : > { %4072 = vmatmul.f32.gmra.mxu2 %v5377_v27  ;;  %v4736_v27 = vmul.f32 0.020408163, %v4708_v38  ;;  %v2263_v57 = vld [vmem:[%s7153_s24 + $0x938] sm:$0xff]  ;;  %4309 = vmatpush.msra.mxu1 %v2331_v6 }
 0x5a4   : > { %v8815_v23 = vadd.f32 %v3804_v49, %v3767_v40  ;;  %v2455_v33 = vld [vmem:[%s7153_s24 + $0xf38] sm:$0xff]  ;;  %4272 = vmatpush.msra.mxu0 %v2263_v57 }
 0x5a5   : > { %v8818_v53 = vadd.f32 1e-05, %v4736_v27  ;;  %v2387_v43 = vld [vmem:[%s7153_s24 + $0xd18] sm:$0xff]  ;;  %4386 = vmatpush.msra.mxu3 %v2455_v33 }
 0x5a6   : > { %v5387_v55 = vld [vmem:[%s9601_s0 + $0x78] sm:$0xff]  ;;  %4349 = vmatpush.msra.mxu2 %v2387_v43 }
 0x5a7   : > { %4133 = vmatmul.f32.gmra.mxu0 %v5384_v3  ;;  %5206 = vrsqrt.f32 %v8818_v53  ;;  %v2327_v44 = vld [vmem:[%s7153_s24 + $0xb38] sm:$0xff]  ;;  %v3827_v54 = vpop.f32.mrf.mxu0  ;;  %vm4760_vm4 = vweird.f32 %v8818_v53 }
 0x5a8   : > { %4171 = vmatmul.f32.gmra.mxu1 %v5386_v47  ;;  %4247 = vmatmul.f32.gmra.mxu3 %v5387_v55  ;;  %v2259_v13 = vld [vmem:[%s7153_s24 + $0x918] sm:$0xff]  ;;  %v3807_v48 = vpop.f32.mrf.mxu3  ;;  %v3828_v17 = vadd.f32 %v3827_v54, %v8663_v24  ;;  %v3865_v7 = vpop.f32.mrf.mxu1  ;;  %v5389_v24 = vld [vmem:[%s9601_s0 + $0xd0] sm:$0xff] }
 0x5a9   : > { %v2451_v31 = vld [vmem:[%s7153_s24 + $0xf18] sm:$0xff]  ;;  %4310 = vmatpush.msra.mxu1 %v2327_v44  ;;  %4273 = vmatpush.msra.mxu0 %v2259_v13 }
 0x5aa   : > { %v2383_v19 = vld [vmem:[%s7153_s24 + $0xcf8] sm:$0xff]  ;;  %4387 = vmatpush.msra.mxu3 %v2451_v31  ;;  %v3866_v42 = vadd.f32 %v3865_v7, %v3828_v17  ;;  %v5393_v31 = vld [vmem:[%s9601_s0 + $0x130] sm:$0xff]  ;;  %v5394_v7 = vld [vmem:[%s9601_s0 + $0x128] sm:$0xff] }
 0x5ab   : > { %4206 = vmatmul.f32.vlgmr.msrb.gmra.mxu2 %v5381_v21  ;;  %v4746_v21 = vmul.f32 %v8811_v56, %v4745_v25  ;;  %v2323_v18 = vld [vmem:[%s7153_s24 + $0xb18] sm:$0xff] }
 0x5ac   : > { %v2255_v20 = vld [vmem:[%s7153_s24 + $0x8f8] sm:$0xff]  ;;  %4350 = vmatpush.msra.mxu2 %v2383_v19  ;;  %4311 = vmatpush.msra.mxu1 %v2323_v18 }
 0x5ad   : > { %v2447_v29 = vld [vmem:[%s7153_s24 + $0xef8] sm:$0xff]  ;;  %v8851_v30 = vpop.eup %5206  ;;  %v4747_v45 = vmul.f32 0.5, %v4746_v21  ;;  %4274 = vmatpush.msra.mxu0 %v2255_v20 }
 0x5ae   : > { %v3769_v10 = vpop.f32.mrf.mxu2  ;;  %v2319_v35 = vld [vmem:[%s7153_s24 + $0xaf8] sm:$0xff]  ;;  %v4755_v38 = vmul.f32 %v8851_v30, %v8818_v53  ;;  %4388 = vmatpush.msra.mxu3 %v2447_v29  ;;  %vm4761_vm2 = vweird.f32 %v8851_v30 }
 0x5af   : > { %v3770_v14 = vadd.f32 %v3769_v10, %v3732_v36  ;;  %4136 = vmatmul.f32.gmra.mxu0 %v5388_v34  ;;  %v2379_v40 = vld [vmem:[%s7153_s24 + $0xcd8] sm:$0xff]  ;;  %4312 = vmatpush.msra.mxu1 %v2319_v35  ;;  %v4748_v6 = vsub.f32 1.5, %v4747_v45  ;;  %v3830_v36 = vpop.f32.mrf.mxu0  ;;  %vm8899_vm5 = vmor %vm4760_vm4, %vm4761_vm2 }
 0x5b0   : > { %v2251_v46 = vld [vmem:[%s7153_s24 + $0x8d8] sm:$0xff]  ;;  %4174 = vmatmul.f32.gmra.mxu1 %v5390_v32  ;;  %v4756_v11 = vmul.f32 %v8851_v30, %v4755_v38  ;;  %4351 = vmatpush.msra.mxu2 %v2379_v40  ;;  %v3831_v47 = vadd.f32 %v3830_v36, %v8690_v37  ;;  %v3941_v33 = vpop.f32.mrf.mxu3  ;;  %v5392_v37 = vld [vmem:[%s9601_s0 + $0x120] sm:$0xff]  ;;  %v5398_v36 = vld [vmem:[%s9601_s0 + $0x188] sm:$0xff] }
 0x5b1   : > { %v8848_v28 = vadd.f32 %v3807_v48, %v3770_v14  ;;  %v2443_v27 = vld [vmem:[%s7153_s24 + $0xed8] sm:$0xff]  ;;  %4275 = vmatpush.msra.mxu0 %v2251_v46  ;;  %v3868_v13 = vpop.f32.mrf.mxu1  ;;  %v4749_v21 = vmul.f32 %v8811_v56, %v4748_v6 }
 0x5b2   : > { %v2315_v49 = vld [vmem:[%s7153_s24 + $0xad8] sm:$0xff]  ;;  %v4757_v57 = vmul.f32 0.5, %v4756_v11  ;;  %4389 = vmatpush.msra.mxu3 %v2443_v27  ;;  %v3869_v20 = vadd.f32 %v3868_v13, %v3831_v47 }
 0x5b3   : > { %4209 = vmatmul.f32.gmra.mxu2 %v5385_v1  ;;  %v5391_v50 = vld [vmem:[%s9601_s0 + $0xd8] sm:$0xff]  ;;  %4313 = vmatpush.msra.mxu1 %v2315_v49 }
 0x5b4   : > { %4250 = vmatmul.f32.gmra.mxu3 %v5391_v50  ;;  %v2375_v52 = vld [vmem:[%s7153_s24 + $0xcb8] sm:$0xff]  ;;  %v4758_v10 = vsub.f32 1.5, %v4757_v57 }
 0x5b5   : > { %v2247_v3 = vld [vmem:[%s7153_s24 + $0x8b8] sm:$0xff]  ;;  %4352 = vmatpush.msra.mxu2 %v2375_v52 }
 0x5b6   : > { %v2439_v9 = vld [vmem:[%s7153_s24 + $0xeb8] sm:$0xff]  ;;  %4276 = vmatpush.msra.mxu0 %v2247_v3  ;;  %v4759_v54 = vmul.f32 %v8851_v30, %v4758_v10 }
 0x5b7   : > { %v2311_v25 = vld [vmem:[%s7153_s24 + $0xab8] sm:$0xff]  ;;  %4390 = vmatpush.msra.mxu3 %v2439_v9  ;;  %4139 = vmatmul.f32.gmra.mxu0 %v5392_v37  ;;  %v3833_v32 = vpop.f32.mrf.mxu0 }
 0x5b8   : > { %v2371_v43 = vld [vmem:[%s7153_s24 + $0xc98] sm:$0xff]  ;;  %4314 = vmatpush.msra.mxu1 %v2311_v25  ;;  %v4763_v34 = vsel %vm8899_vm5, %v8851_v30, %v4759_v54  ;;  %v3834_v49 = vadd.f32 %v3833_v32, %v8735_v60  ;;  %v3944_v11 = vpop.f32.mrf.mxu3  ;;  %v5397_v60 = vld [vmem:[%s9601_s0 + $0x190] sm:$0xff] }
 0x5b9   : > { %v2243_v55 = vld [vmem:[%s7153_s24 + $0x898] sm:$0xff]  ;;  %4353 = vmatpush.msra.mxu2 %v2371_v43  ;;  %4177 = vmatmul.f32.gmra.mxu1 %v5394_v7  ;;  %v4788_v40 = vrot.slane %v4763_v34, 7  ;;  %v3871_v3 = vpop.f32.mrf.mxu1 }
 0x5ba   : > { %v3903_v51 = vpop.f32.mrf.mxu2  ;;  %v2435_v14 = vld [vmem:[%s7153_s24 + $0xe98] sm:$0xff]  ;;  %4277 = vmatpush.msra.mxu0 %v2243_v55  ;;  %v3872_v57 = vadd.f32 %v3871_v3, %v3834_v49 }
 0x5bb   : > { %4212 = vmatmul.f32.gmra.mxu2 %v5389_v24  ;;  %v3904_v1 = vadd.f32 %v3903_v51, %v3866_v42  ;;  %v2367_v19 = vld [vmem:[%s7153_s24 + $0xc78] sm:$0xff]  ;;  %4391 = vmatpush.msra.mxu3 %v2435_v14  ;;  %v4753_v42 = vsel %vm4752_vm7, %v8811_v56, %v4749_v21 }
 0x5bc   : > { %v2307_v48 = vld [vmem:[%s7153_s24 + $0xa98] sm:$0xff]  ;;  %4354 = vmatpush.msra.mxu2 %v2367_v19  ;;  %v8923_v27 = vsel %vm4575_vm1, %v4753_v42, %v4788_v40 }
 0x5bd   : > { %v8881_v44 = vadd.f32 %v3941_v33, %v3904_v1  ;;  %v2239_v17 = vld [vmem:[%s7153_s24 + $0x878] sm:$0xff]  ;;  %4315 = vmatpush.msra.mxu1 %v2307_v48  ;;  %v5396_v1 = vld [vmem:[%s9601_s0 + $0x180] sm:$0xff] }
 0x5be   : > { %v2431_v53 = vld [vmem:[%s7153_s24 + $0xe78] sm:$0xff]  ;;  %4278 = vmatpush.msra.mxu0 %v2239_v17 }
 0x5bf   : > { %v2363_v29 = vld [vmem:[%s7153_s24 + $0xc58] sm:$0xff]  ;;  %4392 = vmatpush.msra.mxu3 %v2431_v53  ;;  %4142 = vmatmul.f32.gmra.mxu0 %v5396_v1  ;;  %v3836_v19 = vpop.f32.mrf.mxu0  ;;  %v5400_v53 = vld [vmem:[%s9601_s0 + $0x1e0] sm:$0xff] }
 0x5c0   : > { %v5395_v24 = vld [vmem:[%s9601_s0 + $0x138] sm:$0xff]  ;;  %4355 = vmatpush.msra.mxu2 %v2363_v29  ;;  %v3837_v21 = vadd.f32 %v3836_v19, %v8759_v41  ;;  %v3947_v54 = vpop.f32.mrf.mxu3  ;;  %v5401_v41 = vld [vmem:[%s9601_s0 + $0x1f0] sm:$0xff] }
 0x5c1   : > { %4253 = vmatmul.f32.gmra.mxu3 %v5395_v24  ;;  %v2303_v45 = vld [vmem:[%s7153_s24 + $0xa78] sm:$0xff]  ;;  %4180 = vmatmul.f32.gmra.mxu1 %v5398_v36 }
 0x5c2   : > { %v2235_v38 = vld [vmem:[%s7153_s24 + $0x858] sm:$0xff]  ;;  %4316 = vmatpush.msra.mxu1 %v2303_v45  ;;  %v5402_v45 = vld [vmem:[%s9601_s0 + $0x1e8] sm:$0xff] }
 0x5c3   : > { %4215 = vmatmul.f32.gmra.mxu2 %v5393_v31  ;;  %v3906_v35 = vpop.f32.mrf.mxu2  ;;  %v2427_v46 = vld [vmem:[%s7153_s24 + $0xe58] sm:$0xff]  ;;  %4279 = vmatpush.msra.mxu0 %v2235_v38 }
 0x5c4   : > { %v3907_v26 = vadd.f32 %v3906_v35, %v3869_v20  ;;  %v2359_v30 = vld [vmem:[%s7153_s24 + $0xc38] sm:$0xff]  ;;  %4393 = vmatpush.msra.mxu3 %v2427_v46  ;;  %v3874_v20 = vpop.f32.mrf.mxu1 }
 0x5c5   : > { %v2299_v50 = vld [vmem:[%s7153_s24 + $0xa58] sm:$0xff]  ;;  %4356 = vmatpush.msra.mxu2 %v2359_v30  ;;  %v3875_v35 = vadd.f32 %v3874_v20, %v3837_v21 }
 0x5c6   : > { %v2231_v51 = vld [vmem:[%s7153_s24 + $0x838] sm:$0xff]  ;;  %v8928_v52 = vadd.f32 %v3944_v11, %v3907_v26  ;;  %4317 = vmatpush.msra.mxu1 %v2299_v50 }
 0x5c7   : > { %v2423_v56 = vld [vmem:[%s7153_s24 + $0xe38] sm:$0xff]  ;;  %4280 = vmatpush.msra.mxu0 %v2231_v51  ;;  %v3839_v50 = vpop.f32.mrf.mxu0 }
 0x5c8   : > { %v2295_v9 = vld [vmem:[%s7153_s24 + $0xa38] sm:$0xff]  ;;  %4394 = vmatpush.msra.mxu3 %v2423_v56  ;;  %4145 = vmatmul.f32.gmra.mxu0 %v5400_v53  ;;  %v3840_v51 = vadd.f32 %v3839_v50, %v8785_v12  ;;  %v3950_v3 = vpop.f32.mrf.mxu3  ;;  %v5405_v12 = vld [vmem:[%s9601_s0 + $0x250] sm:$0x1] }
 0x5c9   : > { %v2355_v25 = vld [vmem:[%s7153_s24 + $0xc18] sm:$0xff]  ;;  %4318 = vmatpush.msra.mxu1 %v2295_v9 }
 0x5ca   : > { %v2227_v6 = vld [vmem:[%s7153_s24 + $0x818] sm:$0xff]  ;;  %4357 = vmatpush.msra.mxu2 %v2355_v25  ;;  %4183 = vmatmul.f32.gmra.mxu1 %v5402_v45 }
 0x5cb   : > { %4218 = vmatmul.f32.gmra.mxu2 %v5397_v60  ;;  %v2419_v47 = vld [vmem:[%s7153_s24 + $0xe18] sm:$0xff]  ;;  %4281 = vmatpush.msra.mxu0 %v2227_v6  ;;  %v5404_v6 = vld [vmem:[%s9601_s0 + $0x240] sm:$0x1] }
 0x5cc   : > { %v2671_v33 = vld [vmem:[%s7153_s24 + $0x15f8] sm:$0xff]  ;;  %4395 = vmatpush.msra.mxu3 %v2419_v47  ;;  %v3877_v9 = vpop.f32.mrf.mxu1 }
 0x5cd   : > { %v5399_v43 = vld [vmem:[%s9601_s0 + $0x198] sm:$0xff]  ;;  %v3909_v55 = vpop.f32.mrf.mxu2  ;;  %4494 = vmatpush.msrb.mxu2 %v2671_v33  ;;  %v3878_v33 = vadd.f32 %v3877_v9, %v3840_v51 }
 0x5ce   : > { %4256 = vmatmul.f32.gmra.mxu3 %v5399_v43  ;;  %v2291_v10 = vld [vmem:[%s7153_s24 + $0xa18] sm:$0xff]  ;;  %v3910_v14 = vadd.f32 %v3909_v55, %v3872_v57  ;;  %v5406_v43 = vld [vmem:[%s9601_s0 + $0x248] sm:$0x1] }
 0x5cf   : > { %v2543_v13 = vld [vmem:[%s7153_s24 + $0x11f8] sm:$0xff]  ;;  %4319 = vmatpush.msra.mxu1 %v2291_v10 }
 0x5d0   : > { %v2723_v37 = vld [vmem:[%s7153_s24 + $0x1798] sm:$0xff]  ;;  %4418 = vmatpush.msrb.mxu0 %v2543_v13  ;;  %v8955_v18 = vadd.f32 %v3947_v54, %v3910_v14 }
 0x5d1   : > { %v2607_v31 = vld [vmem:[%s7153_s24 + $0x13f8] sm:$0xff]  ;;  %4535 = vmatpush.msrb.mxu3 %v2723_v37  ;;  %4148 = vmatmul.f32.gmra.mxu0 %v5404_v6  ;;  %v3953_v20 = vpop.f32.mrf.mxu3  ;;  %v5412_v6 = vld [vmem:[%s9601_s0 + $0x80] sm:$0xff] }
 0x5d2   : > { %v2667_v48 = vld [vmem:[%s7153_s24 + $0x15d8] sm:$0xff]  ;;  %4456 = vmatpush.msrb.mxu1 %v2607_v31 }
 0x5d3   : > { %v2539_v17 = vld [vmem:[%s7153_s24 + $0x11d8] sm:$0xff]  ;;  %4221 = vmatmul.f32.gmra.mxu2 %v5401_v41  ;;  %4186 = vmatmul.f32.gmra.mxu1 %v5406_v43 }
 0x5d4   : > { %v2719_v7 = vld [vmem:[%s7153_s24 + $0x1778] sm:$0xff]  ;;  %4495 = vmatpush.msrb.mxu2 %v2667_v48  ;;  %4419 = vmatpush.msrb.mxu0 %v2539_v17  ;;  %v3842_v48 = vpop.f32.mrf.mxu0 }
 0x5d5   : > { %v2663_v29 = vld [vmem:[%s7153_s24 + $0x15b8] sm:$0xff]  ;;  %4536 = vmatpush.msrb.mxu3 %v2719_v7  ;;  %v3843_v17 = vadd.f32 %v3842_v48, %v8815_v23  ;;  %v5408_v23 = vld [vmem:[%s9601_s0 + $0x20] sm:$0xff] }
 0x5d6   : > { %v2603_v34 = vld [vmem:[%s7153_s24 + $0x13d8] sm:$0xff]  ;;  %v3912_v46 = vpop.f32.mrf.mxu2  ;;  %4496 = vmatpush.msrb.mxu2 %v2663_v29  ;;  %v3880_v29 = vpop.f32.mrf.mxu1 }
 0x5d7   : > { %v2535_v24 = vld [vmem:[%s7153_s24 + $0x11b8] sm:$0xff]  ;;  %v3913_v32 = vadd.f32 %v3912_v46, %v3875_v35  ;;  %4457 = vmatpush.msrb.mxu1 %v2603_v34 }
 0x5d8   : > { %v2659_v38 = vld [vmem:[%s7153_s24 + $0x1598] sm:$0xff]  ;;  %4420 = vmatpush.msrb.mxu0 %v2535_v24  ;;  %v5409_v24 = vld [vmem:[%s9601_s0 + $0x30] sm:$0xff] }
 0x5d9   : > { %v2715_v40 = vld [vmem:[%s7153_s24 + $0x1758] sm:$0xff]  ;;  %4497 = vmatpush.msrb.mxu2 %v2659_v38  ;;  %v8982_v60 = vadd.f32 %v3950_v3, %v3913_v32  ;;  %4282 = vmatmul.f32.vlgmr.msra.gmra.mxu0 %v5408_v23  ;;  %v3881_v38 = vadd.f32 %v3880_v29, %v3843_v17  ;;  %v5417_v29 = vld [vmem:[%s9601_s0 + $0xf0] sm:$0xff] }
 0x5da   : > { %v5403_v26 = vld [vmem:[%s9601_s0 + $0x1f8] sm:$0xff]  ;;  %4537 = vmatpush.msrb.mxu3 %v2715_v40  ;;  %v5410_v40 = vld [vmem:[%s9601_s0 + $0x28] sm:$0xff] }
 0x5db   : > { %4259 = vmatmul.f32.gmra.mxu3 %v5403_v26  ;;  %v2599_v30 = vld [vmem:[%s7153_s24 + $0x13b8] sm:$0xff]  ;;  %4224 = vmatmul.f32.gmra.mxu2 %v5405_v12  ;;  %v5413_v12 = vld [vmem:[%s9601_s0 + $0x90] sm:$0xff] }
 0x5dc   : > { %v2531_v42 = vld [vmem:[%s7153_s24 + $0x1198] sm:$0xff]  ;;  %4458 = vmatpush.msrb.mxu1 %v2599_v30  ;;  %v3845_v3 = vpop.f32.mrf.mxu0 }
 0x5dd   : > { %v2655_v49 = vld [vmem:[%s7153_s24 + $0x1578] sm:$0xff]  ;;  %4421 = vmatpush.msrb.mxu0 %v2531_v42  ;;  %4320 = vmatmul.f32.vlgmr.msra.gmra.mxu1 %v5410_v40 }
 0x5de   : > { %v2711_v11 = vld [vmem:[%s7153_s24 + $0x1738] sm:$0xff]  ;;  %4498 = vmatpush.msrb.mxu2 %v2655_v49  ;;  %v3915_v14 = vpop.f32.mrf.mxu2 }
 0x5df   : > { %v2595_v56 = vld [vmem:[%s7153_s24 + $0x1398] sm:$0xff]  ;;  %4538 = vmatpush.msrb.mxu3 %v2711_v11  ;;  %v3916_v19 = vadd.f32 %v3915_v14, %v3878_v33  ;;  %v5414_v33 = vld [vmem:[%s9601_s0 + $0x88] sm:$0xff] }
 0x5e0   : > { %v2527_v1 = vld [vmem:[%s7153_s24 + $0x1178] sm:$0xff]  ;;  %4459 = vmatpush.msrb.mxu1 %v2595_v56  ;;  %v3846_v56 = vadd.f32 %v3845_v3, %v8848_v28 }
 0x5e1   : > { %v2651_v25 = vld [vmem:[%s7153_s24 + $0x1558] sm:$0xff]  ;;  %4422 = vmatpush.msrb.mxu0 %v2527_v1  ;;  %v9009_v41 = vadd.f32 %v3953_v20, %v3916_v19  ;;  %v3956_v1 = vpop.f32.mrf.mxu3 }
 0x5e2   : > { %v2591_v57 = vld [vmem:[%s7153_s24 + $0x1378] sm:$0xff]  ;;  %4499 = vmatpush.msrb.mxu2 %v2651_v25  ;;  %v3883_v25 = vpop.f32.mrf.mxu1  ;;  %4285 = vmatmul.f32.gmra.mxu0 %v5412_v6 }
 0x5e3   : > { %v2523_v36 = vld [vmem:[%s7153_s24 + $0x1158] sm:$0xff]  ;;  %4460 = vmatpush.msrb.mxu1 %v2591_v57  ;;  %4358 = vmatmul.f32.vlgmr.msra.gmra.mxu2 %v5409_v24 }
 0x5e4   : > { %v2707_v47 = vld [vmem:[%s7153_s24 + $0x1718] sm:$0xff]  ;;  %4423 = vmatpush.msrb.mxu0 %v2523_v36 }
 0x5e5   : > { %v2647_v55 = vld [vmem:[%s7153_s24 + $0x1538] sm:$0xff]  ;;  %4539 = vmatpush.msrb.mxu3 %v2707_v47  ;;  %v3884_v47 = vadd.f32 %v3883_v25, %v3846_v56  ;;  %4323 = vmatmul.f32.gmra.mxu1 %v5414_v33  ;;  %v5420_v56 = vld [vmem:[%s9601_s0 + $0x140] sm:$0xff] }
 0x5e6   : > { %v2587_v10 = vld [vmem:[%s7153_s24 + $0x1358] sm:$0xff]  ;;  %4500 = vmatpush.msrb.mxu2 %v2647_v55  ;;  %v3918_v32 = vpop.f32.mrf.mxu2 }
 0x5e7   : > { %v5407_v13 = vld [vmem:[%s9601_s0 + $0x258] sm:$0x1]  ;;  %4461 = vmatpush.msrb.mxu1 %v2587_v10  ;;  %v3919_v11 = vadd.f32 %v3918_v32, %v3881_v38 }
 0x5e8   : > { %4262 = vmatmul.f32.gmra.mxu3 %v5407_v13  ;;  %v2519_v37 = vld [vmem:[%s7153_s24 + $0x1138] sm:$0xff] }
 0x5e9   : > { %v2703_v31 = vld [vmem:[%s7153_s24 + $0x16f8] sm:$0xff]  ;;  %4424 = vmatpush.msrb.mxu0 %v2519_v37  ;;  %v9033_v9 = vadd.f32 %v3956_v1, %v3919_v11  ;;  %v3959_v48 = vpop.f32.mrf.mxu3  ;;  %v5421_v1 = vld [vmem:[%s9601_s0 + $0x150] sm:$0xff] }
 0x5ea   : > { %v2583_v21 = vld [vmem:[%s7153_s24 + $0x1338] sm:$0xff]  ;;  %4540 = vmatpush.msrb.mxu3 %v2703_v31 }
 0x5eb   : > { %v2643_v54 = vld [vmem:[%s7153_s24 + $0x1518] sm:$0xff]  ;;  %4462 = vmatpush.msrb.mxu1 %v2583_v21  ;;  %4361 = vmatmul.f32.gmra.mxu2 %v5413_v12 }
 0x5ec   : > { %v2515_v7 = vld [vmem:[%s7153_s24 + $0x1118] sm:$0xff]  ;;  %4501 = vmatpush.msrb.mxu2 %v2643_v54  ;;  %v3979_v54 = vpop.f32.mrf.mxu0 }
 0x5ed   : > { %v2639_v53 = vld [vmem:[%s7153_s24 + $0x14f8] sm:$0xff]  ;;  %4425 = vmatpush.msrb.mxu0 %v2515_v7  ;;  %v3980_v17 = vadd.f32 %v3979_v54, %v8881_v44  ;;  %v4017_v7 = vpop.f32.mrf.mxu1 }
 0x5ee   : > { %v2699_v34 = vld [vmem:[%s7153_s24 + $0x16d8] sm:$0xff]  ;;  %4502 = vmatpush.msrb.mxu2 %v2639_v53  ;;  %v3921_v13 = vpop.f32.mrf.mxu2  ;;  %v5416_v53 = vld [vmem:[%s9601_s0 + $0xe0] sm:$0xff] }
 0x5ef   : > { %v2579_v35 = vld [vmem:[%s7153_s24 + $0x1318] sm:$0xff]  ;;  %4541 = vmatpush.msrb.mxu3 %v2699_v34  ;;  %v3922_v31 = vadd.f32 %v3921_v13, %v3884_v47  ;;  %4288 = vmatmul.f32.gmra.mxu0 %v5416_v53  ;;  %v4018_v24 = vadd.f32 %v4017_v7, %v3980_v17 }
 0x5f0   : > { %v2511_v45 = vld [vmem:[%s7153_s24 + $0x10f8] sm:$0xff]  ;;  %4463 = vmatpush.msrb.mxu1 %v2579_v35  ;;  %v5418_v35 = vld [vmem:[%s9601_s0 + $0xe8] sm:$0xff] }
 0x5f1   : > { %v2575_v26 = vld [vmem:[%s7153_s24 + $0x12f8] sm:$0xff]  ;;  %4426 = vmatpush.msrb.mxu0 %v2511_v45  ;;  %v9057_v20 = vadd.f32 %v3959_v48, %v3922_v31  ;;  %4326 = vmatmul.f32.gmra.mxu1 %v5418_v35  ;;  %v5424_v31 = vld [vmem:[%s9601_s0 + $0x1a0] sm:$0xff]  ;;  %v5429_v35 = vld [vmem:[%s9601_s0 + $0x210] sm:$0xff] }
 0x5f2   : > { %v2635_v46 = vld [vmem:[%s7153_s24 + $0x14d8] sm:$0xff]  ;;  %4464 = vmatpush.msrb.mxu1 %v2575_v26 }
 0x5f3   : > { %v2695_v30 = vld [vmem:[%s7153_s24 + $0x16b8] sm:$0xff]  ;;  %4503 = vmatpush.msrb.mxu2 %v2635_v46 }
 0x5f4   : > { %v5411_v42 = vld [vmem:[%s9601_s0 + $0x38] sm:$0xff]  ;;  %4542 = vmatpush.msrb.mxu3 %v2695_v30  ;;  %4364 = vmatmul.f32.gmra.mxu2 %v5417_v29 }
 0x5f5   : > { %4396 = vmatmul.f32.vlgmr.msra.gmra.mxu3 %v5411_v42  ;;  %v2507_v49 = vld [vmem:[%s7153_s24 + $0x10d8] sm:$0xff]  ;;  %v4020_v3 = vpop.f32.mrf.mxu1 }
 0x5f6   : > { %v2631_v50 = vld [vmem:[%s7153_s24 + $0x14b8] sm:$0xff]  ;;  %4427 = vmatpush.msrb.mxu0 %v2507_v49  ;;  %v4055_v26 = vpop.f32.mrf.mxu2  ;;  %v3982_v49 = vpop.f32.mrf.mxu0 }
 0x5f7   : > { %v2571_v51 = vld [vmem:[%s7153_s24 + $0x12d8] sm:$0xff]  ;;  %4504 = vmatpush.msrb.mxu2 %v2631_v50  ;;  %v4056_v42 = vadd.f32 %v4055_v26, %v4018_v24  ;;  %v3983_v11 = vadd.f32 %v3982_v49, %v8928_v52  ;;  %v4093_v50 = vpop.f32.mrf.mxu3  ;;  %4291 = vmatmul.f32.gmra.mxu0 %v5420_v56  ;;  %v5428_v24 = vld [vmem:[%s9601_s0 + $0x200] sm:$0xff]  ;;  %v5433_v56 = vld [vmem:[%s9601_s0 + $0x270] sm:$0x1] }
 0x5f8   : > { %4465 = vmatpush.msrb.mxu1 %v2571_v51  ;;  %v2503_v28 = vld [vmem:[%s7153_s24 + $0x10b8] sm:$0xff] }
 0x5f9   : > { %v2691_v57 = vld [vmem:[%s7153_s24 + $0x1698] sm:$0xff]  ;;  %4428 = vmatpush.msrb.mxu0 %v2503_v28  ;;  %v9080_v51 = vadd.f32 %v4093_v50, %v4056_v42 }
 0x5fa   : > { %v2567_v36 = vld [vmem:[%s7153_s24 + $0x12b8] sm:$0xff]  ;;  %4543 = vmatpush.msrb.mxu3 %v2691_v57  ;;  %v4021_v57 = vadd.f32 %v4020_v3, %v3983_v11  ;;  %v5432_v3 = vld [vmem:[%s9601_s0 + $0x260] sm:$0x1] }
 0x5fb   : > { %v2627_v43 = vld [vmem:[%s7153_s24 + $0x1498] sm:$0xff]  ;;  %4466 = vmatpush.msrb.mxu1 %v2567_v36  ;;  %v5422_v36 = vld [vmem:[%s9601_s0 + $0x148] sm:$0xff] }
 0x5fc   : > { %v2499_v55 = vld [vmem:[%s7153_s24 + $0x1098] sm:$0xff]  ;;  %4505 = vmatpush.msrb.mxu2 %v2627_v43  ;;  %4329 = vmatmul.f32.gmra.mxu1 %v5422_v36 }
 0x5fd   : > { %v5415_v10 = vld [vmem:[%s9601_s0 + $0x98] sm:$0xff]  ;;  %4429 = vmatpush.msrb.mxu0 %v2499_v55  ;;  %4367 = vmatmul.f32.gmra.mxu2 %v5421_v1 }
 0x5fe   : > { %4399 = vmatmul.f32.gmra.mxu3 %v5415_v10  ;;  %v2687_v14 = vld [vmem:[%s7153_s24 + $0x1678] sm:$0xff]  ;;  %v4058_v33 = vpop.f32.mrf.mxu2  ;;  %v3985_v55 = vpop.f32.mrf.mxu0 }
 0x5ff   : > { %v2623_v37 = vld [vmem:[%s7153_s24 + $0x1478] sm:$0xff]  ;;  %4544 = vmatpush.msrb.mxu3 %v2687_v14  ;;  %v4059_v43 = vadd.f32 %v4058_v33, %v4021_v57  ;;  %v3986_v10 = vadd.f32 %v3985_v55, %v8955_v18  ;;  %v4096_v13 = vpop.f32.mrf.mxu3  ;;  %4294 = vmatmul.f32.gmra.mxu0 %v5424_v31  ;;  %v5426_v18 = vld [vmem:[%s9601_s0 + $0x1a8] sm:$0xff]  ;;  %v5437_v55 = vld [vmem:[%s9601_s0 + $0x50] sm:$0xff] }
 0x600   : > { %v2563_v19 = vld [vmem:[%s7153_s24 + $0x1298] sm:$0xff]  ;;  %4506 = vmatpush.msrb.mxu2 %v2623_v37  ;;  %v4023_v37 = vpop.f32.mrf.mxu1 }
 0x601   : > { %v2495_v21 = vld [vmem:[%s7153_s24 + $0x1078] sm:$0xff]  ;;  %4467 = vmatpush.msrb.mxu1 %v2563_v19  ;;  %v9100_v14 = vadd.f32 %v4096_v13, %v4059_v43  ;;  %v5425_v19 = vld [vmem:[%s9601_s0 + $0x1b0] sm:$0xff]  ;;  %v4024_v54 = vadd.f32 %v4023_v37, %v3986_v10  ;;  %v5436_v43 = vld [vmem:[%s9601_s0 + $0x40] sm:$0xff] }
 0x602   : > { %4430 = vmatpush.msrb.mxu0 %v2495_v21  ;;  %v2559_v44 = vld [vmem:[%s7153_s24 + $0x1278] sm:$0xff] }
 0x603   : > { %v2619_v34 = vld [vmem:[%s7153_s24 + $0x1458] sm:$0xff]  ;;  %4468 = vmatpush.msrb.mxu1 %v2559_v44  ;;  %v4597_v21 = vadd.f32 %v9100_v14, %v9080_v51 }
 0x604   : > { %v2683_v23 = vld [vmem:[%s7153_s24 + $0x1658] sm:$0xff]  ;;  %4507 = vmatpush.msrb.mxu2 %v2619_v34  ;;  %4332 = vmatmul.f32.gmra.mxu1 %v5426_v18 }
 0x605   : > { %v2491_v45 = vld [vmem:[%s7153_s24 + $0x1058] sm:$0xff]  ;;  %4545 = vmatpush.msrb.mxu3 %v2683_v23  ;;  %4370 = vmatmul.f32.gmra.mxu2 %v5425_v19 }
 0x606   : > { %v2615_v38 = vld [vmem:[%s7153_s24 + $0x1438] sm:$0xff]  ;;  %4431 = vmatpush.msrb.mxu0 %v2491_v45  ;;  %v4061_v17 = vpop.f32.mrf.mxu2  ;;  %v3988_v53 = vpop.f32.mrf.mxu0 }
 0x607   : > { %v5419_v40 = vld [vmem:[%s9601_s0 + $0xf8] sm:$0xff]  ;;  %4508 = vmatpush.msrb.mxu2 %v2615_v38  ;;  %v4062_v7 = vadd.f32 %v4061_v17, %v4024_v54  ;;  %v3989_v29 = vadd.f32 %v3988_v53, %v8982_v60  ;;  %v4099_v44 = vpop.f32.mrf.mxu3  ;;  %4297 = vmatmul.f32.gmra.mxu0 %v5428_v24  ;;  %v5430_v60 = vld [vmem:[%s9601_s0 + $0x208] sm:$0xff]  ;;  %v5441_v53 = vld [vmem:[%s9601_s0 + $0xb0] sm:$0xff] }
 0x608   : > { %4402 = vmatmul.f32.gmra.mxu3 %v5419_v40  ;;  %v2555_v46 = vld [vmem:[%s7153_s24 + $0x1258] sm:$0xff]  ;;  %v4026_v23 = vpop.f32.mrf.mxu1 }
 0x609   : > { %v2679_v30 = vld [vmem:[%s7153_s24 + $0x1638] sm:$0xff]  ;;  %4469 = vmatpush.msrb.mxu1 %v2555_v46  ;;  %v9117_v34 = vadd.f32 %v4099_v44, %v4062_v7  ;;  %v4027_v38 = vadd.f32 %v4026_v23, %v3989_v29  ;;  %v5440_v7 = vld [vmem:[%s9601_s0 + $0xa0] sm:$0xff] }
 0x60a   : > { %v2487_v32 = vld [vmem:[%s7153_s24 + $0x1038] sm:$0xff]  ;;  %4546 = vmatpush.msrb.mxu3 %v2679_v30 }
 0x60b   : > { %4432 = vmatpush.msrb.mxu0 %v2487_v32  ;;  %v2551_v25 = vld [vmem:[%s7153_s24 + $0x1238] sm:$0xff]  ;;  %v4598_v45 = vadd.f32 %v4597_v21, %v9117_v34 }
 0x60c   : > { %v2611_v6 = vld [vmem:[%s7153_s24 + $0x1418] sm:$0xff]  ;;  %4470 = vmatpush.msrb.mxu1 %v2551_v25 }
 0x60d   : > { %v2483_v52 = vld [vmem:[%s7153_s24 + $0x1018] sm:$0xff]  ;;  %4509 = vmatpush.msrb.mxu2 %v2611_v6  ;;  %4335 = vmatmul.f32.gmra.mxu1 %v5430_v60 }
 0x60e   : > { %v2675_v12 = vld [vmem:[%s7153_s24 + $0x1618] sm:$0xff]  ;;  %4433 = vmatpush.msrb.mxu0 %v2483_v52  ;;  %4373 = vmatmul.f32.gmra.mxu2 %v5429_v35  ;;  %v4064_v26 = vpop.f32.mrf.mxu2  ;;  %v3991_v30 = vpop.f32.mrf.mxu0 }
 0x60f   : > { %v2547_v28 = vld [vmem:[%s7153_s24 + $0x1218] sm:$0xff]  ;;  %4547 = vmatpush.msrb.mxu3 %v2675_v12  ;;  %v4065_v46 = vadd.f32 %v4064_v26, %v4027_v38  ;;  %v3992_v42 = vadd.f32 %v3991_v30, %v9009_v41  ;;  %v4102_v32 = vpop.f32.mrf.mxu3  ;;  %4300 = vmatmul.f32.gmra.mxu0 %v5432_v3  ;;  %v5434_v41 = vld [vmem:[%s9601_s0 + $0x268] sm:$0x1]  ;;  %v5444_v26 = vld [vmem:[%s9601_s0 + $0x100] sm:$0xff] }
 0x610   : > { %v5423_v47 = vld [vmem:[%s9601_s0 + $0x158] sm:$0xff]  ;;  %4471 = vmatpush.msrb.mxu1 %v2547_v28  ;;  %v4029_v11 = vpop.f32.mrf.mxu1 }
 0x611   : > { %4405 = vmatmul.f32.gmra.mxu3 %v5423_v47  ;;  %v5427_v48 = vld [vmem:[%s9601_s0 + $0x1b8] sm:$0xff]  ;;  %v9133_v49 = vadd.f32 %v4102_v32, %v4065_v46  ;;  %v4030_v50 = vadd.f32 %v4029_v11, %v3992_v42  ;;  %v5445_v46 = vld [vmem:[%s9601_s0 + $0x110] sm:$0xff]  ;;  %v5446_v32 = vld [vmem:[%s9601_s0 + $0x108] sm:$0xff] }
 0x612   : > { %v5431_v40 = vld [vmem:[%s9601_s0 + $0x218] sm:$0xff] }
 0x613   : > { %v4599_v1 = vadd.f32 %v4598_v45, %v9133_v49  ;;  %v5435_v25 = vld [vmem:[%s9601_s0 + $0x278] sm:$0x1] }
 0x614   : > { %v5439_v13 = vld [vmem:[%s9601_s0 + $0x58] sm:$0xff] }
 0x615   : > { %4338 = vmatmul.f32.gmra.mxu1 %v5434_v41  ;;  %v5443_v44 = vld [vmem:[%s9601_s0 + $0xb8] sm:$0xff] }
 0x616   : > { %4376 = vmatmul.f32.gmra.mxu2 %v5433_v56  ;;  %v4067_v6 = vpop.f32.mrf.mxu2  ;;  %v3994_v12 = vpop.f32.mrf.mxu0  ;;  %v5447_v11 = vld [vmem:[%s9601_s0 + $0x118] sm:$0xff] }
 0x617   : > { %v4068_v52 = vadd.f32 %v4067_v6, %v4030_v50  ;;  %v3995_v28 = vadd.f32 %v3994_v12, %v9033_v9  ;;  %v4105_v57 = vpop.f32.mrf.mxu3  ;;  %4434 = vmatmul.f32.vlgmr.msrb.gmra.mxu0 %v5436_v43  ;;  %v5438_v9 = vld [vmem:[%s9601_s0 + $0x48] sm:$0xff] }
 0x618   : > { %v4032_v47 = vpop.f32.mrf.mxu1  ;;  %v5450_v43 = vld [vmem:[%s9601_s0 + $0x168] sm:$0xff] }
 0x619   : > { %4408 = vmatmul.f32.gmra.mxu3 %v5427_v48  ;;  %v9149_v36 = vadd.f32 %v4105_v57, %v4068_v52  ;;  %v4033_v33 = vadd.f32 %v4032_v47, %v3995_v28  ;;  %v5448_v57 = vld [vmem:[%s9601_s0 + $0x160] sm:$0xff]  ;;  %v5449_v47 = vld [vmem:[%s9601_s0 + $0x170] sm:$0xff] }
 0x61b   : > { %v4600_v10 = vadd.f32 %v4599_v1, %v9149_v36 }
 0x61d   : > { %4472 = vmatmul.f32.vlgmr.msrb.gmra.mxu1 %v5438_v9 }
 0x61e   : > { %4510 = vmatmul.f32.vlgmr.msrb.gmra.mxu2 %v5437_v55  ;;  %v4070_v37 = vpop.f32.mrf.mxu2  ;;  %v3997_v19 = vpop.f32.mrf.mxu0  ;;  %v5451_v55 = vld [vmem:[%s9601_s0 + $0x178] sm:$0xff] }
 0x61f   : > { %v4071_v31 = vadd.f32 %v4070_v37, %v4033_v33  ;;  %v3998_v21 = vadd.f32 %v3997_v19, %v9057_v20  ;;  %v4108_v54 = vpop.f32.mrf.mxu3  ;;  %4437 = vmatmul.f32.gmra.mxu0 %v5440_v7  ;;  %v5442_v20 = vld [vmem:[%s9601_s0 + $0xa8] sm:$0xff]  ;;  %v5452_v7 = vld [vmem:[%s9601_s0 + $0x1c0] sm:$0xff] }
 0x620   : > { %v4035_v48 = vpop.f32.mrf.mxu1 }
 0x621   : > { %4411 = vmatmul.f32.gmra.mxu3 %v5431_v40  ;;  %v9166_v18 = vadd.f32 %v4108_v54, %v4071_v31  ;;  %v4036_v17 = vadd.f32 %v4035_v48, %v3998_v21 }
 0x623   : > { %v4601_v29 = vadd.f32 %v4600_v10, %v9166_v18 }
 0x625   : > { %4475 = vmatmul.f32.gmra.mxu1 %v5442_v20 }
 0x626   : > { %4513 = vmatmul.f32.gmra.mxu2 %v5441_v53  ;;  %v4073_v23 = vpop.f32.mrf.mxu2  ;;  %v4131_v35 = vpop.f32.mrf.mxu0  ;;  %v5453_v53 = vld [vmem:[%s9601_s0 + $0x1d0] sm:$0xff] }
 0x627   : > { %v4074_v24 = vadd.f32 %v4073_v23, %v4036_v17  ;;  %v4111_v45 = vpop.f32.mrf.mxu3  ;;  %4440 = vmatmul.f32.gmra.mxu0 %v5444_v26 }
 0x628   : > { %v4169_v60 = vpop.f32.mrf.mxu1 }
 0x629   : > { %4414 = vmatmul.f32.gmra.mxu3 %v5435_v25  ;;  %v4112_v38 = vadd.f32 %v4111_v45, %v4074_v24  ;;  %v4170_v40 = vadd.f32 %v4169_v60, %v4131_v35  ;;  %v5454_v24 = vld [vmem:[%s9601_s0 + $0x1c8] sm:$0xff] }
 0x62b   : > { %v4602_v30 = vsel %vm4575_vm1, %v4112_v38, 0.0 }
 0x62c   : > { %v4603_v42 = vadd.f32 %v4602_v30, %v4601_v29 }
 0x62d   : > { %4478 = vmatmul.f32.gmra.mxu1 %v5446_v32 }
 0x62e   : > { %4516 = vmatmul.f32.gmra.mxu2 %v5445_v46  ;;  %v4207_v50 = vpop.f32.mrf.mxu2  ;;  %v4604_v3 = vrot.slane %v4603_v42, 4  ;;  %v4134_v1 = vpop.f32.mrf.mxu0 }
 0x62f   : > { %v4208_v56 = vadd.f32 %v4207_v50, %v4170_v40  ;;  %v4245_v25 = vpop.f32.mrf.mxu3  ;;  %4443 = vmatmul.f32.gmra.mxu0 %v5448_v57  ;;  %v5457_v50 = vld [vmem:[%s9601_s0 + $0x230] sm:$0xff] }
 0x630   : > { %v4605_v41 = vadd.f32 %v4604_v3, %v4603_v42  ;;  %v4172_v52 = vpop.f32.mrf.mxu1  ;;  %v5458_v3 = vld [vmem:[%s9601_s0 + $0x228] sm:$0xff] }
 0x631   : > { %5162 = vmatmul.msk.f32.vlgmr.msrb.gmra.mxu3 %vm2724_vm0, %v5439_v13  ;;  %v9196_v6 = vadd.f32 %v4245_v25, %v4208_v56  ;;  %v4173_v28 = vadd.f32 %v4172_v52, %v4134_v1  ;;  %v5459_v56 = vld [vmem:[%s9601_s0 + $0x238] sm:$0xff] }
 0x632   : > { %v4606_v12 = vrot.slane %v4605_v41, 2 }
 0x634   : > { %v4607_v33 = vadd.f32 %v4606_v12, %v4605_v41 }
 0x635   : > { %4481 = vmatmul.f32.gmra.mxu1 %v5450_v43  ;;  %v5462_v43 = vld [vmem:[%s9601_s0 + $0x288] sm:$0x1] }
 0x636   : > { %4519 = vmatmul.f32.gmra.mxu2 %v5449_v47  ;;  %v4210_v10 = vpop.f32.mrf.mxu2  ;;  %v4608_v9 = vrot.slane %v4607_v33, 1  ;;  %v4137_v37 = vpop.f32.mrf.mxu0  ;;  %v5460_v47 = vld [vmem:[%s9601_s0 + $0x280] sm:$0x1] }
 0x637   : > { %v4211_v13 = vadd.f32 %v4210_v10, %v4173_v28  ;;  %v4248_v19 = vpop.f32.mrf.mxu3  ;;  %4446 = vmatmul.f32.gmra.mxu0 %v5452_v7 }
 0x638   : > { %v4609_v31 = vadd.f32 %v4608_v9, %v4607_v33  ;;  %v4175_v54 = vpop.f32.mrf.mxu1  ;;  %v5461_v33 = vld [vmem:[%s9601_s0 + $0x290] sm:$0x1] }
 0x639   : > { %5163 = vmatmul.msk.f32.gmra.mxu3 %vm2724_vm0, %v5443_v44  ;;  %v9211_v21 = vadd.f32 %v4248_v19, %v4211_v13  ;;  %v4176_v17 = vadd.f32 %v4175_v54, %v4137_v37 }
 0x63a   : > { %v4625_v48 = vmul.f32 0.020408163, %v4609_v31 }
 0x63c   : > { %v9220_v29 = vsub.f32 %v9080_v51, %v4625_v48  ;;  %v9223_v20 = vsub.f32 %v9100_v14, %v4625_v48  ;;  %v9226_v44 = vsub.f32 %v9117_v34, %v4625_v48  ;;  %v9229_v23 = vsub.f32 %v9133_v49, %v4625_v48  ;;  %v5455_v14 = vld [vmem:[%s9601_s0 + $0x1d8] sm:$0xff] }
 0x63d   : > { %4484 = vmatmul.f32.gmra.mxu1 %v5454_v24  ;;  %v9235_v35 = vsub.f32 %v9149_v36, %v4625_v48  ;;  %v9238_v51 = vsub.f32 %v9166_v18, %v4625_v48  ;;  %v9240_v45 = vsub.f32 %v4112_v38, %v4625_v48 }
 0x63e   : > { %4522 = vmatmul.f32.gmra.mxu2 %v5453_v53  ;;  %v4213_v34 = vpop.f32.mrf.mxu2  ;;  %v4657_v49 = vmul.f32 %v9220_v29, %v9220_v29  ;;  %v4661_v60 = vmul.f32 %v9223_v20, %v9223_v20  ;;  %v4140_v40 = vpop.f32.mrf.mxu0  ;;  %v4665_v18 = vmul.f32 %v9226_v44, %v9226_v44 }
 0x63f   : > { %v4214_v36 = vadd.f32 %v4213_v34, %v4176_v17  ;;  %v4251_v26 = vpop.f32.mrf.mxu3 }
 0x640   : > { %v4709_v38 = vadd.f32 %v4661_v60, %v4657_v49  ;;  %v4178_v30 = vpop.f32.mrf.mxu1 }
 0x641   : > { %5164 = vmatmul.msk.f32.gmra.mxu3 %vm2724_vm0, %v5447_v11  ;;  %v4252_v46 = vadd.f32 %v4251_v26, %v4214_v36  ;;  %v4179_v32 = vadd.f32 %v4178_v30, %v4140_v40  ;;  %v5456_v11 = vld [vmem:[%s9601_s0 + $0x220] sm:$0xff] }
 0x642   : > { %v9252_v42 = vadd.f32 %v4709_v38, %v4665_v18  ;;  %4449 = vmatmul.f32.gmra.mxu0 %v5456_v11 }
 0x645   : > { %4487 = vmatmul.f32.gmra.mxu1 %v5458_v3 }
 0x646   : > { %4525 = vmatmul.f32.gmra.mxu2 %v5457_v50  ;;  %v4216_v1 = vpop.f32.mrf.mxu2  ;;  %v4143_v25 = vpop.f32.mrf.mxu0 }
 0x647   : > { %v4217_v41 = vadd.f32 %v4216_v1, %v4179_v32  ;;  %v4254_v52 = vpop.f32.mrf.mxu3 }
 0x648   : > { %v4181_v28 = vpop.f32.mrf.mxu1 }
 0x649   : > { %5165 = vmatmul.msk.f32.gmra.mxu3 %vm2724_vm0, %v5451_v55  ;;  %v4255_v12 = vadd.f32 %v4254_v52, %v4217_v41  ;;  %v4182_v57 = vadd.f32 %v4181_v28, %v4143_v25  ;;  %v5463_v55 = vld [vmem:[%s9601_s0 + $0x298] sm:$0x1] }
 0x64a   : > { %4452 = vmatmul.f32.gmra.mxu0 %v5460_v47 }
 0x64d   : > { %4490 = vmatmul.f32.gmra.mxu1 %v5462_v43 }
 0x64e   : > { %4528 = vmatmul.f32.gmra.mxu2 %v5461_v33  ;;  %v4219_v10 = vpop.f32.mrf.mxu2  ;;  %v4146_v13 = vpop.f32.mrf.mxu0 }
 0x64f   : > { %v4220_v9 = vadd.f32 %v4219_v10, %v4182_v57 }
 0x650   : > { %v4184_v19 = vpop.f32.mrf.mxu1 }
 0x651   : > { %5166 = vmatmul.msk.f32.gmra.mxu3 %vm2724_vm0, %v5455_v14  ;;  %v4257_v37 = vpop.f32.mrf.mxu3  ;;  %v4185_v54 = vadd.f32 %v4184_v19, %v4146_v13 }
 0x652   : > { %v9280_v31 = vadd.f32 %v4257_v37, %v4220_v9 }
 0x656   : > { %v4222_v48 = vpop.f32.mrf.mxu2  ;;  %v4149_v7 = vpop.f32.mrf.mxu0 }
 0x657   : > { %v4223_v17 = vadd.f32 %v4222_v48, %v4185_v54 }
 0x658   : > { %v4187_v14 = vpop.f32.mrf.mxu1 }
 0x659   : > { %5167 = vmatmul.msk.f32.gmra.mxu3 %vm2724_vm0, %v5459_v56  ;;  %v4188_v34 = vadd.f32 %v4187_v14, %v4149_v7 }
 0x65e   : > { %v4260_v53 = vpop.f32.mrf.mxu3  ;;  %v4225_v49 = vpop.f32.mrf.mxu2 }
 0x65f   : > { %v9282_v24 = vadd.f32 %v4260_v53, %v4223_v17  ;;  %v4226_v60 = vadd.f32 %v4225_v49, %v4188_v34  ;;  %v4283_v36 = vpop.f32.mrf.mxu0 }
 0x660   : > { %v4284_v18 = vadd.f32 %v4283_v36, %v9196_v6  ;;  %v4321_v26 = vpop.f32.mrf.mxu1 }
 0x661   : > { %5168 = vmatmul.msk.f32.gmra.mxu3 %vm2724_vm0, %v5463_v55 }
 0x662   : > { %v4322_v30 = vadd.f32 %v4321_v26, %v4284_v18 }
 0x666   : > { %v4359_v32 = vpop.f32.mrf.mxu2 }
 0x667   : > { %v4360_v11 = vadd.f32 %v4359_v32, %v4322_v30  ;;  %v4286_v50 = vpop.f32.mrf.mxu0 }
 0x668   : > { %v4287_v3 = vadd.f32 %v4286_v50, %v9211_v21  ;;  %v4324_v41 = vpop.f32.mrf.mxu1 }
 0x66a   : > { %v4325_v25 = vadd.f32 %v4324_v41, %v4287_v3 }
 0x66b   : > { %v4263_v40 = vpop.f32.mrf.mxu3 }
 0x66c   : > { %v9285_v38 = vadd.f32 %v4263_v40, %v4226_v60 }
 0x66e   : > { %v4362_v52 = vpop.f32.mrf.mxu2 }
 0x66f   : > { %v4363_v28 = vadd.f32 %v4362_v52, %v4325_v25  ;;  %v4289_v57 = vpop.f32.mrf.mxu0 }
 0x670   : > { %v4290_v47 = vadd.f32 %v4289_v57, %v4252_v46  ;;  %v4327_v6 = vpop.f32.mrf.mxu1 }
 0x672   : > { %v4328_v55 = vadd.f32 %v4327_v6, %v4290_v47 }
 0x677   : > { %v4365_v10 = vpop.f32.mrf.mxu2  ;;  %v4292_v13 = vpop.f32.mrf.mxu0 }
 0x678   : > { %v4397_v56 = vpop.f32.mrf.mxu3  ;;  %v4366_v9 = vadd.f32 %v4365_v10, %v4328_v55  ;;  %v4293_v37 = vadd.f32 %v4292_v13, %v4255_v12 }
 0x679   : > { %v4398_v1 = vadd.f32 %v4397_v56, %v4360_v11  ;;  %v4330_v48 = vpop.f32.mrf.mxu1 }
 0x67a   : > { %v4331_v21 = vadd.f32 %v4330_v48, %v4293_v37 }
 0x67f   : > { %v4295_v53 = vpop.f32.mrf.mxu0 }
 0x680   : > { %v4368_v17 = vpop.f32.mrf.mxu2 }
 0x681   : > { %v4400_v33 = vpop.f32.mrf.mxu3  ;;  %v4369_v7 = vadd.f32 %v4368_v17, %v4331_v21  ;;  %v4333_v49 = vpop.f32.mrf.mxu1 }
 0x682   : > { %v4401_v43 = vadd.f32 %v4400_v33, %v4363_v28 }
 0x687   : > { %v4298_v46 = vpop.f32.mrf.mxu0 }
 0x688   : > { %v4371_v60 = vpop.f32.mrf.mxu2 }
 0x68a   : > { %v4336_v40 = vpop.f32.mrf.mxu1 }
 0x68b   : > { %v4403_v19 = vpop.f32.mrf.mxu3 }
 0x68c   : > { %v4404_v54 = vadd.f32 %v4403_v19, %v4366_v9 }
 0x68f   : > { %v4301_v26 = vpop.f32.mrf.mxu0 }
 0x691   : > { %v4374_v18 = vpop.f32.mrf.mxu2 }
 0x692   : > { %v4339_v32 = vpop.f32.mrf.mxu1 }
 0x694   : > { %v4406_v14 = vpop.f32.mrf.mxu3 }
 0x695   : > { %v4407_v34 = vadd.f32 %v4406_v14, %v4369_v7 }
 0x697   : > { %v4435_v12 = vpop.f32.mrf.mxu0 }
 0x698   : > { %v4436_v41 = vadd.f32 %v4435_v12, %v4398_v1 }
 0x699   : > { %v4377_v11 = vpop.f32.mrf.mxu2 }
 0x69a   : > { %v4473_v3 = vpop.f32.mrf.mxu1 }
 0x69b   : > { %v4474_v47 = vadd.f32 %v4473_v3, %v4436_v41 }
 0x69c   : > { %v4409_v36 = vpop.f32.mrf.mxu3 }
 0x69f   : > { %v4438_v25 = vpop.f32.mrf.mxu0 }
 0x6a0   : > { %v4439_v52 = vadd.f32 %v4438_v25, %v4401_v43  ;;  %v4296_v43 = vadd.f32 %v4295_v53, %v9280_v31 }
 0x6a1   : > { %v4511_v56 = vpop.f32.mrf.mxu2 }
 0x6a2   : > { %v4476_v57 = vpop.f32.mrf.mxu1  ;;  %v4512_v6 = vadd.f32 %v4511_v56, %v4474_v47  ;;  %v4334_v3 = vadd.f32 %v4333_v49, %v4296_v43 }
 0x6a3   : > { %v4477_v33 = vadd.f32 %v4476_v57, %v4439_v52  ;;  %v4299_v57 = vadd.f32 %v4298_v46, %v9282_v24 }
 0x6a4   : > { %v4412_v30 = vpop.f32.mrf.mxu3  ;;  %v4372_v52 = vadd.f32 %v4371_v60, %v4334_v3 }
 0x6a5   : > { %v4337_v53 = vadd.f32 %v4336_v40, %v4299_v57 }
 0x6a7   : > { %v4441_v9 = vpop.f32.mrf.mxu0 }
 0x6a8   : > { %v4442_v13 = vadd.f32 %v4441_v9, %v4404_v54 }
 0x6a9   : > { %v4514_v55 = vpop.f32.mrf.mxu2 }
 0x6aa   : > { %v4515_v10 = vadd.f32 %v4514_v55, %v4477_v33  ;;  %v4479_v21 = vpop.f32.mrf.mxu1 }
 0x6ab   : > { %v4480_v17 = vadd.f32 %v4479_v21, %v4442_v13  ;;  %v4302_v21 = vadd.f32 %v4301_v26, %v9285_v38 }
 0x6ac   : > { %v4415_v50 = vpop.f32.mrf.mxu3 }
 0x6ad   : > { %v4340_v24 = vadd.f32 %v4339_v32, %v4302_v21 }
 0x6af   : > { %v4444_v12 = vpop.f32.mrf.mxu0  ;;  %v4378_v3 = vadd.f32 %v4377_v11, %v4340_v24 }
 0x6b0   : > { %v4445_v56 = vadd.f32 %v4444_v12, %v4407_v34  ;;  %v4375_v34 = vadd.f32 %v4374_v18, %v4337_v53 }
 0x6b1   : > { %v4517_v7 = vpop.f32.mrf.mxu2  ;;  %v4416_v38 = vadd.f32 %v4415_v50, %v4378_v3 }
 0x6b2   : > { %v4518_v14 = vadd.f32 %v4517_v7, %v4480_v17  ;;  %v4482_v54 = vpop.f32.mrf.mxu1  ;;  %v4413_v17 = vadd.f32 %v4412_v30, %v4375_v34  ;;  %v4673_v30 = vmul.f32 %v9235_v35, %v9235_v35 }
 0x6b3   : > { %v4483_v47 = vadd.f32 %v4482_v54, %v4445_v56  ;;  %v4669_v56 = vmul.f32 %v9229_v23, %v9229_v23 }
 0x6b4   : > { %v4549_v28 = vpop.f32.mrf.mxu3 }
 0x6b5   : > { %v9288_v19 = vadd.f32 %v4549_v28, %v4512_v6  ;;  %v4410_v6 = vadd.f32 %v4409_v36, %v4372_v52  ;;  %v4711_v54 = vadd.f32 %v9252_v42, %v4669_v56 }
 0x6b7   : > { %v4447_v31 = vpop.f32.mrf.mxu0 }
 0x6b9   : > { %v4520_v33 = vpop.f32.mrf.mxu2 }
 0x6ba   : > { %v4521_v55 = vadd.f32 %v4520_v33, %v4483_v47  ;;  %v4485_v49 = vpop.f32.mrf.mxu1  ;;  %v4712_v33 = vadd.f32 %v4711_v54, %v4673_v30 }
 0x6bc   : > { %v4552_v37 = vpop.f32.mrf.mxu3 }
 0x6bd   : > { %v9290_v48 = vadd.f32 %v4552_v37, %v4515_v10  ;;  %v4448_v10 = vadd.f32 %v4447_v31, %v4410_v6  ;;  %v4677_v6 = vmul.f32 %v9238_v51, %v9238_v51  ;;  %v4681_v31 = vmul.f32 %v9240_v45, %v9240_v45 }
 0x6bf   : > { %v4610_v1 = vadd.f32 %v9290_v48, %v9288_v19  ;;  %v4486_v43 = vadd.f32 %v4485_v49, %v4448_v10  ;;  %v4450_v7 = vpop.f32.mrf.mxu0  ;;  %v4713_v50 = vadd.f32 %v4712_v33, %v4677_v6 }
 0x6c0   : > { %v4451_v46 = vadd.f32 %v4450_v7, %v4413_v17 }
 0x6c1   : > { %v4523_v60 = vpop.f32.mrf.mxu2 }
 0x6c2   : > { %v4488_v12 = vpop.f32.mrf.mxu1 }
 0x6c4   : > { %v4555_v41 = vpop.f32.mrf.mxu3 }
 0x6c5   : > { %v9295_v25 = vadd.f32 %v4555_v41, %v4518_v14  ;;  %v4489_v41 = vadd.f32 %v4488_v12, %v4451_v46 }
 0x6c7   : > { %v4611_v28 = vadd.f32 %v4610_v1, %v9295_v25  ;;  %v4524_v1 = vadd.f32 %v4523_v60, %v4486_v43  ;;  %v4453_v52 = vpop.f32.mrf.mxu0 }
 0x6c8   : > { %v4454_v32 = vadd.f32 %v4453_v52, %v4416_v38 }
 0x6c9   : > { %v4526_v18 = vpop.f32.mrf.mxu2 }
 0x6ca   : > { %v4527_v26 = vadd.f32 %v4526_v18, %v4489_v41  ;;  %v4491_v47 = vpop.f32.mrf.mxu1 }
 0x6cc   : > { %v4558_v9 = vpop.f32.mrf.mxu3 }
 0x6cd   : > { %v4559_v13 = vadd.f32 %v4558_v9, %v4521_v55  ;;  %v4492_v55 = vadd.f32 %v4491_v47, %v4454_v32  ;;  %v4714_v9 = vsel %vm4575_vm1, %v4681_v31, 0.0 }
 0x6ce   : > { %v4715_v34 = vadd.f32 %v4714_v9, %v4713_v50 }
 0x6cf   : > { %v4612_v37 = vadd.f32 %v4611_v28, %v4559_v13 }
 0x6d0   : > { %v4716_v43 = vrot.slane %v4715_v34, 4 }
 0x6d1   : > { %v4529_v42 = vpop.f32.mrf.mxu2 }
 0x6d2   : > { %v4530_v53 = vadd.f32 %v4529_v42, %v4492_v55 }
 0x6d4   : > { %v4561_v14 = vpop.f32.mrf.mxu3 }
 0x6d5   : > { %v4562_v36 = vadd.f32 %v4561_v14, %v4524_v1  ;;  %v4717_v1 = vadd.f32 %v4716_v43, %v4715_v34 }
 0x6d7   : > { %v4613_v40 = vadd.f32 %v4612_v37, %v4562_v36  ;;  %v4718_v46 = vrot.slane %v4717_v1, 2 }
 0x6d9   : > { %v4719_v3 = vadd.f32 %v4718_v46, %v4717_v1 }
 0x6db   : > { %v4720_v30 = vrot.slane %v4719_v3, 1 }
 0x6dc   : > { %v4564_v28 = vpop.f32.mrf.mxu3 }
 0x6dd   : > { %v4565_v57 = vadd.f32 %v4564_v28, %v4527_v26  ;;  %v4721_v28 = vadd.f32 %v4720_v30, %v4719_v3 }
 0x6df   : > { %v4614_v11 = vadd.f32 %v4613_v40, %v4565_v57 }
 0x6e4   : > { %v4567_v10 = vpop.f32.mrf.mxu3 }
 0x6e5   : > { %v4568_v49 = vadd.f32 %v4567_v10, %v4530_v53 }
 0x6e7   : > { %v4615_v37 = vsel %vm4575_vm1, %v4568_v49, 0.0 }
 0x6e8   : > { %v4616_v21 = vadd.f32 %v4615_v37, %v4614_v11  ;;  %v4737_v11 = vmul.f32 0.020408163, %v4721_v28 }
 0x6ea   : > { %v4617_v60 = vrot.slane %v4616_v21, 4  ;;  %v4742_v50 = vadd.f32 1e-05, %v4737_v11 }
 0x6ec   : > { %v4618_v17 = vadd.f32 %v4617_v60, %v4616_v21  ;;  %5208 = vrsqrt.f32 %v4742_v50  ;;  %vm4770_vm9 = vweird.f32 %v4742_v50 }
 0x6ee   : > { %v4619_v7 = vrot.slane %v4618_v17, 2 }
 0x6f0   : > { %v4620_v24 = vadd.f32 %v4619_v7, %v4618_v17 }
 0x6f2   : > { %v4621_v14 = vrot.slane %v4620_v24, 1  ;;  %v5209_v37 = vpop.eup %5208 }
 0x6f3   : > { %v4765_v60 = vmul.f32 %v5209_v37, %v4742_v50  ;;  %vm4771_vm8 = vweird.f32 %v5209_v37 }
 0x6f4   : > { %v4622_v12 = vadd.f32 %v4621_v14, %v4620_v24  ;;  %vm4772_vm11 = vmor %vm4770_vm9, %vm4771_vm8 }
 0x6f5   : > { %v4766_v7 = vmul.f32 %v5209_v37, %v4765_v60 }
 0x6f6   : > { %v4626_v40 = vmul.f32 0.020408163, %v4622_v12 }
 0x6f7   : > { %v4767_v24 = vmul.f32 0.5, %v4766_v7 }
 0x6f8   : > { %v9312_v56 = vsub.f32 %v9288_v19, %v4626_v40  ;;  %v9315_v41 = vsub.f32 %v9290_v48, %v4626_v40  ;;  %v9318_v18 = vsub.f32 %v9295_v25, %v4626_v40  ;;  %v9320_v54 = vsub.f32 %v4559_v13, %v4626_v40 }
 0x6f9   : > { %v9322_v38 = vsub.f32 %v4562_v36, %v4626_v40  ;;  %v9324_v26 = vsub.f32 %v4565_v57, %v4626_v40  ;;  %v9326_v52 = vsub.f32 %v4568_v49, %v4626_v40  ;;  %v4768_v14 = vsub.f32 1.5, %v4767_v24 }
 0x6fa   : > { %v4658_v32 = vmul.f32 %v9312_v56, %v9312_v56  ;;  %v4662_v19 = vmul.f32 %v9315_v41, %v9315_v41  ;;  %v4666_v48 = vmul.f32 %v9318_v18, %v9318_v18  ;;  %v4670_v13 = vmul.f32 %v9320_v54, %v9320_v54 }
 0x6fb   : > { %v4674_v57 = vmul.f32 %v9322_v38, %v9322_v38  ;;  %v4682_v33 = vmul.f32 %v9326_v52, %v9326_v52  ;;  %v4678_v6 = vmul.f32 %v9324_v26, %v9324_v26  ;;  %v4769_v40 = vmul.f32 %v5209_v37, %v4768_v14 }
 0x6fc   : > { %v4722_v25 = vadd.f32 %v4662_v19, %v4658_v32 }
 0x6fd   : > { %v4727_v42 = vsel %vm4575_vm1, %v4682_v33, 0.0  ;;  %v4773_v19 = vsel %vm4772_vm11, %v5209_v37, %v4769_v40  ;;  %v4803_v37 = vld [vmem:[%s9405_s11 + $0x28] sm:$0xff] }
 0x6fe   : > { %v4723_v36 = vadd.f32 %v4722_v25, %v4666_v48  ;;  %v4789_v28 = vrot.slane %v4773_v19, 6  ;;  %v4807_v40 = vld [vmem:[%s9405_s11 + $0x48] sm:$0xff] }
 0x700   : > { %v4724_v47 = vadd.f32 %v4723_v36, %v4670_v13  ;;  %v4739_v36 = vld [vmem:[%s1876_s8] sm:$0xf] }
 0x702   : > { %v4725_v55 = vadd.f32 %v4724_v47, %v4674_v57 }
 0x704   : > { %v4726_v31 = vadd.f32 %v4725_v55, %v4678_v6 }
 0x706   : > { %v4728_v53 = vadd.f32 %v4727_v42, %v4726_v31 }
 0x708   : > { %v4729_v10 = vrot.slane %v4728_v53, 4 }
 0x70a   : > { %v4730_v9 = vadd.f32 %v4729_v10, %v4728_v53 }
 0x70c   : > { %v4731_v49 = vrot.slane %v4730_v9, 2 }
 0x70e   : > { %v4732_v34 = vadd.f32 %v4731_v49, %v4730_v9 }
 0x710   : > { %v4733_v21 = vrot.slane %v4732_v34, 1 }
 0x712   : > { %v4734_v43 = vadd.f32 %v4733_v21, %v4732_v34 }
 0x714   : > { %v4738_v17 = vmul.f32 0.020408163, %v4734_v43 }
 0x716   : > { %v4743_v1 = vadd.f32 1e-05, %v4738_v17 }
 0x718   : > { %5210 = vrsqrt.f32 %v4743_v1  ;;  %vm4780_vm12 = vweird.f32 %v4743_v1 }
 0x71e   : > { %v5211_v46 = vpop.eup %5210 }
 0x71f   : > { %v4775_v12 = vmul.f32 %v5211_v46, %v4743_v1  ;;  %vm4781_vm10 = vweird.f32 %v5211_v46  ;;  %v4804_v1 = vld [vmem:[%s9405_s11 + $0x30] sm:$0xff] }
 0x720   : > { %vm4782_vm13 = vmor %vm4780_vm12, %vm4781_vm10 }
 0x721   : > { %v4776_v3 = vmul.f32 %v5211_v46, %v4775_v12  ;;  %v4806_v12 = vld [vmem:[%s9405_s11 + $0x40] sm:$0xff] }
 0x723   : > { %v4777_v30 = vmul.f32 0.5, %v4776_v3 }
 0x725   : > { %v4778_v32 = vsub.f32 1.5, %v4777_v30 }
 0x727   : > { %v4779_v48 = vmul.f32 %v5211_v46, %v4778_v32 }
 0x729   : > { %v4783_v25 = vsel %vm4782_vm13, %v5211_v46, %v4779_v48  ;;  %v4805_v46 = vld [vmem:[%s9405_s11 + $0x38] sm:$0xff] }
 0x72a   : > { %v4790_v13 = vrot.slane %v4783_v25, 5  ;;  %v4808_v25 = vld [vmem:[%s9405_s11 + $0x50] sm:$0xff] }
 0x72c   : > { %v4793_v57 = vsel %vm4792_vm14, %v4789_v28, %v4790_v13 }
 0x72d   : > { %v4795_v47 = vsel %vm4794_vm15, %v8923_v27, %v4793_v57 }
 0x72e   : > { %v4797_v33 = vmul.f32 %v4795_v47, %v4739_v36  ;;  %v4809_v36 = vld [vmem:[%s9405_s11 + $0x58] sm:$0xff] }
 0x730   : > { %v9351_v11 = vperm.slane %v4797_v33, 0  ;;  %v9353_v6 = vperm.slane %v4797_v33, 1  ;;  %v9355_v55 = vperm.slane %v4797_v33, 2  ;;  %v4830_v31 = vperm.slane %v4797_v33, 3  ;;  %v4810_v33 = vld [vmem:[%s9405_s11 + $0x60] sm:$0xff] }
 0x732   : > { %v4835_v42 = vmul.f32 %v9351_v11, %v8150_v4  ;;  %v4836_v50 = vmul.f32 %v9353_v6, %v8701_v59  ;;  %v4837_v27 = vmul.f32 %v9355_v55, %v9220_v29  ;;  %v4838_v53 = vmul.f32 %v4830_v31, %v9312_v56 }
 0x733   : > { %v4839_v10 = vmul.f32 %v9351_v11, %v8153_v58  ;;  %v4840_v9 = vmul.f32 %v9353_v6, %v8704_v61  ;;  %v4841_v49 = vmul.f32 %v9355_v55, %v9223_v20  ;;  %v4842_v4 = vmul.f32 %v4830_v31, %v9315_v41 }
 0x734   : > { %v4843_v59 = vmul.f32 %v9351_v11, %v8156_v62  ;;  %v4844_v29 = vmul.f32 %v9353_v6, %v8707_v0  ;;  %v4845_v56 = vmul.f32 %v9355_v55, %v9226_v44  ;;  %v4846_v58 = vmul.f32 %v4830_v31, %v9318_v18  ;;  %v4891_v18 = vld [vmem:[%s1881_s10] sm:$0xf] }
 0x735   : > { %v4847_v61 = vmul.f32 %v9351_v11, %v8159_v5  ;;  %v9389_v20 = vmul.f32 %v4830_v31, %v9320_v54  ;;  %v9393_v62 = vmul.f32 %v9351_v11, %v8166_v8  ;;  %v9396_v0 = vmul.f32 %v4830_v31, %v9322_v38  ;;  %v4798_v5 = vld [vmem:[%s9405_s11] sm:$0xff]  ;;  %v4799_v8 = vld [vmem:[%s9405_s11 + $0x8] sm:$0xff]  ;;  %v4800_v54 = vld [vmem:[%s9405_s11 + $0x10] sm:$0xff] }
 0x736   : > { %v9399_v44 = vmul.f32 %v4830_v31, %v9324_v26  ;;  %v9402_v41 = vmul.f32 %v4830_v31, %v9326_v52  ;;  %v4801_v38 = vld [vmem:[%s9405_s11 + $0x18] sm:$0xff]  ;;  %v4802_v26 = vld [vmem:[%s9405_s11 + $0x20] sm:$0xff]  ;;  %v9412_v52 = vperm.slane %v4891_v18, 0  ;;  %v9414_v34 = vperm.slane %v4891_v18, 1 }
 0x737   : > { %v4863_v21 = vadd.f32 %v4835_v42, %v4798_v5  ;;  %v4864_v43 = vadd.f32 %v4836_v50, %v4799_v8  ;;  %v4865_v60 = vadd.f32 %v4837_v27, %v4800_v54  ;;  %v9417_v17 = vperm.slane %v4891_v18, 2  ;;  %v4811_v27 = vld [vmem:[%s9405_s11 + $0x68] sm:$0xff] }
 0x738   : > { %v4866_v7 = vadd.f32 %v4838_v53, %v4801_v38  ;;  %v9420_v24 = vperm.slane %v4891_v18, 3  ;;  %v4867_v14 = vadd.f32 %v4839_v10, %v4802_v26  ;;  %v4868_v3 = vadd.f32 %v4840_v9, %v4803_v37  ;;  %v4815_v8 = vld [vmem:[%s9405_s11 + $0x88] sm:$0xff]  ;;  %v4816_v26 = vld [vmem:[%s9405_s11 + $0x90] sm:$0xff] }
 0x739   : > { %v4869_v30 = vadd.f32 %v4841_v49, %v4804_v1  ;;  %v4901_v32 = vadd.f32 %v9412_v52, %v4863_v21  ;;  %v4902_v19 = vadd.f32 %v9414_v34, %v4864_v43  ;;  %v4903_v48 = vadd.f32 %v9417_v17, %v4865_v60  ;;  %v4812_v49 = vld [vmem:[%s9405_s11 + $0x70] sm:$0xff]  ;;  %v4817_v21 = vld [vmem:[%s9405_s11 + $0x98] sm:$0xff]  ;;  %v4818_v1 = vld [vmem:[%s9405_s11 + $0xa0] sm:$0xff] }
 0x73a   : > { %v4870_v28 = vadd.f32 %v4842_v4, %v4805_v46  ;;  %v4904_v13 = vadd.f32 %v9420_v24, %v4866_v7  ;;  %v4871_v57 = vadd.f32 %v4843_v59, %v4806_v12  ;;  %v4905_v47 = vadd.f32 %v9412_v52, %v4867_v14  ;;  %v4813_v59 = vld [vmem:[%s9405_s11 + $0x78] sm:$0xff]  ;;  %v4819_v14 = vld [vmem:[%s9405_s11 + $0xa8] sm:$0xff] }
 0x73b   : > { %4929 = vst [vmem:[%s9433_s12] sm:$0xff] %v4901_v32  ;;  %v4848_v31 = vmul.f32 %v9353_v6, %v8710_v15  ;;  %v4872_v42 = vadd.f32 %v4844_v29, %v4807_v40  ;;  %v4906_v50 = vadd.f32 %v9414_v34, %v4868_v3  ;;  %v4849_v53 = vmul.f32 %v9355_v55, %v9229_v23  ;;  %v4814_v23 = vld [vmem:[%s9405_s11 + $0x80] sm:$0xff]  ;;  %v4820_v3 = vld [vmem:[%s9405_s11 + $0xb0] sm:$0xff] }
 0x73c   : > { %4930 = vst [vmem:[%s9433_s12 + $0x8] sm:$0xff] %v4902_v19  ;;  %v4873_v10 = vadd.f32 %v4845_v56, %v4808_v25  ;;  %v4907_v9 = vadd.f32 %v9417_v17, %v4869_v30  ;;  %v4874_v4 = vadd.f32 %v4846_v58, %v4809_v36  ;;  %v4908_v15 = vadd.f32 %v9420_v24, %v4870_v28  ;;  %v4821_v30 = vld [vmem:[%s9405_s11 + $0xb8] sm:$0xff] }
 0x73d   : > { %4931 = vst [vmem:[%s9433_s12 + $0x10] sm:$0xff] %v4903_v48  ;;  %v4875_v29 = vadd.f32 %v4847_v61, %v4810_v33  ;;  %v4909_v18 = vadd.f32 %v9412_v52, %v4871_v57  ;;  %v4852_v56 = vmul.f32 %v9353_v6, %v8717_v63  ;;  %v4876_v5 = vadd.f32 %v4848_v31, %v4811_v27  ;;  %v4822_v48 = vld [vmem:[%s9405_s11 + $0xc0] sm:$0x1]  ;;  %v4824_v57 = vld [vmem:[%s9405_s11 + $0xd0] sm:$0x1] }
 0x73e   : > { %4932 = vst [vmem:[%s9433_s12 + $0x18] sm:$0xff] %v4904_v13  ;;  %v4910_v58 = vadd.f32 %v9414_v34, %v4872_v42  ;;  %v4853_v54 = vmul.f32 %v9355_v55, %v9235_v35  ;;  %v4877_v61 = vadd.f32 %v4849_v53, %v4812_v49  ;;  %v4911_v38 = vadd.f32 %v9417_v17, %v4873_v10  ;;  %v4823_v13 = vld [vmem:[%s9405_s11 + $0xc8] sm:$0x1] }
 0x73f   : > { %4933 = vst [vmem:[%s9433_s12 + $0x20] sm:$0xff] %v4905_v47  ;;  %v4878_v37 = vadd.f32 %v9389_v20, %v4813_v59  ;;  %v4912_v63 = vadd.f32 %v9420_v24, %v4874_v4  ;;  %v4855_v43 = vmul.f32 %v9351_v11, %v8169_v2  ;;  %v4879_v35 = vadd.f32 %v9393_v62, %v4814_v23 }
 0x740   : > { %4934 = vst [vmem:[%s9433_s12 + $0x28] sm:$0xff] %v4906_v50  ;;  %v4913_v60 = vadd.f32 %v9412_v52, %v4875_v29  ;;  %v4856_v20 = vmul.f32 %v9353_v6, %v8720_v16  ;;  %v4880_v7 = vadd.f32 %v4852_v56, %v4815_v8  ;;  %v4914_v46 = vadd.f32 %v9414_v34, %v4876_v5 }
 0x741   : > { %4935 = vst [vmem:[%s9433_s12 + $0x30] sm:$0xff] %v4907_v9  ;;  %v4857_v2 = vmul.f32 %v9355_v55, %v9238_v51  ;;  %v4881_v62 = vadd.f32 %v4853_v54, %v4816_v26  ;;  %v4915_v12 = vadd.f32 %v9417_v17, %v4877_v61  ;;  %v4882_v40 = vadd.f32 %v9396_v0, %v4817_v21 }
 0x742   : > { %4936 = vst [vmem:[%s9433_s12 + $0x38] sm:$0xff] %v4908_v15  ;;  %v4916_v16 = vadd.f32 %v9420_v24, %v4878_v37  ;;  %v4859_v32 = vmul.f32 %v9351_v11, %v8172_v22  ;;  %v4883_v19 = vadd.f32 %v4855_v43, %v4818_v1  ;;  %v4917_v51 = vadd.f32 %v9412_v52, %v4879_v35 }
 0x743   : > { %4937 = vst [vmem:[%s9433_s12 + $0x40] sm:$0xff] %v4909_v18  ;;  %v4860_v25 = vmul.f32 %v9353_v6, %v8723_v39  ;;  %v4884_v0 = vadd.f32 %v4856_v20, %v4819_v14  ;;  %v4918_v28 = vadd.f32 %v9414_v34, %v4880_v7  ;;  %v4861_v22 = vmul.f32 %v9355_v55, %v9240_v45  ;;  %v4825_v6 = vld [vmem:[%s9405_s11 + $0xd8] sm:$0x1] }
 0x744   : > { %4938 = vst [vmem:[%s9433_s12 + $0x48] sm:$0xff] %v4910_v58  ;;  %v4885_v11 = vadd.f32 %v4857_v2, %v4820_v3  ;;  %v4919_v36 = vadd.f32 %v9417_v17, %v4881_v62  ;;  %v4886_v47 = vadd.f32 %v9399_v44, %v4821_v30  ;;  %v4920_v39 = vadd.f32 %v9420_v24, %v4882_v40 }
 0x745   : > { %4939 = vst [vmem:[%s9433_s12 + $0x50] sm:$0xff] %v4911_v38  ;;  %v4887_v33 = vadd.f32 %v4859_v32, %v4822_v48  ;;  %v4921_v31 = vadd.f32 %v9412_v52, %v4883_v19  ;;  %v4888_v45 = vadd.f32 %v4860_v25, %v4823_v13  ;;  %v4922_v55 = vadd.f32 %v9414_v34, %v4884_v0 }
 0x746   : > { %4940 = vst [vmem:[%s9433_s12 + $0x58] sm:$0xff] %v4912_v63  ;;  %v4889_v42 = vadd.f32 %v4861_v22, %v4824_v57  ;;  %v4923_v44 = vadd.f32 %v9417_v17, %v4885_v11  ;;  %v4890_v50 = vadd.f32 %v9402_v41, %v4825_v6  ;;  %v4924_v27 = vadd.f32 %v9420_v24, %v4886_v47  ;;  %v4979_v41 = vld [vmem:[%s9433_s12] sm:$0xff] (%p5553_p5) }
 0x747   : > { %4941 = vst [vmem:[%s9433_s12 + $0x60] sm:$0xff] %v4913_v60  ;;  %v4925_v53 = vadd.f32 %v9412_v52, %v4887_v33  ;;  %v4926_v10 = vadd.f32 %v9414_v34, %v4888_v45  ;;  %v4981_v52 = vld [vmem:[%s9433_s12 + $0x8] sm:$0xff] (%p5553_p5)  ;;  %v4983_v34 = vld [vmem:[%s9433_s12 + $0x10] sm:$0xff] (%p5553_p5) }
 0x748   : > { %4942 = vst [vmem:[%s9433_s12 + $0x68] sm:$0xff] %v4914_v46  ;;  %v4927_v9 = vadd.f32 %v9417_v17, %v4889_v42  ;;  %v4928_v49 = vadd.f32 %v9420_v24, %v4890_v50  ;;  %v4985_v17 = vld [vmem:[%s9433_s12 + $0x18] sm:$0xff] (%p5553_p5)  ;;  %v4987_v24 = vld [vmem:[%s9433_s12 + $0x20] sm:$0xff] (%p5553_p5)  ;;  %v4989_v4 = vld [vmem:[%s9433_s12 + $0x28] sm:$0xff] (%p5553_p5) }
 0x749   : > { %4943 = vst [vmem:[%s9433_s12 + $0x70] sm:$0xff] %v4915_v12  ;;  %v4991_v15 = vld [vmem:[%s9433_s12 + $0x30] sm:$0xff] (%p5553_p5)  ;;  %v4993_v59 = vld [vmem:[%s9433_s12 + $0x38] sm:$0xff] (%p5553_p5) }
 0x74a   : > { %4944 = vst [vmem:[%s9433_s12 + $0x78] sm:$0xff] %v4916_v16  ;;  %v4995_v29 = vld [vmem:[%s9433_s12 + $0x40] sm:$0xff] (%p5553_p5) }
 0x74b   : > { %4945 = vst [vmem:[%s9433_s12 + $0x80] sm:$0xff] %v4917_v51  ;;  %v4997_v18 = vld [vmem:[%s9433_s12 + $0x48] sm:$0xff] (%p5553_p5) }
 0x74c   : > { %4946 = vst [vmem:[%s9433_s12 + $0x88] sm:$0xff] %v4918_v28  ;;  %v4999_v23 = vld [vmem:[%s9433_s12 + $0x50] sm:$0xff] (%p5553_p5) }
 0x74d   : > { %4947 = vst [vmem:[%s9433_s12 + $0x90] sm:$0xff] %v4919_v36  ;;  %v5001_v56 = vld [vmem:[%s9433_s12 + $0x58] sm:$0xff] (%p5553_p5) }
 0x74e   : > { %4948 = vst [vmem:[%s9433_s12 + $0x98] sm:$0xff] %v4920_v39  ;;  %v5003_v5 = vld [vmem:[%s9433_s12 + $0x60] sm:$0xff] (%p5553_p5) }
 0x74f   : > { %4949 = vst [vmem:[%s9433_s12 + $0xa0] sm:$0xff] %v4921_v31  ;;  %v5005_v58 = vld [vmem:[%s9433_s12 + $0x68] sm:$0xff] (%p5553_p5) }
 0x750   : > { %4950 = vst [vmem:[%s9433_s12 + $0xa8] sm:$0xff] %v4922_v55  ;;  %v5007_v8 = vld [vmem:[%s9433_s12 + $0x70] sm:$0xff] (%p5553_p5) }
 0x751   : > { %4951 = vst [vmem:[%s9433_s12 + $0xb0] sm:$0xff] %v4923_v44  ;;  %v5009_v54 = vld [vmem:[%s9433_s12 + $0x78] sm:$0xff] (%p5553_p5) }
 0x752   : > { %4952 = vst [vmem:[%s9433_s12 + $0xb8] sm:$0xff] %v4924_v27  ;;  %4963 = sbr.rel (!%p5553_p5) target bundleno = 1907 (0x773), region = 90  ;;  %v5011_v61 = vld [vmem:[%s9433_s12 + $0x80] sm:$0xff] (%p5553_p5) }
 0x753   : > { %4953 = vst [vmem:[%s9433_s12 + $0xc0] sm:$0x1] %v4925_v53  ;;  %v5013_v38 = vld [vmem:[%s9433_s12 + $0x88] sm:$0xff] (%p5553_p5) }
 0x754   : > { %4954 = vst [vmem:[%s9433_s12 + $0xc8] sm:$0x1] %v4926_v10  ;;  %v5015_v26 = vld [vmem:[%s9433_s12 + $0x90] sm:$0xff] (%p5553_p5) }
 0x755   : > { %4955 = vst [vmem:[%s9433_s12 + $0xd0] sm:$0x1] %v4927_v9  ;;  %v5017_v37 = vld [vmem:[%s9433_s12 + $0x98] sm:$0xff] (%p5553_p5) }
 0x756   : > { %4956 = vst [vmem:[%s9433_s12 + $0xd8] sm:$0x1] %v4928_v49  ;;  %v5019_v63 = vld [vmem:[%s9433_s12 + $0xa0] sm:$0xff] (%p5553_p5) }
 0x757   : > { %4980 = vst [vmem:[%s9535_s15] sm:$0xff] %v4979_v41  ;;  %v5021_v21 = vld [vmem:[%s9433_s12 + $0xa8] sm:$0xff] }
 0x758   : > { %4982 = vst [vmem:[%s9535_s15 + $0x8] sm:$0xff] %v4981_v52  ;;  %v5023_v43 = vld [vmem:[%s9433_s12 + $0xb0] sm:$0xff] }
 0x759   : > { %4984 = vst [vmem:[%s9535_s15 + $0x10] sm:$0xff] %v4983_v34  ;;  %v5025_v35 = vld [vmem:[%s9433_s12 + $0xb8] sm:$0xff] }
 0x75a   : > { %4986 = vst [vmem:[%s9535_s15 + $0x18] sm:$0xff] %v4985_v17  ;;  %v5027_v60 = vld [vmem:[%s9433_s12 + $0xc0] sm:$0xff] }
 0x75b   : > { %4988 = vst [vmem:[%s9535_s15 + $0x60] sm:$0xff] %v4987_v24  ;;  %v5029_v1 = vld [vmem:[%s9433_s12 + $0xc8] sm:$0xff] }
 0x75c   : > { %4990 = vst [vmem:[%s9535_s15 + $0x68] sm:$0xff] %v4989_v4  ;;  %v5031_v20 = vld [vmem:[%s9433_s12 + $0xd0] sm:$0xff] }
 0x75d   : > { %4992 = vst [vmem:[%s9535_s15 + $0x70] sm:$0xff] %v4991_v15  ;;  %v5033_v7 = vld [vmem:[%s9433_s12 + $0xd8] sm:$0xff] }
 0x75e   : > { %4994 = vst [vmem:[%s9535_s15 + $0x78] sm:$0xff] %v4993_v59 }
 0x75f   : > { %4996 = vst [vmem:[%s9535_s15 + $0xc0] sm:$0xff] %v4995_v29 }
 0x760   : > { %4998 = vst [vmem:[%s9535_s15 + $0xc8] sm:$0xff] %v4997_v18 }
 0x761   : > { %5000 = vst [vmem:[%s9535_s15 + $0xd0] sm:$0xff] %v4999_v23 }
 0x762   : > { %5002 = vst [vmem:[%s9535_s15 + $0xd8] sm:$0xff] %v5001_v56 }
 0x763   : > { %5004 = vst [vmem:[%s9535_s15 + $0x120] sm:$0xff] %v5003_v5 }
 0x764   : > { %5006 = vst [vmem:[%s9535_s15 + $0x128] sm:$0xff] %v5005_v58 }
 0x765   : > { %5008 = vst [vmem:[%s9535_s15 + $0x130] sm:$0xff] %v5007_v8 }
 0x766   : > { %5010 = vst [vmem:[%s9535_s15 + $0x138] sm:$0xff] %v5009_v54 }
 0x767   : > { %5012 = vst [vmem:[%s9535_s15 + $0x180] sm:$0xff] %v5011_v61 }
 0x768   : > { %5014 = vst [vmem:[%s9535_s15 + $0x188] sm:$0xff] %v5013_v38 }
 0x769   : > { %5016 = vst [vmem:[%s9535_s15 + $0x190] sm:$0xff] %v5015_v26 }
 0x76a   : > { %5018 = vst [vmem:[%s9535_s15 + $0x198] sm:$0xff] %v5017_v37 }
 0x76b   : > { %5020 = vst [vmem:[%s9535_s15 + $0x1e0] sm:$0xff] %v5019_v63 }
 0x76c   : > { %5022 = vst [vmem:[%s9535_s15 + $0x1e8] sm:$0xff] %v5021_v21 }
 0x76d   : > { %5024 = vst [vmem:[%s9535_s15 + $0x1f0] sm:$0xff] %v5023_v43 }
 0x76e   : > { %5026 = vst [vmem:[%s9535_s15 + $0x1f8] sm:$0xff] %v5025_v35 }
 0x76f   : > { %5028 = vst [vmem:[%s9535_s15 + $0x240] sm:$0xff] %v5027_v60 }
 0x770   : > { %5030 = vst [vmem:[%s9535_s15 + $0x248] sm:$0xff] %v5029_v1 }
 0x771   : > { %5032 = vst [vmem:[%s9535_s15 + $0x250] sm:$0xff] %v5031_v20 }
 0x772   : > { %5034 = vst [vmem:[%s9535_s15 + $0x258] sm:$0xff] %v5033_v7 }
 0x773 PF: > { %p12_p11 = scmp.ge.s32.totalorder %s5537_s22, 5   ;;  %s9611_s18 = smov %s5482_s19 }
 0x774   : > { %s9612_s19 = smov %s5547_s25  ;;  %s9613_s20 = smov %s5537_s22 }
 0x775   :  { %14 = sbr.rel (!%p12_p11) target bundleno = 2 (0x2), region = 158 }

</bundles_post_ra>
